<compile_context>
chip_gen: v5e
topology: v5e:2x2
jax: 0.10.0
libtpu: 0.0.40
codegen_flags: <defaults>
</compile_context>

<pallas_src>
import math

import jax
import jax.numpy as jnp
from jax import lax
from jax.experimental import pallas as pl
from jax.experimental.pallas import tpu as pltpu


_BN_EPS = 1e-5
_LN_EPS = 1e-5


# ----------------------------- small math helpers (f32) -----------------------------

def _softmax_lastdim(x):
    m = jnp.max(x, axis=-1, keepdims=True)
    e = jnp.exp(x - m)
    return e / jnp.sum(e, axis=-1, keepdims=True)


def _sigmoid(x):
    return 1.0 / (1.0 + jnp.exp(-x))


def _layernorm(x, g, b, eps=_LN_EPS):
    m = jnp.mean(x, axis=-1, keepdims=True)
    v = jnp.mean((x - m) ** 2, axis=-1, keepdims=True)
    return (x - m) * lax.rsqrt(v + eps) * g + b


def _mm_ct(a, b):
    # contract the rows of both operands: a^T @ b without materializing a.T
    return lax.dot_general(a, b, (((0,), (0,)), ((), ())),
                           preferred_element_type=jnp.float32)


def _mm_cl(a, b):
    # contract the last dims of both operands: a @ b^T without materializing b.T
    return lax.dot_general(a, b, (((1,), (1,)), ((), ())),
                           preferred_element_type=jnp.float32)


def _conv3x3_rows(a, w_ref, wo):
    """3x3 SAME conv on a row-major flattened image held in vregs.

    a:     (Ho*Wo, Cin) f32, row index p = h*Wo + w.
    w_ref: (9, Cin, Cout) f32 ref, tap index t = dh*3 + dw.

    im2col happens in-register: 9 shifted/masked f32 matmuls accumulated in f32;
    zero row padding handles the top/bottom image edges, a per-pixel column mask
    handles the left/right edges.
    TODO(synk): at real channel counts, build the taps with pltpu.roll (XLU slot)
    and concatenate them along K (Cin padded to 128) so v6e/v7x issue one deep
    matmul instead of 9 shallow MXU pushes.
    """
    hw, cin = a.shape
    cout = w_ref.shape[-1]
    pad = jnp.zeros((wo + 1, cin), jnp.float32)
    ext = jnp.concatenate([pad, a, pad], axis=0)              # (hw + 2*wo + 2, cin)
    col = lax.broadcasted_iota(jnp.int32, (hw, 1), 0) % wo    # pixel column index
    acc = jnp.zeros((hw, cout), jnp.float32)
    for dh in range(3):
        for dw in range(3):
            delta = (dh - 1) * wo + (dw - 1)
            tap = ext[wo + 1 + delta: wo + 1 + delta + hw, :]
            if dw != 1:  # mask taps that wrap across an image row boundary
                ok = jnp.logical_and(col + (dw - 1) >= 0, col + (dw - 1) < wo)
                tap = jnp.where(ok, tap, 0.0)
            acc = acc + jnp.dot(tap, w_ref[dh * 3 + dw],
                                preferred_element_type=jnp.float32)
    return acc


def _efb_block(x, wa, wb, ln, half):
    """EFB on one image, channel-last activations (HW, C), f32 throughout."""
    hw, c = x.shape
    inv_scale = 1.0 / float(hw * half)

    x1 = x[:, :half]
    x2 = x[:, half:]
    w1 = wa[:, :half]                 # ln_1   (W^T)
    w2 = wa[:, half:4 * half]         # ln_2   (W^T)
    wo1 = wa[:, 4 * half:]            # out_1  linear (W^T)
    wo2 = wb[:, :half]                # out_2  linear (W^T), rows split below
    wful = wb[:, half:]               # out    linear (W^T), rows split below
    g1, b1 = ln[0:1, :half], ln[1:2, :half]
    g2, b2 = ln[2:3, :half], ln[3:4, :half]
    go, bo = ln[4:5, :], ln[5:6, :]

    nd1 = jnp.dot(x1, w1, preferred_element_type=jnp.float32)   # (HW, half)
    nd2 = jnp.dot(x2, w2, preferred_element_type=jnp.float32)   # (HW, 3*half)
    q = nd2[:, :half]
    k = nd2[:, half:2 * half]
    v = nd2[:, 2 * half:]

    att = _softmax_lastdim(_mm_ct(q, k) * inv_scale)            # (half, half)
    attn2 = _mm_cl(v, att)                                      # (HW, half), channel-last

    # out_2(cat(x2, attn_x2)) with a row-split weight — no lane concat.
    y2 = (jnp.dot(x2, wo2[:half], preferred_element_type=jnp.float32)
          + jnp.dot(attn2, wo2[half:], preferred_element_type=jnp.float32))
    y2 = _layernorm(y2, g2, b2)

    corr = _sigmoid(_mm_cl(y2, _softmax_lastdim(_mm_ct(nd1, y2) * inv_scale)))
    x1n = x1 * corr + x1
    y1 = _layernorm(jnp.dot(x1n, wo1, preferred_element_type=jnp.float32), g1, b1)

    # out(cat(y1, y2)) with a row-split weight — no lane concat.
    z = (jnp.dot(y1, wful[:half], preferred_element_type=jnp.float32)
         + jnp.dot(y2, wful[half:], preferred_element_type=jnp.float32))
    z = jnp.maximum(_layernorm(z, go, bo), 0.0)
    return z + x                                                # residual


# ----------------------------- the single fused kernel -----------------------------

def _downscaling_kernel(x_ref, w1_ref, cb1_ref, w2_ref, cb2_ref,
                        wa_ref, wb_ref, ln_ref, o_ref, y1_ref, y2_ref):
    n, ho, _, wo, cin2 = x_ref.shape
    cin = cin2 // 2
    hw = ho * wo
    cmid = w1_ref.shape[-1]
    cout = w2_ref.shape[-1]
    half = cout // 2
    inv_count = 1.0 / float(n * hw)

    cb1 = cb1_ref[...]        # rows: [conv1 bias, bn1 gamma, bn1 beta]
    cb2 = cb2_ref[...]        # rows: [conv2 bias, bn2 gamma, bn2 beta]

    # ---------- pass 1: 2x2 max-pool + conv1 + bias (pre-BN1) ----------
    s1 = jnp.zeros((1, cmid), jnp.float32)
    for i in range(n):
        xi = x_ref[i]                                         # (Ho, 2, Wo, 2*Cin)
        pooled = jnp.maximum(
            jnp.maximum(xi[:, 0, :, :cin], xi[:, 0, :, cin:]),
            jnp.maximum(xi[:, 1, :, :cin], xi[:, 1, :, cin:]))
        pooled = pooled.reshape(hw, cin)                      # row-major (h, w) pixels
        acc = _conv3x3_rows(pooled, w1_ref, wo) + cb1[0:1, :]
        y1_ref[i] = acc                                       # stays in VMEM scratch
        s1 = s1 + jnp.sum(acc, axis=0, keepdims=True)
    mean1 = s1 * inv_count
    v1 = jnp.zeros((1, cmid), jnp.float32)
    for i in range(n):                                        # centered variance pass
        d = y1_ref[i] - mean1
        v1 = v1 + jnp.sum(d * d, axis=0, keepdims=True)
    scale1 = cb1[1:2, :] * lax.rsqrt(v1 * inv_count + _BN_EPS)
    shift1 = cb1[2:3, :] - mean1 * scale1

    # ---------- pass 2: BN1 + ReLU + conv2 + bias (pre-BN2) ----------
    s2 = jnp.zeros((1, cout), jnp.float32)
    for i in range(n):
        a = jnp.maximum(y1_ref[i] * scale1 + shift1, 0.0)
        acc = _conv3x3_rows(a, w2_ref, wo) + cb2[0:1, :]
        y2_ref[i] = acc
        s2 = s2 + jnp.sum(acc, axis=0, keepdims=True)
    mean2 = s2 * inv_count
    v2 = jnp.zeros((1, cout), jnp.float32)
    for i in range(n):
        d = y2_ref[i] - mean2
        v2 = v2 + jnp.sum(d * d, axis=0, keepdims=True)
    scale2 = cb2[1:2, :] * lax.rsqrt(v2 * inv_count + _BN_EPS)
    shift2 = cb2[2:3, :] - mean2 * scale2

    # ---------- pass 3: BN2 + ReLU + EFB + residual ----------
    wa = wa_ref[...]
    wb = wb_ref[...]
    ln = ln_ref[...]
    for i in range(n):
        xin = jnp.maximum(y2_ref[i] * scale2 + shift2, 0.0)
        out = _efb_block(xin, wa, wb, ln, half)
        # Channel-first store: lane dim = HW (dense), NCHW output is then a free
        # metadata reshape in the wrapper.
        o_ref[i] = out.T


# ----------------------------- wrapper -----------------------------

def downscaling_forward(x_nchw, packed):
    n, cin, h, w = x_nchw.shape
    ho, wo = h // 2, w // 2
    hw = ho * wo
    cmid = packed["cb1"].shape[1]
    cout = packed["cb2"].shape[1]
    half = cout // 2
    f32 = jnp.float32

    # One tiny boundary transform (NCHW -> pool-tap layout): the reshape exposes the
    # 2x2 pool taps by (row-parity, lane-half), so the kernel needs no strided slices.
    # TODO(synk): fold this transpose into the kernel (read NCHW blocks and relayout
    # in-register) to drop the last pre-kernel XLA op and its HBM round trip.
    x = jnp.transpose(x_nchw, (0, 2, 3, 1)).reshape(n, ho, 2, wo, 2 * cin)

    flops = 2 * n * hw * 9 * (cin * cmid + cmid * cout) + 20 * n * hw * cout * cout
    cost = pl.CostEstimate(
        flops=int(flops),
        transcendentals=int(6 * n * hw * cout),
        bytes_accessed=int(x.size * 4 + n * cout * hw * 4 + 16384))

    out = pl.pallas_call(
        _downscaling_kernel,
        out_shape=jax.ShapeDtypeStruct((n, cout, hw), f32),
        grid=(1,),
        in_specs=[
            pl.BlockSpec((n, ho, 2, wo, 2 * cin), lambda i: (0, 0, 0, 0, 0)),
            pl.BlockSpec((9, cin, cmid), lambda i: (0, 0, 0)),   # conv1 taps
            pl.BlockSpec((3, cmid), lambda i: (0, 0)),           # conv1 bias, bn1 g/b
            pl.BlockSpec((9, cmid, cout), lambda i: (0, 0, 0)),  # conv2 taps
            pl.BlockSpec((3, cout), lambda i: (0, 0)),           # conv2 bias, bn2 g/b
            pl.BlockSpec((half, 5 * half), lambda i: (0, 0)),    # EFB ln_1|ln_2|out_1
            pl.BlockSpec((cout, cout + half), lambda i: (0, 0)), # EFB out_2|out
            pl.BlockSpec((6, cout), lambda i: (0, 0)),           # all LN gammas/betas
        ],
        out_specs=pl.BlockSpec((n, cout, hw), lambda i: (0, 0, 0)),
        scratch_shapes=[pltpu.VMEM((n, hw, cmid), f32),          # y1 (pre-BN1)
                        pltpu.VMEM((n, hw, cout), f32)],         # y2 (pre-BN2)
        compiler_params=pltpu.CompilerParams(
            dimension_semantics=("arbitrary",),
            vmem_limit_bytes=32 * 1024 * 1024),
        cost_estimate=cost,
    )(x, packed["w1"], packed["cb1"], packed["w2"], packed["cb2"],
      packed["wa"], packed["wb"], packed["ln"])

    # (N, C, HW) -> (N, C, Ho, Wo): metadata-only reshape, no HBM transpose.
    return out.reshape(n, cout, ho, wo)


# ----------------------------- parameters -----------------------------

def init_params(key, in_channel, out_channel):
    mid = out_channel                     # DoubleConv default: mid_channel = out
    c = out_channel
    half = c // 2
    ks = iter(jax.random.split(key, 12))

    def lin(shape, fan_in):
        bound = 1.0 / math.sqrt(fan_in)
        return jax.random.uniform(next(ks), shape, jnp.float32, -bound, bound)

    return {
        "conv1_w": lin((3, 3, in_channel, mid), in_channel * 9),   # HWIO
        "conv1_b": lin((mid,), in_channel * 9),
        "bn1_g": jnp.ones((mid,), jnp.float32),
        "bn1_b": jnp.zeros((mid,), jnp.float32),
        "conv2_w": lin((3, 3, mid, c), mid * 9),
        "conv2_b": lin((c,), mid * 9),
        "bn2_g": jnp.ones((c,), jnp.float32),
        "bn2_b": jnp.zeros((c,), jnp.float32),
        "efb": {
            "w1": lin((half, half), half),        # stored (in, out) = W^T
            "w2": lin((half, 3 * half), half),
            "wo1": lin((half, half), half),
            "wo2": lin((c, half), c),
            "wfull": lin((c, c), c),
            "g1": jnp.ones((half,), jnp.float32), "b1": jnp.zeros((half,), jnp.float32),
            "g2": jnp.ones((half,), jnp.float32), "b2": jnp.zeros((half,), jnp.float32),
            "go": jnp.ones((c,), jnp.float32), "bo": jnp.zeros((c,), jnp.float32),
        },
    }


def pack_params(p):
    """Pack weights once, outside the jitted forward (no per-step reshape/convert)."""
    cin = p["conv1_w"].shape[2]
    cmid = p["conv1_w"].shape[3]
    cout = p["conv2_w"].shape[3]
    half = cout // 2
    e = p["efb"]
    ln = jnp.zeros((6, cout), jnp.float32)
    ln = ln.at[0, :half].set(e["g1"]).at[1, :half].set(e["b1"])
    ln = ln.at[2, :half].set(e["g2"]).at[3, :half].set(e["b2"])
    ln = ln.at[4, :].set(e["go"]).at[5, :].set(e["bo"])
    return {
        "w1": p["conv1_w"].reshape(9, cin, cmid),
        "cb1": jnp.stack([p["conv1_b"], p["bn1_g"], p["bn1_b"]], axis=0),
        "w2": p["conv2_w"].reshape(9, cmid, cout),
        "cb2": jnp.stack([p["conv2_b"], p["bn2_g"], p["bn2_b"]], axis=0),
        "wa": jnp.concatenate([e["w1"], e["w2"], e["wo1"]], axis=1),    # (half, 5*half)
        "wb": jnp.concatenate([e["wo2"], e["wfull"]], axis=1),          # (c, c + half)
        "ln": ln,                                                       # (6, c)
    }


# ----------------------------- pure-JAX reference -----------------------------

def reference_forward(x_nchw, params):
    x = jnp.transpose(x_nchw, (0, 2, 3, 1)).astype(jnp.float32)
    n, h, w, c0 = x.shape
    x = jnp.max(x.reshape(n, h // 2, 2, w // 2, 2, c0), axis=(2, 4))

    hp = lax.Precision.HIGHEST

    def conv(xx, wt, b):
        y = lax.conv_general_dilated(xx, wt, (1, 1), "SAME",
                                     dimension_numbers=("NHWC", "HWIO", "NHWC"),
                                     precision=hp)
        return y + b

    def bn(xx, g, bta):
        m = jnp.mean(xx, axis=(0, 1, 2), keepdims=True)
        v = jnp.mean((xx - m) ** 2, axis=(0, 1, 2), keepdims=True)
        return jnp.maximum((xx - m) * lax.rsqrt(v + _BN_EPS) * g + bta, 0.0)

    x = bn(conv(x, params["conv1_w"], params["conv1_b"]), params["bn1_g"], params["bn1_b"])
    x = bn(conv(x, params["conv2_w"], params["conv2_b"]), params["bn2_g"], params["bn2_b"])

    e = params["efb"]
    n, ho, wo_, c = x.shape
    hw, half = ho * wo_, c // 2
    xf = x.reshape(n, hw, c)

    def one(xb):
        x1, x2 = xb[:, :half], xb[:, half:]
        nd1 = jnp.dot(x1, e["w1"], precision=hp)
        nd2 = jnp.dot(x2, e["w2"], precision=hp)
        q, k, v = nd2[:, :half], nd2[:, half:2 * half], nd2[:, 2 * half:]
        a = _softmax_lastdim(jnp.dot(q.T, k, precision=hp) / (hw * half))
        attn2 = jnp.dot(v, a.T, precision=hp)
        y2 = _layernorm(jnp.dot(jnp.concatenate([x2, attn2], -1), e["wo2"], precision=hp),
                        e["g2"], e["b2"])
        a1 = _softmax_lastdim(jnp.dot(nd1.T, y2, precision=hp) / (hw * half))
        corr = _sigmoid(jnp.dot(y2, a1.T, precision=hp))
        x1n = x1 * corr + x1
        y1 = _layernorm(jnp.dot(x1n, e["wo1"], precision=hp), e["g1"], e["b1"])
        z = _layernorm(jnp.dot(jnp.concatenate([y1, y2], -1), e["wfull"], precision=hp),
                       e["go"], e["bo"])
        return jnp.maximum(z, 0.0) + xb

    out = jax.vmap(one)(xf).reshape(n, ho, wo_, c)
    return jnp.transpose(out, (0, 3, 1, 2))


# ----------------------------- main -----------------------------

if __name__ == "__main__":
    in_channel, out_channel = 4, 8
    n, h, w = 2, 16, 16

    kx, kp = jax.random.split(jax.random.PRNGKey(0))
    params = init_params(kp, in_channel, out_channel)
    packed = pack_params(params)
    x = jax.random.normal(kx, (n, in_channel, h, w), jnp.float32)

    fwd = jax.jit(downscaling_forward)
    out = jax.block_until_ready(fwd(x, packed))
    assert out.shape == (n, out_channel, h // 2, w // 2), out.shape

    ref = reference_forward(x, params)
    err = float(jnp.max(jnp.abs(out - ref)))
    if not (err < 2e-2):
        raise AssertionError(f"max abs err {err}")

    print("KERNEL_OK")
</pallas_src>

<mosaic_0001>
module attributes {stable_mosaic.version = 11 : i64} {
  func.func @_downscaling_kernel(%arg0: i32, %arg1: memref<2x8x2x8x8xf32, #tpu.memory_space<vmem>>, %arg2: memref<9x4x8xf32, #tpu.memory_space<vmem>>, %arg3: memref<3x8xf32, #tpu.memory_space<vmem>>, %arg4: memref<9x8x8xf32, #tpu.memory_space<vmem>>, %arg5: memref<3x8xf32, #tpu.memory_space<vmem>>, %arg6: memref<4x20xf32, #tpu.memory_space<vmem>>, %arg7: memref<8x12xf32, #tpu.memory_space<vmem>>, %arg8: memref<6x8xf32, #tpu.memory_space<vmem>>, %arg9: memref<2x8x64xf32, #tpu.memory_space<vmem>>, %arg10: memref<2x64x8xf32, #tpu.memory_space<vmem>>, %arg11: memref<2x64x8xf32, #tpu.memory_space<vmem>>) attributes {dimension_semantics = [#tpu.dimension_semantics<arbitrary>], iteration_bounds = array<i64: 1>, scalar_prefetch = 0 : i64, scratch_operands = 2 : i64, tpu.core_type = #tpu.core_type<tc>, window_params = [{pipeline_mode = #tpu.pipeline_mode<synchronous>, transform_indices = @transform_0, window_bounds = array<i64: 2, 8, 2, 8, 8>}, {pipeline_mode = #tpu.pipeline_mode<synchronous>, transform_indices = @transform_1, window_bounds = array<i64: 9, 4, 8>}, {pipeline_mode = #tpu.pipeline_mode<synchronous>, transform_indices = @transform_2, window_bounds = array<i64: 3, 8>}, {pipeline_mode = #tpu.pipeline_mode<synchronous>, transform_indices = @transform_3, window_bounds = array<i64: 9, 8, 8>}, {pipeline_mode = #tpu.pipeline_mode<synchronous>, transform_indices = @transform_4, window_bounds = array<i64: 3, 8>}, {pipeline_mode = #tpu.pipeline_mode<synchronous>, transform_indices = @transform_5, window_bounds = array<i64: 4, 20>}, {pipeline_mode = #tpu.pipeline_mode<synchronous>, transform_indices = @transform_6, window_bounds = array<i64: 8, 12>}, {pipeline_mode = #tpu.pipeline_mode<synchronous>, transform_indices = @transform_7, window_bounds = array<i64: 6, 8>}, {pipeline_mode = #tpu.pipeline_mode<synchronous>, transform_indices = @transform_8, window_bounds = array<i64: 2, 8, 64>}]} {
    %c0 = arith.constant 0 : index
    %c0_0 = arith.constant 0 : index
    %0 = vector.load %arg3[%c0, %c0_0] : memref<3x8xf32, #tpu.memory_space<vmem>>, vector<3x8xf32>
    %c0_1 = arith.constant 0 : index
    %c0_2 = arith.constant 0 : index
    %1 = vector.load %arg5[%c0_1, %c0_2] : memref<3x8xf32, #tpu.memory_space<vmem>>, vector<3x8xf32>
    %cst = arith.constant 0.000000e+00 : f32
    %2 = vector.broadcast %cst : f32 to vector<1x8xf32>
    %c0_3 = arith.constant 0 : index
    %c0_4 = arith.constant 0 : index
    %c0_5 = arith.constant 0 : index
    %c0_6 = arith.constant 0 : index
    %c0_7 = arith.constant 0 : index
    %3 = vector.load %arg1[%c0_3, %c0_4, %c0_5, %c0_6, %c0_7] : memref<2x8x2x8x8xf32, #tpu.memory_space<vmem>>, vector<1x8x2x8x8xf32>
    %4 = vector.shape_cast %3 : vector<1x8x2x8x8xf32> to vector<8x2x8x8xf32>
    %5 = vector.extract_strided_slice %4 {offsets = [0, 0, 0, 0], sizes = [8, 1, 8, 4], strides = [1, 1, 1, 1]} : vector<8x2x8x8xf32> to vector<8x1x8x4xf32>
    %6 = vector.shape_cast %5 : vector<8x1x8x4xf32> to vector<8x8x4xf32>
    %7 = vector.extract_strided_slice %4 {offsets = [0, 0, 0, 4], sizes = [8, 1, 8, 4], strides = [1, 1, 1, 1]} : vector<8x2x8x8xf32> to vector<8x1x8x4xf32>
    %8 = vector.shape_cast %7 : vector<8x1x8x4xf32> to vector<8x8x4xf32>
    %9 = arith.maximumf %6, %8 : vector<8x8x4xf32>
    %10 = vector.extract_strided_slice %4 {offsets = [0, 1, 0, 0], sizes = [8, 1, 8, 4], strides = [1, 1, 1, 1]} : vector<8x2x8x8xf32> to vector<8x1x8x4xf32>
    %11 = vector.shape_cast %10 : vector<8x1x8x4xf32> to vector<8x8x4xf32>
    %12 = vector.extract_strided_slice %4 {offsets = [0, 1, 0, 4], sizes = [8, 1, 8, 4], strides = [1, 1, 1, 1]} : vector<8x2x8x8xf32> to vector<8x1x8x4xf32>
    %13 = vector.shape_cast %12 : vector<8x1x8x4xf32> to vector<8x8x4xf32>
    %14 = arith.maximumf %11, %13 : vector<8x8x4xf32>
    %15 = arith.maximumf %9, %14 : vector<8x8x4xf32>
    %16 = vector.shape_cast %15 : vector<8x8x4xf32> to vector<64x4xf32>
    %cst_8 = arith.constant 0.000000e+00 : f32
    %17 = vector.broadcast %cst_8 : f32 to vector<9x4xf32>
    %18 = tpu.concatenate %17, %16, %17 in 0 : vector<9x4xf32>, vector<64x4xf32>, vector<9x4xf32> -> vector<82x4xf32>
    %19 = tpu.iota {dimensions = array<i32: 0>} : vector<64x1xi32>
    %c8_i32 = arith.constant 8 : i32
    %c0_i32 = arith.constant 0 : i32
    %20 = arith.cmpi eq, %c8_i32, %c0_i32 : i32
    %c1_i32 = arith.constant 1 : i32
    %21 = arith.select %20, %c1_i32, %c8_i32 : i32
    %22 = vector.broadcast %21 : i32 to vector<64x1xi32>
    %23 = arith.remsi %19, %22 : vector<64x1xi32>
    %c0_i32_9 = arith.constant 0 : i32
    %24 = vector.broadcast %c0_i32_9 : i32 to vector<64x1xi32>
    %25 = arith.cmpi ne, %23, %24 : vector<64x1xi32>
    %c0_i32_10 = arith.constant 0 : i32
    %26 = vector.broadcast %c0_i32_10 : i32 to vector<64x1xi32>
    %27 = arith.cmpi slt, %23, %26 : vector<64x1xi32>
    %c0_i32_11 = arith.constant 0 : i32
    %28 = arith.cmpi slt, %21, %c0_i32_11 : i32
    %29 = vector.broadcast %28 : i1 to vector<64x1xi1>
    %30 = vector.broadcast %29 : vector<64x1xi1> to vector<64x1xi1>
    %31 = arith.xori %27, %30 : vector<64x1xi1>
    %32 = arith.andi %31, %25 : vector<64x1xi1>
    %33 = vector.broadcast %21 : i32 to vector<64x1xi32>
    %34 = arith.addi %23, %33 : vector<64x1xi32>
    %35 = arith.select %32, %34, %23 : vector<64x1xi1>, vector<64x1xi32>
    %cst_12 = arith.constant 0.000000e+00 : f32
    %36 = vector.broadcast %cst_12 : f32 to vector<64x8xf32>
    %37 = vector.extract_strided_slice %18 {offsets = [0, 0], sizes = [64, 4], strides = [1, 1]} : vector<82x4xf32> to vector<64x4xf32>
    %c-1_i32 = arith.constant -1 : i32
    %38 = vector.broadcast %c-1_i32 : i32 to vector<64x1xi32>
    %39 = arith.addi %35, %38 : vector<64x1xi32>
    %c0_i32_13 = arith.constant 0 : i32
    %40 = vector.broadcast %c0_i32_13 : i32 to vector<64x1xi32>
    %41 = arith.cmpi sge, %39, %40 : vector<64x1xi32>
    %c-1_i32_14 = arith.constant -1 : i32
    %42 = vector.broadcast %c-1_i32_14 : i32 to vector<64x1xi32>
    %43 = arith.addi %35, %42 : vector<64x1xi32>
    %c8_i32_15 = arith.constant 8 : i32
    %44 = vector.broadcast %c8_i32_15 : i32 to vector<64x1xi32>
    %45 = arith.cmpi slt, %43, %44 : vector<64x1xi32>
    %46 = arith.andi %41, %45 : vector<64x1xi1>
    %cst_16 = arith.constant 0.000000e+00 : f32
    %47 = vector.shape_cast %46 : vector<64x1xi1> to vector<64x1xi1>
    %48 = vector.broadcast %47 : vector<64x1xi1> to vector<64x4xi1>
    %49 = vector.broadcast %cst_16 : f32 to vector<64x4xf32>
    %50 = arith.select %48, %37, %49 : vector<64x4xi1>, vector<64x4xf32>
    %c0_17 = arith.constant 0 : index
    %c0_18 = arith.constant 0 : index
    %c0_19 = arith.constant 0 : index
    %51 = vector.load %arg2[%c0_17, %c0_18, %c0_19] : memref<9x4x8xf32, #tpu.memory_space<vmem>>, vector<1x4x8xf32>
    %52 = vector.shape_cast %51 : vector<1x4x8xf32> to vector<4x8xf32>
    %cst_20 = arith.constant dense<0.000000e+00> : vector<64x8xf32>
    %53 = tpu.matmul %50, %52, %cst_20 {dimension_numbers = #tpu.dot_dimension_numbers<[1], [0], [0], [1], [0, 0, 1, 1], [], []>} : vector<64x4xf32>, vector<4x8xf32>, vector<64x8xf32> -> vector<64x8xf32>
    %54 = arith.addf %36, %53 : vector<64x8xf32>
    %55 = vector.extract_strided_slice %18 {offsets = [1, 0], sizes = [64, 4], strides = [1, 1]} : vector<82x4xf32> to vector<64x4xf32>
    %c1 = arith.constant 1 : index
    %c0_21 = arith.constant 0 : index
    %c0_22 = arith.constant 0 : index
    %56 = vector.load %arg2[%c1, %c0_21, %c0_22] : memref<9x4x8xf32, #tpu.memory_space<vmem>>, vector<1x4x8xf32>
    %57 = vector.shape_cast %56 : vector<1x4x8xf32> to vector<4x8xf32>
    %cst_23 = arith.constant dense<0.000000e+00> : vector<64x8xf32>
    %58 = tpu.matmul %55, %57, %cst_23 {dimension_numbers = #tpu.dot_dimension_numbers<[1], [0], [0], [1], [0, 0, 1, 1], [], []>} : vector<64x4xf32>, vector<4x8xf32>, vector<64x8xf32> -> vector<64x8xf32>
    %59 = arith.addf %54, %58 : vector<64x8xf32>
    %60 = vector.extract_strided_slice %18 {offsets = [2, 0], sizes = [64, 4], strides = [1, 1]} : vector<82x4xf32> to vector<64x4xf32>
    %c1_i32_24 = arith.constant 1 : i32
    %61 = vector.broadcast %c1_i32_24 : i32 to vector<64x1xi32>
    %62 = arith.addi %35, %61 : vector<64x1xi32>
    %c0_i32_25 = arith.constant 0 : i32
    %63 = vector.broadcast %c0_i32_25 : i32 to vector<64x1xi32>
    %64 = arith.cmpi sge, %62, %63 : vector<64x1xi32>
    %c1_i32_26 = arith.constant 1 : i32
    %65 = vector.broadcast %c1_i32_26 : i32 to vector<64x1xi32>
    %66 = arith.addi %35, %65 : vector<64x1xi32>
    %c8_i32_27 = arith.constant 8 : i32
    %67 = vector.broadcast %c8_i32_27 : i32 to vector<64x1xi32>
    %68 = arith.cmpi slt, %66, %67 : vector<64x1xi32>
    %69 = arith.andi %64, %68 : vector<64x1xi1>
    %cst_28 = arith.constant 0.000000e+00 : f32
    %70 = vector.shape_cast %69 : vector<64x1xi1> to vector<64x1xi1>
    %71 = vector.broadcast %70 : vector<64x1xi1> to vector<64x4xi1>
    %72 = vector.broadcast %cst_28 : f32 to vector<64x4xf32>
    %73 = arith.select %71, %60, %72 : vector<64x4xi1>, vector<64x4xf32>
    %c2 = arith.constant 2 : index
    %c0_29 = arith.constant 0 : index
    %c0_30 = arith.constant 0 : index
    %74 = vector.load %arg2[%c2, %c0_29, %c0_30] : memref<9x4x8xf32, #tpu.memory_space<vmem>>, vector<1x4x8xf32>
    %75 = vector.shape_cast %74 : vector<1x4x8xf32> to vector<4x8xf32>
    %cst_31 = arith.constant dense<0.000000e+00> : vector<64x8xf32>
    %76 = tpu.matmul %73, %75, %cst_31 {dimension_numbers = #tpu.dot_dimension_numbers<[1], [0], [0], [1], [0, 0, 1, 1], [], []>} : vector<64x4xf32>, vector<4x8xf32>, vector<64x8xf32> -> vector<64x8xf32>
    %77 = arith.addf %59, %76 : vector<64x8xf32>
    %78 = vector.extract_strided_slice %18 {offsets = [8, 0], sizes = [64, 4], strides = [1, 1]} : vector<82x4xf32> to vector<64x4xf32>
    %c-1_i32_32 = arith.constant -1 : i32
    %79 = vector.broadcast %c-1_i32_32 : i32 to vector<64x1xi32>
    %80 = arith.addi %35, %79 : vector<64x1xi32>
    %c0_i32_33 = arith.constant 0 : i32
    %81 = vector.broadcast %c0_i32_33 : i32 to vector<64x1xi32>
    %82 = arith.cmpi sge, %80, %81 : vector<64x1xi32>
    %c-1_i32_34 = arith.constant -1 : i32
    %83 = vector.broadcast %c-1_i32_34 : i32 to vector<64x1xi32>
    %84 = arith.addi %35, %83 : vector<64x1xi32>
    %c8_i32_35 = arith.constant 8 : i32
    %85 = vector.broadcast %c8_i32_35 : i32 to vector<64x1xi32>
    %86 = arith.cmpi slt, %84, %85 : vector<64x1xi32>
    %87 = arith.andi %82, %86 : vector<64x1xi1>
    %cst_36 = arith.constant 0.000000e+00 : f32
    %88 = vector.shape_cast %87 : vector<64x1xi1> to vector<64x1xi1>
    %89 = vector.broadcast %88 : vector<64x1xi1> to vector<64x4xi1>
    %90 = vector.broadcast %cst_36 : f32 to vector<64x4xf32>
    %91 = arith.select %89, %78, %90 : vector<64x4xi1>, vector<64x4xf32>
    %c3 = arith.constant 3 : index
    %c0_37 = arith.constant 0 : index
    %c0_38 = arith.constant 0 : index
    %92 = vector.load %arg2[%c3, %c0_37, %c0_38] : memref<9x4x8xf32, #tpu.memory_space<vmem>>, vector<1x4x8xf32>
    %93 = vector.shape_cast %92 : vector<1x4x8xf32> to vector<4x8xf32>
    %cst_39 = arith.constant dense<0.000000e+00> : vector<64x8xf32>
    %94 = tpu.matmul %91, %93, %cst_39 {dimension_numbers = #tpu.dot_dimension_numbers<[1], [0], [0], [1], [0, 0, 1, 1], [], []>} : vector<64x4xf32>, vector<4x8xf32>, vector<64x8xf32> -> vector<64x8xf32>
    %95 = arith.addf %77, %94 : vector<64x8xf32>
    %96 = vector.extract_strided_slice %18 {offsets = [9, 0], sizes = [64, 4], strides = [1, 1]} : vector<82x4xf32> to vector<64x4xf32>
    %c4 = arith.constant 4 : index
    %c0_40 = arith.constant 0 : index
    %c0_41 = arith.constant 0 : index
    %97 = vector.load %arg2[%c4, %c0_40, %c0_41] : memref<9x4x8xf32, #tpu.memory_space<vmem>>, vector<1x4x8xf32>
    %98 = vector.shape_cast %97 : vector<1x4x8xf32> to vector<4x8xf32>
    %cst_42 = arith.constant dense<0.000000e+00> : vector<64x8xf32>
    %99 = tpu.matmul %96, %98, %cst_42 {dimension_numbers = #tpu.dot_dimension_numbers<[1], [0], [0], [1], [0, 0, 1, 1], [], []>} : vector<64x4xf32>, vector<4x8xf32>, vector<64x8xf32> -> vector<64x8xf32>
    %100 = arith.addf %95, %99 : vector<64x8xf32>
    %101 = vector.extract_strided_slice %18 {offsets = [10, 0], sizes = [64, 4], strides = [1, 1]} : vector<82x4xf32> to vector<64x4xf32>
    %c1_i32_43 = arith.constant 1 : i32
    %102 = vector.broadcast %c1_i32_43 : i32 to vector<64x1xi32>
    %103 = arith.addi %35, %102 : vector<64x1xi32>
    %c0_i32_44 = arith.constant 0 : i32
    %104 = vector.broadcast %c0_i32_44 : i32 to vector<64x1xi32>
    %105 = arith.cmpi sge, %103, %104 : vector<64x1xi32>
    %c1_i32_45 = arith.constant 1 : i32
    %106 = vector.broadcast %c1_i32_45 : i32 to vector<64x1xi32>
    %107 = arith.addi %35, %106 : vector<64x1xi32>
    %c8_i32_46 = arith.constant 8 : i32
    %108 = vector.broadcast %c8_i32_46 : i32 to vector<64x1xi32>
    %109 = arith.cmpi slt, %107, %108 : vector<64x1xi32>
    %110 = arith.andi %105, %109 : vector<64x1xi1>
    %cst_47 = arith.constant 0.000000e+00 : f32
    %111 = vector.shape_cast %110 : vector<64x1xi1> to vector<64x1xi1>
    %112 = vector.broadcast %111 : vector<64x1xi1> to vector<64x4xi1>
    %113 = vector.broadcast %cst_47 : f32 to vector<64x4xf32>
    %114 = arith.select %112, %101, %113 : vector<64x4xi1>, vector<64x4xf32>
    %c5 = arith.constant 5 : index
    %c0_48 = arith.constant 0 : index
    %c0_49 = arith.constant 0 : index
    %115 = vector.load %arg2[%c5, %c0_48, %c0_49] : memref<9x4x8xf32, #tpu.memory_space<vmem>>, vector<1x4x8xf32>
    %116 = vector.shape_cast %115 : vector<1x4x8xf32> to vector<4x8xf32>
    %cst_50 = arith.constant dense<0.000000e+00> : vector<64x8xf32>
    %117 = tpu.matmul %114, %116, %cst_50 {dimension_numbers = #tpu.dot_dimension_numbers<[1], [0], [0], [1], [0, 0, 1, 1], [], []>} : vector<64x4xf32>, vector<4x8xf32>, vector<64x8xf32> -> vector<64x8xf32>
    %118 = arith.addf %100, %117 : vector<64x8xf32>
    %119 = vector.extract_strided_slice %18 {offsets = [16, 0], sizes = [64, 4], strides = [1, 1]} : vector<82x4xf32> to vector<64x4xf32>
    %c-1_i32_51 = arith.constant -1 : i32
    %120 = vector.broadcast %c-1_i32_51 : i32 to vector<64x1xi32>
    %121 = arith.addi %35, %120 : vector<64x1xi32>
    %c0_i32_52 = arith.constant 0 : i32
    %122 = vector.broadcast %c0_i32_52 : i32 to vector<64x1xi32>
    %123 = arith.cmpi sge, %121, %122 : vector<64x1xi32>
    %c-1_i32_53 = arith.constant -1 : i32
    %124 = vector.broadcast %c-1_i32_53 : i32 to vector<64x1xi32>
    %125 = arith.addi %35, %124 : vector<64x1xi32>
    %c8_i32_54 = arith.constant 8 : i32
    %126 = vector.broadcast %c8_i32_54 : i32 to vector<64x1xi32>
    %127 = arith.cmpi slt, %125, %126 : vector<64x1xi32>
    %128 = arith.andi %123, %127 : vector<64x1xi1>
    %cst_55 = arith.constant 0.000000e+00 : f32
    %129 = vector.shape_cast %128 : vector<64x1xi1> to vector<64x1xi1>
    %130 = vector.broadcast %129 : vector<64x1xi1> to vector<64x4xi1>
    %131 = vector.broadcast %cst_55 : f32 to vector<64x4xf32>
    %132 = arith.select %130, %119, %131 : vector<64x4xi1>, vector<64x4xf32>
    %c6 = arith.constant 6 : index
    %c0_56 = arith.constant 0 : index
    %c0_57 = arith.constant 0 : index
    %133 = vector.load %arg2[%c6, %c0_56, %c0_57] : memref<9x4x8xf32, #tpu.memory_space<vmem>>, vector<1x4x8xf32>
    %134 = vector.shape_cast %133 : vector<1x4x8xf32> to vector<4x8xf32>
    %cst_58 = arith.constant dense<0.000000e+00> : vector<64x8xf32>
    %135 = tpu.matmul %132, %134, %cst_58 {dimension_numbers = #tpu.dot_dimension_numbers<[1], [0], [0], [1], [0, 0, 1, 1], [], []>} : vector<64x4xf32>, vector<4x8xf32>, vector<64x8xf32> -> vector<64x8xf32>
    %136 = arith.addf %118, %135 : vector<64x8xf32>
    %137 = vector.extract_strided_slice %18 {offsets = [17, 0], sizes = [64, 4], strides = [1, 1]} : vector<82x4xf32> to vector<64x4xf32>
    %c7 = arith.constant 7 : index
    %c0_59 = arith.constant 0 : index
    %c0_60 = arith.constant 0 : index
    %138 = vector.load %arg2[%c7, %c0_59, %c0_60] : memref<9x4x8xf32, #tpu.memory_space<vmem>>, vector<1x4x8xf32>
    %139 = vector.shape_cast %138 : vector<1x4x8xf32> to vector<4x8xf32>
    %cst_61 = arith.constant dense<0.000000e+00> : vector<64x8xf32>
    %140 = tpu.matmul %137, %139, %cst_61 {dimension_numbers = #tpu.dot_dimension_numbers<[1], [0], [0], [1], [0, 0, 1, 1], [], []>} : vector<64x4xf32>, vector<4x8xf32>, vector<64x8xf32> -> vector<64x8xf32>
    %141 = arith.addf %136, %140 : vector<64x8xf32>
    %142 = vector.extract_strided_slice %18 {offsets = [18, 0], sizes = [64, 4], strides = [1, 1]} : vector<82x4xf32> to vector<64x4xf32>
    %c1_i32_62 = arith.constant 1 : i32
    %143 = vector.broadcast %c1_i32_62 : i32 to vector<64x1xi32>
    %144 = arith.addi %35, %143 : vector<64x1xi32>
    %c0_i32_63 = arith.constant 0 : i32
    %145 = vector.broadcast %c0_i32_63 : i32 to vector<64x1xi32>
    %146 = arith.cmpi sge, %144, %145 : vector<64x1xi32>
    %c1_i32_64 = arith.constant 1 : i32
    %147 = vector.broadcast %c1_i32_64 : i32 to vector<64x1xi32>
    %148 = arith.addi %35, %147 : vector<64x1xi32>
    %c8_i32_65 = arith.constant 8 : i32
    %149 = vector.broadcast %c8_i32_65 : i32 to vector<64x1xi32>
    %150 = arith.cmpi slt, %148, %149 : vector<64x1xi32>
    %151 = arith.andi %146, %150 : vector<64x1xi1>
    %cst_66 = arith.constant 0.000000e+00 : f32
    %152 = vector.shape_cast %151 : vector<64x1xi1> to vector<64x1xi1>
    %153 = vector.broadcast %152 : vector<64x1xi1> to vector<64x4xi1>
    %154 = vector.broadcast %cst_66 : f32 to vector<64x4xf32>
    %155 = arith.select %153, %142, %154 : vector<64x4xi1>, vector<64x4xf32>
    %c8 = arith.constant 8 : index
    %c0_67 = arith.constant 0 : index
    %c0_68 = arith.constant 0 : index
    %156 = vector.load %arg2[%c8, %c0_67, %c0_68] : memref<9x4x8xf32, #tpu.memory_space<vmem>>, vector<1x4x8xf32>
    %157 = vector.shape_cast %156 : vector<1x4x8xf32> to vector<4x8xf32>
    %cst_69 = arith.constant dense<0.000000e+00> : vector<64x8xf32>
    %158 = tpu.matmul %155, %157, %cst_69 {dimension_numbers = #tpu.dot_dimension_numbers<[1], [0], [0], [1], [0, 0, 1, 1], [], []>} : vector<64x4xf32>, vector<4x8xf32>, vector<64x8xf32> -> vector<64x8xf32>
    %159 = arith.addf %141, %158 : vector<64x8xf32>
    %160 = vector.extract_strided_slice %0 {offsets = [0, 0], sizes = [1, 8], strides = [1, 1]} : vector<3x8xf32> to vector<1x8xf32>
    %161 = vector.broadcast %160 : vector<1x8xf32> to vector<64x8xf32>
    %162 = arith.addf %159, %161 : vector<64x8xf32>
    %c0_70 = arith.constant 0 : index
    %c0_71 = arith.constant 0 : index
    %c0_72 = arith.constant 0 : index
    %163 = vector.load %arg10[%c0_70, %c0_71, %c0_72] : memref<2x64x8xf32, #tpu.memory_space<vmem>>, vector<1x64x8xf32>
    %164 = vector.shape_cast %163 : vector<1x64x8xf32> to vector<64x8xf32>
    %165 = vector.shape_cast %162 : vector<64x8xf32> to vector<1x64x8xf32>
    tpu.vector_store %arg10[%c0_70, %c0_71, %c0_72], %165 {strides = array<i32>} : memref<2x64x8xf32, #tpu.memory_space<vmem>>, vector<1x64x8xf32>,
    %cst_73 = arith.constant dense<0.000000e+00> : vector<8xf32>
    %166 = vector.multi_reduction <add>, %162, %cst_73 [0] : vector<64x8xf32> to vector<8xf32>
    %167 = vector.shape_cast %166 : vector<8xf32> to vector<1x8xf32>
    %168 = arith.addf %2, %167 : vector<1x8xf32>
    %c1_74 = arith.constant 1 : index
    %c0_75 = arith.constant 0 : index
    %c0_76 = arith.constant 0 : index
    %c0_77 = arith.constant 0 : index
    %c0_78 = arith.constant 0 : index
    %169 = vector.load %arg1[%c1_74, %c0_75, %c0_76, %c0_77, %c0_78] : memref<2x8x2x8x8xf32, #tpu.memory_space<vmem>>, vector<1x8x2x8x8xf32>
    %170 = vector.shape_cast %169 : vector<1x8x2x8x8xf32> to vector<8x2x8x8xf32>
    %171 = vector.extract_strided_slice %170 {offsets = [0, 0, 0, 0], sizes = [8, 1, 8, 4], strides = [1, 1, 1, 1]} : vector<8x2x8x8xf32> to vector<8x1x8x4xf32>
    %172 = vector.shape_cast %171 : vector<8x1x8x4xf32> to vector<8x8x4xf32>
    %173 = vector.extract_strided_slice %170 {offsets = [0, 0, 0, 4], sizes = [8, 1, 8, 4], strides = [1, 1, 1, 1]} : vector<8x2x8x8xf32> to vector<8x1x8x4xf32>
    %174 = vector.shape_cast %173 : vector<8x1x8x4xf32> to vector<8x8x4xf32>
    %175 = arith.maximumf %172, %174 : vector<8x8x4xf32>
    %176 = vector.extract_strided_slice %170 {offsets = [0, 1, 0, 0], sizes = [8, 1, 8, 4], strides = [1, 1, 1, 1]} : vector<8x2x8x8xf32> to vector<8x1x8x4xf32>
    %177 = vector.shape_cast %176 : vector<8x1x8x4xf32> to vector<8x8x4xf32>
    %178 = vector.extract_strided_slice %170 {offsets = [0, 1, 0, 4], sizes = [8, 1, 8, 4], strides = [1, 1, 1, 1]} : vector<8x2x8x8xf32> to vector<8x1x8x4xf32>
    %179 = vector.shape_cast %178 : vector<8x1x8x4xf32> to vector<8x8x4xf32>
    %180 = arith.maximumf %177, %179 : vector<8x8x4xf32>
    %181 = arith.maximumf %175, %180 : vector<8x8x4xf32>
    %182 = vector.shape_cast %181 : vector<8x8x4xf32> to vector<64x4xf32>
    %cst_79 = arith.constant 0.000000e+00 : f32
    %183 = vector.broadcast %cst_79 : f32 to vector<9x4xf32>
    %184 = tpu.concatenate %183, %182, %183 in 0 : vector<9x4xf32>, vector<64x4xf32>, vector<9x4xf32> -> vector<82x4xf32>
    %185 = tpu.iota {dimensions = array<i32: 0>} : vector<64x1xi32>
    %c8_i32_80 = arith.constant 8 : i32
    %c0_i32_81 = arith.constant 0 : i32
    %186 = arith.cmpi eq, %c8_i32_80, %c0_i32_81 : i32
    %c1_i32_82 = arith.constant 1 : i32
    %187 = arith.select %186, %c1_i32_82, %c8_i32_80 : i32
    %188 = vector.broadcast %187 : i32 to vector<64x1xi32>
    %189 = arith.remsi %185, %188 : vector<64x1xi32>
    %c0_i32_83 = arith.constant 0 : i32
    %190 = vector.broadcast %c0_i32_83 : i32 to vector<64x1xi32>
    %191 = arith.cmpi ne, %189, %190 : vector<64x1xi32>
    %c0_i32_84 = arith.constant 0 : i32
    %192 = vector.broadcast %c0_i32_84 : i32 to vector<64x1xi32>
    %193 = arith.cmpi slt, %189, %192 : vector<64x1xi32>
    %c0_i32_85 = arith.constant 0 : i32
    %194 = arith.cmpi slt, %187, %c0_i32_85 : i32
    %195 = vector.broadcast %194 : i1 to vector<64x1xi1>
    %196 = vector.broadcast %195 : vector<64x1xi1> to vector<64x1xi1>
    %197 = arith.xori %193, %196 : vector<64x1xi1>
    %198 = arith.andi %197, %191 : vector<64x1xi1>
    %199 = vector.broadcast %187 : i32 to vector<64x1xi32>
    %200 = arith.addi %189, %199 : vector<64x1xi32>
    %201 = arith.select %198, %200, %189 : vector<64x1xi1>, vector<64x1xi32>
    %cst_86 = arith.constant 0.000000e+00 : f32
    %202 = vector.broadcast %cst_86 : f32 to vector<64x8xf32>
    %203 = vector.extract_strided_slice %184 {offsets = [0, 0], sizes = [64, 4], strides = [1, 1]} : vector<82x4xf32> to vector<64x4xf32>
    %c-1_i32_87 = arith.constant -1 : i32
    %204 = vector.broadcast %c-1_i32_87 : i32 to vector<64x1xi32>
    %205 = arith.addi %201, %204 : vector<64x1xi32>
    %c0_i32_88 = arith.constant 0 : i32
    %206 = vector.broadcast %c0_i32_88 : i32 to vector<64x1xi32>
    %207 = arith.cmpi sge, %205, %206 : vector<64x1xi32>
    %c-1_i32_89 = arith.constant -1 : i32
    %208 = vector.broadcast %c-1_i32_89 : i32 to vector<64x1xi32>
    %209 = arith.addi %201, %208 : vector<64x1xi32>
    %c8_i32_90 = arith.constant 8 : i32
    %210 = vector.broadcast %c8_i32_90 : i32 to vector<64x1xi32>
    %211 = arith.cmpi slt, %209, %210 : vector<64x1xi32>
    %212 = arith.andi %207, %211 : vector<64x1xi1>
    %cst_91 = arith.constant 0.000000e+00 : f32
    %213 = vector.shape_cast %212 : vector<64x1xi1> to vector<64x1xi1>
    %214 = vector.broadcast %213 : vector<64x1xi1> to vector<64x4xi1>
    %215 = vector.broadcast %cst_91 : f32 to vector<64x4xf32>
    %216 = arith.select %214, %203, %215 : vector<64x4xi1>, vector<64x4xf32>
    %c0_92 = arith.constant 0 : index
    %c0_93 = arith.constant 0 : index
    %c0_94 = arith.constant 0 : index
    %217 = vector.load %arg2[%c0_92, %c0_93, %c0_94] : memref<9x4x8xf32, #tpu.memory_space<vmem>>, vector<1x4x8xf32>
    %218 = vector.shape_cast %217 : vector<1x4x8xf32> to vector<4x8xf32>
    %cst_95 = arith.constant dense<0.000000e+00> : vector<64x8xf32>
    %219 = tpu.matmul %216, %218, %cst_95 {dimension_numbers = #tpu.dot_dimension_numbers<[1], [0], [0], [1], [0, 0, 1, 1], [], []>} : vector<64x4xf32>, vector<4x8xf32>, vector<64x8xf32> -> vector<64x8xf32>
    %220 = arith.addf %202, %219 : vector<64x8xf32>
    %221 = vector.extract_strided_slice %184 {offsets = [1, 0], sizes = [64, 4], strides = [1, 1]} : vector<82x4xf32> to vector<64x4xf32>
    %c1_96 = arith.constant 1 : index
    %c0_97 = arith.constant 0 : index
    %c0_98 = arith.constant 0 : index
    %222 = vector.load %arg2[%c1_96, %c0_97, %c0_98] : memref<9x4x8xf32, #tpu.memory_space<vmem>>, vector<1x4x8xf32>
    %223 = vector.shape_cast %222 : vector<1x4x8xf32> to vector<4x8xf32>
    %cst_99 = arith.constant dense<0.000000e+00> : vector<64x8xf32>
    %224 = tpu.matmul %221, %223, %cst_99 {dimension_numbers = #tpu.dot_dimension_numbers<[1], [0], [0], [1], [0, 0, 1, 1], [], []>} : vector<64x4xf32>, vector<4x8xf32>, vector<64x8xf32> -> vector<64x8xf32>
    %225 = arith.addf %220, %224 : vector<64x8xf32>
    %226 = vector.extract_strided_slice %184 {offsets = [2, 0], sizes = [64, 4], strides = [1, 1]} : vector<82x4xf32> to vector<64x4xf32>
    %c1_i32_100 = arith.constant 1 : i32
    %227 = vector.broadcast %c1_i32_100 : i32 to vector<64x1xi32>
    %228 = arith.addi %201, %227 : vector<64x1xi32>
    %c0_i32_101 = arith.constant 0 : i32
    %229 = vector.broadcast %c0_i32_101 : i32 to vector<64x1xi32>
    %230 = arith.cmpi sge, %228, %229 : vector<64x1xi32>
    %c1_i32_102 = arith.constant 1 : i32
    %231 = vector.broadcast %c1_i32_102 : i32 to vector<64x1xi32>
    %232 = arith.addi %201, %231 : vector<64x1xi32>
    %c8_i32_103 = arith.constant 8 : i32
    %233 = vector.broadcast %c8_i32_103 : i32 to vector<64x1xi32>
    %234 = arith.cmpi slt, %232, %233 : vector<64x1xi32>
    %235 = arith.andi %230, %234 : vector<64x1xi1>
    %cst_104 = arith.constant 0.000000e+00 : f32
    %236 = vector.shape_cast %235 : vector<64x1xi1> to vector<64x1xi1>
    %237 = vector.broadcast %236 : vector<64x1xi1> to vector<64x4xi1>
    %238 = vector.broadcast %cst_104 : f32 to vector<64x4xf32>
    %239 = arith.select %237, %226, %238 : vector<64x4xi1>, vector<64x4xf32>
    %c2_105 = arith.constant 2 : index
    %c0_106 = arith.constant 0 : index
    %c0_107 = arith.constant 0 : index
    %240 = vector.load %arg2[%c2_105, %c0_106, %c0_107] : memref<9x4x8xf32, #tpu.memory_space<vmem>>, vector<1x4x8xf32>
    %241 = vector.shape_cast %240 : vector<1x4x8xf32> to vector<4x8xf32>
    %cst_108 = arith.constant dense<0.000000e+00> : vector<64x8xf32>
    %242 = tpu.matmul %239, %241, %cst_108 {dimension_numbers = #tpu.dot_dimension_numbers<[1], [0], [0], [1], [0, 0, 1, 1], [], []>} : vector<64x4xf32>, vector<4x8xf32>, vector<64x8xf32> -> vector<64x8xf32>
    %243 = arith.addf %225, %242 : vector<64x8xf32>
    %244 = vector.extract_strided_slice %184 {offsets = [8, 0], sizes = [64, 4], strides = [1, 1]} : vector<82x4xf32> to vector<64x4xf32>
    %c-1_i32_109 = arith.constant -1 : i32
    %245 = vector.broadcast %c-1_i32_109 : i32 to vector<64x1xi32>
    %246 = arith.addi %201, %245 : vector<64x1xi32>
    %c0_i32_110 = arith.constant 0 : i32
    %247 = vector.broadcast %c0_i32_110 : i32 to vector<64x1xi32>
    %248 = arith.cmpi sge, %246, %247 : vector<64x1xi32>
    %c-1_i32_111 = arith.constant -1 : i32
    %249 = vector.broadcast %c-1_i32_111 : i32 to vector<64x1xi32>
    %250 = arith.addi %201, %249 : vector<64x1xi32>
    %c8_i32_112 = arith.constant 8 : i32
    %251 = vector.broadcast %c8_i32_112 : i32 to vector<64x1xi32>
    %252 = arith.cmpi slt, %250, %251 : vector<64x1xi32>
    %253 = arith.andi %248, %252 : vector<64x1xi1>
    %cst_113 = arith.constant 0.000000e+00 : f32
    %254 = vector.shape_cast %253 : vector<64x1xi1> to vector<64x1xi1>
    %255 = vector.broadcast %254 : vector<64x1xi1> to vector<64x4xi1>
    %256 = vector.broadcast %cst_113 : f32 to vector<64x4xf32>
    %257 = arith.select %255, %244, %256 : vector<64x4xi1>, vector<64x4xf32>
    %c3_114 = arith.constant 3 : index
    %c0_115 = arith.constant 0 : index
    %c0_116 = arith.constant 0 : index
    %258 = vector.load %arg2[%c3_114, %c0_115, %c0_116] : memref<9x4x8xf32, #tpu.memory_space<vmem>>, vector<1x4x8xf32>
    %259 = vector.shape_cast %258 : vector<1x4x8xf32> to vector<4x8xf32>
    %cst_117 = arith.constant dense<0.000000e+00> : vector<64x8xf32>
    %260 = tpu.matmul %257, %259, %cst_117 {dimension_numbers = #tpu.dot_dimension_numbers<[1], [0], [0], [1], [0, 0, 1, 1], [], []>} : vector<64x4xf32>, vector<4x8xf32>, vector<64x8xf32> -> vector<64x8xf32>
    %261 = arith.addf %243, %260 : vector<64x8xf32>
    %262 = vector.extract_strided_slice %184 {offsets = [9, 0], sizes = [64, 4], strides = [1, 1]} : vector<82x4xf32> to vector<64x4xf32>
    %c4_118 = arith.constant 4 : index
    %c0_119 = arith.constant 0 : index
    %c0_120 = arith.constant 0 : index
    %263 = vector.load %arg2[%c4_118, %c0_119, %c0_120] : memref<9x4x8xf32, #tpu.memory_space<vmem>>, vector<1x4x8xf32>
    %264 = vector.shape_cast %263 : vector<1x4x8xf32> to vector<4x8xf32>
    %cst_121 = arith.constant dense<0.000000e+00> : vector<64x8xf32>
    %265 = tpu.matmul %262, %264, %cst_121 {dimension_numbers = #tpu.dot_dimension_numbers<[1], [0], [0], [1], [0, 0, 1, 1], [], []>} : vector<64x4xf32>, vector<4x8xf32>, vector<64x8xf32> -> vector<64x8xf32>
    %266 = arith.addf %261, %265 : vector<64x8xf32>
    %267 = vector.extract_strided_slice %184 {offsets = [10, 0], sizes = [64, 4], strides = [1, 1]} : vector<82x4xf32> to vector<64x4xf32>
    %c1_i32_122 = arith.constant 1 : i32
    %268 = vector.broadcast %c1_i32_122 : i32 to vector<64x1xi32>
    %269 = arith.addi %201, %268 : vector<64x1xi32>
    %c0_i32_123 = arith.constant 0 : i32
    %270 = vector.broadcast %c0_i32_123 : i32 to vector<64x1xi32>
    %271 = arith.cmpi sge, %269, %270 : vector<64x1xi32>
    %c1_i32_124 = arith.constant 1 : i32
    %272 = vector.broadcast %c1_i32_124 : i32 to vector<64x1xi32>
    %273 = arith.addi %201, %272 : vector<64x1xi32>
    %c8_i32_125 = arith.constant 8 : i32
    %274 = vector.broadcast %c8_i32_125 : i32 to vector<64x1xi32>
    %275 = arith.cmpi slt, %273, %274 : vector<64x1xi32>
    %276 = arith.andi %271, %275 : vector<64x1xi1>
    %cst_126 = arith.constant 0.000000e+00 : f32
    %277 = vector.shape_cast %276 : vector<64x1xi1> to vector<64x1xi1>
    %278 = vector.broadcast %277 : vector<64x1xi1> to vector<64x4xi1>
    %279 = vector.broadcast %cst_126 : f32 to vector<64x4xf32>
    %280 = arith.select %278, %267, %279 : vector<64x4xi1>, vector<64x4xf32>
    %c5_127 = arith.constant 5 : index
    %c0_128 = arith.constant 0 : index
    %c0_129 = arith.constant 0 : index
    %281 = vector.load %arg2[%c5_127, %c0_128, %c0_129] : memref<9x4x8xf32, #tpu.memory_space<vmem>>, vector<1x4x8xf32>
    %282 = vector.shape_cast %281 : vector<1x4x8xf32> to vector<4x8xf32>
    %cst_130 = arith.constant dense<0.000000e+00> : vector<64x8xf32>
    %283 = tpu.matmul %280, %282, %cst_130 {dimension_numbers = #tpu.dot_dimension_numbers<[1], [0], [0], [1], [0, 0, 1, 1], [], []>} : vector<64x4xf32>, vector<4x8xf32>, vector<64x8xf32> -> vector<64x8xf32>
    %284 = arith.addf %266, %283 : vector<64x8xf32>
    %285 = vector.extract_strided_slice %184 {offsets = [16, 0], sizes = [64, 4], strides = [1, 1]} : vector<82x4xf32> to vector<64x4xf32>
    %c-1_i32_131 = arith.constant -1 : i32
    %286 = vector.broadcast %c-1_i32_131 : i32 to vector<64x1xi32>
    %287 = arith.addi %201, %286 : vector<64x1xi32>
    %c0_i32_132 = arith.constant 0 : i32
    %288 = vector.broadcast %c0_i32_132 : i32 to vector<64x1xi32>
    %289 = arith.cmpi sge, %287, %288 : vector<64x1xi32>
    %c-1_i32_133 = arith.constant -1 : i32
    %290 = vector.broadcast %c-1_i32_133 : i32 to vector<64x1xi32>
    %291 = arith.addi %201, %290 : vector<64x1xi32>
    %c8_i32_134 = arith.constant 8 : i32
    %292 = vector.broadcast %c8_i32_134 : i32 to vector<64x1xi32>
    %293 = arith.cmpi slt, %291, %292 : vector<64x1xi32>
    %294 = arith.andi %289, %293 : vector<64x1xi1>
    %cst_135 = arith.constant 0.000000e+00 : f32
    %295 = vector.shape_cast %294 : vector<64x1xi1> to vector<64x1xi1>
    %296 = vector.broadcast %295 : vector<64x1xi1> to vector<64x4xi1>
    %297 = vector.broadcast %cst_135 : f32 to vector<64x4xf32>
    %298 = arith.select %296, %285, %297 : vector<64x4xi1>, vector<64x4xf32>
    %c6_136 = arith.constant 6 : index
    %c0_137 = arith.constant 0 : index
    %c0_138 = arith.constant 0 : index
    %299 = vector.load %arg2[%c6_136, %c0_137, %c0_138] : memref<9x4x8xf32, #tpu.memory_space<vmem>>, vector<1x4x8xf32>
    %300 = vector.shape_cast %299 : vector<1x4x8xf32> to vector<4x8xf32>
    %cst_139 = arith.constant dense<0.000000e+00> : vector<64x8xf32>
    %301 = tpu.matmul %298, %300, %cst_139 {dimension_numbers = #tpu.dot_dimension_numbers<[1], [0], [0], [1], [0, 0, 1, 1], [], []>} : vector<64x4xf32>, vector<4x8xf32>, vector<64x8xf32> -> vector<64x8xf32>
    %302 = arith.addf %284, %301 : vector<64x8xf32>
    %303 = vector.extract_strided_slice %184 {offsets = [17, 0], sizes = [64, 4], strides = [1, 1]} : vector<82x4xf32> to vector<64x4xf32>
    %c7_140 = arith.constant 7 : index
    %c0_141 = arith.constant 0 : index
    %c0_142 = arith.constant 0 : index
    %304 = vector.load %arg2[%c7_140, %c0_141, %c0_142] : memref<9x4x8xf32, #tpu.memory_space<vmem>>, vector<1x4x8xf32>
    %305 = vector.shape_cast %304 : vector<1x4x8xf32> to vector<4x8xf32>
    %cst_143 = arith.constant dense<0.000000e+00> : vector<64x8xf32>
    %306 = tpu.matmul %303, %305, %cst_143 {dimension_numbers = #tpu.dot_dimension_numbers<[1], [0], [0], [1], [0, 0, 1, 1], [], []>} : vector<64x4xf32>, vector<4x8xf32>, vector<64x8xf32> -> vector<64x8xf32>
    %307 = arith.addf %302, %306 : vector<64x8xf32>
    %308 = vector.extract_strided_slice %184 {offsets = [18, 0], sizes = [64, 4], strides = [1, 1]} : vector<82x4xf32> to vector<64x4xf32>
    %c1_i32_144 = arith.constant 1 : i32
    %309 = vector.broadcast %c1_i32_144 : i32 to vector<64x1xi32>
    %310 = arith.addi %201, %309 : vector<64x1xi32>
    %c0_i32_145 = arith.constant 0 : i32
    %311 = vector.broadcast %c0_i32_145 : i32 to vector<64x1xi32>
    %312 = arith.cmpi sge, %310, %311 : vector<64x1xi32>
    %c1_i32_146 = arith.constant 1 : i32
    %313 = vector.broadcast %c1_i32_146 : i32 to vector<64x1xi32>
    %314 = arith.addi %201, %313 : vector<64x1xi32>
    %c8_i32_147 = arith.constant 8 : i32
    %315 = vector.broadcast %c8_i32_147 : i32 to vector<64x1xi32>
    %316 = arith.cmpi slt, %314, %315 : vector<64x1xi32>
    %317 = arith.andi %312, %316 : vector<64x1xi1>
    %cst_148 = arith.constant 0.000000e+00 : f32
    %318 = vector.shape_cast %317 : vector<64x1xi1> to vector<64x1xi1>
    %319 = vector.broadcast %318 : vector<64x1xi1> to vector<64x4xi1>
    %320 = vector.broadcast %cst_148 : f32 to vector<64x4xf32>
    %321 = arith.select %319, %308, %320 : vector<64x4xi1>, vector<64x4xf32>
    %c8_149 = arith.constant 8 : index
    %c0_150 = arith.constant 0 : index
    %c0_151 = arith.constant 0 : index
    %322 = vector.load %arg2[%c8_149, %c0_150, %c0_151] : memref<9x4x8xf32, #tpu.memory_space<vmem>>, vector<1x4x8xf32>
    %323 = vector.shape_cast %322 : vector<1x4x8xf32> to vector<4x8xf32>
    %cst_152 = arith.constant dense<0.000000e+00> : vector<64x8xf32>
    %324 = tpu.matmul %321, %323, %cst_152 {dimension_numbers = #tpu.dot_dimension_numbers<[1], [0], [0], [1], [0, 0, 1, 1], [], []>} : vector<64x4xf32>, vector<4x8xf32>, vector<64x8xf32> -> vector<64x8xf32>
    %325 = arith.addf %307, %324 : vector<64x8xf32>
    %326 = vector.extract_strided_slice %0 {offsets = [0, 0], sizes = [1, 8], strides = [1, 1]} : vector<3x8xf32> to vector<1x8xf32>
    %327 = vector.broadcast %326 : vector<1x8xf32> to vector<64x8xf32>
    %328 = arith.addf %325, %327 : vector<64x8xf32>
    %c1_153 = arith.constant 1 : index
    %c0_154 = arith.constant 0 : index
    %c0_155 = arith.constant 0 : index
    %329 = vector.load %arg10[%c1_153, %c0_154, %c0_155] : memref<2x64x8xf32, #tpu.memory_space<vmem>>, vector<1x64x8xf32>
    %330 = vector.shape_cast %329 : vector<1x64x8xf32> to vector<64x8xf32>
    %331 = vector.shape_cast %328 : vector<64x8xf32> to vector<1x64x8xf32>
    tpu.vector_store %arg10[%c1_153, %c0_154, %c0_155], %331 {strides = array<i32>} : memref<2x64x8xf32, #tpu.memory_space<vmem>>, vector<1x64x8xf32>,
    %cst_156 = arith.constant dense<0.000000e+00> : vector<8xf32>
    %332 = vector.multi_reduction <add>, %328, %cst_156 [0] : vector<64x8xf32> to vector<8xf32>
    %333 = vector.shape_cast %332 : vector<8xf32> to vector<1x8xf32>
    %334 = arith.addf %168, %333 : vector<1x8xf32>
    %cst_157 = arith.constant 7.812500e-03 : f32
    %335 = vector.broadcast %cst_157 : f32 to vector<1x8xf32>
    %336 = arith.mulf %334, %335 : vector<1x8xf32>
    %cst_158 = arith.constant 0.000000e+00 : f32
    %337 = vector.broadcast %cst_158 : f32 to vector<1x8xf32>
    %c0_159 = arith.constant 0 : index
    %c0_160 = arith.constant 0 : index
    %c0_161 = arith.constant 0 : index
    %338 = vector.load %arg10[%c0_159, %c0_160, %c0_161] : memref<2x64x8xf32, #tpu.memory_space<vmem>>, vector<1x64x8xf32>
    %339 = vector.shape_cast %338 : vector<1x64x8xf32> to vector<64x8xf32>
    %340 = vector.broadcast %336 : vector<1x8xf32> to vector<64x8xf32>
    %341 = arith.subf %339, %340 : vector<64x8xf32>
    %342 = arith.mulf %341, %341 : vector<64x8xf32>
    %cst_162 = arith.constant dense<0.000000e+00> : vector<8xf32>
    %343 = vector.multi_reduction <add>, %342, %cst_162 [0] : vector<64x8xf32> to vector<8xf32>
    %344 = vector.shape_cast %343 : vector<8xf32> to vector<1x8xf32>
    %345 = arith.addf %337, %344 : vector<1x8xf32>
    %c1_163 = arith.constant 1 : index
    %c0_164 = arith.constant 0 : index
    %c0_165 = arith.constant 0 : index
    %346 = vector.load %arg10[%c1_163, %c0_164, %c0_165] : memref<2x64x8xf32, #tpu.memory_space<vmem>>, vector<1x64x8xf32>
    %347 = vector.shape_cast %346 : vector<1x64x8xf32> to vector<64x8xf32>
    %348 = vector.broadcast %336 : vector<1x8xf32> to vector<64x8xf32>
    %349 = arith.subf %347, %348 : vector<64x8xf32>
    %350 = arith.mulf %349, %349 : vector<64x8xf32>
    %cst_166 = arith.constant dense<0.000000e+00> : vector<8xf32>
    %351 = vector.multi_reduction <add>, %350, %cst_166 [0] : vector<64x8xf32> to vector<8xf32>
    %352 = vector.shape_cast %351 : vector<8xf32> to vector<1x8xf32>
    %353 = arith.addf %345, %352 : vector<1x8xf32>
    %354 = vector.extract_strided_slice %0 {offsets = [1, 0], sizes = [1, 8], strides = [1, 1]} : vector<3x8xf32> to vector<1x8xf32>
    %cst_167 = arith.constant 7.812500e-03 : f32
    %355 = vector.broadcast %cst_167 : f32 to vector<1x8xf32>
    %356 = arith.mulf %353, %355 : vector<1x8xf32>
    %cst_168 = arith.constant 9.99999974E-6 : f32
    %357 = vector.broadcast %cst_168 : f32 to vector<1x8xf32>
    %358 = arith.addf %356, %357 : vector<1x8xf32>
    %359 = math.rsqrt %358 : vector<1x8xf32>
    %360 = arith.mulf %354, %359 : vector<1x8xf32>
    %361 = vector.extract_strided_slice %0 {offsets = [2, 0], sizes = [1, 8], strides = [1, 1]} : vector<3x8xf32> to vector<1x8xf32>
    %362 = arith.mulf %336, %360 : vector<1x8xf32>
    %363 = arith.subf %361, %362 : vector<1x8xf32>
    %cst_169 = arith.constant 0.000000e+00 : f32
    %364 = vector.broadcast %cst_169 : f32 to vector<1x8xf32>
    %c0_170 = arith.constant 0 : index
    %c0_171 = arith.constant 0 : index
    %c0_172 = arith.constant 0 : index
    %365 = vector.load %arg10[%c0_170, %c0_171, %c0_172] : memref<2x64x8xf32, #tpu.memory_space<vmem>>, vector<1x64x8xf32>
    %366 = vector.shape_cast %365 : vector<1x64x8xf32> to vector<64x8xf32>
    %367 = vector.broadcast %360 : vector<1x8xf32> to vector<64x8xf32>
    %368 = arith.mulf %366, %367 : vector<64x8xf32>
    %369 = vector.broadcast %363 : vector<1x8xf32> to vector<64x8xf32>
    %370 = arith.addf %368, %369 : vector<64x8xf32>
    %cst_173 = arith.constant 0.000000e+00 : f32
    %371 = vector.broadcast %cst_173 : f32 to vector<64x8xf32>
    %372 = arith.maximumf %370, %371 : vector<64x8xf32>
    %cst_174 = arith.constant 0.000000e+00 : f32
    %373 = vector.broadcast %cst_174 : f32 to vector<9x8xf32>
    %374 = tpu.concatenate %373, %372, %373 in 0 : vector<9x8xf32>, vector<64x8xf32>, vector<9x8xf32> -> vector<82x8xf32>
    %375 = tpu.iota {dimensions = array<i32: 0>} : vector<64x1xi32>
    %c8_i32_175 = arith.constant 8 : i32
    %c0_i32_176 = arith.constant 0 : i32
    %376 = arith.cmpi eq, %c8_i32_175, %c0_i32_176 : i32
    %c1_i32_177 = arith.constant 1 : i32
    %377 = arith.select %376, %c1_i32_177, %c8_i32_175 : i32
    %378 = vector.broadcast %377 : i32 to vector<64x1xi32>
    %379 = arith.remsi %375, %378 : vector<64x1xi32>
    %c0_i32_178 = arith.constant 0 : i32
    %380 = vector.broadcast %c0_i32_178 : i32 to vector<64x1xi32>
    %381 = arith.cmpi ne, %379, %380 : vector<64x1xi32>
    %c0_i32_179 = arith.constant 0 : i32
    %382 = vector.broadcast %c0_i32_179 : i32 to vector<64x1xi32>
    %383 = arith.cmpi slt, %379, %382 : vector<64x1xi32>
    %c0_i32_180 = arith.constant 0 : i32
    %384 = arith.cmpi slt, %377, %c0_i32_180 : i32
    %385 = vector.broadcast %384 : i1 to vector<64x1xi1>
    %386 = vector.broadcast %385 : vector<64x1xi1> to vector<64x1xi1>
    %387 = arith.xori %383, %386 : vector<64x1xi1>
    %388 = arith.andi %387, %381 : vector<64x1xi1>
    %389 = vector.broadcast %377 : i32 to vector<64x1xi32>
    %390 = arith.addi %379, %389 : vector<64x1xi32>
    %391 = arith.select %388, %390, %379 : vector<64x1xi1>, vector<64x1xi32>
    %cst_181 = arith.constant 0.000000e+00 : f32
    %392 = vector.broadcast %cst_181 : f32 to vector<64x8xf32>
    %393 = vector.extract_strided_slice %374 {offsets = [0, 0], sizes = [64, 8], strides = [1, 1]} : vector<82x8xf32> to vector<64x8xf32>
    %c-1_i32_182 = arith.constant -1 : i32
    %394 = vector.broadcast %c-1_i32_182 : i32 to vector<64x1xi32>
    %395 = arith.addi %391, %394 : vector<64x1xi32>
    %c0_i32_183 = arith.constant 0 : i32
    %396 = vector.broadcast %c0_i32_183 : i32 to vector<64x1xi32>
    %397 = arith.cmpi sge, %395, %396 : vector<64x1xi32>
    %c-1_i32_184 = arith.constant -1 : i32
    %398 = vector.broadcast %c-1_i32_184 : i32 to vector<64x1xi32>
    %399 = arith.addi %391, %398 : vector<64x1xi32>
    %c8_i32_185 = arith.constant 8 : i32
    %400 = vector.broadcast %c8_i32_185 : i32 to vector<64x1xi32>
    %401 = arith.cmpi slt, %399, %400 : vector<64x1xi32>
    %402 = arith.andi %397, %401 : vector<64x1xi1>
    %cst_186 = arith.constant 0.000000e+00 : f32
    %403 = vector.shape_cast %402 : vector<64x1xi1> to vector<64x1xi1>
    %404 = vector.broadcast %403 : vector<64x1xi1> to vector<64x8xi1>
    %405 = vector.broadcast %cst_186 : f32 to vector<64x8xf32>
    %406 = arith.select %404, %393, %405 : vector<64x8xi1>, vector<64x8xf32>
    %c0_187 = arith.constant 0 : index
    %c0_188 = arith.constant 0 : index
    %c0_189 = arith.constant 0 : index
    %407 = vector.load %arg4[%c0_187, %c0_188, %c0_189] : memref<9x8x8xf32, #tpu.memory_space<vmem>>, vector<1x8x8xf32>
    %408 = vector.shape_cast %407 : vector<1x8x8xf32> to vector<8x8xf32>
    %cst_190 = arith.constant dense<0.000000e+00> : vector<64x8xf32>
    %409 = tpu.matmul %406, %408, %cst_190 {dimension_numbers = #tpu.dot_dimension_numbers<[1], [0], [0], [1], [0, 0, 1, 1], [], []>} : vector<64x8xf32>, vector<8x8xf32>, vector<64x8xf32> -> vector<64x8xf32>
    %410 = arith.addf %392, %409 : vector<64x8xf32>
    %411 = vector.extract_strided_slice %374 {offsets = [1, 0], sizes = [64, 8], strides = [1, 1]} : vector<82x8xf32> to vector<64x8xf32>
    %c1_191 = arith.constant 1 : index
    %c0_192 = arith.constant 0 : index
    %c0_193 = arith.constant 0 : index
    %412 = vector.load %arg4[%c1_191, %c0_192, %c0_193] : memref<9x8x8xf32, #tpu.memory_space<vmem>>, vector<1x8x8xf32>
    %413 = vector.shape_cast %412 : vector<1x8x8xf32> to vector<8x8xf32>
    %cst_194 = arith.constant dense<0.000000e+00> : vector<64x8xf32>
    %414 = tpu.matmul %411, %413, %cst_194 {dimension_numbers = #tpu.dot_dimension_numbers<[1], [0], [0], [1], [0, 0, 1, 1], [], []>} : vector<64x8xf32>, vector<8x8xf32>, vector<64x8xf32> -> vector<64x8xf32>
    %415 = arith.addf %410, %414 : vector<64x8xf32>
    %416 = vector.extract_strided_slice %374 {offsets = [2, 0], sizes = [64, 8], strides = [1, 1]} : vector<82x8xf32> to vector<64x8xf32>
    %c1_i32_195 = arith.constant 1 : i32
    %417 = vector.broadcast %c1_i32_195 : i32 to vector<64x1xi32>
    %418 = arith.addi %391, %417 : vector<64x1xi32>
    %c0_i32_196 = arith.constant 0 : i32
    %419 = vector.broadcast %c0_i32_196 : i32 to vector<64x1xi32>
    %420 = arith.cmpi sge, %418, %419 : vector<64x1xi32>
    %c1_i32_197 = arith.constant 1 : i32
    %421 = vector.broadcast %c1_i32_197 : i32 to vector<64x1xi32>
    %422 = arith.addi %391, %421 : vector<64x1xi32>
    %c8_i32_198 = arith.constant 8 : i32
    %423 = vector.broadcast %c8_i32_198 : i32 to vector<64x1xi32>
    %424 = arith.cmpi slt, %422, %423 : vector<64x1xi32>
    %425 = arith.andi %420, %424 : vector<64x1xi1>
    %cst_199 = arith.constant 0.000000e+00 : f32
    %426 = vector.shape_cast %425 : vector<64x1xi1> to vector<64x1xi1>
    %427 = vector.broadcast %426 : vector<64x1xi1> to vector<64x8xi1>
    %428 = vector.broadcast %cst_199 : f32 to vector<64x8xf32>
    %429 = arith.select %427, %416, %428 : vector<64x8xi1>, vector<64x8xf32>
    %c2_200 = arith.constant 2 : index
    %c0_201 = arith.constant 0 : index
    %c0_202 = arith.constant 0 : index
    %430 = vector.load %arg4[%c2_200, %c0_201, %c0_202] : memref<9x8x8xf32, #tpu.memory_space<vmem>>, vector<1x8x8xf32>
    %431 = vector.shape_cast %430 : vector<1x8x8xf32> to vector<8x8xf32>
    %cst_203 = arith.constant dense<0.000000e+00> : vector<64x8xf32>
    %432 = tpu.matmul %429, %431, %cst_203 {dimension_numbers = #tpu.dot_dimension_numbers<[1], [0], [0], [1], [0, 0, 1, 1], [], []>} : vector<64x8xf32>, vector<8x8xf32>, vector<64x8xf32> -> vector<64x8xf32>
    %433 = arith.addf %415, %432 : vector<64x8xf32>
    %434 = vector.extract_strided_slice %374 {offsets = [8, 0], sizes = [64, 8], strides = [1, 1]} : vector<82x8xf32> to vector<64x8xf32>
    %c-1_i32_204 = arith.constant -1 : i32
    %435 = vector.broadcast %c-1_i32_204 : i32 to vector<64x1xi32>
    %436 = arith.addi %391, %435 : vector<64x1xi32>
    %c0_i32_205 = arith.constant 0 : i32
    %437 = vector.broadcast %c0_i32_205 : i32 to vector<64x1xi32>
    %438 = arith.cmpi sge, %436, %437 : vector<64x1xi32>
    %c-1_i32_206 = arith.constant -1 : i32
    %439 = vector.broadcast %c-1_i32_206 : i32 to vector<64x1xi32>
    %440 = arith.addi %391, %439 : vector<64x1xi32>
    %c8_i32_207 = arith.constant 8 : i32
    %441 = vector.broadcast %c8_i32_207 : i32 to vector<64x1xi32>
    %442 = arith.cmpi slt, %440, %441 : vector<64x1xi32>
    %443 = arith.andi %438, %442 : vector<64x1xi1>
    %cst_208 = arith.constant 0.000000e+00 : f32
    %444 = vector.shape_cast %443 : vector<64x1xi1> to vector<64x1xi1>
    %445 = vector.broadcast %444 : vector<64x1xi1> to vector<64x8xi1>
    %446 = vector.broadcast %cst_208 : f32 to vector<64x8xf32>
    %447 = arith.select %445, %434, %446 : vector<64x8xi1>, vector<64x8xf32>
    %c3_209 = arith.constant 3 : index
    %c0_210 = arith.constant 0 : index
    %c0_211 = arith.constant 0 : index
    %448 = vector.load %arg4[%c3_209, %c0_210, %c0_211] : memref<9x8x8xf32, #tpu.memory_space<vmem>>, vector<1x8x8xf32>
    %449 = vector.shape_cast %448 : vector<1x8x8xf32> to vector<8x8xf32>
    %cst_212 = arith.constant dense<0.000000e+00> : vector<64x8xf32>
    %450 = tpu.matmul %447, %449, %cst_212 {dimension_numbers = #tpu.dot_dimension_numbers<[1], [0], [0], [1], [0, 0, 1, 1], [], []>} : vector<64x8xf32>, vector<8x8xf32>, vector<64x8xf32> -> vector<64x8xf32>
    %451 = arith.addf %433, %450 : vector<64x8xf32>
    %452 = vector.extract_strided_slice %374 {offsets = [9, 0], sizes = [64, 8], strides = [1, 1]} : vector<82x8xf32> to vector<64x8xf32>
    %c4_213 = arith.constant 4 : index
    %c0_214 = arith.constant 0 : index
    %c0_215 = arith.constant 0 : index
    %453 = vector.load %arg4[%c4_213, %c0_214, %c0_215] : memref<9x8x8xf32, #tpu.memory_space<vmem>>, vector<1x8x8xf32>
    %454 = vector.shape_cast %453 : vector<1x8x8xf32> to vector<8x8xf32>
    %cst_216 = arith.constant dense<0.000000e+00> : vector<64x8xf32>
    %455 = tpu.matmul %452, %454, %cst_216 {dimension_numbers = #tpu.dot_dimension_numbers<[1], [0], [0], [1], [0, 0, 1, 1], [], []>} : vector<64x8xf32>, vector<8x8xf32>, vector<64x8xf32> -> vector<64x8xf32>
    %456 = arith.addf %451, %455 : vector<64x8xf32>
    %457 = vector.extract_strided_slice %374 {offsets = [10, 0], sizes = [64, 8], strides = [1, 1]} : vector<82x8xf32> to vector<64x8xf32>
    %c1_i32_217 = arith.constant 1 : i32
    %458 = vector.broadcast %c1_i32_217 : i32 to vector<64x1xi32>
    %459 = arith.addi %391, %458 : vector<64x1xi32>
    %c0_i32_218 = arith.constant 0 : i32
    %460 = vector.broadcast %c0_i32_218 : i32 to vector<64x1xi32>
    %461 = arith.cmpi sge, %459, %460 : vector<64x1xi32>
    %c1_i32_219 = arith.constant 1 : i32
    %462 = vector.broadcast %c1_i32_219 : i32 to vector<64x1xi32>
    %463 = arith.addi %391, %462 : vector<64x1xi32>
    %c8_i32_220 = arith.constant 8 : i32
    %464 = vector.broadcast %c8_i32_220 : i32 to vector<64x1xi32>
    %465 = arith.cmpi slt, %463, %464 : vector<64x1xi32>
    %466 = arith.andi %461, %465 : vector<64x1xi1>
    %cst_221 = arith.constant 0.000000e+00 : f32
    %467 = vector.shape_cast %466 : vector<64x1xi1> to vector<64x1xi1>
    %468 = vector.broadcast %467 : vector<64x1xi1> to vector<64x8xi1>
    %469 = vector.broadcast %cst_221 : f32 to vector<64x8xf32>
    %470 = arith.select %468, %457, %469 : vector<64x8xi1>, vector<64x8xf32>
    %c5_222 = arith.constant 5 : index
    %c0_223 = arith.constant 0 : index
    %c0_224 = arith.constant 0 : index
    %471 = vector.load %arg4[%c5_222, %c0_223, %c0_224] : memref<9x8x8xf32, #tpu.memory_space<vmem>>, vector<1x8x8xf32>
    %472 = vector.shape_cast %471 : vector<1x8x8xf32> to vector<8x8xf32>
    %cst_225 = arith.constant dense<0.000000e+00> : vector<64x8xf32>
    %473 = tpu.matmul %470, %472, %cst_225 {dimension_numbers = #tpu.dot_dimension_numbers<[1], [0], [0], [1], [0, 0, 1, 1], [], []>} : vector<64x8xf32>, vector<8x8xf32>, vector<64x8xf32> -> vector<64x8xf32>
    %474 = arith.addf %456, %473 : vector<64x8xf32>
    %475 = vector.extract_strided_slice %374 {offsets = [16, 0], sizes = [64, 8], strides = [1, 1]} : vector<82x8xf32> to vector<64x8xf32>
    %c-1_i32_226 = arith.constant -1 : i32
    %476 = vector.broadcast %c-1_i32_226 : i32 to vector<64x1xi32>
    %477 = arith.addi %391, %476 : vector<64x1xi32>
    %c0_i32_227 = arith.constant 0 : i32
    %478 = vector.broadcast %c0_i32_227 : i32 to vector<64x1xi32>
    %479 = arith.cmpi sge, %477, %478 : vector<64x1xi32>
    %c-1_i32_228 = arith.constant -1 : i32
    %480 = vector.broadcast %c-1_i32_228 : i32 to vector<64x1xi32>
    %481 = arith.addi %391, %480 : vector<64x1xi32>
    %c8_i32_229 = arith.constant 8 : i32
    %482 = vector.broadcast %c8_i32_229 : i32 to vector<64x1xi32>
    %483 = arith.cmpi slt, %481, %482 : vector<64x1xi32>
    %484 = arith.andi %479, %483 : vector<64x1xi1>
    %cst_230 = arith.constant 0.000000e+00 : f32
    %485 = vector.shape_cast %484 : vector<64x1xi1> to vector<64x1xi1>
    %486 = vector.broadcast %485 : vector<64x1xi1> to vector<64x8xi1>
    %487 = vector.broadcast %cst_230 : f32 to vector<64x8xf32>
    %488 = arith.select %486, %475, %487 : vector<64x8xi1>, vector<64x8xf32>
    %c6_231 = arith.constant 6 : index
    %c0_232 = arith.constant 0 : index
    %c0_233 = arith.constant 0 : index
    %489 = vector.load %arg4[%c6_231, %c0_232, %c0_233] : memref<9x8x8xf32, #tpu.memory_space<vmem>>, vector<1x8x8xf32>
    %490 = vector.shape_cast %489 : vector<1x8x8xf32> to vector<8x8xf32>
    %cst_234 = arith.constant dense<0.000000e+00> : vector<64x8xf32>
    %491 = tpu.matmul %488, %490, %cst_234 {dimension_numbers = #tpu.dot_dimension_numbers<[1], [0], [0], [1], [0, 0, 1, 1], [], []>} : vector<64x8xf32>, vector<8x8xf32>, vector<64x8xf32> -> vector<64x8xf32>
    %492 = arith.addf %474, %491 : vector<64x8xf32>
    %493 = vector.extract_strided_slice %374 {offsets = [17, 0], sizes = [64, 8], strides = [1, 1]} : vector<82x8xf32> to vector<64x8xf32>
    %c7_235 = arith.constant 7 : index
    %c0_236 = arith.constant 0 : index
    %c0_237 = arith.constant 0 : index
    %494 = vector.load %arg4[%c7_235, %c0_236, %c0_237] : memref<9x8x8xf32, #tpu.memory_space<vmem>>, vector<1x8x8xf32>
    %495 = vector.shape_cast %494 : vector<1x8x8xf32> to vector<8x8xf32>
    %cst_238 = arith.constant dense<0.000000e+00> : vector<64x8xf32>
    %496 = tpu.matmul %493, %495, %cst_238 {dimension_numbers = #tpu.dot_dimension_numbers<[1], [0], [0], [1], [0, 0, 1, 1], [], []>} : vector<64x8xf32>, vector<8x8xf32>, vector<64x8xf32> -> vector<64x8xf32>
    %497 = arith.addf %492, %496 : vector<64x8xf32>
    %498 = vector.extract_strided_slice %374 {offsets = [18, 0], sizes = [64, 8], strides = [1, 1]} : vector<82x8xf32> to vector<64x8xf32>
    %c1_i32_239 = arith.constant 1 : i32
    %499 = vector.broadcast %c1_i32_239 : i32 to vector<64x1xi32>
    %500 = arith.addi %391, %499 : vector<64x1xi32>
    %c0_i32_240 = arith.constant 0 : i32
    %501 = vector.broadcast %c0_i32_240 : i32 to vector<64x1xi32>
    %502 = arith.cmpi sge, %500, %501 : vector<64x1xi32>
    %c1_i32_241 = arith.constant 1 : i32
    %503 = vector.broadcast %c1_i32_241 : i32 to vector<64x1xi32>
    %504 = arith.addi %391, %503 : vector<64x1xi32>
    %c8_i32_242 = arith.constant 8 : i32
    %505 = vector.broadcast %c8_i32_242 : i32 to vector<64x1xi32>
    %506 = arith.cmpi slt, %504, %505 : vector<64x1xi32>
    %507 = arith.andi %502, %506 : vector<64x1xi1>
    %cst_243 = arith.constant 0.000000e+00 : f32
    %508 = vector.shape_cast %507 : vector<64x1xi1> to vector<64x1xi1>
    %509 = vector.broadcast %508 : vector<64x1xi1> to vector<64x8xi1>
    %510 = vector.broadcast %cst_243 : f32 to vector<64x8xf32>
    %511 = arith.select %509, %498, %510 : vector<64x8xi1>, vector<64x8xf32>
    %c8_244 = arith.constant 8 : index
    %c0_245 = arith.constant 0 : index
    %c0_246 = arith.constant 0 : index
    %512 = vector.load %arg4[%c8_244, %c0_245, %c0_246] : memref<9x8x8xf32, #tpu.memory_space<vmem>>, vector<1x8x8xf32>
    %513 = vector.shape_cast %512 : vector<1x8x8xf32> to vector<8x8xf32>
    %cst_247 = arith.constant dense<0.000000e+00> : vector<64x8xf32>
    %514 = tpu.matmul %511, %513, %cst_247 {dimension_numbers = #tpu.dot_dimension_numbers<[1], [0], [0], [1], [0, 0, 1, 1], [], []>} : vector<64x8xf32>, vector<8x8xf32>, vector<64x8xf32> -> vector<64x8xf32>
    %515 = arith.addf %497, %514 : vector<64x8xf32>
    %516 = vector.extract_strided_slice %1 {offsets = [0, 0], sizes = [1, 8], strides = [1, 1]} : vector<3x8xf32> to vector<1x8xf32>
    %517 = vector.broadcast %516 : vector<1x8xf32> to vector<64x8xf32>
    %518 = arith.addf %515, %517 : vector<64x8xf32>
    %c0_248 = arith.constant 0 : index
    %c0_249 = arith.constant 0 : index
    %c0_250 = arith.constant 0 : index
    %519 = vector.load %arg11[%c0_248, %c0_249, %c0_250] : memref<2x64x8xf32, #tpu.memory_space<vmem>>, vector<1x64x8xf32>
    %520 = vector.shape_cast %519 : vector<1x64x8xf32> to vector<64x8xf32>
    %521 = vector.shape_cast %518 : vector<64x8xf32> to vector<1x64x8xf32>
    tpu.vector_store %arg11[%c0_248, %c0_249, %c0_250], %521 {strides = array<i32>} : memref<2x64x8xf32, #tpu.memory_space<vmem>>, vector<1x64x8xf32>,
    %cst_251 = arith.constant dense<0.000000e+00> : vector<8xf32>
    %522 = vector.multi_reduction <add>, %518, %cst_251 [0] : vector<64x8xf32> to vector<8xf32>
    %523 = vector.shape_cast %522 : vector<8xf32> to vector<1x8xf32>
    %524 = arith.addf %364, %523 : vector<1x8xf32>
    %c1_252 = arith.constant 1 : index
    %c0_253 = arith.constant 0 : index
    %c0_254 = arith.constant 0 : index
    %525 = vector.load %arg10[%c1_252, %c0_253, %c0_254] : memref<2x64x8xf32, #tpu.memory_space<vmem>>, vector<1x64x8xf32>
    %526 = vector.shape_cast %525 : vector<1x64x8xf32> to vector<64x8xf32>
    %527 = vector.broadcast %360 : vector<1x8xf32> to vector<64x8xf32>
    %528 = arith.mulf %526, %527 : vector<64x8xf32>
    %529 = vector.broadcast %363 : vector<1x8xf32> to vector<64x8xf32>
    %530 = arith.addf %528, %529 : vector<64x8xf32>
    %cst_255 = arith.constant 0.000000e+00 : f32
    %531 = vector.broadcast %cst_255 : f32 to vector<64x8xf32>
    %532 = arith.maximumf %530, %531 : vector<64x8xf32>
    %cst_256 = arith.constant 0.000000e+00 : f32
    %533 = vector.broadcast %cst_256 : f32 to vector<9x8xf32>
    %534 = tpu.concatenate %533, %532, %533 in 0 : vector<9x8xf32>, vector<64x8xf32>, vector<9x8xf32> -> vector<82x8xf32>
    %535 = tpu.iota {dimensions = array<i32: 0>} : vector<64x1xi32>
    %c8_i32_257 = arith.constant 8 : i32
    %c0_i32_258 = arith.constant 0 : i32
    %536 = arith.cmpi eq, %c8_i32_257, %c0_i32_258 : i32
    %c1_i32_259 = arith.constant 1 : i32
    %537 = arith.select %536, %c1_i32_259, %c8_i32_257 : i32
    %538 = vector.broadcast %537 : i32 to vector<64x1xi32>
    %539 = arith.remsi %535, %538 : vector<64x1xi32>
    %c0_i32_260 = arith.constant 0 : i32
    %540 = vector.broadcast %c0_i32_260 : i32 to vector<64x1xi32>
    %541 = arith.cmpi ne, %539, %540 : vector<64x1xi32>
    %c0_i32_261 = arith.constant 0 : i32
    %542 = vector.broadcast %c0_i32_261 : i32 to vector<64x1xi32>
    %543 = arith.cmpi slt, %539, %542 : vector<64x1xi32>
    %c0_i32_262 = arith.constant 0 : i32
    %544 = arith.cmpi slt, %537, %c0_i32_262 : i32
    %545 = vector.broadcast %544 : i1 to vector<64x1xi1>
    %546 = vector.broadcast %545 : vector<64x1xi1> to vector<64x1xi1>
    %547 = arith.xori %543, %546 : vector<64x1xi1>
    %548 = arith.andi %547, %541 : vector<64x1xi1>
    %549 = vector.broadcast %537 : i32 to vector<64x1xi32>
    %550 = arith.addi %539, %549 : vector<64x1xi32>
    %551 = arith.select %548, %550, %539 : vector<64x1xi1>, vector<64x1xi32>
    %cst_263 = arith.constant 0.000000e+00 : f32
    %552 = vector.broadcast %cst_263 : f32 to vector<64x8xf32>
    %553 = vector.extract_strided_slice %534 {offsets = [0, 0], sizes = [64, 8], strides = [1, 1]} : vector<82x8xf32> to vector<64x8xf32>
    %c-1_i32_264 = arith.constant -1 : i32
    %554 = vector.broadcast %c-1_i32_264 : i32 to vector<64x1xi32>
    %555 = arith.addi %551, %554 : vector<64x1xi32>
    %c0_i32_265 = arith.constant 0 : i32
    %556 = vector.broadcast %c0_i32_265 : i32 to vector<64x1xi32>
    %557 = arith.cmpi sge, %555, %556 : vector<64x1xi32>
    %c-1_i32_266 = arith.constant -1 : i32
    %558 = vector.broadcast %c-1_i32_266 : i32 to vector<64x1xi32>
    %559 = arith.addi %551, %558 : vector<64x1xi32>
    %c8_i32_267 = arith.constant 8 : i32
    %560 = vector.broadcast %c8_i32_267 : i32 to vector<64x1xi32>
    %561 = arith.cmpi slt, %559, %560 : vector<64x1xi32>
    %562 = arith.andi %557, %561 : vector<64x1xi1>
    %cst_268 = arith.constant 0.000000e+00 : f32
    %563 = vector.shape_cast %562 : vector<64x1xi1> to vector<64x1xi1>
    %564 = vector.broadcast %563 : vector<64x1xi1> to vector<64x8xi1>
    %565 = vector.broadcast %cst_268 : f32 to vector<64x8xf32>
    %566 = arith.select %564, %553, %565 : vector<64x8xi1>, vector<64x8xf32>
    %c0_269 = arith.constant 0 : index
    %c0_270 = arith.constant 0 : index
    %c0_271 = arith.constant 0 : index
    %567 = vector.load %arg4[%c0_269, %c0_270, %c0_271] : memref<9x8x8xf32, #tpu.memory_space<vmem>>, vector<1x8x8xf32>
    %568 = vector.shape_cast %567 : vector<1x8x8xf32> to vector<8x8xf32>
    %cst_272 = arith.constant dense<0.000000e+00> : vector<64x8xf32>
    %569 = tpu.matmul %566, %568, %cst_272 {dimension_numbers = #tpu.dot_dimension_numbers<[1], [0], [0], [1], [0, 0, 1, 1], [], []>} : vector<64x8xf32>, vector<8x8xf32>, vector<64x8xf32> -> vector<64x8xf32>
    %570 = arith.addf %552, %569 : vector<64x8xf32>
    %571 = vector.extract_strided_slice %534 {offsets = [1, 0], sizes = [64, 8], strides = [1, 1]} : vector<82x8xf32> to vector<64x8xf32>
    %c1_273 = arith.constant 1 : index
    %c0_274 = arith.constant 0 : index
    %c0_275 = arith.constant 0 : index
    %572 = vector.load %arg4[%c1_273, %c0_274, %c0_275] : memref<9x8x8xf32, #tpu.memory_space<vmem>>, vector<1x8x8xf32>
    %573 = vector.shape_cast %572 : vector<1x8x8xf32> to vector<8x8xf32>
    %cst_276 = arith.constant dense<0.000000e+00> : vector<64x8xf32>
    %574 = tpu.matmul %571, %573, %cst_276 {dimension_numbers = #tpu.dot_dimension_numbers<[1], [0], [0], [1], [0, 0, 1, 1], [], []>} : vector<64x8xf32>, vector<8x8xf32>, vector<64x8xf32> -> vector<64x8xf32>
    %575 = arith.addf %570, %574 : vector<64x8xf32>
    %576 = vector.extract_strided_slice %534 {offsets = [2, 0], sizes = [64, 8], strides = [1, 1]} : vector<82x8xf32> to vector<64x8xf32>
    %c1_i32_277 = arith.constant 1 : i32
    %577 = vector.broadcast %c1_i32_277 : i32 to vector<64x1xi32>
    %578 = arith.addi %551, %577 : vector<64x1xi32>
    %c0_i32_278 = arith.constant 0 : i32
    %579 = vector.broadcast %c0_i32_278 : i32 to vector<64x1xi32>
    %580 = arith.cmpi sge, %578, %579 : vector<64x1xi32>
    %c1_i32_279 = arith.constant 1 : i32
    %581 = vector.broadcast %c1_i32_279 : i32 to vector<64x1xi32>
    %582 = arith.addi %551, %581 : vector<64x1xi32>
    %c8_i32_280 = arith.constant 8 : i32
    %583 = vector.broadcast %c8_i32_280 : i32 to vector<64x1xi32>
    %584 = arith.cmpi slt, %582, %583 : vector<64x1xi32>
    %585 = arith.andi %580, %584 : vector<64x1xi1>
    %cst_281 = arith.constant 0.000000e+00 : f32
    %586 = vector.shape_cast %585 : vector<64x1xi1> to vector<64x1xi1>
    %587 = vector.broadcast %586 : vector<64x1xi1> to vector<64x8xi1>
    %588 = vector.broadcast %cst_281 : f32 to vector<64x8xf32>
    %589 = arith.select %587, %576, %588 : vector<64x8xi1>, vector<64x8xf32>
    %c2_282 = arith.constant 2 : index
    %c0_283 = arith.constant 0 : index
    %c0_284 = arith.constant 0 : index
    %590 = vector.load %arg4[%c2_282, %c0_283, %c0_284] : memref<9x8x8xf32, #tpu.memory_space<vmem>>, vector<1x8x8xf32>
    %591 = vector.shape_cast %590 : vector<1x8x8xf32> to vector<8x8xf32>
    %cst_285 = arith.constant dense<0.000000e+00> : vector<64x8xf32>
    %592 = tpu.matmul %589, %591, %cst_285 {dimension_numbers = #tpu.dot_dimension_numbers<[1], [0], [0], [1], [0, 0, 1, 1], [], []>} : vector<64x8xf32>, vector<8x8xf32>, vector<64x8xf32> -> vector<64x8xf32>
    %593 = arith.addf %575, %592 : vector<64x8xf32>
    %594 = vector.extract_strided_slice %534 {offsets = [8, 0], sizes = [64, 8], strides = [1, 1]} : vector<82x8xf32> to vector<64x8xf32>
    %c-1_i32_286 = arith.constant -1 : i32
    %595 = vector.broadcast %c-1_i32_286 : i32 to vector<64x1xi32>
    %596 = arith.addi %551, %595 : vector<64x1xi32>
    %c0_i32_287 = arith.constant 0 : i32
    %597 = vector.broadcast %c0_i32_287 : i32 to vector<64x1xi32>
    %598 = arith.cmpi sge, %596, %597 : vector<64x1xi32>
    %c-1_i32_288 = arith.constant -1 : i32
    %599 = vector.broadcast %c-1_i32_288 : i32 to vector<64x1xi32>
    %600 = arith.addi %551, %599 : vector<64x1xi32>
    %c8_i32_289 = arith.constant 8 : i32
    %601 = vector.broadcast %c8_i32_289 : i32 to vector<64x1xi32>
    %602 = arith.cmpi slt, %600, %601 : vector<64x1xi32>
    %603 = arith.andi %598, %602 : vector<64x1xi1>
    %cst_290 = arith.constant 0.000000e+00 : f32
    %604 = vector.shape_cast %603 : vector<64x1xi1> to vector<64x1xi1>
    %605 = vector.broadcast %604 : vector<64x1xi1> to vector<64x8xi1>
    %606 = vector.broadcast %cst_290 : f32 to vector<64x8xf32>
    %607 = arith.select %605, %594, %606 : vector<64x8xi1>, vector<64x8xf32>
    %c3_291 = arith.constant 3 : index
    %c0_292 = arith.constant 0 : index
    %c0_293 = arith.constant 0 : index
    %608 = vector.load %arg4[%c3_291, %c0_292, %c0_293] : memref<9x8x8xf32, #tpu.memory_space<vmem>>, vector<1x8x8xf32>
    %609 = vector.shape_cast %608 : vector<1x8x8xf32> to vector<8x8xf32>
    %cst_294 = arith.constant dense<0.000000e+00> : vector<64x8xf32>
    %610 = tpu.matmul %607, %609, %cst_294 {dimension_numbers = #tpu.dot_dimension_numbers<[1], [0], [0], [1], [0, 0, 1, 1], [], []>} : vector<64x8xf32>, vector<8x8xf32>, vector<64x8xf32> -> vector<64x8xf32>
    %611 = arith.addf %593, %610 : vector<64x8xf32>
    %612 = vector.extract_strided_slice %534 {offsets = [9, 0], sizes = [64, 8], strides = [1, 1]} : vector<82x8xf32> to vector<64x8xf32>
    %c4_295 = arith.constant 4 : index
    %c0_296 = arith.constant 0 : index
    %c0_297 = arith.constant 0 : index
    %613 = vector.load %arg4[%c4_295, %c0_296, %c0_297] : memref<9x8x8xf32, #tpu.memory_space<vmem>>, vector<1x8x8xf32>
    %614 = vector.shape_cast %613 : vector<1x8x8xf32> to vector<8x8xf32>
    %cst_298 = arith.constant dense<0.000000e+00> : vector<64x8xf32>
    %615 = tpu.matmul %612, %614, %cst_298 {dimension_numbers = #tpu.dot_dimension_numbers<[1], [0], [0], [1], [0, 0, 1, 1], [], []>} : vector<64x8xf32>, vector<8x8xf32>, vector<64x8xf32> -> vector<64x8xf32>
    %616 = arith.addf %611, %615 : vector<64x8xf32>
    %617 = vector.extract_strided_slice %534 {offsets = [10, 0], sizes = [64, 8], strides = [1, 1]} : vector<82x8xf32> to vector<64x8xf32>
    %c1_i32_299 = arith.constant 1 : i32
    %618 = vector.broadcast %c1_i32_299 : i32 to vector<64x1xi32>
    %619 = arith.addi %551, %618 : vector<64x1xi32>
    %c0_i32_300 = arith.constant 0 : i32
    %620 = vector.broadcast %c0_i32_300 : i32 to vector<64x1xi32>
    %621 = arith.cmpi sge, %619, %620 : vector<64x1xi32>
    %c1_i32_301 = arith.constant 1 : i32
    %622 = vector.broadcast %c1_i32_301 : i32 to vector<64x1xi32>
    %623 = arith.addi %551, %622 : vector<64x1xi32>
    %c8_i32_302 = arith.constant 8 : i32
    %624 = vector.broadcast %c8_i32_302 : i32 to vector<64x1xi32>
    %625 = arith.cmpi slt, %623, %624 : vector<64x1xi32>
    %626 = arith.andi %621, %625 : vector<64x1xi1>
    %cst_303 = arith.constant 0.000000e+00 : f32
    %627 = vector.shape_cast %626 : vector<64x1xi1> to vector<64x1xi1>
    %628 = vector.broadcast %627 : vector<64x1xi1> to vector<64x8xi1>
    %629 = vector.broadcast %cst_303 : f32 to vector<64x8xf32>
    %630 = arith.select %628, %617, %629 : vector<64x8xi1>, vector<64x8xf32>
    %c5_304 = arith.constant 5 : index
    %c0_305 = arith.constant 0 : index
    %c0_306 = arith.constant 0 : index
    %631 = vector.load %arg4[%c5_304, %c0_305, %c0_306] : memref<9x8x8xf32, #tpu.memory_space<vmem>>, vector<1x8x8xf32>
    %632 = vector.shape_cast %631 : vector<1x8x8xf32> to vector<8x8xf32>
    %cst_307 = arith.constant dense<0.000000e+00> : vector<64x8xf32>
    %633 = tpu.matmul %630, %632, %cst_307 {dimension_numbers = #tpu.dot_dimension_numbers<[1], [0], [0], [1], [0, 0, 1, 1], [], []>} : vector<64x8xf32>, vector<8x8xf32>, vector<64x8xf32> -> vector<64x8xf32>
    %634 = arith.addf %616, %633 : vector<64x8xf32>
    %635 = vector.extract_strided_slice %534 {offsets = [16, 0], sizes = [64, 8], strides = [1, 1]} : vector<82x8xf32> to vector<64x8xf32>
    %c-1_i32_308 = arith.constant -1 : i32
    %636 = vector.broadcast %c-1_i32_308 : i32 to vector<64x1xi32>
    %637 = arith.addi %551, %636 : vector<64x1xi32>
    %c0_i32_309 = arith.constant 0 : i32
    %638 = vector.broadcast %c0_i32_309 : i32 to vector<64x1xi32>
    %639 = arith.cmpi sge, %637, %638 : vector<64x1xi32>
    %c-1_i32_310 = arith.constant -1 : i32
    %640 = vector.broadcast %c-1_i32_310 : i32 to vector<64x1xi32>
    %641 = arith.addi %551, %640 : vector<64x1xi32>
    %c8_i32_311 = arith.constant 8 : i32
    %642 = vector.broadcast %c8_i32_311 : i32 to vector<64x1xi32>
    %643 = arith.cmpi slt, %641, %642 : vector<64x1xi32>
    %644 = arith.andi %639, %643 : vector<64x1xi1>
    %cst_312 = arith.constant 0.000000e+00 : f32
    %645 = vector.shape_cast %644 : vector<64x1xi1> to vector<64x1xi1>
    %646 = vector.broadcast %645 : vector<64x1xi1> to vector<64x8xi1>
    %647 = vector.broadcast %cst_312 : f32 to vector<64x8xf32>
    %648 = arith.select %646, %635, %647 : vector<64x8xi1>, vector<64x8xf32>
    %c6_313 = arith.constant 6 : index
    %c0_314 = arith.constant 0 : index
    %c0_315 = arith.constant 0 : index
    %649 = vector.load %arg4[%c6_313, %c0_314, %c0_315] : memref<9x8x8xf32, #tpu.memory_space<vmem>>, vector<1x8x8xf32>
    %650 = vector.shape_cast %649 : vector<1x8x8xf32> to vector<8x8xf32>
    %cst_316 = arith.constant dense<0.000000e+00> : vector<64x8xf32>
    %651 = tpu.matmul %648, %650, %cst_316 {dimension_numbers = #tpu.dot_dimension_numbers<[1], [0], [0], [1], [0, 0, 1, 1], [], []>} : vector<64x8xf32>, vector<8x8xf32>, vector<64x8xf32> -> vector<64x8xf32>
    %652 = arith.addf %634, %651 : vector<64x8xf32>
    %653 = vector.extract_strided_slice %534 {offsets = [17, 0], sizes = [64, 8], strides = [1, 1]} : vector<82x8xf32> to vector<64x8xf32>
    %c7_317 = arith.constant 7 : index
    %c0_318 = arith.constant 0 : index
    %c0_319 = arith.constant 0 : index
    %654 = vector.load %arg4[%c7_317, %c0_318, %c0_319] : memref<9x8x8xf32, #tpu.memory_space<vmem>>, vector<1x8x8xf32>
    %655 = vector.shape_cast %654 : vector<1x8x8xf32> to vector<8x8xf32>
    %cst_320 = arith.constant dense<0.000000e+00> : vector<64x8xf32>
    %656 = tpu.matmul %653, %655, %cst_320 {dimension_numbers = #tpu.dot_dimension_numbers<[1], [0], [0], [1], [0, 0, 1, 1], [], []>} : vector<64x8xf32>, vector<8x8xf32>, vector<64x8xf32> -> vector<64x8xf32>
    %657 = arith.addf %652, %656 : vector<64x8xf32>
    %658 = vector.extract_strided_slice %534 {offsets = [18, 0], sizes = [64, 8], strides = [1, 1]} : vector<82x8xf32> to vector<64x8xf32>
    %c1_i32_321 = arith.constant 1 : i32
    %659 = vector.broadcast %c1_i32_321 : i32 to vector<64x1xi32>
    %660 = arith.addi %551, %659 : vector<64x1xi32>
    %c0_i32_322 = arith.constant 0 : i32
    %661 = vector.broadcast %c0_i32_322 : i32 to vector<64x1xi32>
    %662 = arith.cmpi sge, %660, %661 : vector<64x1xi32>
    %c1_i32_323 = arith.constant 1 : i32
    %663 = vector.broadcast %c1_i32_323 : i32 to vector<64x1xi32>
    %664 = arith.addi %551, %663 : vector<64x1xi32>
    %c8_i32_324 = arith.constant 8 : i32
    %665 = vector.broadcast %c8_i32_324 : i32 to vector<64x1xi32>
    %666 = arith.cmpi slt, %664, %665 : vector<64x1xi32>
    %667 = arith.andi %662, %666 : vector<64x1xi1>
    %cst_325 = arith.constant 0.000000e+00 : f32
    %668 = vector.shape_cast %667 : vector<64x1xi1> to vector<64x1xi1>
    %669 = vector.broadcast %668 : vector<64x1xi1> to vector<64x8xi1>
    %670 = vector.broadcast %cst_325 : f32 to vector<64x8xf32>
    %671 = arith.select %669, %658, %670 : vector<64x8xi1>, vector<64x8xf32>
    %c8_326 = arith.constant 8 : index
    %c0_327 = arith.constant 0 : index
    %c0_328 = arith.constant 0 : index
    %672 = vector.load %arg4[%c8_326, %c0_327, %c0_328] : memref<9x8x8xf32, #tpu.memory_space<vmem>>, vector<1x8x8xf32>
    %673 = vector.shape_cast %672 : vector<1x8x8xf32> to vector<8x8xf32>
    %cst_329 = arith.constant dense<0.000000e+00> : vector<64x8xf32>
    %674 = tpu.matmul %671, %673, %cst_329 {dimension_numbers = #tpu.dot_dimension_numbers<[1], [0], [0], [1], [0, 0, 1, 1], [], []>} : vector<64x8xf32>, vector<8x8xf32>, vector<64x8xf32> -> vector<64x8xf32>
    %675 = arith.addf %657, %674 : vector<64x8xf32>
    %676 = vector.extract_strided_slice %1 {offsets = [0, 0], sizes = [1, 8], strides = [1, 1]} : vector<3x8xf32> to vector<1x8xf32>
    %677 = vector.broadcast %676 : vector<1x8xf32> to vector<64x8xf32>
    %678 = arith.addf %675, %677 : vector<64x8xf32>
    %c1_330 = arith.constant 1 : index
    %c0_331 = arith.constant 0 : index
    %c0_332 = arith.constant 0 : index
    %679 = vector.load %arg11[%c1_330, %c0_331, %c0_332] : memref<2x64x8xf32, #tpu.memory_space<vmem>>, vector<1x64x8xf32>
    %680 = vector.shape_cast %679 : vector<1x64x8xf32> to vector<64x8xf32>
    %681 = vector.shape_cast %678 : vector<64x8xf32> to vector<1x64x8xf32>
    tpu.vector_store %arg11[%c1_330, %c0_331, %c0_332], %681 {strides = array<i32>} : memref<2x64x8xf32, #tpu.memory_space<vmem>>, vector<1x64x8xf32>,
    %cst_333 = arith.constant dense<0.000000e+00> : vector<8xf32>
    %682 = vector.multi_reduction <add>, %678, %cst_333 [0] : vector<64x8xf32> to vector<8xf32>
    %683 = vector.shape_cast %682 : vector<8xf32> to vector<1x8xf32>
    %684 = arith.addf %524, %683 : vector<1x8xf32>
    %cst_334 = arith.constant 7.812500e-03 : f32
    %685 = vector.broadcast %cst_334 : f32 to vector<1x8xf32>
    %686 = arith.mulf %684, %685 : vector<1x8xf32>
    %cst_335 = arith.constant 0.000000e+00 : f32
    %687 = vector.broadcast %cst_335 : f32 to vector<1x8xf32>
    %c0_336 = arith.constant 0 : index
    %c0_337 = arith.constant 0 : index
    %c0_338 = arith.constant 0 : index
    %688 = vector.load %arg11[%c0_336, %c0_337, %c0_338] : memref<2x64x8xf32, #tpu.memory_space<vmem>>, vector<1x64x8xf32>
    %689 = vector.shape_cast %688 : vector<1x64x8xf32> to vector<64x8xf32>
    %690 = vector.broadcast %686 : vector<1x8xf32> to vector<64x8xf32>
    %691 = arith.subf %689, %690 : vector<64x8xf32>
    %692 = arith.mulf %691, %691 : vector<64x8xf32>
    %cst_339 = arith.constant dense<0.000000e+00> : vector<8xf32>
    %693 = vector.multi_reduction <add>, %692, %cst_339 [0] : vector<64x8xf32> to vector<8xf32>
    %694 = vector.shape_cast %693 : vector<8xf32> to vector<1x8xf32>
    %695 = arith.addf %687, %694 : vector<1x8xf32>
    %c1_340 = arith.constant 1 : index
    %c0_341 = arith.constant 0 : index
    %c0_342 = arith.constant 0 : index
    %696 = vector.load %arg11[%c1_340, %c0_341, %c0_342] : memref<2x64x8xf32, #tpu.memory_space<vmem>>, vector<1x64x8xf32>
    %697 = vector.shape_cast %696 : vector<1x64x8xf32> to vector<64x8xf32>
    %698 = vector.broadcast %686 : vector<1x8xf32> to vector<64x8xf32>
    %699 = arith.subf %697, %698 : vector<64x8xf32>
    %700 = arith.mulf %699, %699 : vector<64x8xf32>
    %cst_343 = arith.constant dense<0.000000e+00> : vector<8xf32>
    %701 = vector.multi_reduction <add>, %700, %cst_343 [0] : vector<64x8xf32> to vector<8xf32>
    %702 = vector.shape_cast %701 : vector<8xf32> to vector<1x8xf32>
    %703 = arith.addf %695, %702 : vector<1x8xf32>
    %704 = vector.extract_strided_slice %1 {offsets = [1, 0], sizes = [1, 8], strides = [1, 1]} : vector<3x8xf32> to vector<1x8xf32>
    %cst_344 = arith.constant 7.812500e-03 : f32
    %705 = vector.broadcast %cst_344 : f32 to vector<1x8xf32>
    %706 = arith.mulf %703, %705 : vector<1x8xf32>
    %cst_345 = arith.constant 9.99999974E-6 : f32
    %707 = vector.broadcast %cst_345 : f32 to vector<1x8xf32>
    %708 = arith.addf %706, %707 : vector<1x8xf32>
    %709 = math.rsqrt %708 : vector<1x8xf32>
    %710 = arith.mulf %704, %709 : vector<1x8xf32>
    %711 = vector.extract_strided_slice %1 {offsets = [2, 0], sizes = [1, 8], strides = [1, 1]} : vector<3x8xf32> to vector<1x8xf32>
    %712 = arith.mulf %686, %710 : vector<1x8xf32>
    %713 = arith.subf %711, %712 : vector<1x8xf32>
    %c0_346 = arith.constant 0 : index
    %c0_347 = arith.constant 0 : index
    %714 = vector.load %arg6[%c0_346, %c0_347] : memref<4x20xf32, #tpu.memory_space<vmem>>, vector<4x20xf32>
    %c0_348 = arith.constant 0 : index
    %c0_349 = arith.constant 0 : index
    %715 = vector.load %arg7[%c0_348, %c0_349] : memref<8x12xf32, #tpu.memory_space<vmem>>, vector<8x12xf32>
    %c0_350 = arith.constant 0 : index
    %c0_351 = arith.constant 0 : index
    %716 = vector.load %arg8[%c0_350, %c0_351] : memref<6x8xf32, #tpu.memory_space<vmem>>, vector<6x8xf32>
    %c0_352 = arith.constant 0 : index
    %c0_353 = arith.constant 0 : index
    %c0_354 = arith.constant 0 : index
    %717 = vector.load %arg11[%c0_352, %c0_353, %c0_354] : memref<2x64x8xf32, #tpu.memory_space<vmem>>, vector<1x64x8xf32>
    %718 = vector.shape_cast %717 : vector<1x64x8xf32> to vector<64x8xf32>
    %719 = vector.broadcast %710 : vector<1x8xf32> to vector<64x8xf32>
    %720 = arith.mulf %718, %719 : vector<64x8xf32>
    %721 = vector.broadcast %713 : vector<1x8xf32> to vector<64x8xf32>
    %722 = arith.addf %720, %721 : vector<64x8xf32>
    %cst_355 = arith.constant 0.000000e+00 : f32
    %723 = vector.broadcast %cst_355 : f32 to vector<64x8xf32>
    %724 = arith.maximumf %722, %723 : vector<64x8xf32>
    %725 = vector.extract_strided_slice %724 {offsets = [0, 0], sizes = [64, 4], strides = [1, 1]} : vector<64x8xf32> to vector<64x4xf32>
    %726 = vector.extract_strided_slice %724 {offsets = [0, 4], sizes = [64, 4], strides = [1, 1]} : vector<64x8xf32> to vector<64x4xf32>
    %727 = vector.extract_strided_slice %714 {offsets = [0, 0], sizes = [4, 4], strides = [1, 1]} : vector<4x20xf32> to vector<4x4xf32>
    %728 = vector.extract_strided_slice %714 {offsets = [0, 4], sizes = [4, 12], strides = [1, 1]} : vector<4x20xf32> to vector<4x12xf32>
    %729 = vector.extract_strided_slice %714 {offsets = [0, 16], sizes = [4, 4], strides = [1, 1]} : vector<4x20xf32> to vector<4x4xf32>
    %730 = vector.extract_strided_slice %715 {offsets = [0, 0], sizes = [8, 4], strides = [1, 1]} : vector<8x12xf32> to vector<8x4xf32>
    %731 = vector.extract_strided_slice %715 {offsets = [0, 4], sizes = [8, 8], strides = [1, 1]} : vector<8x12xf32> to vector<8x8xf32>
    %732 = vector.extract_strided_slice %716 {offsets = [0, 0], sizes = [1, 4], strides = [1, 1]} : vector<6x8xf32> to vector<1x4xf32>
    %733 = vector.extract_strided_slice %716 {offsets = [1, 0], sizes = [1, 4], strides = [1, 1]} : vector<6x8xf32> to vector<1x4xf32>
    %734 = vector.extract_strided_slice %716 {offsets = [2, 0], sizes = [1, 4], strides = [1, 1]} : vector<6x8xf32> to vector<1x4xf32>
    %735 = vector.extract_strided_slice %716 {offsets = [3, 0], sizes = [1, 4], strides = [1, 1]} : vector<6x8xf32> to vector<1x4xf32>
    %736 = vector.extract_strided_slice %716 {offsets = [4, 0], sizes = [1, 8], strides = [1, 1]} : vector<6x8xf32> to vector<1x8xf32>
    %737 = vector.extract_strided_slice %716 {offsets = [5, 0], sizes = [1, 8], strides = [1, 1]} : vector<6x8xf32> to vector<1x8xf32>
    %cst_356 = arith.constant dense<0.000000e+00> : vector<64x4xf32>
    %738 = tpu.matmul %725, %727, %cst_356 {dimension_numbers = #tpu.dot_dimension_numbers<[1], [0], [0], [1], [0, 0, 1, 1], [], []>} : vector<64x4xf32>, vector<4x4xf32>, vector<64x4xf32> -> vector<64x4xf32>
    %cst_357 = arith.constant dense<0.000000e+00> : vector<64x12xf32>
    %739 = tpu.matmul %726, %728, %cst_357 {dimension_numbers = #tpu.dot_dimension_numbers<[1], [0], [0], [1], [0, 0, 1, 1], [], []>} : vector<64x4xf32>, vector<4x12xf32>, vector<64x12xf32> -> vector<64x12xf32>
    %740 = vector.extract_strided_slice %739 {offsets = [0, 0], sizes = [64, 4], strides = [1, 1]} : vector<64x12xf32> to vector<64x4xf32>
    %741 = vector.extract_strided_slice %739 {offsets = [0, 4], sizes = [64, 4], strides = [1, 1]} : vector<64x12xf32> to vector<64x4xf32>
    %742 = vector.extract_strided_slice %739 {offsets = [0, 8], sizes = [64, 4], strides = [1, 1]} : vector<64x12xf32> to vector<64x4xf32>
    %cst_358 = arith.constant dense<0.000000e+00> : vector<4x4xf32>
    %743 = tpu.matmul %740, %741, %cst_358 {dimension_numbers = #tpu.dot_dimension_numbers<[0], [0], [1], [1], [0, 1, 1, 1], [], []>} : vector<64x4xf32>, vector<64x4xf32>, vector<4x4xf32> -> vector<4x4xf32>
    %cst_359 = arith.constant 3.906250e-03 : f32
    %744 = vector.broadcast %cst_359 : f32 to vector<4x4xf32>
    %745 = arith.mulf %743, %744 : vector<4x4xf32>
    %cst_360 = arith.constant dense<0xFF800000> : vector<4xf32>
    %746 = vector.multi_reduction <maximumf>, %745, %cst_360 [1] : vector<4x4xf32> to vector<4xf32>
    %747 = vector.shape_cast %746 : vector<4xf32> to vector<4x1xf32>
    %748 = vector.broadcast %747 : vector<4x1xf32> to vector<4x4xf32>
    %749 = arith.subf %745, %748 : vector<4x4xf32>
    %750 = math.exp %749 : vector<4x4xf32>
    %cst_361 = arith.constant dense<0.000000e+00> : vector<4xf32>
    %751 = vector.multi_reduction <add>, %750, %cst_361 [1] : vector<4x4xf32> to vector<4xf32>
    %752 = vector.shape_cast %751 : vector<4xf32> to vector<4x1xf32>
    %753 = vector.broadcast %752 : vector<4x1xf32> to vector<4x4xf32>
    %754 = arith.divf %750, %753 : vector<4x4xf32>
    %cst_362 = arith.constant dense<0.000000e+00> : vector<64x4xf32>
    %755 = tpu.matmul %742, %754, %cst_362 {dimension_numbers = #tpu.dot_dimension_numbers<[1], [1], [0], [0], [0, 0, 1, 0], [], []>} : vector<64x4xf32>, vector<4x4xf32>, vector<64x4xf32> -> vector<64x4xf32>
    %756 = vector.extract_strided_slice %730 {offsets = [0, 0], sizes = [4, 4], strides = [1, 1]} : vector<8x4xf32> to vector<4x4xf32>
    %cst_363 = arith.constant dense<0.000000e+00> : vector<64x4xf32>
    %757 = tpu.matmul %726, %756, %cst_363 {dimension_numbers = #tpu.dot_dimension_numbers<[1], [0], [0], [1], [0, 0, 1, 1], [], []>} : vector<64x4xf32>, vector<4x4xf32>, vector<64x4xf32> -> vector<64x4xf32>
    %758 = vector.extract_strided_slice %730 {offsets = [4, 0], sizes = [4, 4], strides = [1, 1]} : vector<8x4xf32> to vector<4x4xf32>
    %cst_364 = arith.constant dense<0.000000e+00> : vector<64x4xf32>
    %759 = tpu.matmul %755, %758, %cst_364 {dimension_numbers = #tpu.dot_dimension_numbers<[1], [0], [0], [1], [0, 0, 1, 1], [], []>} : vector<64x4xf32>, vector<4x4xf32>, vector<64x4xf32> -> vector<64x4xf32>
    %760 = arith.addf %757, %759 : vector<64x4xf32>
    %cst_365 = arith.constant dense<0.000000e+00> : vector<64xf32>
    %761 = vector.multi_reduction <add>, %760, %cst_365 [1] : vector<64x4xf32> to vector<64xf32>
    %762 = vector.shape_cast %761 : vector<64xf32> to vector<64x1xf32>
    %cst_366 = arith.constant 4.000000e+00 : f32
    %763 = vector.broadcast %cst_366 : f32 to vector<64x1xf32>
    %764 = arith.divf %762, %763 : vector<64x1xf32>
    %765 = vector.broadcast %764 : vector<64x1xf32> to vector<64x4xf32>
    %766 = arith.subf %760, %765 : vector<64x4xf32>
    %767 = arith.mulf %766, %766 : vector<64x4xf32>
    %cst_367 = arith.constant dense<0.000000e+00> : vector<64xf32>
    %768 = vector.multi_reduction <add>, %767, %cst_367 [1] : vector<64x4xf32> to vector<64xf32>
    %769 = vector.shape_cast %768 : vector<64xf32> to vector<64x1xf32>
    %cst_368 = arith.constant 4.000000e+00 : f32
    %770 = vector.broadcast %cst_368 : f32 to vector<64x1xf32>
    %771 = arith.divf %769, %770 : vector<64x1xf32>
    %772 = vector.broadcast %764 : vector<64x1xf32> to vector<64x4xf32>
    %773 = arith.subf %760, %772 : vector<64x4xf32>
    %cst_369 = arith.constant 9.99999974E-6 : f32
    %774 = vector.broadcast %cst_369 : f32 to vector<64x1xf32>
    %775 = arith.addf %771, %774 : vector<64x1xf32>
    %776 = math.rsqrt %775 : vector<64x1xf32>
    %777 = vector.broadcast %776 : vector<64x1xf32> to vector<64x4xf32>
    %778 = arith.mulf %773, %777 : vector<64x4xf32>
    %779 = vector.broadcast %734 : vector<1x4xf32> to vector<64x4xf32>
    %780 = arith.mulf %778, %779 : vector<64x4xf32>
    %781 = vector.broadcast %735 : vector<1x4xf32> to vector<64x4xf32>
    %782 = arith.addf %780, %781 : vector<64x4xf32>
    %cst_370 = arith.constant dense<0.000000e+00> : vector<4x4xf32>
    %783 = tpu.matmul %738, %782, %cst_370 {dimension_numbers = #tpu.dot_dimension_numbers<[0], [0], [1], [1], [0, 1, 1, 1], [], []>} : vector<64x4xf32>, vector<64x4xf32>, vector<4x4xf32> -> vector<4x4xf32>
    %cst_371 = arith.constant 3.906250e-03 : f32
    %784 = vector.broadcast %cst_371 : f32 to vector<4x4xf32>
    %785 = arith.mulf %783, %784 : vector<4x4xf32>
    %cst_372 = arith.constant dense<0xFF800000> : vector<4xf32>
    %786 = vector.multi_reduction <maximumf>, %785, %cst_372 [1] : vector<4x4xf32> to vector<4xf32>
    %787 = vector.shape_cast %786 : vector<4xf32> to vector<4x1xf32>
    %788 = vector.broadcast %787 : vector<4x1xf32> to vector<4x4xf32>
    %789 = arith.subf %785, %788 : vector<4x4xf32>
    %790 = math.exp %789 : vector<4x4xf32>
    %cst_373 = arith.constant dense<0.000000e+00> : vector<4xf32>
    %791 = vector.multi_reduction <add>, %790, %cst_373 [1] : vector<4x4xf32> to vector<4xf32>
    %792 = vector.shape_cast %791 : vector<4xf32> to vector<4x1xf32>
    %793 = vector.broadcast %792 : vector<4x1xf32> to vector<4x4xf32>
    %794 = arith.divf %790, %793 : vector<4x4xf32>
    %cst_374 = arith.constant dense<0.000000e+00> : vector<64x4xf32>
    %795 = tpu.matmul %782, %794, %cst_374 {dimension_numbers = #tpu.dot_dimension_numbers<[1], [1], [0], [0], [0, 0, 1, 0], [], []>} : vector<64x4xf32>, vector<4x4xf32>, vector<64x4xf32> -> vector<64x4xf32>
    %cst_375 = arith.constant 0.000000e+00 : f32
    %796 = vector.broadcast %cst_375 : f32 to vector<64x4xf32>
    %797 = arith.subf %796, %795 : vector<64x4xf32>
    %798 = math.exp %797 : vector<64x4xf32>
    %cst_376 = arith.constant 1.000000e+00 : f32
    %799 = vector.broadcast %cst_376 : f32 to vector<64x4xf32>
    %800 = arith.addf %799, %798 : vector<64x4xf32>
    %cst_377 = arith.constant 1.000000e+00 : f32
    %801 = vector.broadcast %cst_377 : f32 to vector<64x4xf32>
    %802 = arith.divf %801, %800 : vector<64x4xf32>
    %803 = arith.mulf %725, %802 : vector<64x4xf32>
    %804 = arith.addf %803, %725 : vector<64x4xf32>
    %cst_378 = arith.constant dense<0.000000e+00> : vector<64x4xf32>
    %805 = tpu.matmul %804, %729, %cst_378 {dimension_numbers = #tpu.dot_dimension_numbers<[1], [0], [0], [1], [0, 0, 1, 1], [], []>} : vector<64x4xf32>, vector<4x4xf32>, vector<64x4xf32> -> vector<64x4xf32>
    %cst_379 = arith.constant dense<0.000000e+00> : vector<64xf32>
    %806 = vector.multi_reduction <add>, %805, %cst_379 [1] : vector<64x4xf32> to vector<64xf32>
    %807 = vector.shape_cast %806 : vector<64xf32> to vector<64x1xf32>
    %cst_380 = arith.constant 4.000000e+00 : f32
    %808 = vector.broadcast %cst_380 : f32 to vector<64x1xf32>
    %809 = arith.divf %807, %808 : vector<64x1xf32>
    %810 = vector.broadcast %809 : vector<64x1xf32> to vector<64x4xf32>
    %811 = arith.subf %805, %810 : vector<64x4xf32>
    %812 = arith.mulf %811, %811 : vector<64x4xf32>
    %cst_381 = arith.constant dense<0.000000e+00> : vector<64xf32>
    %813 = vector.multi_reduction <add>, %812, %cst_381 [1] : vector<64x4xf32> to vector<64xf32>
    %814 = vector.shape_cast %813 : vector<64xf32> to vector<64x1xf32>
    %cst_382 = arith.constant 4.000000e+00 : f32
    %815 = vector.broadcast %cst_382 : f32 to vector<64x1xf32>
    %816 = arith.divf %814, %815 : vector<64x1xf32>
    %817 = vector.broadcast %809 : vector<64x1xf32> to vector<64x4xf32>
    %818 = arith.subf %805, %817 : vector<64x4xf32>
    %cst_383 = arith.constant 9.99999974E-6 : f32
    %819 = vector.broadcast %cst_383 : f32 to vector<64x1xf32>
    %820 = arith.addf %816, %819 : vector<64x1xf32>
    %821 = math.rsqrt %820 : vector<64x1xf32>
    %822 = vector.broadcast %821 : vector<64x1xf32> to vector<64x4xf32>
    %823 = arith.mulf %818, %822 : vector<64x4xf32>
    %824 = vector.broadcast %732 : vector<1x4xf32> to vector<64x4xf32>
    %825 = arith.mulf %823, %824 : vector<64x4xf32>
    %826 = vector.broadcast %733 : vector<1x4xf32> to vector<64x4xf32>
    %827 = arith.addf %825, %826 : vector<64x4xf32>
    %828 = vector.extract_strided_slice %731 {offsets = [0, 0], sizes = [4, 8], strides = [1, 1]} : vector<8x8xf32> to vector<4x8xf32>
    %cst_384 = arith.constant dense<0.000000e+00> : vector<64x8xf32>
    %829 = tpu.matmul %827, %828, %cst_384 {dimension_numbers = #tpu.dot_dimension_numbers<[1], [0], [0], [1], [0, 0, 1, 1], [], []>} : vector<64x4xf32>, vector<4x8xf32>, vector<64x8xf32> -> vector<64x8xf32>
    %830 = vector.extract_strided_slice %731 {offsets = [4, 0], sizes = [4, 8], strides = [1, 1]} : vector<8x8xf32> to vector<4x8xf32>
    %cst_385 = arith.constant dense<0.000000e+00> : vector<64x8xf32>
    %831 = tpu.matmul %782, %830, %cst_385 {dimension_numbers = #tpu.dot_dimension_numbers<[1], [0], [0], [1], [0, 0, 1, 1], [], []>} : vector<64x4xf32>, vector<4x8xf32>, vector<64x8xf32> -> vector<64x8xf32>
    %832 = arith.addf %829, %831 : vector<64x8xf32>
    %cst_386 = arith.constant dense<0.000000e+00> : vector<64xf32>
    %833 = vector.multi_reduction <add>, %832, %cst_386 [1] : vector<64x8xf32> to vector<64xf32>
    %834 = vector.shape_cast %833 : vector<64xf32> to vector<64x1xf32>
    %cst_387 = arith.constant 8.000000e+00 : f32
    %835 = vector.broadcast %cst_387 : f32 to vector<64x1xf32>
    %836 = arith.divf %834, %835 : vector<64x1xf32>
    %837 = vector.broadcast %836 : vector<64x1xf32> to vector<64x8xf32>
    %838 = arith.subf %832, %837 : vector<64x8xf32>
    %839 = arith.mulf %838, %838 : vector<64x8xf32>
    %cst_388 = arith.constant dense<0.000000e+00> : vector<64xf32>
    %840 = vector.multi_reduction <add>, %839, %cst_388 [1] : vector<64x8xf32> to vector<64xf32>
    %841 = vector.shape_cast %840 : vector<64xf32> to vector<64x1xf32>
    %cst_389 = arith.constant 8.000000e+00 : f32
    %842 = vector.broadcast %cst_389 : f32 to vector<64x1xf32>
    %843 = arith.divf %841, %842 : vector<64x1xf32>
    %844 = vector.broadcast %836 : vector<64x1xf32> to vector<64x8xf32>
    %845 = arith.subf %832, %844 : vector<64x8xf32>
    %cst_390 = arith.constant 9.99999974E-6 : f32
    %846 = vector.broadcast %cst_390 : f32 to vector<64x1xf32>
    %847 = arith.addf %843, %846 : vector<64x1xf32>
    %848 = math.rsqrt %847 : vector<64x1xf32>
    %849 = vector.broadcast %848 : vector<64x1xf32> to vector<64x8xf32>
    %850 = arith.mulf %845, %849 : vector<64x8xf32>
    %851 = vector.broadcast %736 : vector<1x8xf32> to vector<64x8xf32>
    %852 = arith.mulf %850, %851 : vector<64x8xf32>
    %853 = vector.broadcast %737 : vector<1x8xf32> to vector<64x8xf32>
    %854 = arith.addf %852, %853 : vector<64x8xf32>
    %cst_391 = arith.constant 0.000000e+00 : f32
    %855 = vector.broadcast %cst_391 : f32 to vector<64x8xf32>
    %856 = arith.maximumf %854, %855 : vector<64x8xf32>
    %857 = arith.addf %856, %724 : vector<64x8xf32>
    %858 = tpu.transpose %857, [1, 0] : vector<64x8xf32> -> vector<8x64xf32>
    %c0_392 = arith.constant 0 : index
    %c0_393 = arith.constant 0 : index
    %c0_394 = arith.constant 0 : index
    %859 = vector.load %arg9[%c0_392, %c0_393, %c0_394] : memref<2x8x64xf32, #tpu.memory_space<vmem>>, vector<1x8x64xf32>
    %860 = vector.shape_cast %859 : vector<1x8x64xf32> to vector<8x64xf32>
    %861 = vector.shape_cast %858 : vector<8x64xf32> to vector<1x8x64xf32>
    tpu.vector_store %arg9[%c0_392, %c0_393, %c0_394], %861 {strides = array<i32>} : memref<2x8x64xf32, #tpu.memory_space<vmem>>, vector<1x8x64xf32>,
    %c1_395 = arith.constant 1 : index
    %c0_396 = arith.constant 0 : index
    %c0_397 = arith.constant 0 : index
    %862 = vector.load %arg11[%c1_395, %c0_396, %c0_397] : memref<2x64x8xf32, #tpu.memory_space<vmem>>, vector<1x64x8xf32>
    %863 = vector.shape_cast %862 : vector<1x64x8xf32> to vector<64x8xf32>
    %864 = vector.broadcast %710 : vector<1x8xf32> to vector<64x8xf32>
    %865 = arith.mulf %863, %864 : vector<64x8xf32>
    %866 = vector.broadcast %713 : vector<1x8xf32> to vector<64x8xf32>
    %867 = arith.addf %865, %866 : vector<64x8xf32>
    %cst_398 = arith.constant 0.000000e+00 : f32
    %868 = vector.broadcast %cst_398 : f32 to vector<64x8xf32>
    %869 = arith.maximumf %867, %868 : vector<64x8xf32>
    %870 = vector.extract_strided_slice %869 {offsets = [0, 0], sizes = [64, 4], strides = [1, 1]} : vector<64x8xf32> to vector<64x4xf32>
    %871 = vector.extract_strided_slice %869 {offsets = [0, 4], sizes = [64, 4], strides = [1, 1]} : vector<64x8xf32> to vector<64x4xf32>
    %872 = vector.extract_strided_slice %714 {offsets = [0, 0], sizes = [4, 4], strides = [1, 1]} : vector<4x20xf32> to vector<4x4xf32>
    %873 = vector.extract_strided_slice %714 {offsets = [0, 4], sizes = [4, 12], strides = [1, 1]} : vector<4x20xf32> to vector<4x12xf32>
    %874 = vector.extract_strided_slice %714 {offsets = [0, 16], sizes = [4, 4], strides = [1, 1]} : vector<4x20xf32> to vector<4x4xf32>
    %875 = vector.extract_strided_slice %715 {offsets = [0, 0], sizes = [8, 4], strides = [1, 1]} : vector<8x12xf32> to vector<8x4xf32>
    %876 = vector.extract_strided_slice %715 {offsets = [0, 4], sizes = [8, 8], strides = [1, 1]} : vector<8x12xf32> to vector<8x8xf32>
    %877 = vector.extract_strided_slice %716 {offsets = [0, 0], sizes = [1, 4], strides = [1, 1]} : vector<6x8xf32> to vector<1x4xf32>
    %878 = vector.extract_strided_slice %716 {offsets = [1, 0], sizes = [1, 4], strides = [1, 1]} : vector<6x8xf32> to vector<1x4xf32>
    %879 = vector.extract_strided_slice %716 {offsets = [2, 0], sizes = [1, 4], strides = [1, 1]} : vector<6x8xf32> to vector<1x4xf32>
    %880 = vector.extract_strided_slice %716 {offsets = [3, 0], sizes = [1, 4], strides = [1, 1]} : vector<6x8xf32> to vector<1x4xf32>
    %881 = vector.extract_strided_slice %716 {offsets = [4, 0], sizes = [1, 8], strides = [1, 1]} : vector<6x8xf32> to vector<1x8xf32>
    %882 = vector.extract_strided_slice %716 {offsets = [5, 0], sizes = [1, 8], strides = [1, 1]} : vector<6x8xf32> to vector<1x8xf32>
    %cst_399 = arith.constant dense<0.000000e+00> : vector<64x4xf32>
    %883 = tpu.matmul %870, %872, %cst_399 {dimension_numbers = #tpu.dot_dimension_numbers<[1], [0], [0], [1], [0, 0, 1, 1], [], []>} : vector<64x4xf32>, vector<4x4xf32>, vector<64x4xf32> -> vector<64x4xf32>
    %cst_400 = arith.constant dense<0.000000e+00> : vector<64x12xf32>
    %884 = tpu.matmul %871, %873, %cst_400 {dimension_numbers = #tpu.dot_dimension_numbers<[1], [0], [0], [1], [0, 0, 1, 1], [], []>} : vector<64x4xf32>, vector<4x12xf32>, vector<64x12xf32> -> vector<64x12xf32>
    %885 = vector.extract_strided_slice %884 {offsets = [0, 0], sizes = [64, 4], strides = [1, 1]} : vector<64x12xf32> to vector<64x4xf32>
    %886 = vector.extract_strided_slice %884 {offsets = [0, 4], sizes = [64, 4], strides = [1, 1]} : vector<64x12xf32> to vector<64x4xf32>
    %887 = vector.extract_strided_slice %884 {offsets = [0, 8], sizes = [64, 4], strides = [1, 1]} : vector<64x12xf32> to vector<64x4xf32>
    %cst_401 = arith.constant dense<0.000000e+00> : vector<4x4xf32>
    %888 = tpu.matmul %885, %886, %cst_401 {dimension_numbers = #tpu.dot_dimension_numbers<[0], [0], [1], [1], [0, 1, 1, 1], [], []>} : vector<64x4xf32>, vector<64x4xf32>, vector<4x4xf32> -> vector<4x4xf32>
    %cst_402 = arith.constant 3.906250e-03 : f32
    %889 = vector.broadcast %cst_402 : f32 to vector<4x4xf32>
    %890 = arith.mulf %888, %889 : vector<4x4xf32>
    %cst_403 = arith.constant dense<0xFF800000> : vector<4xf32>
    %891 = vector.multi_reduction <maximumf>, %890, %cst_403 [1] : vector<4x4xf32> to vector<4xf32>
    %892 = vector.shape_cast %891 : vector<4xf32> to vector<4x1xf32>
    %893 = vector.broadcast %892 : vector<4x1xf32> to vector<4x4xf32>
    %894 = arith.subf %890, %893 : vector<4x4xf32>
    %895 = math.exp %894 : vector<4x4xf32>
    %cst_404 = arith.constant dense<0.000000e+00> : vector<4xf32>
    %896 = vector.multi_reduction <add>, %895, %cst_404 [1] : vector<4x4xf32> to vector<4xf32>
    %897 = vector.shape_cast %896 : vector<4xf32> to vector<4x1xf32>
    %898 = vector.broadcast %897 : vector<4x1xf32> to vector<4x4xf32>
    %899 = arith.divf %895, %898 : vector<4x4xf32>
    %cst_405 = arith.constant dense<0.000000e+00> : vector<64x4xf32>
    %900 = tpu.matmul %887, %899, %cst_405 {dimension_numbers = #tpu.dot_dimension_numbers<[1], [1], [0], [0], [0, 0, 1, 0], [], []>} : vector<64x4xf32>, vector<4x4xf32>, vector<64x4xf32> -> vector<64x4xf32>
    %901 = vector.extract_strided_slice %875 {offsets = [0, 0], sizes = [4, 4], strides = [1, 1]} : vector<8x4xf32> to vector<4x4xf32>
    %cst_406 = arith.constant dense<0.000000e+00> : vector<64x4xf32>
    %902 = tpu.matmul %871, %901, %cst_406 {dimension_numbers = #tpu.dot_dimension_numbers<[1], [0], [0], [1], [0, 0, 1, 1], [], []>} : vector<64x4xf32>, vector<4x4xf32>, vector<64x4xf32> -> vector<64x4xf32>
    %903 = vector.extract_strided_slice %875 {offsets = [4, 0], sizes = [4, 4], strides = [1, 1]} : vector<8x4xf32> to vector<4x4xf32>
    %cst_407 = arith.constant dense<0.000000e+00> : vector<64x4xf32>
    %904 = tpu.matmul %900, %903, %cst_407 {dimension_numbers = #tpu.dot_dimension_numbers<[1], [0], [0], [1], [0, 0, 1, 1], [], []>} : vector<64x4xf32>, vector<4x4xf32>, vector<64x4xf32> -> vector<64x4xf32>
    %905 = arith.addf %902, %904 : vector<64x4xf32>
    %cst_408 = arith.constant dense<0.000000e+00> : vector<64xf32>
    %906 = vector.multi_reduction <add>, %905, %cst_408 [1] : vector<64x4xf32> to vector<64xf32>
    %907 = vector.shape_cast %906 : vector<64xf32> to vector<64x1xf32>
    %cst_409 = arith.constant 4.000000e+00 : f32
    %908 = vector.broadcast %cst_409 : f32 to vector<64x1xf32>
    %909 = arith.divf %907, %908 : vector<64x1xf32>
    %910 = vector.broadcast %909 : vector<64x1xf32> to vector<64x4xf32>
    %911 = arith.subf %905, %910 : vector<64x4xf32>
    %912 = arith.mulf %911, %911 : vector<64x4xf32>
    %cst_410 = arith.constant dense<0.000000e+00> : vector<64xf32>
    %913 = vector.multi_reduction <add>, %912, %cst_410 [1] : vector<64x4xf32> to vector<64xf32>
    %914 = vector.shape_cast %913 : vector<64xf32> to vector<64x1xf32>
    %cst_411 = arith.constant 4.000000e+00 : f32
    %915 = vector.broadcast %cst_411 : f32 to vector<64x1xf32>
    %916 = arith.divf %914, %915 : vector<64x1xf32>
    %917 = vector.broadcast %909 : vector<64x1xf32> to vector<64x4xf32>
    %918 = arith.subf %905, %917 : vector<64x4xf32>
    %cst_412 = arith.constant 9.99999974E-6 : f32
    %919 = vector.broadcast %cst_412 : f32 to vector<64x1xf32>
    %920 = arith.addf %916, %919 : vector<64x1xf32>
    %921 = math.rsqrt %920 : vector<64x1xf32>
    %922 = vector.broadcast %921 : vector<64x1xf32> to vector<64x4xf32>
    %923 = arith.mulf %918, %922 : vector<64x4xf32>
    %924 = vector.broadcast %879 : vector<1x4xf32> to vector<64x4xf32>
    %925 = arith.mulf %923, %924 : vector<64x4xf32>
    %926 = vector.broadcast %880 : vector<1x4xf32> to vector<64x4xf32>
    %927 = arith.addf %925, %926 : vector<64x4xf32>
    %cst_413 = arith.constant dense<0.000000e+00> : vector<4x4xf32>
    %928 = tpu.matmul %883, %927, %cst_413 {dimension_numbers = #tpu.dot_dimension_numbers<[0], [0], [1], [1], [0, 1, 1, 1], [], []>} : vector<64x4xf32>, vector<64x4xf32>, vector<4x4xf32> -> vector<4x4xf32>
    %cst_414 = arith.constant 3.906250e-03 : f32
    %929 = vector.broadcast %cst_414 : f32 to vector<4x4xf32>
    %930 = arith.mulf %928, %929 : vector<4x4xf32>
    %cst_415 = arith.constant dense<0xFF800000> : vector<4xf32>
    %931 = vector.multi_reduction <maximumf>, %930, %cst_415 [1] : vector<4x4xf32> to vector<4xf32>
    %932 = vector.shape_cast %931 : vector<4xf32> to vector<4x1xf32>
    %933 = vector.broadcast %932 : vector<4x1xf32> to vector<4x4xf32>
    %934 = arith.subf %930, %933 : vector<4x4xf32>
    %935 = math.exp %934 : vector<4x4xf32>
    %cst_416 = arith.constant dense<0.000000e+00> : vector<4xf32>
    %936 = vector.multi_reduction <add>, %935, %cst_416 [1] : vector<4x4xf32> to vector<4xf32>
    %937 = vector.shape_cast %936 : vector<4xf32> to vector<4x1xf32>
    %938 = vector.broadcast %937 : vector<4x1xf32> to vector<4x4xf32>
    %939 = arith.divf %935, %938 : vector<4x4xf32>
    %cst_417 = arith.constant dense<0.000000e+00> : vector<64x4xf32>
    %940 = tpu.matmul %927, %939, %cst_417 {dimension_numbers = #tpu.dot_dimension_numbers<[1], [1], [0], [0], [0, 0, 1, 0], [], []>} : vector<64x4xf32>, vector<4x4xf32>, vector<64x4xf32> -> vector<64x4xf32>
    %cst_418 = arith.constant 0.000000e+00 : f32
    %941 = vector.broadcast %cst_418 : f32 to vector<64x4xf32>
    %942 = arith.subf %941, %940 : vector<64x4xf32>
    %943 = math.exp %942 : vector<64x4xf32>
    %cst_419 = arith.constant 1.000000e+00 : f32
    %944 = vector.broadcast %cst_419 : f32 to vector<64x4xf32>
    %945 = arith.addf %944, %943 : vector<64x4xf32>
    %cst_420 = arith.constant 1.000000e+00 : f32
    %946 = vector.broadcast %cst_420 : f32 to vector<64x4xf32>
    %947 = arith.divf %946, %945 : vector<64x4xf32>
    %948 = arith.mulf %870, %947 : vector<64x4xf32>
    %949 = arith.addf %948, %870 : vector<64x4xf32>
    %cst_421 = arith.constant dense<0.000000e+00> : vector<64x4xf32>
    %950 = tpu.matmul %949, %874, %cst_421 {dimension_numbers = #tpu.dot_dimension_numbers<[1], [0], [0], [1], [0, 0, 1, 1], [], []>} : vector<64x4xf32>, vector<4x4xf32>, vector<64x4xf32> -> vector<64x4xf32>
    %cst_422 = arith.constant dense<0.000000e+00> : vector<64xf32>
    %951 = vector.multi_reduction <add>, %950, %cst_422 [1] : vector<64x4xf32> to vector<64xf32>
    %952 = vector.shape_cast %951 : vector<64xf32> to vector<64x1xf32>
    %cst_423 = arith.constant 4.000000e+00 : f32
    %953 = vector.broadcast %cst_423 : f32 to vector<64x1xf32>
    %954 = arith.divf %952, %953 : vector<64x1xf32>
    %955 = vector.broadcast %954 : vector<64x1xf32> to vector<64x4xf32>
    %956 = arith.subf %950, %955 : vector<64x4xf32>
    %957 = arith.mulf %956, %956 : vector<64x4xf32>
    %cst_424 = arith.constant dense<0.000000e+00> : vector<64xf32>
    %958 = vector.multi_reduction <add>, %957, %cst_424 [1] : vector<64x4xf32> to vector<64xf32>
    %959 = vector.shape_cast %958 : vector<64xf32> to vector<64x1xf32>
    %cst_425 = arith.constant 4.000000e+00 : f32
    %960 = vector.broadcast %cst_425 : f32 to vector<64x1xf32>
    %961 = arith.divf %959, %960 : vector<64x1xf32>
    %962 = vector.broadcast %954 : vector<64x1xf32> to vector<64x4xf32>
    %963 = arith.subf %950, %962 : vector<64x4xf32>
    %cst_426 = arith.constant 9.99999974E-6 : f32
    %964 = vector.broadcast %cst_426 : f32 to vector<64x1xf32>
    %965 = arith.addf %961, %964 : vector<64x1xf32>
    %966 = math.rsqrt %965 : vector<64x1xf32>
    %967 = vector.broadcast %966 : vector<64x1xf32> to vector<64x4xf32>
    %968 = arith.mulf %963, %967 : vector<64x4xf32>
    %969 = vector.broadcast %877 : vector<1x4xf32> to vector<64x4xf32>
    %970 = arith.mulf %968, %969 : vector<64x4xf32>
    %971 = vector.broadcast %878 : vector<1x4xf32> to vector<64x4xf32>
    %972 = arith.addf %970, %971 : vector<64x4xf32>
    %973 = vector.extract_strided_slice %876 {offsets = [0, 0], sizes = [4, 8], strides = [1, 1]} : vector<8x8xf32> to vector<4x8xf32>
    %cst_427 = arith.constant dense<0.000000e+00> : vector<64x8xf32>
    %974 = tpu.matmul %972, %973, %cst_427 {dimension_numbers = #tpu.dot_dimension_numbers<[1], [0], [0], [1], [0, 0, 1, 1], [], []>} : vector<64x4xf32>, vector<4x8xf32>, vector<64x8xf32> -> vector<64x8xf32>
    %975 = vector.extract_strided_slice %876 {offsets = [4, 0], sizes = [4, 8], strides = [1, 1]} : vector<8x8xf32> to vector<4x8xf32>
    %cst_428 = arith.constant dense<0.000000e+00> : vector<64x8xf32>
    %976 = tpu.matmul %927, %975, %cst_428 {dimension_numbers = #tpu.dot_dimension_numbers<[1], [0], [0], [1], [0, 0, 1, 1], [], []>} : vector<64x4xf32>, vector<4x8xf32>, vector<64x8xf32> -> vector<64x8xf32>
    %977 = arith.addf %974, %976 : vector<64x8xf32>
    %cst_429 = arith.constant dense<0.000000e+00> : vector<64xf32>
    %978 = vector.multi_reduction <add>, %977, %cst_429 [1] : vector<64x8xf32> to vector<64xf32>
    %979 = vector.shape_cast %978 : vector<64xf32> to vector<64x1xf32>
    %cst_430 = arith.constant 8.000000e+00 : f32
    %980 = vector.broadcast %cst_430 : f32 to vector<64x1xf32>
    %981 = arith.divf %979, %980 : vector<64x1xf32>
    %982 = vector.broadcast %981 : vector<64x1xf32> to vector<64x8xf32>
    %983 = arith.subf %977, %982 : vector<64x8xf32>
    %984 = arith.mulf %983, %983 : vector<64x8xf32>
    %cst_431 = arith.constant dense<0.000000e+00> : vector<64xf32>
    %985 = vector.multi_reduction <add>, %984, %cst_431 [1] : vector<64x8xf32> to vector<64xf32>
    %986 = vector.shape_cast %985 : vector<64xf32> to vector<64x1xf32>
    %cst_432 = arith.constant 8.000000e+00 : f32
    %987 = vector.broadcast %cst_432 : f32 to vector<64x1xf32>
    %988 = arith.divf %986, %987 : vector<64x1xf32>
    %989 = vector.broadcast %981 : vector<64x1xf32> to vector<64x8xf32>
    %990 = arith.subf %977, %989 : vector<64x8xf32>
    %cst_433 = arith.constant 9.99999974E-6 : f32
    %991 = vector.broadcast %cst_433 : f32 to vector<64x1xf32>
    %992 = arith.addf %988, %991 : vector<64x1xf32>
    %993 = math.rsqrt %992 : vector<64x1xf32>
    %994 = vector.broadcast %993 : vector<64x1xf32> to vector<64x8xf32>
    %995 = arith.mulf %990, %994 : vector<64x8xf32>
    %996 = vector.broadcast %881 : vector<1x8xf32> to vector<64x8xf32>
    %997 = arith.mulf %995, %996 : vector<64x8xf32>
    %998 = vector.broadcast %882 : vector<1x8xf32> to vector<64x8xf32>
    %999 = arith.addf %997, %998 : vector<64x8xf32>
    %cst_434 = arith.constant 0.000000e+00 : f32
    %1000 = vector.broadcast %cst_434 : f32 to vector<64x8xf32>
    %1001 = arith.maximumf %999, %1000 : vector<64x8xf32>
    %1002 = arith.addf %1001, %869 : vector<64x8xf32>
    %1003 = tpu.transpose %1002, [1, 0] : vector<64x8xf32> -> vector<8x64xf32>
    %c1_435 = arith.constant 1 : index
    %c0_436 = arith.constant 0 : index
    %c0_437 = arith.constant 0 : index
    %1004 = vector.load %arg9[%c1_435, %c0_436, %c0_437] : memref<2x8x64xf32, #tpu.memory_space<vmem>>, vector<1x8x64xf32>
    %1005 = vector.shape_cast %1004 : vector<1x8x64xf32> to vector<8x64xf32>
    %1006 = vector.shape_cast %1003 : vector<8x64xf32> to vector<1x8x64xf32>
    tpu.vector_store %arg9[%c1_435, %c0_436, %c0_437], %1006 {strides = array<i32>} : memref<2x8x64xf32, #tpu.memory_space<vmem>>, vector<1x8x64xf32>,
    return
  }
  func.func @transform_0(%arg0: i32) -> (i32, i32, i32, i32, i32) {
    %c0_i32 = arith.constant 0 : i32
    %c0_i32_0 = arith.constant 0 : i32
    %c0_i32_1 = arith.constant 0 : i32
    %c0_i32_2 = arith.constant 0 : i32
    %c0_i32_3 = arith.constant 0 : i32
    %c0_i32_4 = arith.constant 0 : i32
    return %c0_i32, %c0_i32_0, %c0_i32_1, %c0_i32_2, %c0_i32_3 : i32, i32, i32, i32, i32
  }
  func.func @transform_1(%arg0: i32) -> (i32, i32, i32) {
    %c0_i32 = arith.constant 0 : i32
    %c0_i32_0 = arith.constant 0 : i32
    %c0_i32_1 = arith.constant 0 : i32
    %c0_i32_2 = arith.constant 0 : i32
    return %c0_i32, %c0_i32_0, %c0_i32_1 : i32, i32, i32
  }
  func.func @transform_2(%arg0: i32) -> (i32, i32) {
    %c0_i32 = arith.constant 0 : i32
    %c0_i32_0 = arith.constant 0 : i32
    %c0_i32_1 = arith.constant 0 : i32
    return %c0_i32, %c0_i32_0 : i32, i32
  }
  func.func @transform_3(%arg0: i32) -> (i32, i32, i32) {
    %c0_i32 = arith.constant 0 : i32
    %c0_i32_0 = arith.constant 0 : i32
    %c0_i32_1 = arith.constant 0 : i32
    %c0_i32_2 = arith.constant 0 : i32
    return %c0_i32, %c0_i32_0, %c0_i32_1 : i32, i32, i32
  }
  func.func @transform_4(%arg0: i32) -> (i32, i32) {
    %c0_i32 = arith.constant 0 : i32
    %c0_i32_0 = arith.constant 0 : i32
    %c0_i32_1 = arith.constant 0 : i32
    return %c0_i32, %c0_i32_0 : i32, i32
  }
  func.func @transform_5(%arg0: i32) -> (i32, i32) {
    %c0_i32 = arith.constant 0 : i32
    %c0_i32_0 = arith.constant 0 : i32
    %c0_i32_1 = arith.constant 0 : i32
    return %c0_i32, %c0_i32_0 : i32, i32
  }
  func.func @transform_6(%arg0: i32) -> (i32, i32) {
    %c0_i32 = arith.constant 0 : i32
    %c0_i32_0 = arith.constant 0 : i32
    %c0_i32_1 = arith.constant 0 : i32
    return %c0_i32, %c0_i32_0 : i32, i32
  }
  func.func @transform_7(%arg0: i32) -> (i32, i32) {
    %c0_i32 = arith.constant 0 : i32
    %c0_i32_0 = arith.constant 0 : i32
    %c0_i32_1 = arith.constant 0 : i32
    return %c0_i32, %c0_i32_0 : i32, i32
  }
  func.func @transform_8(%arg0: i32) -> (i32, i32, i32) {
    %c0_i32 = arith.constant 0 : i32
    %c0_i32_0 = arith.constant 0 : i32
    %c0_i32_1 = arith.constant 0 : i32
    %c0_i32_2 = arith.constant 0 : i32
    return %c0_i32, %c0_i32_0, %c0_i32_1 : i32, i32, i32
  }
}

</mosaic_0001>

<bundles_post_ra>
// kernel: downscaling_forward.1
= control target key start
LH: loop header
LB: loop body
LE: loop exit
PB: predicated region body
PF: predicated region fallthrough
CT: control target
= control target key end

     0   :  { %s7818_s9 = smov 124   ;;  %vm11973_vm0 = vcmask 1043456   ;;  %vm11932_vm1 = vcmask 1040384   ;;  %vm11925_vm2 = vcmask 1046528   ;;  %vm11972_vm3 = vcmask 31744   ;;  %s7822_s23 = smov 112   ;;  %s11911_s0 = inlined_call_operand.vmem [shape: f32[2,8,2,8,8], index: 0, kind: input, shape index: {}]   ;;  %s11912_s1 = inlined_call_operand.vmem [shape: f32[9,4,8], index: 1, kind: input, shape index: {}]   ;;  %s11913_s2 = inlined_call_operand.vmem [shape: f32[3,8], index: 2, kind: input, shape index: {}]   ;;  %s11914_s3 = inlined_call_operand.vmem [shape: f32[9,8,8], index: 3, kind: input, shape index: {}]   ;;  %s11915_s4 = inlined_call_operand.vmem [shape: f32[3,8], index: 4, kind: input, shape index: {}]   ;;  %s11916_s5 = inlined_call_operand.vmem [shape: f32[4,20], index: 5, kind: input, shape index: {}]   ;;  %s11917_s6 = inlined_call_operand.vmem [shape: f32[8,12], index: 6, kind: input, shape index: {}]   ;;  %s11918_s7 = inlined_call_operand.vmem [shape: f32[6,8], index: 7, kind: input, shape index: {}]   ;;  %s11919_s8 = inlined_call_operand.vmem [shape: f32[2,8,64], index: 8, kind: output, shape index: {}]  }
   0x1   :  { %v41_v0 = vld [vmem:[%s11911_s0 + $0x50] sm:$0xff]  ;;  %v40_v2 = vld [vmem:[%s11911_s0 + $0x48] sm:$0xff]  ;;  %v38_v3 = vld [vmem:[%s11911_s0 + $0x38] sm:$0xff]  ;;  %v170_v51 = vlaneseq  ;;  %vm530_vm5 = vcmask 1045504  }
   0x2   :  { %v7875_v1 = vld [vmem:[%s11911_s0 + $0x30] sm:$0xff]  ;;  %65 = vrot.lane.b32.xlu1 %v41_v0, %s7818_s9  ;;  %103 = vrot.lane.b32.xlu2 %v40_v2, %s7818_s9  ;;  %v39_v4 = vld [vmem:[%s11911_s0 + $0x40] sm:$0xff] }
   0x3   :  { %61 = vrot.lane.b32.xlu0 %v7875_v1, %s7818_s9  ;;  %v42_v5 = vld [vmem:[%s11911_s0 + $0x58] sm:$0xff]  ;;  %v7899_v6 = vld [vmem:[%s11911_s0 + $0x68] sm:$0xff]  ;;  %v7904_v7 = vld [vmem:[%s11911_s0 + $0x60] sm:$0xff]  ;;  %v8049_v58 = vshrl.u32 %v170_v51, 7 }
   0x4   :  { %v7909_v8 = vld [vmem:[%s11911_s0 + $0x70] sm:$0xff]  ;;  %v7920_v9 = vld [vmem:[%s11911_s0 + $0x78] sm:$0xff]  ;;  %v7925_v10 = vld [vmem:[%s11911_s0] sm:$0xff] }
   0x5   :  { %v7930_v11 = vld [vmem:[%s11911_s0 + $0x8] sm:$0xff]  ;;  %v7941_v12 = vld [vmem:[%s11911_s0 + $0x10] sm:$0xff]  ;;  %v7946_v13 = vld [vmem:[%s11911_s0 + $0x18] sm:$0xff]  ;;  %v11927_v62 = vand.u32 7, %v8049_v58 }
   0x6   :  { %v7951_v14 = vld [vmem:[%s11911_s0 + $0x20] sm:$0xff]  ;;  %v7962_v15 = vld [vmem:[%s11911_s0 + $0x28] sm:$0xff]  ;;  %v7984_v23 = vld [vmem:[%s11911_s0 + $0x90] sm:$0xff] }
   0x7   :  { %v7065_v16 = vld [vmem:[%s11912_s1 + $0x4] sm:$0xf]  ;;  %v7083_v22 = vld [vmem:[%s11912_s1 + $0x8] sm:$0xf]  ;;  %v7989_v24 = vld [vmem:[%s11911_s0 + $0x98] sm:$0xff] }
   0x8   :  { %7582 = vmatpush.msk.msra.mxu1 %vm11973_vm0, %v7065_v16  ;;  %7066 = vmatpush.msk.msra.mxu0 %vm11973_vm0, %v7065_v16  ;;  %v7974_v18 = vld [vmem:[%s11911_s0 + $0x80] sm:$0xff]  ;;  %v8004_v36 = vld [vmem:[%s11911_s0 + $0xa8] sm:$0xff]  ;;  %v8036_v53 = vld [vmem:[%s11911_s0 + $0xb0] sm:$0xff] }
   0x9   :  { %7084 = vmatpush.msk.msra.mxu2 %vm11973_vm0, %v7083_v22  ;;  %v330_v34 = vld [vmem:[%s11912_s1] sm:$0xf]  ;;  %v7093_v44 = vld [vmem:[%s11912_s1 + $0xc] sm:$0xf] }
   0xa   :  { %101 = vrot.lane.b32.xlu1 %v38_v3, %s7818_s9  ;;  %105 = vrot.lane.b32.xlu2 %v42_v5, %s7818_s9  ;;  %v8031_v52 = vld [vmem:[%s11911_s0 + $0x88] sm:$0xff] }
   0xb   :  { %63 = vrot.lane.b32.xlu0 %v39_v4, %s7818_s9  ;;  %7075 = vmatpush.msk.msrb.mxu1 %vm11973_vm0, %v330_v34  ;;  %v8108_v34 = vld [vmem:[%s11911_s0 + $0xd8] sm:$0xff] }
   0xc   :  { %7583 = vmatpush.msk.msra.mxu3 %vm11973_vm0, %v7093_v44  ;;  %7094 = vmatpush.msk.msrb.mxu2 %vm11973_vm0, %v7093_v44 }
  0x12   :  { %107 = vrot.lane.b32.xlu1 %v7899_v6, %s7818_s9  ;;  %69 = vrot.lane.b32.xlu2 %v7909_v8, %s7818_s9 }
  0x13   :  { %67 = vrot.lane.b32.xlu0 %v7904_v7, %s7818_s9 }
  0x1a   :  { %55 = vrot.lane.b32.xlu1 %v7925_v10, %s7818_s9  ;;  %95 = vrot.lane.b32.xlu2 %v7930_v11, %s7818_s9 }
  0x1b   :  { %109 = vrot.lane.b32.xlu0 %v7920_v9, %s7818_s9 }
  0x22   :  { %97 = vrot.lane.b32.xlu1 %v7946_v13, %s7818_s9  ;;  %59 = vrot.lane.b32.xlu2 %v7951_v14, %s7818_s9 }
  0x23   :  { %57 = vrot.lane.b32.xlu0 %v7941_v12, %s7818_s9 }
  0x2a   :  { %1172 = vrot.lane.b32.xlu1 %v7974_v18, %s7818_s9  ;;  %1212 = vrot.lane.b32.xlu2 %v8031_v52, %s7818_s9 }
  0x2b   :  { %99 = vrot.lane.b32.xlu0 %v7962_v15, %s7818_s9 }
  0x32   :  { %1214 = vrot.lane.b32.xlu1 %v7989_v24, %s7818_s9 }
  0x33   :  { %1174 = vrot.lane.b32.xlu0 %v7984_v23, %s7818_s9 }
  0x3a   :  { %1178 = vrot.lane.b32.xlu1 %v8036_v53, %s7818_s9 }
  0x3b   :  { %1216 = vrot.lane.b32.xlu0 %v8004_v36, %s7818_s9 }
  0x5c   :  { %v104_v17 = vpop.permute.xlu2 %103 }
  0x5d   :  { %v123_v27 = vmax.f32 %v40_v2, %v104_v17  ;;  %v11921_v17 = vmov 0.0  }
  0x64   :  { %v106_v21 = vpop.permute.xlu2 %105 }
  0x65   :  { %v124_v26 = vmax.f32 %v42_v5, %v106_v21  ;;  %v8068_v5 = vld [vmem:[%s11911_s0 + $0xc8] sm:$0xff] }
  0x66   :  { %1220 = vrot.lane.b32.xlu1 %v8068_v5, %s7818_s9 }
  0x6c   :  { %v70_v35 = vpop.permute.xlu2 %69 }
  0x6d   :  { %v86_v59 = vmax.f32 %v7909_v8, %v70_v35  ;;  %v8113_v35 = vld [vmem:[%s11911_s0 + $0xa0] sm:$0xff] }
  0x6e   :  { %1176 = vrot.lane.b32.xlu2 %v8113_v35, %s7818_s9 }
  0x74   :  { %v66_v19 = vpop.permute.xlu1 %65  ;;  %v96_v56 = vpop.permute.xlu2 %95 }
  0x75   :  { %v62_v20 = vpop.permute.xlu0 %61  ;;  %v84_v25 = vmax.f32 %v41_v0, %v66_v19  ;;  %v119_v61 = vmax.f32 %v7930_v11, %v96_v56  ;;  %v8085_v19 = vrot.slane %v11921_v17, 1 }
  0x76   :  { %v82_v31 = vmax.f32 %v7875_v1, %v62_v20  ;;  %v8088_v20 = vrot.slane %v11921_v17, 2 }
  0x77   :  { %v132_v30 = vmax.f32 %v84_v25, %v124_v26  ;;  %12015 = vst [vmem:[#allocation5_spill] sm:$0xff] %v8085_v19 }
  0x78   :  { %12016 = vst [vmem:[#allocation6_spill] sm:$0xff] %v8088_v20 }
  0x79   :  { %v153_v39 = vrot.slane %v132_v30, 7 }
  0x7c   :  { %v102_v28 = vpop.permute.xlu1 %101 }
  0x7d   :  { %v64_v29 = vpop.permute.xlu0 %63  ;;  %v122_v32 = vmax.f32 %v38_v3, %v102_v28 }
  0x7e   :  { %v83_v33 = vmax.f32 %v39_v4, %v64_v29  ;;  %v8063_v4 = vld [vmem:[%s11911_s0 + $0xc0] sm:$0xff] }
  0x7f   :  { %v8006_v37 = vmax.f32 %v82_v31, %v122_v32  ;;  %1180 = vrot.lane.b32.xlu0 %v8063_v4, %s7818_s9 }
  0x80   :  { %v131_v38 = vmax.f32 %v83_v33, %v123_v27 }
  0x81   :  { %v149_v40 = vrot.slane %v8006_v37, 7 }
  0x82   :  { %v151_v41 = vrot.slane %v131_v38, 7 }
  0x84   :  { %v8014_v42 = vsel %vm11932_vm1, %v149_v40, %v151_v41  ;;  %v8017_v43 = vsel %vm11932_vm1, %v151_v41, %v153_v39  ;;  %v108_v45 = vpop.permute.xlu1 %107 }
  0x85   :  { %v68_v46 = vpop.permute.xlu0 %67  ;;  %v345_v47 = vrot.slane %v8014_v42, 1  ;;  %v347_v48 = vrot.slane %v8017_v43, 1  ;;  %v125_v49 = vmax.f32 %v7899_v6, %v108_v45  ;;  %v8133_v45 = vadd.s32 24, %v8049_v58 }
  0x86   :  { %v85_v50 = vmax.f32 %v7904_v7, %v68_v46 }
  0x87   :  { %v8041_v54 = vsel %vm11925_vm2, %v345_v47, %v347_v48  ;;  %1222 = vrot.lane.b32.xlu0 %v8108_v34, %s7818_s9 }
  0x88   :  { %v133_v55 = vmax.f32 %v85_v50, %v125_v49  ;;  %7072 = vmatmul.msk.f32.vlgmr.msra.gmra.mxu1 %vm11972_vm3, %v8041_v54 }
  0x8a   :  { %v155_v57 = vrot.slane %v133_v55, 7  ;;  %v173_v55 = vadd.s32 16, %v8049_v58 }
  0x8c   :  { %v8053_v60 = vsel %vm11932_vm1, %v153_v39, %v155_v57  ;;  %v56_v0 = vpop.permute.xlu1 %55 }
  0x8d   :  { %v110_v63 = vpop.permute.xlu0 %109  ;;  %v349_v1 = vrot.slane %v8053_v60, 1  ;;  %v79_v3 = vmax.f32 %v7925_v10, %v56_v0  ;;  %v172_v10 = vadd.s32 8, %v8049_v58 }
  0x8e   :  { %v126_v2 = vmax.f32 %v7920_v9, %v110_v63  ;;  %v8081_v9 = vadd.s32 1, %v11927_v62  ;;  %v204_v63 = vand.u32 7, %v8133_v45 }
  0x8f   :  { %v8071_v6 = vsel %vm11925_vm2, %v347_v48, %v349_v1  ;;  %v127_v8 = vmax.f32 %v79_v3, %v119_v61  ;;  %v190_v25 = vand.u32 7, %v172_v10  ;;  %v60_v48 = vpop.permute.xlu2 %59  ;;  %v8162_v3 = vadd.s32 32, %v8049_v58 }
  0x90   :  { %v134_v7 = vmax.f32 %v86_v59, %v126_v2  ;;  %7073 = vmatmul.msk.f32.gmra.mxu1 %vm11972_vm3, %v8071_v6  ;;  %12014 = vst [vmem:[#allocation4_spill] sm:$0xff] %v8081_v9  ;;  %vm498_vm4 = vcmp.lt.s32.totalorder %v8081_v9, 8  ;;  %v81_v61 = vmax.f32 %v7951_v14, %v60_v48  ;;  %v197_v10 = vand.u32 7, %v173_v55  ;;  %v7103_v14 = vld [vmem:[%s11912_s1 + $0x10] sm:$0xf] }
  0x91   :  { %v144_v16 = vrot.slane %v127_v8, 7  ;;  %v8137_v49 = vadd.s32 1, %v190_v25  ;;  %v8165_v8 = vadd.s32 4294967295, %v190_v25  ;;  %7104 = vmatpush.msk.msrb.mxu0 %vm11973_vm0, %v7103_v14  ;;  %v8229_v48 = vld [vmem:[%s11911_s0 + $0xf0] sm:$0xff] }
  0x92   :  { %v157_v11 = vrot.slane %v134_v7, 7  ;;  %1186 = vrot.lane.b32.xlu0 %v8229_v48, %s7818_s9 }
  0x93   :  { %v8094_v22 = vsel %vm11932_vm1, 0.0, %v144_v16  ;;  %12017 = vst [vmem:[#allocation7_spill] sm:$0xff] %v8137_v49  ;;  %vm499_vm6 = vcmp.lt.s32.totalorder %v8137_v49, 8  ;;  %vm284_vm7 = vcmp.ge.s32.totalorder %v8165_v8, 0 }
  0x94   :  { %v8091_v21 = vsel %vm11932_vm1, %v155_v57, %v157_v11  ;;  %v8098_v26 = vsel %vm11932_vm1, %v157_v11, 0.0  ;;  %v98_v28 = vpop.permute.xlu1 %97  ;;  %v337_v30 = vrot.slane %v8094_v22, 1  ;;  %v532_v31 = vrot.slane %v8094_v22, 2  ;;  %12018 = vst [vmem:[#allocation8_spill] sm:$0xff] %v8165_v8  ;;  %v8173_v11 = vld [vmem:[%s11911_s0 + $0xb8] sm:$0xff] }
  0x95   :  { %v58_v27 = vpop.permute.xlu0 %57  ;;  %v351_v29 = vrot.slane %v8091_v21, 1  ;;  %v120_v33 = vmax.f32 %v7946_v13, %v98_v28  ;;  %v546_v13 = vrot.slane %v8091_v21, 2  ;;  %v11923_v46 = vrot.slane %v8098_v26, 1  ;;  %1218 = vrot.lane.b32.xlu2 %v8173_v11, %s7818_s9 }
  0x96   :  { %v80_v32 = vmax.f32 %v7941_v12, %v58_v27  ;;  %v338_v39 = vsel %vm11925_vm2, %v8085_v19, %v337_v30  ;;  %v533_v12 = vsel %vm530_vm5, %v8088_v20, %v532_v31  ;;  %v11920_v50 = vrot.slane %v8098_v26, 2 }
  0x97   :  { %v8116_v38 = vsel %vm11925_vm2, %v349_v1, %v351_v29  ;;  %7067 = vmatmul.msk.f32.vlgmr.msra.gmra.mxu0 %vm11972_vm3, %v338_v39  ;;  %v556_v44 = vsel %vm498_vm4, %v533_v12, 0.0  ;;  %v8144_v56 = vsel %vm11925_vm2, %v351_v29, %v11923_v46  ;;  %v8195_v29 = vadd.s32 4294967295, %v204_v63 }
  0x98   :  { %v128_v41 = vmax.f32 %v80_v32, %v120_v33  ;;  %7074 = vmatmul.msk.f32.gmra.mxu1 %vm11972_vm3, %v8116_v38  ;;  %7085 = vmatmul.msk.f32.vlgmr.msra.gmra.mxu2 %vm11972_vm3, %v556_v44  ;;  %v8151_v57 = vsel %vm530_vm5, %v546_v13, %v11920_v50  ;;  %v211_v32 = vand.u32 7, %v8162_v3  ;;  %v323_v44 = vsel %vm284_vm7, %v8094_v22, 0.0 }
  0x99   :  { %12019 = vst [vmem:[#allocation9_spill] sm:$0xff] %v8195_v29  ;;  %vm11924_vm8 = vcmp.ge.s32.totalorder %v8195_v29, 0  ;;  %v8258_v3 = vadd.s32 4294967295, %v197_v10  ;;  %v542_v50 = vrot.slane %v8017_v43, 2 }
  0x9a   :  { %v145_v51 = vrot.slane %v128_v41, 7  ;;  %v8223_v37 = vadd.s32 4294967295, %v211_v32 }
  0x9b   :  { %12022 = vst [vmem:[#allocation12_spill] sm:$0xff] %v8258_v3  ;;  %vm11931_vm11 = vcmp.ge.s32.totalorder %v8258_v3, 0 }
  0x9c   :  { %v8154_v59 = vsel %vm11932_vm1, %v144_v16, %v145_v51  ;;  %v8178_v16 = vld [vmem:[%s11911_s0 + $0xe0] sm:$0xff]  ;;  %12021 = vst [vmem:[#allocation11_spill] sm:$0xff] %v8223_v37  ;;  %vm11926_vm10 = vcmp.ge.s32.totalorder %v8223_v37, 0 }
  0x9d   :  { %v100_v0 = vpop.permute.xlu0 %99  ;;  %v339_v1 = vrot.slane %v8154_v59, 1  ;;  %v534_v2 = vrot.slane %v8154_v59, 2  ;;  %1184 = vrot.lane.b32.xlu1 %v8178_v16, %s7818_s9 }
  0x9e   :  { %v121_v7 = vmax.f32 %v7962_v15, %v100_v0 }
  0x9f   :  { %v8181_v27 = vsel %vm11925_vm2, %v337_v30, %v339_v1  ;;  %v8184_v15 = vsel %vm530_vm5, %v532_v31, %v534_v2  ;;  %v8197_v30 = vadd.s32 1, %v197_v10 }
  0xa0   :  { %v129_v25 = vmax.f32 %v81_v61, %v121_v7  ;;  %457 = vmatmul.f32.vlgmr.msrb.gmra.mxu1 %v11921_v17  ;;  %7068 = vmatmul.msk.f32.gmra.mxu0 %vm11972_vm3, %v8181_v27  ;;  %v557_v28 = vsel %vm499_vm6, %v8184_v15, 0.0  ;;  %v7113_v17 = vld [vmem:[%s11912_s1 + $0x14] sm:$0xf] }
  0xa1   :  { %12020 = vst [vmem:[#allocation10_spill] sm:$0xff] %v8197_v30  ;;  %7086 = vmatmul.msk.f32.gmra.mxu2 %vm11972_vm3, %v557_v28  ;;  %vm500_vm9 = vcmp.lt.s32.totalorder %v8197_v30, 8  ;;  %v646_v28 = vsel %vm11926_vm10, %v8014_v42, 0.0  ;;  %7114 = vmatpush.msk.msra.mxu1 %vm11973_vm0, %v7113_v17 }
  0xa2   :  { %v147_v31 = vrot.slane %v129_v25, 7  ;;  %v8262_v25 = vadd.s32 1, %v204_v63 }
  0xa4   :  { %v8205_v33 = vsel %vm11932_vm1, %v145_v51, %v147_v31  ;;  %v8210_v39 = vsel %vm11932_vm1, %v147_v31, %v149_v40  ;;  %v176_v40 = vadd.s32 40, %v8049_v58  ;;  %v8234_v51 = vld [vmem:[%s11911_s0 + $0xf8] sm:$0xff]  ;;  %12023 = vst [vmem:[#allocation13_spill] sm:$0xff] %v8262_v25  ;;  %vm501_vm12 = vcmp.lt.s32.totalorder %v8262_v25, 8 }
  0xa5   :  { %v645_v12 = vsel %vm11924_vm8, %v8210_v39, 0.0  ;;  %v341_v41 = vrot.slane %v8205_v33, 1  ;;  %v536_v45 = vrot.slane %v8205_v33, 2  ;;  %1226 = vrot.lane.b32.xlu1 %v8234_v51, %s7818_s9  ;;  %v343_v14 = vrot.slane %v8210_v39, 1 }
  0xa6   :  { %7098 = vmatmul.msk.f32.vlgmr.msra.gmra.mxu3 %vm11972_vm3, %v645_v12  ;;  %v218_v7 = vand.u32 7, %v176_v40  ;;  %v8277_v12 = vld [vmem:[%s11911_s0 + $0xd0] sm:$0xff]  ;;  %v8297_v40 = vadd.s32 1, %v211_v32 }
  0xa7   :  { %v8237_v55 = vsel %vm11925_vm2, %v339_v1, %v341_v41  ;;  %v8240_v61 = vsel %vm530_vm5, %v534_v2, %v536_v45  ;;  %v538_v1 = vrot.slane %v8210_v39, 2  ;;  %v7133_v2 = vld [vmem:[%s11912_s1 + $0x1c] sm:$0xf]  ;;  %v8280_v63 = vsel %vm11925_vm2, %v341_v41, %v343_v14  ;;  %1182 = vrot.lane.b32.xlu2 %v8277_v12, %s7818_s9 }
  0xa8   :  { %7069 = vmatmul.msk.f32.gmra.mxu0 %vm11972_vm3, %v8237_v55  ;;  %7076 = vmatmul.msk.f32.gmra.mxu1 %vm11972_vm3, %v323_v44  ;;  %v558_v0 = vsel %vm500_vm9, %v8240_v61, 0.0  ;;  %v8272_v10 = vadd.s32 4294967295, %v218_v7  ;;  %v324_v44 = vsel %vm11931_vm11, %v8154_v59, 0.0  ;;  %v177_v41 = vadd.s32 48, %v8049_v58  ;;  %12025 = vst [vmem:[#allocation15_spill] sm:$0xff] %v8297_v40 }
  0xa9   :  { %7087 = vmatmul.msk.f32.gmra.mxu2 %vm11972_vm3, %v558_v0  ;;  %7134 = vmatpush.msk.msrb.mxu3 %vm11973_vm0, %v7133_v2  ;;  %v8268_v31 = vsel %vm530_vm5, %v536_v45, %v538_v1  ;;  %v540_v0 = vrot.slane %v8014_v42, 2  ;;  %v346_v32 = vsel %vm11925_vm2, %v343_v14, %v345_v47  ;;  %vm502_vm14 = vcmp.lt.s32.totalorder %v8297_v40, 8 }
  0xaa   :  { %12024 = vst [vmem:[#allocation14_spill] sm:$0xff] %v8272_v10  ;;  %v559_v45 = vsel %vm501_vm12, %v8268_v31, 0.0  ;;  %vm288_vm13 = vcmp.ge.s32.totalorder %v8272_v10, 0  ;;  %v225_v2 = vand.u32 7, %v177_v41  ;;  %v325_v41 = vsel %vm11924_vm8, %v8205_v33, 0.0 }
  0xab   :  { %v178_v47 = vadd.s32 56, %v8049_v58  ;;  %v8330_v14 = vadd.s32 1, %v218_v7  ;;  %v8343_v7 = vsel %vm530_vm5, %v540_v0, %v542_v50 }
  0xad   :  { %12027 = vst [vmem:[#allocation17_spill] sm:$0xff] %v8330_v14  ;;  %vm11928_vm8 = vcmp.lt.s32.totalorder %v8330_v14, 8 }
  0xae   :  { %7099 = vmatmul.msk.f32.gmra.mxu3 %vm11972_vm3, %v646_v28  ;;  %v647_v28 = vsel %vm288_vm13, %v8017_v43, 0.0  ;;  %v561_v17 = vsel %vm11928_vm8, %v8343_v7, 0.0 }
  0xb0   :  { %7070 = vmatmul.msk.f32.gmra.mxu0 %vm11972_vm3, %v8280_v63  ;;  %7077 = vmatmul.msk.f32.gmra.mxu1 %vm11972_vm3, %v324_v44  ;;  %v8304_v44 = vsel %vm530_vm5, %v538_v1, %v540_v0  ;;  %v8358_v0 = vadd.s32 1, %v225_v2 }
  0xb1   :  { %7088 = vmatmul.msk.f32.gmra.mxu2 %vm11972_vm3, %v559_v45  ;;  %v8310_v45 = vld [vmem:[%s11911_s0 + $0xe8] sm:$0xff]  ;;  %v560_v1 = vsel %vm502_vm14, %v8304_v44, 0.0 }
  0xb2   :  { %1224 = vrot.lane.b32.xlu2 %v8310_v45, %s7818_s9  ;;  %12029 = vst [vmem:[#allocation19_spill] sm:$0xff] %v8358_v0 }
  0xb6   :  { %7100 = vmatmul.msk.f32.gmra.mxu3 %vm11972_vm3, %v647_v28  ;;  %v8326_v28 = vadd.s32 4294967295, %v225_v2  ;;  %v327_v2 = vsel %vm288_vm13, %v8014_v42, 0.0 }
  0xb8   :  { %7071 = vmatmul.msk.f32.gmra.mxu0 %vm11972_vm3, %v346_v32  ;;  %7078 = vmatmul.msk.f32.gmra.mxu1 %vm11972_vm3, %v325_v41  ;;  %12026 = vst [vmem:[#allocation16_spill] sm:$0xff] %v8326_v28  ;;  %vm11929_vm15 = vcmp.ge.s32.totalorder %v8326_v28, 0  ;;  %v232_v41 = vand.u32 7, %v178_v47 }
  0xb9   :  { %7089 = vmatmul.msk.f32.gmra.mxu2 %vm11972_vm3, %v560_v1  ;;  %v648_v46 = vsel %vm11929_vm15, %v8053_v60, 0.0  ;;  %v326_v1 = vsel %vm11926_vm10, %v8210_v39, 0.0  ;;  %vm504_vm10 = vcmp.lt.s32.totalorder %v8358_v0, 8 }
  0xba   :  { %v8355_v47 = vadd.s32 4294967295, %v232_v41  ;;  %v8380_v62 = vadd.s32 1, %v232_v41 }
  0xbc   :  { %12028 = vst [vmem:[#allocation18_spill] sm:$0xff] %v8355_v47  ;;  %vm290_vm2 = vcmp.ge.s32.totalorder %v8355_v47, 0  ;;  %vm11974_vm8 = vcmp.lt.s32.totalorder %v8380_v62, 8 }
  0xbd   :  { %12030 = vst [vmem:[#allocation20_spill] sm:$0xff] %v8380_v62 }
  0xbe   :  { %7101 = vmatmul.msk.f32.gmra.mxu3 %vm11972_vm3, %v648_v46  ;;  %v544_v46 = vrot.slane %v8053_v60, 2 }
  0xc0   :  { %7079 = vmatmul.msk.f32.gmra.mxu1 %vm11972_vm3, %v326_v1  ;;  %7105 = vmatmul.msk.f32.vlgmr.msrb.gmra.mxu0 %vm11972_vm3, %v8181_v27  ;;  %v649_v1 = vsel %vm290_vm2, %v8091_v21, 0.0  ;;  %v8367_v27 = vsel %vm530_vm5, %v542_v50, %v544_v46  ;;  %v8386_v50 = vsel %vm530_vm5, %v544_v46, %v546_v13  ;;  %v7123_v13 = vld [vmem:[%s11912_s1 + $0x18] sm:$0xf] }
  0xc1   :  { %7090 = vmatmul.msk.f32.gmra.mxu2 %vm11972_vm3, %v561_v17  ;;  %v562_v17 = vsel %vm504_vm10, %v8367_v27, 0.0  ;;  %v563_v41 = vsel %vm11974_vm8, %v8386_v50, 0.0 }
  0xc2   :  { %7124 = vmatpush.msk.msra.mxu2 %vm11973_vm0, %v7123_v13  ;;  %v1173_v13 = vpop.permute.xlu1 %1172 }
  0xc6   :  { %7102 = vmatmul.msk.f32.gmra.mxu3 %vm11972_vm3, %v649_v1  ;;  %v328_v1 = vsel %vm11929_vm15, %v8017_v43, 0.0 }
  0xc8   :  { %7080 = vmatmul.msk.f32.gmra.mxu1 %vm11972_vm3, %v327_v2  ;;  %7106 = vmatmul.msk.f32.gmra.mxu0 %vm11972_vm3, %v8237_v55  ;;  %v329_v2 = vsel %vm290_vm2, %v8053_v60, 0.0 }
  0xc9   :  { %7091 = vmatmul.msk.f32.gmra.mxu2 %vm11972_vm3, %v562_v17  ;;  %v790_v17 = vsel %vm498_vm4, %v8184_v15, 0.0  ;;  %v791_v15 = vsel %vm499_vm6, %v8240_v61, 0.0 }
  0xce   :  { %7135 = vmatmul.msk.f32.vlgmr.msrb.gmra.mxu3 %vm11972_vm3, %v8237_v55  ;;  %v12031_v55 = vand.u32 7, %v8049_v58 }
  0xd0   :  { %7081 = vmatmul.msk.f32.gmra.mxu1 %vm11972_vm3, %v328_v1  ;;  %7107 = vmatmul.msk.f32.gmra.mxu0 %vm11972_vm3, %v8280_v63  ;;  %v8405_v46 = vadd.s32 4294967295, %v12031_v55  ;;  %v7187_v1 = vld [vmem:[%s11912_s1 + $0x8] sm:$0xf]  ;;  %v1213_v55 = vpop.permute.xlu2 %1212 }
  0xd1   :  { %7092 = vmatmul.msk.f32.gmra.mxu2 %vm11972_vm3, %v563_v41  ;;  %7188 = vmatpush.msk.msra.mxu3 %vm11973_vm0, %v7187_v1 }
  0xd2   :  { %12032 = vst [vmem:[#allocation21_spill] sm:$0xff] %v8405_v46  ;;  %vm11930_vm15 = vcmp.ge.s32.totalorder %v8405_v46, 0 }
  0xd3   :  { %v642_v58 = vsel %vm11930_vm15, %v8094_v22, 0.0  ;;  %v643_v22 = vsel %vm284_vm7, %v8154_v59, 0.0  ;;  %v876_v41 = vsel %vm11930_vm15, %v8154_v59, 0.0  ;;  %v877_v59 = vsel %vm284_vm7, %v8205_v33, 0.0 }
  0xd4   :  { %vm12034_vm15 = vcmask 1046528  }
  0xd6   :  { %7136 = vmatmul.msk.f32.gmra.mxu3 %vm11972_vm3, %v8280_v63  ;;  %v7143_v63 = vld [vmem:[%s11912_s1 + $0x20] sm:$0xf] }
  0xd7   :  { %7144 = vmatpush.msk.msra.mxu0 %vm11973_vm0, %v7143_v63  ;;  %v1175_v63 = vpop.permute.xlu0 %1174 }
  0xd8   :  { %7082 = vmatmul.msk.f32.gmra.mxu1 %vm11972_vm3, %v329_v2  ;;  %7108 = vmatmul.msk.f32.gmra.mxu0 %vm11972_vm3, %v346_v32  ;;  %v1196_v2 = vmax.f32 %v7974_v18, %v1173_v13  ;;  %v12033_v13 = vrot.slane %v8098_v26, 1 }
  0xd9   :  { %7095 = vmatmul.msk.f32.vlgmr.msrb.gmra.mxu2 %vm11972_vm3, %v642_v58  ;;  %v793_v58 = vsel %vm501_vm12, %v8304_v44, 0.0 }
  0xde   :  { %7137 = vmatmul.msk.f32.gmra.mxu3 %vm11972_vm3, %v346_v32  ;;  %v644_v32 = vsel %vm11931_vm11, %v8205_v33, 0.0  ;;  %v794_v33 = vsel %vm502_vm14, %v8343_v7, 0.0 }
  0xe0   :  { %7109 = vmatmul.msk.f32.gmra.mxu0 %vm11972_vm3, %v8041_v54  ;;  %7115 = vmatmul.msk.f32.vlgmr.msra.gmra.mxu1 %vm11972_vm3, %v790_v17 }
  0xe1   :  { %7096 = vmatmul.msk.f32.gmra.mxu2 %vm11972_vm3, %v643_v22 }
  0xe6   :  { %7138 = vmatmul.msk.f32.gmra.mxu3 %vm11972_vm3, %v8041_v54  ;;  %v792_v54 = vsel %vm500_vm9, %v8268_v31, 0.0 }
  0xe8   :  { %7110 = vmatmul.msk.f32.gmra.mxu0 %vm11972_vm3, %v8071_v6  ;;  %7116 = vmatmul.msk.f32.gmra.mxu1 %vm11972_vm3, %v791_v15  ;;  %v7169_v15 = vld [vmem:[%s11912_s1 + $0x4] sm:$0xf] }
  0xe9   :  { %7097 = vmatmul.msk.f32.gmra.mxu2 %vm11972_vm3, %v644_v32  ;;  %v1021_v32 = vsel %vm498_vm4, %v8240_v61, 0.0  ;;  %7170 = vmatpush.msk.msrb.mxu1 %vm11973_vm0, %v7169_v15 }
  0xee   :  { %7139 = vmatmul.msk.f32.gmra.mxu3 %vm11972_vm3, %v8071_v6  ;;  %v1236_v6 = vmax.f32 %v8031_v52, %v1213_v55  ;;  %v1215_v52 = vpop.permute.xlu1 %1214  ;;  %v964_v55 = vsel %vm12034_vm15, %v12033_v13, %v8085_v19  ;;  %vm12036_vm15 = vcmp.ge.s32.totalorder %v8195_v29, 0 }
  0xef   :  { %v1237_v22 = vmax.f32 %v7989_v24, %v1215_v52  ;;  %v1177_v24 = vpop.permute.xlu2 %1176 }
  0xf0   :  { %7111 = vmatmul.msk.f32.gmra.mxu0 %vm11972_vm3, %v8116_v38  ;;  %7117 = vmatmul.msk.f32.gmra.mxu1 %vm11972_vm3, %v792_v54  ;;  %v1244_v18 = vmax.f32 %v1196_v2, %v1236_v6  ;;  %v1217_v54 = vpop.permute.xlu0 %1216  ;;  %v1198_v2 = vmax.f32 %v8113_v35, %v1177_v24  ;;  %v1023_v24 = vsel %vm500_vm9, %v8304_v44, 0.0 }
  0xf1   :  { %7125 = vmatmul.msk.f32.vlgmr.msra.gmra.mxu2 %vm11972_vm3, %v876_v41 }
  0xf2   :  { %v1260_v17 = vrot.slane %v1244_v18, 7 }
  0xf6   :  { %7140 = vmatmul.msk.f32.gmra.mxu3 %vm11972_vm3, %v8116_v38  ;;  %v1197_v38 = vmax.f32 %v7984_v23, %v1175_v63  ;;  %v878_v23 = vsel %vm11931_vm11, %v8210_v39, 0.0  ;;  %v1238_v39 = vmax.f32 %v8004_v36, %v1217_v54  ;;  %vm12035_vm11 = vcmp.lt.s32.totalorder %v8330_v14, 8  ;;  %v1293_v54 = vld [vmem:[%s11912_s1] sm:$0xf] }
  0xf7   :  { %v1022_v63 = vsel %vm499_vm6, %v8268_v31, 0.0  ;;  %v879_v36 = vsel %vm12036_vm15, %v8014_v42, 0.0  ;;  %7179 = vmatpush.msk.msrb.mxu2 %vm11973_vm0, %v1293_v54  ;;  %vm12038_vm15 = vcmask 1046528   ;;  %v1025_v54 = vsel %vm502_vm14, %v8367_v27, 0.0 }
  0xf8   :  { %7112 = vmatmul.msk.f32.gmra.mxu0 %vm11972_vm3, %v8144_v56  ;;  %7118 = vmatmul.msk.f32.gmra.mxu1 %vm11972_vm3, %v793_v58  ;;  %v1245_v1 = vmax.f32 %v1197_v38, %v1237_v22  ;;  %v1179_v58 = vpop.permute.xlu1 %1178  ;;  %v1246_v52 = vmax.f32 %v1198_v2, %v1238_v39  ;;  %v1219_v38 = vpop.permute.xlu2 %1218 }
  0xf9   :  { %7126 = vmatmul.msk.f32.gmra.mxu2 %vm11972_vm3, %v877_v59  ;;  %v795_v59 = vsel %vm12035_vm11, %v8367_v27, 0.0  ;;  %v1239_v42 = vmax.f32 %v8173_v11, %v1219_v38  ;;  %vm12037_vm11 = vcmp.ge.s32.totalorder %v8223_v37, 0 }
  0xfa   :  { %v1261_v6 = vrot.slane %v1245_v1, 7 }
  0xfc   :  { %v8525_v18 = vsel %vm11932_vm1, %v1260_v17, %v1261_v6 }
  0xfd   :  { %v1439_v22 = vrot.slane %v8525_v18, 2 }
  0xfe   :  { %7141 = vmatmul.msk.f32.gmra.mxu3 %vm11972_vm3, %v8144_v56  ;;  %v8498_v56 = vsel %vm11932_vm1, 0.0, %v1260_v17  ;;  %v796_v17 = vsel %vm504_vm10, %v8386_v50, 0.0 }
  0xff   :  { %v1437_v61 = vrot.slane %v8498_v56, 2 }
 0x100   :  { %7119 = vmatmul.msk.f32.gmra.mxu1 %vm11972_vm3, %v794_v33  ;;  %7145 = vmatmul.msk.f32.vlgmr.msra.gmra.mxu0 %vm11972_vm3, %v1021_v32  ;;  %v1263_v33 = vrot.slane %v1246_v52, 7  ;;  %v1199_v32 = vmax.f32 %v8036_v53, %v1179_v58  ;;  %v1221_v1 = vpop.permute.xlu1 %1220  ;;  %v880_v53 = vsel %vm12037_vm11, %v8017_v43, 0.0  ;;  %vm12039_vm11 = vcmp.ge.s32.totalorder %v8326_v28, 0 }
 0x101   :  { %7127 = vmatmul.msk.f32.gmra.mxu2 %vm11972_vm3, %v878_v23  ;;  %v1438_v35 = vsel %vm530_vm5, %v8088_v20, %v1437_v61  ;;  %v1181_v23 = vpop.permute.xlu0 %1180  ;;  %v8547_v11 = vsel %vm530_vm5, %v1437_v61, %v1439_v22  ;;  %v1183_v52 = vpop.permute.xlu2 %1182 }
 0x102   :  { %v1461_v31 = vsel %vm498_vm4, %v1438_v35, 0.0  ;;  %v8554_v44 = vsel %vm11932_vm1, %v1261_v6, %v1263_v33  ;;  %v1247_v13 = vmax.f32 %v1199_v32, %v1239_v42  ;;  %v1200_v58 = vmax.f32 %v8063_v4, %v1181_v23 }
 0x103   :  { %v1441_v43 = vrot.slane %v8554_v44, 2  ;;  %v797_v6 = vsel %vm11974_vm8, %v8151_v57, 0.0  ;;  %v881_v4 = vsel %vm288_vm13, %v8053_v60, 0.0  ;;  %v1201_v60 = vmax.f32 %v8277_v12, %v1183_v52 }
 0x104   :  { %v1265_v2 = vrot.slane %v1247_v13, 7 }
 0x105   :  { %v8501_v41 = vpop.f32.mrf.mxu1 }
 0x106   :  { %7142 = vmatmul.msk.f32.gmra.mxu3 %vm11972_vm3, %v964_v55  ;;  %v1462_v55 = vsel %vm499_vm6, %v8547_v11, 0.0  ;;  %v8582_v38 = vsel %vm11932_vm1, %v1263_v33, %v1265_v2 }
 0x107   :  { %v1443_v23 = vrot.slane %v8582_v38, 2 }
 0x108   :  { %7120 = vmatmul.msk.f32.gmra.mxu1 %vm11972_vm3, %v795_v59  ;;  %7146 = vmatmul.msk.f32.gmra.mxu0 %vm11972_vm3, %v1022_v63  ;;  %v1240_v59 = vmax.f32 %v8068_v5, %v1221_v1  ;;  %v1024_v63 = vsel %vm501_vm12, %v8343_v7, 0.0  ;;  %v8578_v5 = vsel %vm530_vm5, %v1439_v22, %v1441_v43  ;;  %v1296_v7 = vrot.slane %v8498_v56, 1 }
 0x109   :  { %7128 = vmatmul.msk.f32.gmra.mxu2 %vm11972_vm3, %v879_v36  ;;  %v1223_v35 = vpop.permute.xlu0 %1222  ;;  %v1463_v42 = vsel %vm500_vm9, %v8578_v5, 0.0  ;;  %v8603_v12 = vsel %vm530_vm5, %v1441_v43, %v1443_v23  ;;  %v1298_v43 = vrot.slane %v8525_v18, 1 }
 0x10a   :  { %v1241_v32 = vmax.f32 %v8108_v34, %v1223_v35  ;;  %v1297_v33 = vsel %vm12038_vm15, %v8085_v19, %v1296_v7  ;;  %v882_v34 = vsel %vm12039_vm11, %v8091_v21, 0.0  ;;  %v1464_v21 = vsel %vm501_vm12, %v8603_v12, 0.0 }
 0x10b   :  { %vm12040_vm15 = vcmp.lt.s32.totalorder %v8330_v14, 8  ;;  %vm12041_vm11 = vcmask 1046528  }
 0x10c   :  { %v1249_v13 = vmax.f32 %v1201_v60, %v1241_v32 }
 0x10d   :  { %v8530_v15 = vpop.f32.mrf.mxu1 }
 0x10e   :  { %7189 = vmatmul.msk.f32.vlgmr.msra.gmra.mxu3 %vm11972_vm3, %v1461_v31  ;;  %v1248_v31 = vmax.f32 %v1200_v58, %v1240_v59 }
 0x10f   :  { %v1185_v36 = vpop.permute.xlu1 %1184 }
 0x110   :  { %7121 = vmatmul.msk.f32.gmra.mxu1 %vm11972_vm3, %v796_v17  ;;  %7147 = vmatmul.msk.f32.gmra.mxu0 %vm11972_vm3, %v1023_v24  ;;  %v1267_v1 = vrot.slane %v1248_v31, 7  ;;  %v1202_v60 = vmax.f32 %v8178_v16, %v1185_v36  ;;  %v883_v16 = vsel %vm290_vm2, %v8098_v26, 0.0 }
 0x111   :  { %7129 = vmatmul.msk.f32.gmra.mxu2 %vm11972_vm3, %v880_v53  ;;  %v1187_v58 = vpop.permute.xlu0 %1186 }
 0x112   :  { %v8612_v27 = vsel %vm11932_vm1, %v1265_v2, %v1267_v1  ;;  %v1203_v52 = vmax.f32 %v8229_v48, %v1187_v58  ;;  %v1027_v58 = vsel %vm504_vm10, %v8151_v57, 0.0  ;;  %v12043_v57 = vmov 0.0  }
 0x113   :  { %v1445_v35 = vrot.slane %v8612_v27, 2 }
 0x114   :  { %v391_v61 = vpop.f32.mrf.mxu0 }
 0x115   :  { %v8561_v39 = vpop.f32.mrf.mxu1 }
 0x116   :  { %7190 = vmatmul.msk.f32.gmra.mxu3 %vm11972_vm3, %v1462_v55  ;;  %v7197_v55 = vld [vmem:[%s11912_s1 + $0xc] sm:$0xf] }
 0x117   :  { %v1227_v59 = vpop.permute.xlu1 %1226  ;;  %7198 = vmatpush.msk.msrb.mxu0 %vm11973_vm0, %v7197_v55 }
 0x118   :  { %7122 = vmatmul.msk.f32.gmra.mxu1 %vm11972_vm3, %v797_v6  ;;  %7148 = vmatmul.msk.f32.gmra.mxu0 %vm11972_vm3, %v1024_v63  ;;  %v1225_v6 = vpop.permute.xlu2 %1224  ;;  %v1269_v63 = vrot.slane %v1249_v13, 7  ;;  %v1243_v2 = vmax.f32 %v8234_v51, %v1227_v59  ;;  %v8641_v51 = vsel %vm530_vm5, %v1443_v23, %v1445_v35 }
 0x119   :  { %7130 = vmatmul.msk.f32.gmra.mxu2 %vm11972_vm3, %v881_v4  ;;  %v1242_v32 = vmax.f32 %v8310_v45, %v1225_v6 }
 0x11a   :  { %v8632_v48 = vsel %vm11932_vm1, %v1267_v1, %v1269_v63  ;;  %v1251_v45 = vmax.f32 %v1203_v52, %v1243_v2  ;;  %v1302_v2 = vrot.slane %v8582_v38, 1 }
 0x11b   :  { %v610_v22 = vpop.f32.mrf.mxu2  ;;  %v1250_v36 = vmax.f32 %v1202_v60, %v1242_v32  ;;  %v1447_v1 = vrot.slane %v8632_v48, 2 }
 0x11d   :  { %v394_v17 = vpop.f32.mrf.mxu0  ;;  %v458_v24 = vpop.f32.mrf.mxu1  ;;  %v1271_v23 = vrot.slane %v1250_v36, 7  ;;  %v8659_v6 = vsel %vm530_vm5, %v1445_v35, %v1447_v1 }
 0x11e   :  { %v459_v53 = vadd.f32 %v458_v24, %v391_v61  ;;  %7191 = vmatmul.msk.f32.gmra.mxu3 %vm11972_vm3, %v1463_v42  ;;  %v1026_v24 = vsel %vm12040_vm15, %v8386_v50, 0.0  ;;  %vm12042_vm15 = vmmov %vm12041_vm11 }
 0x120   :  { %7149 = vmatmul.msk.f32.gmra.mxu0 %vm11972_vm3, %v1025_v54  ;;  %7171 = vmatmul.msk.f32.vlgmr.msrb.gmra.mxu1 %vm11972_vm3, %v1297_v33  ;;  %v8608_v61 = vadd.f32 %v610_v22, %v459_v53  ;;  %v8629_v33 = vsel %vm12041_vm11, %v1296_v7, %v1298_v43  ;;  %v1465_v7 = vsel %vm502_vm14, %v8641_v51, 0.0  ;;  %v1273_v54 = vrot.slane %v1251_v45, 7 }
 0x121   :  { %7131 = vmatmul.msk.f32.gmra.mxu2 %vm11972_vm3, %v882_v34  ;;  %vm12044_vm11 = vcmp.lt.s32.totalorder %v8330_v14, 8 }
 0x122   :  { %v1466_v35 = vsel %vm12044_vm11, %v8659_v6, 0.0  ;;  %vm12046_vm11 = vmmov %vm12042_vm15 }
 0x124   :  { %v613_v4 = vpop.f32.mrf.mxu2 }
 0x125   :  { %v397_v31 = vpop.f32.mrf.mxu0  ;;  %v461_v42 = vpop.f32.mrf.mxu1 }
 0x126   :  { %v462_v22 = vadd.f32 %v461_v42, %v394_v17  ;;  %7192 = vmatmul.msk.f32.gmra.mxu3 %vm11972_vm3, %v1464_v21  ;;  %v1300_v17 = vrot.slane %v8554_v44, 1  ;;  %v8665_v21 = vsel %vm11932_vm1, %v1271_v23, %v1273_v54 }
 0x127   :  { %v1451_v42 = vrot.slane %v8665_v21, 2  ;;  %v11935_v32 = vrot.slane %v8665_v21, 1 }
 0x128   :  { %7150 = vmatmul.msk.f32.gmra.mxu0 %vm11972_vm3, %v1026_v24  ;;  %7172 = vmatmul.msk.f32.gmra.mxu1 %vm11972_vm3, %v8629_v33  ;;  %v8643_v50 = vadd.f32 %v613_v4, %v462_v22  ;;  %v8656_v59 = vsel %vm12042_vm15, %v1298_v43, %v1300_v17  ;;  %v7227_v4 = vld [vmem:[%s11912_s1 + $0x18] sm:$0xf]  ;;  %v8674_v43 = vsel %vm11932_vm1, %v1269_v63, %v1271_v23  ;;  %v12045_v24 = vrot.slane %v8098_v26, 2 }
 0x129   :  { %7132 = vmatmul.msk.f32.gmra.mxu2 %vm11972_vm3, %v883_v16  ;;  %7228 = vmatpush.msk.msrb.mxu3 %vm11973_vm0, %v7227_v4  ;;  %v1449_v45 = vrot.slane %v8674_v43, 2  ;;  %v8709_v23 = vsel %vm12046_vm11, %v1300_v17, %v1302_v2 }
 0x12a   :  { %v1019_v16 = vsel %vm530_vm5, %v12045_v24, %v8088_v20  ;;  %v1782_v20 = vsel %vm288_vm13, %v8674_v43, 0.0 }
 0x12b   :  { %v1028_v26 = vsel %vm11974_vm8, %v1019_v16, 0.0  ;;  %v8722_v4 = vsel %vm530_vm5, %v1447_v1, %v1449_v45 }
 0x12c   :  { %v616_v53 = vpop.f32.mrf.mxu2  ;;  %v1467_v17 = vsel %vm504_vm10, %v8722_v4, 0.0 }
 0x12d   :  { %v400_v13 = vpop.f32.mrf.mxu0  ;;  %v464_v34 = vpop.f32.mrf.mxu1 }
 0x12e   :  { %v465_v55 = vadd.f32 %v464_v34, %v397_v31  ;;  %7193 = vmatmul.msk.f32.gmra.mxu3 %vm11972_vm3, %v1465_v7  ;;  %v8682_v31 = vsel %vm11932_vm1, %v1273_v54, 0.0  ;;  %vm12049_vm1 = vcmp.ge.s32.totalorder %v8258_v3, 0 }
 0x12f   :  { %v11933_v60 = vrot.slane %v8682_v31, 2  ;;  %v11934_v63 = vrot.slane %v8682_v31, 1 }
 0x130   :  { %7151 = vmatmul.msk.f32.gmra.mxu0 %vm11972_vm3, %v1027_v58  ;;  %7173 = vmatmul.msk.f32.gmra.mxu1 %vm11972_vm3, %v8656_v59  ;;  %v8670_v52 = vadd.f32 %v616_v53, %v465_v55  ;;  %v8711_v55 = vpop.f32.mrf.mxu3 }
 0x131   :  { %1412 = vmatmul.f32.vlgmr.msrb.gmra.mxu2 %v12043_v57  ;;  %v8698_v53 = vsel %vm12042_vm15, %v11935_v32, %v11934_v63  ;;  %v8703_v54 = vsel %vm530_vm5, %v1451_v42, %v11933_v60  ;;  %vm12047_vm15 = vmmov %vm12046_vm11  ;;  %vm12048_vm11 = vcmp.ge.s32.totalorder %v8405_v46, 0 }
 0x132   :  { %v1546_v1 = vsel %vm12048_vm11, %v8498_v56, 0.0 }
 0x134   :  { %v619_v22 = vpop.f32.mrf.mxu2 }
 0x135   :  { %v403_v36 = vpop.f32.mrf.mxu0  ;;  %v467_v7 = vpop.f32.mrf.mxu1 }
 0x136   :  { %v468_v34 = vadd.f32 %v467_v7, %v400_v13  ;;  %7194 = vmatmul.msk.f32.gmra.mxu3 %vm11972_vm3, %v1466_v35  ;;  %v1286_v13 = vsel %vm284_vm7, %v8498_v56, 0.0  ;;  %v1304_v35 = vrot.slane %v8612_v27, 1  ;;  %v7207_v56 = vld [vmem:[%s11912_s1 + $0x10] sm:$0xf] }
 0x137   :  { %7208 = vmatpush.msk.msra.mxu1 %vm11973_vm0, %v7207_v56 }
 0x138   :  { %v8713_v58 = vadd.f32 %v619_v22, %v468_v34  ;;  %7152 = vmatmul.msk.f32.gmra.mxu0 %vm11972_vm3, %v1028_v26  ;;  %7174 = vmatmul.msk.f32.gmra.mxu1 %vm11972_vm3, %v8709_v23  ;;  %v8733_v34 = vsel %vm12047_vm15, %v1302_v2, %v1304_v35  ;;  %v8753_v2 = vpop.f32.mrf.mxu3 }
 0x139   :  { %7180 = vmatmul.msk.f32.gmra.mxu2 %vm11972_vm3, %v1286_v13  ;;  %v8747_v13 = vsel %vm530_vm5, %v1449_v45, %v1451_v42 }
 0x13c   :  { %v622_v22 = vpop.f32.mrf.mxu2 }
 0x13d   :  { %v470_v24 = vpop.f32.mrf.mxu1  ;;  %v8729_v16 = vpop.f32.mrf.mxu0 }
 0x13e   :  { %v471_v7 = vadd.f32 %v470_v24, %v403_v36  ;;  %7195 = vmatmul.msk.f32.gmra.mxu3 %vm11972_vm3, %v1467_v17  ;;  %v1287_v36 = vsel %vm12049_vm1, %v8525_v18, 0.0  ;;  %v1468_v17 = vsel %vm11974_vm8, %v8747_v13, 0.0  ;;  %vm12050_vm1 = vmmov %vm12047_vm15  ;;  %vm12051_vm15 = vcmp.ge.s32.totalorder %v8195_v29, 0 }
 0x140   :  { %v8738_v26 = vadd.f32 %v622_v22, %v471_v7  ;;  %7175 = vmatmul.msk.f32.gmra.mxu1 %vm11972_vm3, %v8733_v34  ;;  %7199 = vmatmul.msk.f32.vlgmr.msrb.gmra.mxu0 %vm11972_vm3, %v1546_v1  ;;  %v1306_v22 = vrot.slane %v8632_v48, 1 }
 0x141   :  { %7181 = vmatmul.msk.f32.gmra.mxu2 %vm11972_vm3, %v1287_v36  ;;  %v1547_v36 = vsel %vm284_vm7, %v8525_v18, 0.0 }
 0x142   :  { %v8765_v1 = vsel %vm12050_vm1, %v1304_v35, %v1306_v22  ;;  %v1308_v35 = vrot.slane %v8674_v43, 1 }
 0x144   :  { %v625_v24 = vpop.f32.mrf.mxu2 }
 0x145   :  { %v473_v7 = vpop.f32.mrf.mxu1  ;;  %v8760_v42 = vpop.f32.mrf.mxu0 }
 0x146   :  { %v474_v45 = vadd.f32 %v473_v7, %v8501_v41  ;;  %7196 = vmatmul.msk.f32.gmra.mxu3 %vm11972_vm3, %v1468_v17  ;;  %v1288_v41 = vsel %vm12051_vm15, %v8554_v44, 0.0  ;;  %v8780_v17 = vpop.f32.mrf.mxu3  ;;  %vm12052_vm15 = vcmp.ge.s32.totalorder %v8258_v3, 0 }
 0x148   :  { %v8770_v56 = vadd.f32 %v625_v24, %v474_v45  ;;  %7176 = vmatmul.msk.f32.gmra.mxu1 %vm11972_vm3, %v8765_v1  ;;  %7200 = vmatmul.msk.f32.gmra.mxu0 %vm11972_vm3, %v1547_v36  ;;  %v1777_v24 = vsel %vm12048_vm11, %v8525_v18, 0.0  ;;  %v8790_v36 = vsel %vm12050_vm1, %v1306_v22, %v1308_v35  ;;  %vm12053_vm11 = vcmp.ge.s32.totalorder %v8223_v37, 0 }
 0x149   :  { %7182 = vmatmul.msk.f32.gmra.mxu2 %vm11972_vm3, %v1288_v41  ;;  %v1548_v41 = vsel %vm12052_vm15, %v8554_v44, 0.0  ;;  %v1289_v18 = vsel %vm12053_vm11, %v8582_v38, 0.0  ;;  %vm12055_vm15 = vcmp.ge.s32.totalorder %v8195_v29, 0  ;;  %vm12056_vm11 = vcmp.ge.s32.totalorder %v8258_v3, 0 }
 0x14c   :  { %v628_v7 = vpop.f32.mrf.mxu2 }
 0x14d   :  { %v476_v60 = vpop.f32.mrf.mxu1  ;;  %v8782_v63 = vpop.f32.mrf.mxu0 }
 0x14e   :  { %v477_v45 = vadd.f32 %v476_v60, %v8530_v15  ;;  %7229 = vmatmul.msk.f32.vlgmr.msrb.gmra.mxu3 %vm11972_vm3, %v1777_v24  ;;  %v7217_v15 = vld [vmem:[%s11912_s1 + $0x14] sm:$0xf]  ;;  %v1778_v24 = vsel %vm284_vm7, %v8554_v44, 0.0  ;;  %v1290_v44 = vsel %vm288_vm13, %v8612_v27, 0.0 }
 0x14f   :  { %7218 = vmatpush.msk.msra.mxu2 %vm11973_vm0, %v7217_v15  ;;  %v1549_v15 = vsel %vm12055_vm15, %v8582_v38, 0.0  ;;  %vm12058_vm15 = vcmp.ge.s32.totalorder %v8326_v28, 0 }
 0x150   :  { %v8795_v32 = vadd.f32 %v628_v7, %v477_v45  ;;  %7177 = vmatmul.msk.f32.gmra.mxu1 %vm11972_vm3, %v8790_v36  ;;  %7201 = vmatmul.msk.f32.gmra.mxu0 %vm11972_vm3, %v1548_v41  ;;  %v8813_v45 = vpop.f32.mrf.mxu3  ;;  %v1552_v8 = vsel %vm12058_vm15, %v8674_v43, 0.0 }
 0x151   :  { %7183 = vmatmul.msk.f32.gmra.mxu2 %vm11972_vm3, %v1289_v18  ;;  %v12054_v18 = vrot.slane %v8665_v21, 1 }
 0x153   :  { %v8820_v46 = vsel %vm12050_vm1, %v1308_v35, %v12054_v18  ;;  %vm12057_vm1 = vcmp.ge.s32.totalorder %v8223_v37, 0  ;;  %v1291_v18 = vsel %vm12058_vm15, %v8632_v48, 0.0 }
 0x154   :  { %v631_v60 = vpop.f32.mrf.mxu2  ;;  %v1781_v3 = vsel %vm12057_vm1, %v8632_v48, 0.0 }
 0x155   :  { %v479_v22 = vpop.f32.mrf.mxu1  ;;  %v8808_v7 = vpop.f32.mrf.mxu0 }
 0x156   :  { %v480_v41 = vadd.f32 %v479_v22, %v8561_v39  ;;  %7230 = vmatmul.msk.f32.gmra.mxu3 %vm11972_vm3, %v1778_v24  ;;  %v1550_v24 = vsel %vm12057_vm1, %v8612_v27, 0.0  ;;  %vm1116_vm1 = vcmask 64512  }
 0x158   :  { %v8825_v57 = vadd.f32 %v631_v60, %v480_v41  ;;  %7178 = vmatmul.msk.f32.gmra.mxu1 %vm11972_vm3, %v8820_v46  ;;  %7202 = vmatmul.msk.f32.gmra.mxu0 %vm11972_vm3, %v1549_v15  ;;  %v1779_v60 = vsel %vm12056_vm11, %v8582_v38, 0.0  ;;  %v8843_v41 = vpop.f32.mrf.mxu3  ;;  %v7237_v38 = vld [vmem:[%s11912_s1 + $0x1c] sm:$0xf]  ;;  %vm12059_vm11 = vcmp.ge.s32.totalorder %v8195_v29, 0 }
 0x159   :  { %7184 = vmatmul.msk.f32.gmra.mxu2 %vm11972_vm3, %v1290_v44  ;;  %7238 = vmatpush.msk.msra.mxu0 %vm11973_vm0, %v7237_v38 }
 0x15c   :  { %v696_v39 = vpop.f32.mrf.mxu2 }
 0x15d   :  { %v8834_v35 = vpop.f32.mrf.mxu0  ;;  %v844_v22 = vpop.f32.mrf.mxu1 }
 0x15e   :  { %7231 = vmatmul.msk.f32.gmra.mxu3 %vm11972_vm3, %v1779_v60 }
 0x160   :  { %7203 = vmatmul.msk.f32.gmra.mxu0 %vm11972_vm3, %v1550_v24  ;;  %7209 = vmatmul.msk.f32.vlgmr.msra.gmra.mxu1 %vm11972_vm3, %v8629_v33  ;;  %v1780_v33 = vsel %vm12059_vm11, %v8612_v27, 0.0  ;;  %v1551_v24 = vsel %vm288_vm13, %v8632_v48, 0.0  ;;  %v987_v38 = vpop.f32.mrf.mxu3  ;;  %vm12060_vm11 = vmmov %vm12058_vm15  ;;  %vm12061_vm15 = vcmp.lt.s32.totalorder %v8330_v14, 8 }
 0x161   :  { %7185 = vmatmul.msk.f32.gmra.mxu2 %vm11972_vm3, %v1291_v18  ;;  %v1292_v18 = vsel %vm290_vm2, %v8674_v43, 0.0 }
 0x164   :  { %v699_v15 = vpop.f32.mrf.mxu2 }
 0x165   :  { %v8856_v44 = vpop.f32.mrf.mxu0  ;;  %v847_v60 = vpop.f32.mrf.mxu1 }
 0x166   :  { %7232 = vmatmul.msk.f32.gmra.mxu3 %vm11972_vm3, %v1780_v33 }
 0x168   :  { %7204 = vmatmul.msk.f32.gmra.mxu0 %vm11972_vm3, %v1551_v24  ;;  %7210 = vmatmul.msk.f32.gmra.mxu1 %vm11972_vm3, %v8656_v59  ;;  %v720_v24 = vadd.f32 %v696_v39, %v8608_v61  ;;  %v990_v61 = vpop.f32.mrf.mxu3 }
 0x169   :  { %7186 = vmatmul.msk.f32.gmra.mxu2 %vm11972_vm3, %v1292_v18  ;;  %v1692_v18 = vsel %vm498_vm4, %v8547_v11, 0.0  ;;  %v721_v11 = vadd.f32 %v699_v15, %v8643_v50 }
 0x16a   :  { %v779_v48 = vadd.f32 %v8729_v16, %v720_v24  ;;  %v1693_v16 = vsel %vm499_vm6, %v8578_v5, 0.0 }
 0x16b   :  { %v780_v50 = vadd.f32 %v8760_v42, %v721_v11 }
 0x16c   :  { %v702_v29 = vpop.f32.mrf.mxu2  ;;  %v868_v19 = vadd.f32 %v844_v22, %v779_v48  ;;  %v1783_v48 = vsel %vm12060_vm11, %v8665_v21, 0.0  ;;  %vm12064_vm11 = vcmask 1046528  }
 0x16d   :  { %v8872_v27 = vpop.f32.mrf.mxu0  ;;  %v850_v33 = vpop.f32.mrf.mxu1 }
 0x16e   :  { %7233 = vmatmul.msk.f32.gmra.mxu3 %vm11972_vm3, %v1781_v3 }
 0x170   :  { %7205 = vmatmul.msk.f32.gmra.mxu0 %vm11972_vm3, %v1552_v8  ;;  %7211 = vmatmul.msk.f32.gmra.mxu1 %vm11972_vm3, %v8709_v23  ;;  %v1553_v8 = vsel %vm290_vm2, %v8665_v21, 0.0  ;;  %v1694_v21 = vsel %vm500_vm9, %v8603_v12, 0.0 }
 0x171   :  { %7219 = vmatmul.msk.f32.vlgmr.msra.gmra.mxu2 %vm11972_vm3, %v1692_v18 }
 0x174   :  { %v930_v39 = vpop.f32.mrf.mxu2 }
 0x175   :  { %v8890_v3 = vpop.f32.mrf.mxu0  ;;  %v853_v37 = vpop.f32.mrf.mxu1  ;;  %v954_v18 = vadd.f32 %v930_v39, %v868_v19 }
 0x176   :  { %7234 = vmatmul.msk.f32.gmra.mxu3 %vm11972_vm3, %v1782_v20  ;;  %v8910_v20 = vld [vmem:[%s11913_s2] sm:$0x7]  ;;  %v993_v39 = vpop.f32.mrf.mxu3  ;;  %s7820_s2 = smov 120  }
 0x177   :  { %v1011_v19 = vadd.f32 %v987_v38, %v954_v18  ;;  %v8914_v22 = vperm.slane %v8910_v20, 0  ;;  %v1784_v18 = vsel %vm290_vm2, %v8682_v31, 0.0 }
 0x178   :  { %7206 = vmatmul.msk.f32.gmra.mxu0 %vm11972_vm3, %v1553_v8  ;;  %7212 = vmatmul.msk.f32.gmra.mxu1 %vm11972_vm3, %v8733_v34  ;;  %v869_v8 = vadd.f32 %v847_v60, %v780_v50 }
 0x179   :  { %7220 = vmatmul.msk.f32.gmra.mxu2 %vm11972_vm3, %v1693_v16  ;;  %v722_v16 = vadd.f32 %v702_v29, %v8670_v52 }
 0x17b   :  { %v781_v29 = vadd.f32 %v8782_v63, %v722_v16 }
 0x17c   :  { %v933_v43 = vpop.f32.mrf.mxu2 }
 0x17d   :  { %v856_v15 = vpop.f32.mrf.mxu1  ;;  %v1075_v24 = vpop.f32.mrf.mxu0  ;;  %v955_v42 = vadd.f32 %v933_v43, %v869_v8  ;;  %v870_v50 = vadd.f32 %v850_v33, %v781_v29  ;;  %v723_v33 = vadd.f32 %v8711_v55, %v8713_v58  ;;  %v1696_v55 = vsel %vm502_vm14, %v8659_v6, 0.0 }
 0x17e   :  { %v1099_v10 = vadd.f32 %v1075_v24, %v1011_v19  ;;  %7235 = vmatmul.msk.f32.gmra.mxu3 %vm11972_vm3, %v1783_v48  ;;  %v996_v63 = vpop.f32.mrf.mxu3  ;;  %v724_v58 = vadd.f32 %v8753_v2, %v8738_v26  ;;  %v1697_v26 = vsel %vm12061_vm15, %v8722_v4, 0.0  ;;  %v725_v2 = vadd.f32 %v8780_v17, %v8770_v56 }
 0x17f   :  { %v1012_v60 = vadd.f32 %v990_v61, %v955_v42  ;;  %v1695_v61 = vsel %vm501_vm12, %v8641_v51, 0.0  ;;  %v782_v42 = vadd.f32 %v8808_v7, %v723_v33 }
 0x180   :  { %v1108_v38 = vadd.f32 %v8914_v22, %v1099_v10  ;;  %7213 = vmatmul.msk.f32.gmra.mxu1 %vm11972_vm3, %v8765_v1  ;;  %7239 = vmatmul.msk.f32.vlgmr.msra.gmra.mxu0 %vm11972_vm3, %v8656_v59  ;;  %v7247_v10 = vld [vmem:[%s11912_s1 + $0x20] sm:$0xf] }
 0x181   :  { %7221 = vmatmul.msk.f32.gmra.mxu2 %vm11972_vm3, %v1694_v21  ;;  %7248 = vmatpush.msk.msrb.mxu1 %vm11973_vm0, %v7247_v10 }
 0x182   :  { %1117 = vst.msk [vmem:[#allocation2] sm:$0xff] %vm1116_vm1, %v1108_v38  ;;  %v1125_v48 = vsel %vm1116_vm1, %v1108_v38, 0.0  ;;  %v783_v38 = vadd.f32 %v8834_v35, %v724_v58 }
 0x184   :  { %v936_v52 = vpop.f32.mrf.mxu2 }
 0x185   :  { %v859_v11 = vpop.f32.mrf.mxu1  ;;  %v1078_v59 = vpop.f32.mrf.mxu0  ;;  %v956_v19 = vadd.f32 %v936_v52, %v870_v50  ;;  %v871_v52 = vadd.f32 %v853_v37, %v782_v42 }
 0x186   :  { %v1100_v43 = vadd.f32 %v1078_v59, %v1012_v60  ;;  %7236 = vmatmul.msk.f32.gmra.mxu3 %vm11972_vm3, %v1784_v18  ;;  %v999_v37 = vpop.f32.mrf.mxu3 }
 0x188   :  { %v1109_v24 = vadd.f32 %v8914_v22, %v1100_v43  ;;  %7214 = vmatmul.msk.f32.gmra.mxu1 %vm11972_vm3, %v8790_v36  ;;  %7240 = vmatmul.msk.f32.gmra.mxu0 %vm11972_vm3, %v8709_v23  ;;  %v1013_v23 = vadd.f32 %v993_v39, %v956_v19 }
 0x189   :  { %7222 = vmatmul.msk.f32.gmra.mxu2 %vm11972_vm3, %v1695_v61 }
 0x18a   :  { %1118 = vst.msk [vmem:[#allocation2 + $0x8] sm:$0xff] %vm1116_vm1, %v1109_v24  ;;  %v1126_v8 = vsel %vm1116_vm1, %v1109_v24, 0.0  ;;  %v872_v24 = vadd.f32 %v856_v15, %v783_v38  ;;  %v1921_v38 = vsel %vm499_vm6, %v8603_v12, 0.0 }
 0x18b   :  { %v1127_v16 = vadd.f32 %v1126_v8, %v1125_v48 }
 0x18c   :  { %v939_v21 = vpop.f32.mrf.mxu2 }
 0x18d   :  { %v862_v29 = vpop.f32.mrf.mxu1  ;;  %v1081_v10 = vpop.f32.mrf.mxu0  ;;  %v957_v59 = vadd.f32 %v939_v21, %v871_v52  ;;  %v1920_v52 = vsel %vm498_vm4, %v8578_v5, 0.0 }
 0x18e   :  { %v1101_v60 = vadd.f32 %v1081_v10, %v1013_v23  ;;  %v1002_v8 = vpop.f32.mrf.mxu3 }
 0x18f   :  { %v1014_v43 = vadd.f32 %v996_v63, %v957_v59  ;;  %v784_v63 = vadd.f32 %v8856_v44, %v725_v2  ;;  %v1698_v44 = vsel %vm504_vm10, %v8747_v13, 0.0 }
 0x190   :  { %v1110_v18 = vadd.f32 %v8914_v22, %v1101_v60  ;;  %7215 = vmatmul.msk.f32.gmra.mxu1 %vm11972_vm3, %v8820_v46  ;;  %7241 = vmatmul.msk.f32.gmra.mxu0 %vm11972_vm3, %v8733_v34 }
 0x191   :  { %7223 = vmatmul.msk.f32.gmra.mxu2 %vm11972_vm3, %v1696_v55  ;;  %v873_v23 = vadd.f32 %v859_v11, %v784_v63  ;;  %v726_v11 = vadd.f32 %v8813_v45, %v8795_v32 }
 0x192   :  { %1119 = vst.msk [vmem:[#allocation2 + $0x10] sm:$0xff] %vm1116_vm1, %v1110_v18  ;;  %v1128_v7 = vsel %vm1116_vm1, %v1110_v18, 0.0 }
 0x193   :  { %v1129_v39 = vadd.f32 %v1128_v7, %v1127_v16  ;;  %v785_v59 = vadd.f32 %v8872_v27, %v726_v11  ;;  %v1699_v27 = vsel %vm11974_vm8, %v8703_v54, 0.0 }
 0x194   :  { %v942_v50 = vpop.f32.mrf.mxu2 }
 0x195   :  { %v865_v34 = vpop.f32.mrf.mxu1  ;;  %v1084_v19 = vpop.f32.mrf.mxu0  ;;  %v958_v33 = vadd.f32 %v942_v50, %v872_v24  ;;  %v874_v7 = vadd.f32 %v862_v29, %v785_v59  ;;  %v727_v29 = vadd.f32 %v8843_v41, %v8825_v57 }
 0x196   :  { %v1102_v61 = vadd.f32 %v1084_v19, %v1014_v43 }
 0x197   :  { %v1015_v42 = vadd.f32 %v999_v37, %v958_v33  ;;  %v1005_v37 = vpop.f32.mrf.mxu3  ;;  %v786_v43 = vadd.f32 %v8890_v3, %v727_v29 }
 0x198   :  { %v1111_v48 = vadd.f32 %v8914_v22, %v1102_v61  ;;  %7216 = vmatmul.msk.f32.gmra.mxu1 %vm11972_vm3, %v8698_v53  ;;  %7242 = vmatmul.msk.f32.gmra.mxu0 %vm11972_vm3, %v8765_v1 }
 0x199   :  { %7224 = vmatmul.msk.f32.gmra.mxu2 %vm11972_vm3, %v1697_v26  ;;  %v875_v33 = vadd.f32 %v865_v34, %v786_v43  ;;  %v1922_v26 = vsel %vm500_vm9, %v8641_v51, 0.0 }
 0x19a   :  { %1120 = vst.msk [vmem:[#allocation2 + $0x18] sm:$0xff] %vm1116_vm1, %v1111_v48  ;;  %v1130_v35 = vsel %vm1116_vm1, %v1111_v48, 0.0 }
 0x19b   :  { %v1131_v15 = vadd.f32 %v1130_v35, %v1129_v39 }
 0x19c   :  { %v945_v16 = vpop.f32.mrf.mxu2 }
 0x19d   :  { %v1087_v1 = vpop.f32.mrf.mxu0  ;;  %v8983_v21 = vpop.f32.mrf.mxu1  ;;  %v959_v56 = vadd.f32 %v945_v16, %v873_v23  ;;  %v12062_v16 = vld [vmem:[#allocation5_spill] sm:$0xff] }
 0x19e   :  { %v1103_v10 = vadd.f32 %v1087_v1, %v1015_v42  ;;  %v12063_v42 = vrot.slane %v8682_v31, 1 }
 0x19f   :  { %v1008_v2 = vpop.f32.mrf.mxu3 }
 0x1a0   :  { %v1112_v17 = vadd.f32 %v8914_v22, %v1103_v10  ;;  %7243 = vmatmul.msk.f32.gmra.mxu0 %vm11972_vm3, %v8790_v36  ;;  %7249 = vmatmul.msk.f32.vlgmr.msrb.gmra.mxu1 %vm11972_vm3, %v1920_v52  ;;  %v1016_v36 = vadd.f32 %v1002_v8, %v959_v56  ;;  %v1863_v1 = vsel %vm12064_vm11, %v12063_v42, %v12062_v16 }
 0x1a1   :  { %7225 = vmatmul.msk.f32.gmra.mxu2 %vm11972_vm3, %v1698_v44 }
 0x1a2   :  { %1121 = vst.msk [vmem:[#allocation2 + $0x20] sm:$0xff] %vm1116_vm1, %v1112_v17  ;;  %v1132_v5 = vsel %vm1116_vm1, %v1112_v17, 0.0 }
 0x1a3   :  { %v1133_v60 = vadd.f32 %v1132_v5, %v1131_v15 }
 0x1a4   :  { %v948_v18 = vpop.f32.mrf.mxu2 }
 0x1a5   :  { %v1090_v55 = vpop.f32.mrf.mxu0  ;;  %v9001_v58 = vpop.f32.mrf.mxu1  ;;  %v960_v32 = vadd.f32 %v948_v18, %v874_v7  ;;  %v1925_v18 = vsel %vm12061_vm15, %v8747_v13, 0.0 }
 0x1a6   :  { %v1104_v39 = vadd.f32 %v1090_v55, %v1016_v36 }
 0x1a7   :  { %v1514_v10 = vpop.f32.mrf.mxu3 }
 0x1a8   :  { %v1113_v45 = vadd.f32 %v8914_v22, %v1104_v39  ;;  %7244 = vmatmul.msk.f32.gmra.mxu0 %vm11972_vm3, %v8820_v46  ;;  %7250 = vmatmul.msk.f32.gmra.mxu1 %vm11972_vm3, %v1921_v38  ;;  %v1017_v46 = vadd.f32 %v1005_v37, %v960_v32  ;;  %v12065_v38 = vld [vmem:[#allocation6_spill] sm:$0xff]  ;;  %v12066_v32 = vrot.slane %v8682_v31, 2 }
 0x1a9   :  { %7226 = vmatmul.msk.f32.gmra.mxu2 %vm11972_vm3, %v1699_v27 }
 0x1aa   :  { %1122 = vst.msk [vmem:[#allocation2 + $0x28] sm:$0xff] %vm1116_vm1, %v1113_v45  ;;  %v1134_v12 = vsel %vm1116_vm1, %v1113_v45, 0.0  ;;  %v1918_v45 = vsel %vm530_vm5, %v12066_v32, %v12065_v38 }
 0x1ab   :  { %v1135_v50 = vadd.f32 %v1134_v12, %v1133_v60  ;;  %v1927_v27 = vsel %vm11974_vm8, %v1918_v45, 0.0 }
 0x1ac   :  { %v951_v19 = vpop.f32.mrf.mxu2 }
 0x1ad   :  { %v1093_v24 = vpop.f32.mrf.mxu0  ;;  %v9019_v61 = vpop.f32.mrf.mxu1  ;;  %v961_v57 = vadd.f32 %v951_v19, %v875_v33 }
 0x1ae   :  { %v1105_v48 = vadd.f32 %v1093_v24, %v1017_v46 }
 0x1af   :  { %v1018_v15 = vadd.f32 %v1008_v2, %v961_v57  ;;  %v1517_v5 = vpop.f32.mrf.mxu3 }
 0x1b0   :  { %v1114_v41 = vadd.f32 %v8914_v22, %v1105_v48  ;;  %7245 = vmatmul.msk.f32.gmra.mxu0 %vm11972_vm3, %v8698_v53  ;;  %7251 = vmatmul.msk.f32.gmra.mxu1 %vm11972_vm3, %v1922_v26  ;;  %v1923_v53 = vsel %vm501_vm12, %v8659_v6, 0.0  ;;  %v1924_v6 = vsel %vm502_vm14, %v8722_v4, 0.0  ;;  %v1926_v4 = vsel %vm504_vm10, %v8703_v54, 0.0 }
 0x1b2   :  { %1123 = vst.msk [vmem:[#allocation2 + $0x30] sm:$0xff] %vm1116_vm1, %v1114_v41  ;;  %v1136_v3 = vsel %vm1116_vm1, %v1114_v41, 0.0 }
 0x1b3   :  { %v1137_v35 = vadd.f32 %v1136_v3, %v1135_v50 }
 0x1b4   :  { %v1413_v34 = vpop.f32.mrf.mxu2 }
 0x1b5   :  { %v1096_v63 = vpop.f32.mrf.mxu0  ;;  %v9030_v8 = vpop.f32.mrf.mxu1 }
 0x1b6   :  { %v1106_v51 = vadd.f32 %v1096_v63, %v1018_v15 }
 0x1b7   :  { %v1520_v37 = vpop.f32.mrf.mxu3 }
 0x1b8   :  { %v1115_v23 = vadd.f32 %v8914_v22, %v1106_v51  ;;  %7246 = vmatmul.msk.f32.gmra.mxu0 %vm11972_vm3, %v1863_v1  ;;  %7252 = vmatmul.msk.f32.gmra.mxu1 %vm11972_vm3, %v1923_v53 }
 0x1ba   :  { %1124 = vst.msk [vmem:[#allocation2 + $0x38] sm:$0xff] %vm1116_vm1, %v1115_v23  ;;  %v1138_v52 = vsel %vm1116_vm1, %v1115_v23, 0.0  ;;  %v1414_v23 = vadd.f32 %v1413_v34, %v8983_v21 }
 0x1bb   :  { %v9044_v56 = vadd.f32 %v1138_v52, %v1137_v35 }
 0x1bc   :  { %v1416_v11 = vpop.f32.mrf.mxu2 }
 0x1bd   :  { %v9046_v17 = vpop.f32.mrf.mxu1  ;;  %v1599_v44 = vpop.f32.mrf.mxu0  ;;  %v1417_v32 = vadd.f32 %v1416_v11, %v9001_v58 }
 0x1bf   :  { %v1523_v29 = vpop.f32.mrf.mxu3  ;;  %v1539_v14 = vadd.f32 %v1517_v5, %v1417_v32 }
 0x1c0   :  { %7253 = vmatmul.msk.f32.gmra.mxu1 %vm11972_vm3, %v1924_v6 }
 0x1c4   :  { %v1419_v36 = vpop.f32.mrf.mxu2 }
 0x1c5   :  { %v9052_v60 = vpop.f32.mrf.mxu1  ;;  %v1602_v59 = vpop.f32.mrf.mxu0  ;;  %v1420_v30 = vadd.f32 %v1419_v36, %v9019_v61 }
 0x1c6   :  { %v1624_v40 = vadd.f32 %v1602_v59, %v1539_v14 }
 0x1c7   :  { %v9075_v43 = vpop.f32.mrf.mxu3  ;;  %v1540_v58 = vadd.f32 %v1520_v37, %v1420_v30 }
 0x1c8   :  { %7254 = vmatmul.msk.f32.gmra.mxu1 %vm11972_vm3, %v1925_v18  ;;  %v1538_v18 = vadd.f32 %v1514_v10, %v1414_v23 }
 0x1cc   :  { %v1422_v39 = vpop.f32.mrf.mxu2 }
 0x1cd   :  { %v9058_v55 = vpop.f32.mrf.mxu1  ;;  %v1605_v7 = vpop.f32.mrf.mxu0 }
 0x1cf   :  { %v9081_v24 = vpop.f32.mrf.mxu3 }
 0x1d0   :  { %7255 = vmatmul.msk.f32.gmra.mxu1 %vm11972_vm3, %v1926_v4  ;;  %v1623_v4 = vadd.f32 %v1599_v44, %v1538_v18 }
 0x1d4   :  { %v9073_v50 = vpop.f32.mrf.mxu2 }
 0x1d5   :  { %v9068_v13 = vpop.f32.mrf.mxu1  ;;  %v1608_v12 = vpop.f32.mrf.mxu0 }
 0x1d7   :  { %v9087_v57 = vpop.f32.mrf.mxu3 }
 0x1d8   :  { %7256 = vmatmul.msk.f32.gmra.mxu1 %vm11972_vm3, %v1927_v27 }
 0x1dc   :  { %v9079_v31 = vpop.f32.mrf.mxu2 }
 0x1dd   :  { %v1657_v54 = vpop.f32.mrf.mxu1  ;;  %v9077_v19 = vpop.f32.mrf.mxu0 }
 0x1de   :  { %v1681_v27 = vadd.f32 %v1657_v54, %v1623_v4  ;;  %v1625_v54 = vadd.f32 %v1605_v7, %v1540_v58  ;;  %v1426_v7 = vadd.f32 %v9073_v50, %v9046_v17  ;;  %v1429_v17 = vadd.f32 %v9079_v31, %v9052_v60 }
 0x1df   :  { %v9095_v15 = vpop.f32.mrf.mxu3 }
 0x1e4   :  { %v9085_v26 = vpop.f32.mrf.mxu2 }
 0x1e5   :  { %v1660_v46 = vpop.f32.mrf.mxu1  ;;  %v9083_v33 = vpop.f32.mrf.mxu0 }
 0x1e6   :  { %v1682_v21 = vadd.f32 %v1660_v46, %v1624_v40 }
 0x1e7   :  { %v1830_v1 = vpop.f32.mrf.mxu3 }
 0x1ec   :  { %v9091_v3 = vpop.f32.mrf.mxu2 }
 0x1ed   :  { %v1663_v48 = vpop.f32.mrf.mxu1  ;;  %v9089_v41 = vpop.f32.mrf.mxu0 }
 0x1ee   :  { %v1683_v61 = vadd.f32 %v1663_v48, %v1625_v54 }
 0x1ef   :  { %v1833_v45 = vpop.f32.mrf.mxu3 }
 0x1f4   :  { %v1745_v51 = vpop.f32.mrf.mxu2 }
 0x1f5   :  { %v1666_v2 = vpop.f32.mrf.mxu1  ;;  %v9097_v63 = vpop.f32.mrf.mxu0  ;;  %v1769_v47 = vadd.f32 %v1745_v51, %v1681_v27 }
 0x1f7   :  { %v1854_v25 = vadd.f32 %v1830_v1, %v1769_v47  ;;  %v1836_v9 = vpop.f32.mrf.mxu3  ;;  %v1423_v47 = vadd.f32 %v1422_v39, %v9030_v8 }
 0x1f9   :  { %v1541_v36 = vadd.f32 %v1523_v29, %v1423_v47 }
 0x1fb   :  { %v1626_v46 = vadd.f32 %v1608_v12, %v1541_v36 }
 0x1fc   :  { %v1748_v6 = vpop.f32.mrf.mxu2 }
 0x1fd   :  { %v9093_v35 = vpop.f32.mrf.mxu1  ;;  %v1886_v53 = vpop.f32.mrf.mxu0  ;;  %v1770_v10 = vadd.f32 %v1748_v6, %v1682_v21  ;;  %v1684_v1 = vadd.f32 %v1666_v2, %v1626_v46 }
 0x1fe   :  { %v1910_v34 = vadd.f32 %v1886_v53, %v1854_v25 }
 0x1ff   :  { %v1855_v18 = vadd.f32 %v1833_v45, %v1770_v10 }
 0x204   :  { %v1751_v28 = vpop.f32.mrf.mxu2 }
 0x205   :  { %v9099_v42 = vpop.f32.mrf.mxu1  ;;  %v1889_v62 = vpop.f32.mrf.mxu0  ;;  %v1771_v5 = vadd.f32 %v1751_v28, %v1683_v61  ;;  %v1542_v28 = vadd.f32 %v9075_v43, %v1426_v7  ;;  %v1543_v43 = vadd.f32 %v9081_v24, %v1429_v17 }
 0x206   :  { %v1911_v40 = vadd.f32 %v1889_v62, %v1855_v18 }
 0x207   :  { %v1856_v51 = vadd.f32 %v1836_v9, %v1771_v5  ;;  %v1627_v6 = vadd.f32 %v9077_v19, %v1542_v28  ;;  %v1628_v19 = vadd.f32 %v9083_v33, %v1543_v43 }
 0x209   :  { %v1685_v50 = vadd.f32 %v9093_v35, %v1627_v6  ;;  %v1686_v31 = vadd.f32 %v9099_v42, %v1628_v19  ;;  %v1140_v6 = vrot.slane %v9044_v56, 4 }
 0x20c   :  { %v1754_v14 = vpop.f32.mrf.mxu2 }
 0x20d   :  { %v9102_v52 = vpop.f32.mrf.mxu1  ;;  %v1892_v23 = vpop.f32.mrf.mxu0  ;;  %v1772_v62 = vadd.f32 %v1754_v14, %v1684_v1 }
 0x20e   :  { %v1912_v53 = vadd.f32 %v1892_v23, %v1856_v51 }
 0x214   :  { %v1757_v8 = vpop.f32.mrf.mxu2 }
 0x215   :  { %v9105_v0 = vpop.f32.mrf.mxu1  ;;  %v1895_v37 = vpop.f32.mrf.mxu0  ;;  %v1773_v45 = vadd.f32 %v1757_v8, %v1685_v50 }
 0x21c   :  { %v1760_v21 = vpop.f32.mrf.mxu2 }
 0x21d   :  { %v1973_v49 = vpop.f32.mrf.mxu1  ;;  %v1898_v9 = vpop.f32.mrf.mxu0  ;;  %v1774_v54 = vadd.f32 %v1760_v21, %v1686_v31 }
 0x21e   :  { %v1997_v44 = vadd.f32 %v1973_v49, %v1910_v34  ;;  %v1839_v49 = vpop.f32.mrf.mxu3 }
 0x21f   :  { %v1857_v12 = vadd.f32 %v1839_v49, %v1772_v62 }
 0x220   :  { %v9109_v11 = vadd.f32 %v1997_v44, %v8914_v22  ;;  %v1432_v44 = vadd.f32 %v9085_v26, %v9058_v55  ;;  %v1435_v55 = vadd.f32 %v9091_v3, %v9068_v13 }
 0x221   :  { %v1913_v2 = vadd.f32 %v1895_v37, %v1857_v12 }
 0x222   :  { %2014 = vst.msk [vmem:[#allocation2 + $0x40] sm:$0xff] %vm1116_vm1, %v9109_v11  ;;  %v1544_v24 = vadd.f32 %v9087_v57, %v1432_v44  ;;  %v1545_v57 = vadd.f32 %v9095_v15, %v1435_v55  ;;  %v2022_v7 = vsel %vm1116_vm1, %v9109_v11, 0.0 }
 0x224   :  { %v1763_v47 = vpop.f32.mrf.mxu2  ;;  %v1629_v33 = vadd.f32 %v9089_v41, %v1544_v24  ;;  %v1630_v41 = vadd.f32 %v9097_v63, %v1545_v57 }
 0x225   :  { %v1976_v25 = vpop.f32.mrf.mxu1  ;;  %v1901_v23 = vpop.f32.mrf.mxu0 }
 0x226   :  { %v1998_v59 = vadd.f32 %v1976_v25, %v1911_v40  ;;  %v1842_v4 = vpop.f32.mrf.mxu3  ;;  %v1687_v26 = vadd.f32 %v9102_v52, %v1629_v33  ;;  %v1688_v13 = vadd.f32 %v9105_v0, %v1630_v41 }
 0x227   :  { %v1858_v10 = vadd.f32 %v1842_v4, %v1773_v45 }
 0x228   :  { %v2006_v30 = vadd.f32 %v1998_v59, %v8914_v22  ;;  %v1775_v25 = vadd.f32 %v1763_v47, %v1687_v26 }
 0x229   :  { %v1914_v35 = vadd.f32 %v1898_v9, %v1858_v10  ;;  %v9178_v47 = vld [vmem:[#allocation2 + $0x40] sm:$0xff] }
 0x22a   :  { %2015 = vst.msk [vmem:[#allocation2 + $0x48] sm:$0xff] %vm1116_vm1, %v2006_v30  ;;  %v2023_v3 = vsel %vm1116_vm1, %v2006_v30, 0.0 }
 0x22b   :  { %v2024_v8 = vadd.f32 %v2023_v3, %v2022_v7 }
 0x22c   :  { %v1766_v46 = vpop.f32.mrf.mxu2 }
 0x22d   :  { %v1979_v39 = vpop.f32.mrf.mxu1  ;;  %v1904_v36 = vpop.f32.mrf.mxu0  ;;  %v1776_v1 = vadd.f32 %v1766_v46, %v1688_v13 }
 0x22e   :  { %v1999_v48 = vadd.f32 %v1979_v39, %v1912_v53  ;;  %v1845_v60 = vpop.f32.mrf.mxu3 }
 0x22f   :  { %v1859_v61 = vadd.f32 %v1845_v60, %v1774_v54  ;;  %v9162_v60 = vld [vmem:[%s11914_s3] sm:$0xff] }
 0x230   :  { %v2007_v29 = vadd.f32 %v1999_v48, %v8914_v22  ;;  %2337 = vmatpush.msra.mxu3 %v9162_v60 }
 0x231   :  { %v1915_v42 = vadd.f32 %v1901_v23, %v1859_v61  ;;  %v9182_v61 = vld [vmem:[#allocation2 + $0x48] sm:$0xff] }
 0x232   :  { %2016 = vst.msk [vmem:[#allocation2 + $0x50] sm:$0xff] %vm1116_vm1, %v2007_v29  ;;  %v2025_v15 = vsel %vm1116_vm1, %v2007_v29, 0.0 }
 0x233   :  { %v2026_v48 = vadd.f32 %v2025_v15, %v2024_v8  ;;  %v9212_v8 = vld [vmem:[#allocation2 + $0x8] sm:$0xff] }
 0x235   :  { %v1982_v32 = vpop.f32.mrf.mxu1  ;;  %v1907_v28 = vpop.f32.mrf.mxu0 }
 0x236   :  { %v2000_v27 = vadd.f32 %v1982_v32, %v1913_v2  ;;  %v1848_v59 = vpop.f32.mrf.mxu3  ;;  %v1141_v2 = vadd.f32 %v1140_v6, %v9044_v56  ;;  %v9167_v56 = vld [vmem:[%s11914_s3 + $0x8] sm:$0xff] }
 0x237   :  { %v1860_v37 = vadd.f32 %v1848_v59, %v1775_v25  ;;  %2273 = vmatpush.msrb.mxu2 %v9167_v56 }
 0x238   :  { %v2008_v34 = vadd.f32 %v2000_v27, %v8914_v22  ;;  %v1142_v43 = vrot.slane %v1141_v2, 2 }
 0x239   :  { %v1916_v52 = vadd.f32 %v1904_v36, %v1860_v37  ;;  %v9184_v55 = vld [vmem:[#allocation2 + $0x50] sm:$0xff] }
 0x23a   :  { %2017 = vst.msk [vmem:[#allocation2 + $0x58] sm:$0xff] %vm1116_vm1, %v2008_v34  ;;  %v2027_v63 = vsel %vm1116_vm1, %v2008_v34, 0.0  ;;  %v1143_v10 = vadd.f32 %v1142_v43, %v1141_v2  ;;  %v9237_v43 = vld [vmem:[#allocation2 + $0x28] sm:$0xff] }
 0x23b   :  { %v2028_v11 = vadd.f32 %v2027_v63, %v2026_v48  ;;  %v9214_v63 = vld [vmem:[#allocation2 + $0x10] sm:$0xff]  ;;  %v9219_v48 = vld [vmem:[#allocation2 + $0x18] sm:$0xff] }
 0x23c   :  { %v1144_v23 = vrot.slane %v1143_v10, 1 }
 0x23d   :  { %v1985_v58 = vpop.f32.mrf.mxu1 }
 0x23e   :  { %v2001_v18 = vadd.f32 %v1985_v58, %v1914_v35  ;;  %v1851_v62 = vpop.f32.mrf.mxu3  ;;  %v12067_v35 = vmov 0.0  }
 0x23f   :  { %v1861_v0 = vadd.f32 %v1851_v62, %v1776_v1  ;;  %2338 = vmatmul.f32.vlgmr.msra.gmra.mxu3 %v12067_v35 }
 0x240   :  { %v2009_v14 = vadd.f32 %v2001_v18, %v8914_v22  ;;  %v1145_v18 = vadd.f32 %v1144_v23, %v1143_v10 }
 0x241   :  { %v1917_v4 = vadd.f32 %v1907_v28, %v1861_v0  ;;  %v9186_v26 = vld [vmem:[#allocation2 + $0x58] sm:$0xff] }
 0x242   :  { %2018 = vst.msk [vmem:[#allocation2 + $0x60] sm:$0xff] %vm1116_vm1, %v2009_v14  ;;  %v2029_v30 = vsel %vm1116_vm1, %v2009_v14, 0.0 }
 0x243   :  { %v2030_v12 = vadd.f32 %v2029_v30, %v2028_v11 }
 0x245   :  { %v1988_v40 = vpop.f32.mrf.mxu1 }
 0x246   :  { %v2002_v5 = vadd.f32 %v1988_v40, %v1915_v42 }
 0x248   :  { %v2010_v49 = vadd.f32 %v2002_v5, %v8914_v22 }
 0x249   :  { %v9188_v42 = vld [vmem:[#allocation2 + $0x60] sm:$0xff] }
 0x24a   :  { %2019 = vst.msk [vmem:[#allocation2 + $0x68] sm:$0xff] %vm1116_vm1, %v2010_v49  ;;  %v2031_v29 = vsel %vm1116_vm1, %v2010_v49, 0.0 }
 0x24b   :  { %v2032_v32 = vadd.f32 %v2031_v29, %v2030_v12 }
 0x24d   :  { %v1991_v51 = vpop.f32.mrf.mxu1 }
 0x24e   :  { %v2003_v53 = vadd.f32 %v1991_v51, %v1916_v52 }
 0x250   :  { %v2011_v39 = vadd.f32 %v2003_v53, %v8914_v22  ;;  %v9210_v53 = vld [vmem:[#allocation2] sm:$0xff] }
 0x251   :  { %v9200_v37 = vld [vmem:[#allocation2 + $0x68] sm:$0xff] }
 0x252   :  { %2020 = vst.msk [vmem:[#allocation2 + $0x70] sm:$0xff] %vm1116_vm1, %v2011_v39  ;;  %v2033_v17 = vsel %vm1116_vm1, %v2011_v39, 0.0 }
 0x253   :  { %v2034_v27 = vadd.f32 %v2033_v17, %v2032_v32 }
 0x255   :  { %v1994_v9 = vpop.f32.mrf.mxu1 }
 0x256   :  { %v2004_v50 = vadd.f32 %v1994_v9, %v1917_v4  ;;  %v9232_v9 = vld [vmem:[#allocation2 + $0x20] sm:$0xff] }
 0x258   :  { %v2012_v45 = vadd.f32 %v2004_v50, %v8914_v22  ;;  %v9172_v22 = vld [vmem:[%s11914_s3 + $0x18] sm:$0xff] }
 0x259   :  { %2519 = vmatpush.msra.mxu1 %v9172_v22  ;;  %v9202_v46 = vld [vmem:[#allocation2 + $0x70] sm:$0xff] }
 0x25a   :  { %2021 = vst.msk [vmem:[#allocation2 + $0x78] sm:$0xff] %vm1116_vm1, %v2012_v45  ;;  %v2035_v21 = vsel %vm1116_vm1, %v2012_v45, 0.0 }
 0x25b   :  { %v2036_v34 = vadd.f32 %v2035_v21, %v2034_v27 }
 0x25d   :  { %v2037_v19 = vrot.slane %v2036_v34, 4 }
 0x25f   :  { %v2038_v44 = vadd.f32 %v2037_v19, %v2036_v34 }
 0x261   :  { %v2039_v31 = vrot.slane %v2038_v44, 2  ;;  %v9216_v39 = vld [vmem:[#allocation2 + $0x78] sm:$0xff] }
 0x263   :  { %v2040_v58 = vadd.f32 %v2039_v31, %v2038_v44 }
 0x265   :  { %v2041_v54 = vrot.slane %v2040_v58, 1 }
 0x267   :  { %v2042_v24 = vadd.f32 %v2041_v54, %v2040_v58  ;;  %v9244_v54 = vld [vmem:[#allocation2 + $0x30] sm:$0xff] }
 0x269   :  { %v2043_v14 = vadd.f32 %v2042_v24, %v1145_v18 }
 0x26b   :  { %v9180_v33 = vmul.f32 0.0078125, %v2043_v14 }
 0x26d   :  { %v2099_v40 = vsub.f32 %v9178_v47, %v9180_v33  ;;  %v2100_v25 = vsub.f32 %v9182_v61, %v9180_v33  ;;  %v2101_v5 = vsub.f32 %v9184_v55, %v9180_v33  ;;  %v2102_v59 = vsub.f32 %v9186_v26, %v9180_v33 }
 0x26e   :  { %v2103_v36 = vsub.f32 %v9188_v42, %v9180_v33  ;;  %v2104_v13 = vsub.f32 %v9200_v37, %v9180_v33  ;;  %v2105_v7 = vsub.f32 %v9202_v46, %v9180_v33  ;;  %v2053_v28 = vsub.f32 %v9210_v53, %v9180_v33 }
 0x26f   :  { %v2107_v57 = vmul.f32 %v2099_v40, %v2099_v40  ;;  %v2108_v49 = vmul.f32 %v2100_v25, %v2100_v25  ;;  %v2109_v41 = vmul.f32 %v2101_v5, %v2101_v5  ;;  %v2110_v3 = vmul.f32 %v2102_v59, %v2102_v59  ;;  %v2052_v59 = vld [vmem:[#allocation2 + $0x38] sm:$0xff] }
 0x270   :  { %v2111_v1 = vmul.f32 %v2103_v36, %v2103_v36  ;;  %v2054_v0 = vsub.f32 %v9212_v8, %v9180_v33  ;;  %v2055_v30 = vsub.f32 %v9214_v63, %v9180_v33  ;;  %v2106_v6 = vsub.f32 %v9216_v39, %v9180_v33 }
 0x271   :  { %v2115_v52 = vsel %vm1116_vm1, %v2107_v57, 0.0  ;;  %v2116_v51 = vsel %vm1116_vm1, %v2108_v49, 0.0  ;;  %v2118_v62 = vsel %vm1116_vm1, %v2109_v41, 0.0  ;;  %v2056_v4 = vsub.f32 %v9219_v48, %v9180_v33 }
 0x272   :  { %v2117_v15 = vadd.f32 %v2116_v51, %v2115_v52  ;;  %v2112_v29 = vmul.f32 %v2104_v13, %v2104_v13  ;;  %v2120_v12 = vsel %vm1116_vm1, %v2110_v3, 0.0  ;;  %v2061_v17 = vmul.f32 %v2053_v28, %v2053_v28 }
 0x273   :  { %v2062_v50 = vmul.f32 %v2054_v0, %v2054_v0  ;;  %v2057_v32 = vsub.f32 %v9232_v9, %v9180_v33  ;;  %v2063_v45 = vmul.f32 %v2055_v30, %v2055_v30  ;;  %v2113_v27 = vmul.f32 %v2105_v7, %v2105_v7 }
 0x274   :  { %v2119_v11 = vadd.f32 %v2118_v62, %v2117_v15  ;;  %v2122_v21 = vsel %vm1116_vm1, %v2111_v1, 0.0  ;;  %v2069_v34 = vsel %vm1116_vm1, %v2061_v17, 0.0  ;;  %v2058_v10 = vsub.f32 %v9237_v43, %v9180_v33 }
 0x275   :  { %v2064_v44 = vmul.f32 %v2056_v4, %v2056_v4  ;;  %v2070_v31 = vsel %vm1116_vm1, %v2062_v50, 0.0  ;;  %v2114_v23 = vmul.f32 %v2106_v6, %v2106_v6  ;;  %v2124_v58 = vsel %vm1116_vm1, %v2112_v29, 0.0 }
 0x276   :  { %v2121_v2 = vadd.f32 %v2120_v12, %v2119_v11  ;;  %v2071_v18 = vadd.f32 %v2070_v31, %v2069_v34  ;;  %v2059_v14 = vsub.f32 %v9244_v54, %v9180_v33  ;;  %v2065_v40 = vmul.f32 %v2057_v32, %v2057_v32 }
 0x277   :  { %v2072_v25 = vsel %vm1116_vm1, %v2063_v45, 0.0  ;;  %v2126_v5 = vsel %vm1116_vm1, %v2113_v27, 0.0  ;;  %v2060_v49 = vsub.f32 %v2052_v59, %v9180_v33  ;;  %v2066_v41 = vmul.f32 %v2058_v10, %v2058_v10 }
 0x278   :  { %v2123_v19 = vadd.f32 %v2122_v21, %v2121_v2  ;;  %v2073_v36 = vadd.f32 %v2072_v25, %v2071_v18  ;;  %v2074_v13 = vsel %vm1116_vm1, %v2064_v44, 0.0  ;;  %v2128_v3 = vsel %vm1116_vm1, %v2114_v23, 0.0  ;;  %v9260_v18 = vld [vmem:[%s11914_s3 + $0x10] sm:$0xff] }
 0x279   :  { %v2067_v7 = vmul.f32 %v2059_v14, %v2059_v14  ;;  %v2076_v1 = vsel %vm1116_vm1, %v2065_v40, 0.0  ;;  %v2068_v28 = vmul.f32 %v2060_v49, %v2060_v49  ;;  %v2078_v0 = vsel %vm1116_vm1, %v2066_v41, 0.0  ;;  %2436 = vmatpush.msrb.mxu0 %v9260_v18 }
 0x27a   :  { %v2125_v24 = vadd.f32 %v2124_v58, %v2123_v19  ;;  %v2075_v52 = vadd.f32 %v2074_v13, %v2073_v36 }
 0x27b   :  { %v2080_v6 = vsel %vm1116_vm1, %v2067_v7, 0.0  ;;  %v2082_v29 = vsel %vm1116_vm1, %v2068_v28, 0.0 }
 0x27c   :  { %v2127_v57 = vadd.f32 %v2126_v5, %v2125_v24  ;;  %v2077_v15 = vadd.f32 %v2076_v1, %v2075_v52 }
 0x27e   :  { %v2129_v51 = vadd.f32 %v2128_v3, %v2127_v57  ;;  %v2079_v30 = vadd.f32 %v2078_v0, %v2077_v15 }
 0x280   :  { %v2130_v62 = vrot.slane %v2129_v51, 4  ;;  %v2081_v4 = vadd.f32 %v2080_v6, %v2079_v30 }
 0x282   :  { %v2131_v11 = vadd.f32 %v2130_v62, %v2129_v51  ;;  %v2083_v17 = vadd.f32 %v2082_v29, %v2081_v4 }
 0x284   :  { %v2132_v12 = vrot.slane %v2131_v11, 2  ;;  %v2084_v50 = vrot.slane %v2083_v17, 4 }
 0x286   :  { %v2133_v2 = vadd.f32 %v2132_v12, %v2131_v11  ;;  %v2085_v32 = vadd.f32 %v2084_v50, %v2083_v17 }
 0x288   :  { %v2086_v45 = vrot.slane %v2085_v32, 2  ;;  %v2134_v27 = vrot.slane %v2133_v2, 1 }
 0x28a   :  { %v2087_v21 = vadd.f32 %v2086_v45, %v2085_v32  ;;  %v2135_v19 = vadd.f32 %v2134_v27, %v2133_v2 }
 0x28c   :  { %v2088_v34 = vrot.slane %v2087_v21, 1 }
 0x28e   :  { %v2089_v10 = vadd.f32 %v2088_v34, %v2087_v21 }
 0x290   :  { %v2136_v44 = vadd.f32 %v2135_v19, %v2089_v10 }
 0x292   :  { %v2137_v31 = vmul.f32 0.0078125, %v2136_v44 }
 0x294   :  { %v2138_v23 = vadd.f32 1e-05, %v2137_v31 }
 0x296   :  { %7630 = vrsqrt.f32 %v2138_v23  ;;  %vm2145_vm15 = vweird.f32 %v2138_v23 }
 0x29c   :  { %v7631_v58 = vpop.eup %7630 }
 0x29d   :  { %v2140_v24 = vmul.f32 %v7631_v58, %v2138_v23  ;;  %vm2146_vm11 = vweird.f32 %v7631_v58  ;;  %v12073_v23 = vld [vmem:[#allocation21_spill] sm:$0xff] }
 0x29e   :  { %vm2147_vm3 = vmor %vm2145_vm15, %vm2146_vm11  ;;  %vm12074_vm8 = vcmp.ge.s32.totalorder %v12073_v23, 0 }
 0x29f   :  { %v2141_v14 = vmul.f32 %v7631_v58, %v2140_v24 }
 0x2a1   :  { %v2142_v40 = vmul.f32 0.5, %v2141_v14 }
 0x2a3   :  { %v2143_v25 = vsub.f32 1.5, %v2142_v40 }
 0x2a5   :  { %v2144_v5 = vmul.f32 %v7631_v58, %v2143_v25 }
 0x2a7   :  { %v2148_v36 = vsel %vm2147_vm3, %v7631_v58, %v2144_v5  ;;  %vm12068_vm3 = vcmask 1040384  }
 0x2a8   :  { %v2149_v57 = vmul.f32 %v2148_v36, %v8910_v20  ;;  %vm12069_vm11 = vmmov %vm12068_vm3 }
 0x2a9   :  { %vm12070_vm15 = vmmov %vm12068_vm3 }
 0x2aa   :  { %v2150_v49 = vmul.f32 %v2149_v57, %v9180_v33  ;;  %v9265_v41 = vperm.slane %v2149_v57, 1  ;;  %vm12071_vm0 = vmmov %vm12068_vm3 }
 0x2ac   :  { %v2152_v13 = vrot.slane %v2150_v49, 7  ;;  %v2157_v3 = vmul.f32 %v9265_v41, %v9212_v8  ;;  %v2158_v52 = vmul.f32 %v9265_v41, %v9214_v63  ;;  %v2159_v51 = vmul.f32 %v9265_v41, %v9219_v48 }
 0x2ad   :  { %v2160_v7 = vmul.f32 %v9265_v41, %v9232_v9  ;;  %v2161_v1 = vmul.f32 %v9265_v41, %v9237_v43  ;;  %v2162_v33 = vmul.f32 %v9265_v41, %v9244_v54  ;;  %v2163_v62 = vmul.f32 %v9265_v41, %v2052_v59 }
 0x2ae   :  { %v2154_v15 = vsub.f32 %v8910_v20, %v2152_v13  ;;  %v2156_v8 = vmul.f32 %v9265_v41, %v9210_v53 }
 0x2b0   :  { %v9283_v63 = vperm.slane %v2154_v15, 2 }
 0x2b2   :  { %v2165_v48 = vadd.f32 %v9283_v63, %v2156_v8  ;;  %v2166_v28 = vadd.f32 %v9283_v63, %v2157_v3  ;;  %v2167_v9 = vadd.f32 %v9283_v63, %v2158_v52  ;;  %v2168_v43 = vadd.f32 %v9283_v63, %v2159_v51 }
 0x2b3   :  { %v2169_v0 = vadd.f32 %v9283_v63, %v2160_v7  ;;  %v2170_v54 = vadd.f32 %v9283_v63, %v2161_v1  ;;  %v2171_v20 = vadd.f32 %v9283_v63, %v2162_v33  ;;  %v2172_v59 = vadd.f32 %v9283_v63, %v2163_v62 }
 0x2b4   :  { %v2173_v30 = vmax.f32 %v2165_v48, 0.0  ;;  %v2174_v53 = vmax.f32 %v2166_v28, 0.0  ;;  %v2175_v6 = vmax.f32 %v2167_v9, 0.0  ;;  %v2176_v11 = vmax.f32 %v2168_v43, 0.0 }
 0x2b5   :  { %v2177_v4 = vmax.f32 %v2169_v0, 0.0  ;;  %v2178_v2 = vmax.f32 %v2170_v54, 0.0  ;;  %v2179_v32 = vmax.f32 %v2171_v20, 0.0  ;;  %v2180_v1 = vmax.f32 %v2172_v59, 0.0  ;;  %v12082_v54 = vld [vmem:[#allocation12_spill] sm:$0xff] }
 0x2b6   :  { %v2189_v29 = vrot.slane %v2173_v30, 7  ;;  %v2190_v12 = vrot.slane %v2174_v53, 7  ;;  %v2192_v17 = vrot.slane %v2175_v6, 7  ;;  %v2194_v50 = vrot.slane %v2176_v11, 7 }
 0x2b7   :  { %v2196_v40 = vrot.slane %v2177_v4, 7  ;;  %v2198_v36 = vrot.slane %v2178_v2, 7  ;;  %v2200_v57 = vrot.slane %v2179_v32, 7  ;;  %v2202_v53 = vrot.slane %v2180_v1, 7 }
 0x2b8   :  { %v2213_v45 = vsel %vm12068_vm3, 0.0, %v2189_v29  ;;  %v9295_v27 = vsel %vm12069_vm11, %v2189_v29, %v2190_v12  ;;  %v9298_v21 = vsel %vm12070_vm15, %v2190_v12, %v2192_v17  ;;  %v9301_v34 = vsel %vm12071_vm0, %v2192_v17, %v2194_v50  ;;  %vm12079_vm15 = vmmov %vm12069_vm11 }
 0x2b9   :  { %v2215_v10 = vsel %vm284_vm7, %v2213_v45, 0.0  ;;  %v2226_v44 = vrot.slane %v2213_v45, 1  ;;  %v2363_v31 = vrot.slane %v2213_v45, 2  ;;  %v2470_v58 = vsel %vm12074_vm8, %v2213_v45, 0.0 }
 0x2ba   :  { %7266 = vmatmul.msk.f32.gmra.mxu3 %vm1116_vm1, %v2215_v10  ;;  %7283 = vmatmul.msk.f32.vlgmr.msra.gmra.mxu1 %vm1116_vm1, %v2470_v58  ;;  %v2228_v24 = vrot.slane %v9295_v27, 1  ;;  %v2365_v14 = vrot.slane %v9295_v27, 2  ;;  %vm12075_vm0 = vcmask 1046528   ;;  %v2230_v51 = vrot.slane %v9298_v21, 1 }
 0x2bb   :  { %v2227_v25 = vsel %vm12075_vm0, %v12062_v16, %v2226_v44  ;;  %v2364_v5 = vsel %vm530_vm5, %v12065_v38, %v2363_v31  ;;  %vm12077_vm8 = vmmov %vm12075_vm0  ;;  %v2367_v7 = vrot.slane %v9298_v21, 2  ;;  %v2232_v15 = vrot.slane %v9301_v34, 1 }
 0x2bc   :  { %7258 = vmatmul.msk.f32.vlgmr.msrb.gmra.mxu2 %vm1116_vm1, %v2227_v25  ;;  %v2387_v13 = vsel %vm498_vm4, %v2364_v5, 0.0  ;;  %v9319_v3 = vsel %vm12077_vm8, %v2226_v44, %v2228_v24  ;;  %v9322_v52 = vsel %vm530_vm5, %v2363_v31, %v2365_v14  ;;  %vm12078_vm3 = vmmov %vm12075_vm0  ;;  %v2369_v62 = vrot.slane %v9301_v34, 2  ;;  %v12087_v25 = vld [vmem:[#allocation9_spill] sm:$0xff] }
 0x2bd   :  { %7274 = vmatmul.msk.f32.vlgmr.msrb.gmra.mxu0 %vm1116_vm1, %v2387_v13  ;;  %v9328_v33 = vsel %vm12078_vm3, %v2228_v24, %v2230_v51  ;;  %v9333_v8 = vsel %vm530_vm5, %v2365_v14, %v2367_v7  ;;  %v9336_v48 = vsel %vm12069_vm11, %v2194_v50, %v2196_v40  ;;  %v9339_v28 = vsel %vm12079_vm15, %v2196_v40, %v2198_v36  ;;  %vm12080_vm0 = vmmov %vm12069_vm11 }
 0x2be   :  { %v9342_v9 = vsel %vm12080_vm0, %v2198_v36, %v2200_v57  ;;  %vm12081_vm8 = vmmov %vm12078_vm3  ;;  %v9348_v0 = vsel %vm530_vm5, %v2367_v7, %v2369_v62  ;;  %vm12083_vm3 = vcmp.ge.s32.totalorder %v12082_v54, 0  ;;  %v2471_v59 = vsel %vm284_vm7, %v9295_v27, 0.0 }
 0x2bf   :  { %v9345_v43 = vsel %vm12081_vm8, %v2230_v51, %v2232_v15  ;;  %v2216_v20 = vsel %vm12083_vm3, %v9295_v27, 0.0  ;;  %v2234_v30 = vrot.slane %v9336_v48, 1  ;;  %v2371_v6 = vrot.slane %v9336_v48, 2  ;;  %vm12085_vm11 = vmmov %vm12081_vm8 }
 0x2c0   :  { %v2236_v11 = vrot.slane %v9339_v28, 1  ;;  %v2388_v29 = vsel %vm499_vm6, %v9322_v52, 0.0  ;;  %v2373_v17 = vrot.slane %v9339_v28, 2  ;;  %vm12086_vm15 = vmmov %vm12081_vm8  ;;  %v2238_v32 = vrot.slane %v9342_v9, 1 }
 0x2c1   :  { %v9365_v12 = vsel %vm12085_vm11, %v2232_v15, %v2234_v30  ;;  %v9371_v50 = vsel %vm530_vm5, %v2369_v62, %v2371_v6  ;;  %v2375_v45 = vrot.slane %v9342_v9, 2  ;;  %v9383_v44 = vsel %vm12080_vm0, %v2200_v57, %v2202_v53 }
 0x2c2   :  { %7267 = vmatmul.msk.f32.gmra.mxu3 %vm1116_vm1, %v2216_v20  ;;  %7284 = vmatmul.msk.f32.gmra.mxu1 %vm1116_vm1, %v2471_v59  ;;  %v9374_v2 = vsel %vm12086_vm15, %v2234_v30, %v2236_v11  ;;  %v9380_v10 = vsel %vm530_vm5, %v2371_v6, %v2373_v17  ;;  %v9386_v31 = vsel %vm12081_vm8, %v2236_v11, %v2238_v32  ;;  %v2240_v24 = vrot.slane %v9383_v44, 1  ;;  %vm12090_vm15 = vmmov %vm12081_vm8 }
 0x2c3   :  { %v9389_v58 = vsel %vm530_vm5, %v2373_v17, %v2375_v45  ;;  %v2377_v14 = vrot.slane %v9383_v44, 2  ;;  %v2964_v40 = vmul.f32 %v9265_v41, %v9178_v47  ;;  %vm12088_vm3 = vcmp.ge.s32.totalorder %v12087_v25, 0 }
 0x2c4   :  { %7259 = vmatmul.msk.f32.gmra.mxu2 %vm1116_vm1, %v9319_v3  ;;  %v2217_v5 = vsel %vm12088_vm3, %v9298_v21, 0.0  ;;  %vm12089_vm11 = vcmp.ge.s32.totalorder %v12082_v54, 0  ;;  %v9402_v57 = vsel %vm12090_vm15, %v2238_v32, %v2240_v24  ;;  %v2965_v47 = vmul.f32 %v9265_v41, %v9182_v61  ;;  %vm12095_vm15 = vmmov %vm12080_vm0 }
 0x2c5   :  { %7275 = vmatmul.msk.f32.gmra.mxu0 %vm1116_vm1, %v2388_v29  ;;  %v2472_v36 = vsel %vm12089_vm11, %v9298_v21, 0.0  ;;  %v9405_v13 = vsel %vm530_vm5, %v2375_v45, %v2377_v14  ;;  %v9412_v51 = vsel %vm12080_vm0, %v2202_v53, 0.0  ;;  %v2972_v7 = vadd.f32 %v2964_v40, %v9283_v63 }
 0x2c6   :  { %v2966_v1 = vmul.f32 %v9265_v41, %v9184_v55  ;;  %v2967_v15 = vmul.f32 %v9265_v41, %v9186_v26  ;;  %v2389_v20 = vsel %vm500_vm9, %v9333_v8, 0.0  ;;  %v11975_v61 = vrot.slane %v9412_v51, 2  ;;  %v9431_v55 = vld [vmem:[%s11914_s3 + $0x28] sm:$0xff] }
 0x2c7   :  { %v11976_v59 = vrot.slane %v9412_v51, 1  ;;  %v2973_v30 = vadd.f32 %v2965_v47, %v9283_v63  ;;  %v2980_v26 = vmax.f32 %v2972_v7, 0.0  ;;  %2661 = vmatpush.msrb.mxu3 %v9431_v55  ;;  %v2968_v32 = vmul.f32 %v9265_v41, %v9188_v42 }
 0x2c8   :  { %v2974_v53 = vadd.f32 %v2966_v1, %v9283_v63  ;;  %v2975_v6 = vadd.f32 %v2967_v15, %v9283_v63  ;;  %v9439_v11 = vsel %vm530_vm5, %v2377_v14, %v11975_v61  ;;  %v12092_v14 = vld [vmem:[#allocation11_spill] sm:$0xff]  ;;  %vm12094_vm11 = vcmp.ge.s32.totalorder %v12087_v25, 0 }
 0x2c9   :  { %v9444_v29 = vsel %vm12081_vm8, %v2240_v24, %v11976_v59  ;;  %v2981_v17 = vmax.f32 %v2973_v30, 0.0  ;;  %3079 = vmatpush.msra.mxu3 %v9167_v56  ;;  %v2996_v45 = vrot.slane %v2980_v26, 7  ;;  %vm12093_vm3 = vcmp.ge.s32.totalorder %v12092_v14, 0  ;;  %vm12097_vm8 = vmmov %vm12080_vm0 }
 0x2ca   :  { %7268 = vmatmul.msk.f32.gmra.mxu3 %vm1116_vm1, %v2217_v5  ;;  %7285 = vmatmul.msk.f32.gmra.mxu1 %vm1116_vm1, %v2472_v36  ;;  %v2982_v40 = vmax.f32 %v2974_v53, 0.0  ;;  %v2983_v5 = vmax.f32 %v2975_v6, 0.0  ;;  %v2969_v36 = vmul.f32 %v9265_v41, %v9200_v37  ;;  %v2218_v47 = vsel %vm12093_vm3, %v9301_v34, 0.0  ;;  %vm12099_vm3 = vmmov %vm12080_vm0 }
 0x2cb   :  { %v2473_v24 = vsel %vm12094_vm11, %v9301_v34, 0.0  ;;  %v2997_v7 = vrot.slane %v2981_v17, 7  ;;  %v2976_v1 = vadd.f32 %v2968_v32, %v9283_v63  ;;  %v9459_v42 = vsel %vm12095_vm15, 0.0, %v2996_v45 }
 0x2cc   :  { %7260 = vmatmul.msk.f32.gmra.mxu2 %vm1116_vm1, %v9328_v33  ;;  %v2999_v56 = vrot.slane %v2982_v40, 7  ;;  %v3001_v15 = vrot.slane %v2983_v5, 7  ;;  %v11977_v37 = vrot.slane %v9459_v42, 1  ;;  %v11980_v26 = vrot.slane %v9459_v42, 2 }
 0x2cd   :  { %7276 = vmatmul.msk.f32.gmra.mxu0 %vm1116_vm1, %v2389_v20  ;;  %v2977_v20 = vadd.f32 %v2969_v36, %v9283_v63  ;;  %v9466_v30 = vsel %vm12080_vm0, %v2996_v45, %v2997_v7  ;;  %v2390_v45 = vsel %vm501_vm12, %v9348_v0, 0.0  ;;  %vm12103_vm11 = vcmask 1046528  }
 0x2ce   :  { %12096 = vst [vmem:[#allocation8_spill] sm:$0xff] %v9466_v30  ;;  %v3034_v53 = vrot.slane %v9466_v30, 1  ;;  %v9471_v6 = vsel %vm12097_vm8, %v2997_v7, %v2999_v56  ;;  %v3169_v17 = vrot.slane %v9466_v30, 2  ;;  %v9475_v32 = vsel %vm12099_vm3, %v2999_v56, %v3001_v15  ;;  %vm12105_vm15 = vmmov %vm12103_vm11 }
 0x2cf   :  { %12098 = vst [vmem:[#allocation21_spill] sm:$0xff] %v9471_v6  ;;  %v3036_v5 = vrot.slane %v9471_v6, 1  ;;  %v3038_v36 = vrot.slane %v9475_v32, 1  ;;  %vm12106_vm0 = vmmov %vm12103_vm11  ;;  %v2984_v30 = vmax.f32 %v2976_v1, 0.0  ;;  %vm12110_vm8 = vcmp.ge.s32.totalorder %v12092_v14, 0 }
 0x2d0   :  { %12100 = vst [vmem:[#allocation4_spill] sm:$0xff] %v9475_v32  ;;  %v9498_v7 = vsel %vm12103_vm11, %v11977_v37, %v3034_v53  ;;  %v9503_v56 = vsel %vm530_vm5, %v11980_v26, %v3169_v17  ;;  %v3173_v26 = vrot.slane %v9475_v32, 2  ;;  %vm12114_vm11 = vmmov %vm12099_vm3 }
 0x2d1   :  { %12104 = vst [vmem:[#allocation7_spill] sm:$0xff] %v9503_v56  ;;  %v9509_v61 = vsel %vm12105_vm15, %v3034_v53, %v3036_v5  ;;  %v9512_v59 = vsel %vm12106_vm0, %v3036_v5, %v3038_v36  ;;  %v2985_v56 = vmax.f32 %v2977_v20, 0.0  ;;  %v2219_v53 = vsel %vm288_vm13, %v9336_v48, 0.0  ;;  %vm12116_vm15 = vmmov %vm12106_vm0 }
 0x2d2   :  { %7269 = vmatmul.msk.f32.gmra.mxu3 %vm1116_vm1, %v2218_v47  ;;  %7286 = vmatmul.msk.f32.gmra.mxu1 %vm1116_vm1, %v2473_v24  ;;  %v9488_v47 = vld [vmem:[%s11914_s3 + $0x20] sm:$0xff]  ;;  %v9493_v24 = vld [vmem:[%s11914_s3 + $0x38] sm:$0xff]  ;;  %12107 = vst [vmem:[#allocation9_spill] sm:$0xff] %v9512_v59  ;;  %v2474_v5 = vsel %vm12110_vm8, %v9336_v48, 0.0  ;;  %v3003_v59 = vrot.slane %v2984_v30, 7  ;;  %v2971_v30 = vmul.f32 %v9265_v41, %v9216_v39 }
 0x2d3   :  { %12102 = vst [vmem:[#allocation12_spill] sm:$0xff] %v9493_v24  ;;  %2575 = vmatpush.msra.mxu2 %v9488_v47  ;;  %2798 = vmatpush.msrb.mxu1 %v9493_v24  ;;  %v3005_v1 = vrot.slane %v2985_v56, 7 }
 0x2d4   :  { %7261 = vmatmul.msk.f32.gmra.mxu2 %vm1116_vm1, %v9345_v43  ;;  %v9537_v32 = vsel %vm12099_vm3, %v3001_v15, %v3003_v59 }
 0x2d5   :  { %7277 = vmatmul.msk.f32.gmra.mxu0 %vm1116_vm1, %v2390_v45  ;;  %v3171_v45 = vrot.slane %v9471_v6, 2  ;;  %3239 = vmatpush.msra.mxu1 %v9260_v18  ;;  %v2970_v6 = vmul.f32 %v9265_v41, %v9202_v46  ;;  %12113 = vst [vmem:[#allocation13_spill] sm:$0xff] %v9537_v32  ;;  %v3040_v56 = vrot.slane %v9537_v32, 1  ;;  %v2979_v41 = vadd.f32 %v2971_v30, %v9283_v63 }
 0x2d7   :  { %v9516_v37 = vsel %vm530_vm5, %v3169_v17, %v3171_v45  ;;  %v9528_v18 = vsel %vm530_vm5, %v3171_v45, %v3173_v26  ;;  %v2978_v20 = vadd.f32 %v2970_v6, %v9283_v63  ;;  %v2391_v17 = vsel %vm502_vm14, %v9371_v50, 0.0  ;;  %v7309_v45 = vld [vmem:[%s11914_s3 + $0x30] sm:$0xff] }
 0x2d8   :  { %12108 = vst [vmem:[#allocation10_spill] sm:$0xff] %v9516_v37  ;;  %v9548_v6 = vsel %vm12114_vm11, %v3003_v59, %v3005_v1  ;;  %2744 = vmatpush.msra.mxu0 %v7309_v45  ;;  %vm12120_vm11 = vmmov %vm12106_vm0 }
 0x2d9   :  { %12111 = vst [vmem:[#allocation11_spill] sm:$0xff] %v9528_v18  ;;  %v3042_v15 = vrot.slane %v9548_v6, 1  ;;  %v3177_v39 = vrot.slane %v9548_v6, 2  ;;  %v9556_v18 = vsel %vm12116_vm15, %v3038_v36, %v3040_v56  ;;  %vm12122_vm15 = vmmov %vm12099_vm3 }
 0x2da   :  { %7270 = vmatmul.msk.f32.gmra.mxu3 %vm1116_vm1, %v2219_v53  ;;  %7287 = vmatmul.msk.f32.gmra.mxu1 %vm1116_vm1, %v2474_v5  ;;  %12115 = vst [vmem:[#allocation14_spill] sm:$0xff] %v9548_v6  ;;  %v3175_v53 = vrot.slane %v9537_v32, 2  ;;  %v2986_v5 = vmax.f32 %v2978_v20, 0.0  ;;  %v2987_v32 = vmax.f32 %v2979_v41, 0.0  ;;  %v12117_v6 = vld [vmem:[#allocation16_spill] sm:$0xff] }
 0x2db   :  { %3141 = vmatpush.msrb.mxu0 %v9162_v60  ;;  %v9563_v20 = vsel %vm12106_vm0, %v3040_v56, %v3042_v15  ;;  %vm12118_vm8 = vcmp.ge.s32.totalorder %v12117_v6, 0 }
 0x2dc   :  { %7262 = vmatmul.msk.f32.gmra.mxu2 %vm1116_vm1, %v9365_v12  ;;  %v9559_v37 = vsel %vm530_vm5, %v3173_v26, %v3175_v53  ;;  %v3007_v59 = vrot.slane %v2986_v5, 7  ;;  %v2220_v63 = vsel %vm12118_vm8, %v9339_v28, 0.0  ;;  %v2475_v26 = vsel %vm288_vm13, %v9339_v28, 0.0  ;;  %vm12127_vm8 = vmmov %vm12120_vm11 }
 0x2dd   :  { %7278 = vmatmul.msk.f32.gmra.mxu0 %vm1116_vm1, %v2391_v17  ;;  %v9566_v17 = vsel %vm530_vm5, %v3175_v53, %v3177_v39  ;;  %v3009_v30 = vrot.slane %v2987_v32, 7  ;;  %v12125_v32 = vld [vmem:[#allocation17_spill] sm:$0xff] }
 0x2de   :  { %v9572_v36 = vsel %vm12099_vm3, %v3005_v1, %v3007_v59  ;;  %vm12126_vm0 = vcmp.lt.s32.totalorder %v12125_v32, 8 }
 0x2df   :  { %12119 = vst [vmem:[#allocation15_spill] sm:$0xff] %v9572_v36  ;;  %v3044_v60 = vrot.slane %v9572_v36, 1  ;;  %v3179_v56 = vrot.slane %v9572_v36, 2  ;;  %v9585_v5 = vsel %vm12122_vm15, %v3007_v59, %v3009_v30  ;;  %v2392_v41 = vsel %vm12126_vm0, %v9380_v10, 0.0  ;;  %vm12131_vm15 = vmmov %vm12127_vm8 }
 0x2e0   :  { %12123 = vst [vmem:[#allocation22_spill] sm:$0xff] %v9585_v5 }
 0x2e1   :  { %v9582_v53 = vsel %vm12120_vm11, %v3042_v15, %v3044_v60  ;;  %v9588_v1 = vsel %vm530_vm5, %v3177_v39, %v3179_v56  ;;  %v9605_v39 = vsel %vm12099_vm3, %v3009_v30, 0.0  ;;  %vm12130_vm11 = vcmp.ge.s32.totalorder %v12117_v6, 0 }
 0x2e2   :  { %7271 = vmatmul.msk.f32.gmra.mxu3 %vm1116_vm1, %v2220_v63  ;;  %7288 = vmatmul.msk.f32.gmra.mxu1 %vm1116_vm1, %v2475_v26  ;;  %12121 = vst [vmem:[#allocation16_spill] sm:$0xff] %v9582_v53  ;;  %v3046_v63 = vrot.slane %v9585_v5, 1  ;;  %v3181_v26 = vrot.slane %v9585_v5, 2  ;;  %v2476_v53 = vsel %vm12130_vm11, %v9342_v9, 0.0  ;;  %v12000_v5 = vrot.slane %v9605_v39, 1 }
 0x2e3   :  { %12124 = vst [vmem:[#allocation23_spill] sm:$0xff] %v9588_v1  ;;  %v2221_v1 = vsel %vm290_vm2, %v9342_v9, 0.0  ;;  %vm12136_vm3 = vcmp.ge.s32.totalorder %v12082_v54, 0  ;;  %vm12137_vm11 = vcmp.ge.s32.totalorder %v12087_v25, 0 }
 0x2e4   :  { %7263 = vmatmul.msk.f32.gmra.mxu2 %vm1116_vm1, %v9374_v2  ;;  %v9599_v15 = vsel %vm12127_vm8, %v3044_v60, %v3046_v63  ;;  %v9602_v59 = vsel %vm530_vm5, %v3179_v56, %v3181_v26  ;;  %v12001_v60 = vrot.slane %v9605_v39, 2  ;;  %v9620_v30 = vsel %vm12131_vm15, %v3046_v63, %v12000_v5 }
 0x2e5   :  { %7279 = vmatmul.msk.f32.gmra.mxu0 %vm1116_vm1, %v2392_v41  ;;  %12128 = vst [vmem:[#allocation17_spill] sm:$0xff] %v9599_v15  ;;  %v2393_v41 = vsel %vm504_vm10, %v9389_v58, 0.0  ;;  %v2477_v63 = vsel %vm290_vm2, %v9383_v44, 0.0  ;;  %vm12135_vm8 = vcmp.ge.s32.totalorder %v12073_v23, 0  ;;  %vm12138_vm15 = vcmp.lt.s32.totalorder %v12125_v32, 8 }
 0x2ea   :  { %7272 = vmatmul.msk.f32.gmra.mxu3 %vm1116_vm1, %v2221_v1  ;;  %7289 = vmatmul.msk.f32.gmra.mxu1 %vm1116_vm1, %v2476_v53  ;;  %v9630_v1 = vsel %vm530_vm5, %v3181_v26, %v12001_v60  ;;  %v2612_v53 = vsel %vm498_vm4, %v9322_v52, 0.0  ;;  %v12133_v26 = vld [vmem:[#allocation20_spill] sm:$0xff]  ;;  %v2613_v52 = vsel %vm499_vm6, %v9333_v8, 0.0 }
 0x2eb   :  { %vm12134_vm0 = vcmp.lt.s32.totalorder %v12133_v26, 8 }
 0x2ec   :  { %7264 = vmatmul.msk.f32.gmra.mxu2 %vm1116_vm1, %v9386_v31 }
 0x2ed   :  { %7280 = vmatmul.msk.f32.gmra.mxu0 %vm1116_vm1, %v2393_v41  ;;  %v2394_v41 = vsel %vm12134_vm0, %v9405_v13, 0.0  ;;  %vm12139_vm0 = vcmp.ge.s32.totalorder %v12092_v14, 0 }
 0x2f2   :  { %7290 = vmatmul.msk.f32.gmra.mxu1 %vm1116_vm1, %v2477_v63  ;;  %7301 = vmatmul.msk.f32.vlgmr.msrb.gmra.mxu3 %vm1116_vm1, %v2612_v53  ;;  %v2614_v53 = vsel %vm500_vm9, %v9348_v0, 0.0 }
 0x2f3   :  { %3376 = vmatpush.msrb.mxu3 %v9488_v47  ;;  %v2695_v47 = vsel %vm12135_vm8, %v9295_v27, 0.0  ;;  %v2696_v27 = vsel %vm284_vm7, %v9298_v21, 0.0  ;;  %v2616_v21 = vsel %vm502_vm14, %v9380_v10, 0.0  ;;  %vm12140_vm8 = vcmp.lt.s32.totalorder %v12133_v26, 8 }
 0x2f4   :  { %7265 = vmatmul.msk.f32.gmra.mxu2 %vm1116_vm1, %v9402_v57 }
 0x2f5   :  { %7281 = vmatmul.msk.f32.gmra.mxu0 %vm1116_vm1, %v2394_v41  ;;  %v12146_v41 = vrot.slane %v9459_v42, 2 }
 0x2fa   :  { %7302 = vmatmul.msk.f32.gmra.mxu3 %vm1116_vm1, %v2613_v52  ;;  %7319 = vmatmul.msk.f32.vlgmr.msrb.gmra.mxu1 %vm1116_vm1, %v9328_v33  ;;  %v3168_v52 = vsel %vm530_vm5, %v12065_v38, %v12146_v41 }
 0x2fb   :  { %3543 = vmatpush.msrb.mxu1 %v7309_v45  ;;  %v12144_v45 = vrot.slane %v9459_v42, 1 }
 0x2fc   :  { %7292 = vmatmul.msk.f32.vlgmr.msra.gmra.mxu2 %vm1116_vm1, %v9319_v3  ;;  %v2615_v3 = vsel %vm501_vm12, %v9371_v50, 0.0 }
 0x2fd   :  { %7310 = vmatmul.msk.f32.vlgmr.msra.gmra.mxu0 %vm1116_vm1, %v2695_v47  ;;  %v3191_v47 = vsel %vm498_vm4, %v3168_v52, 0.0 }
 0x2fe   :  { %3461 = vmatpush.msra.mxu0 %v9431_v55  ;;  %v2617_v55 = vsel %vm12138_vm15, %v9389_v58, 0.0 }
 0x302   :  { %7303 = vmatmul.msk.f32.gmra.mxu3 %vm1116_vm1, %v2614_v53  ;;  %7320 = vmatmul.msk.f32.gmra.mxu1 %vm1116_vm1, %v9345_v43 }
 0x304   :  { %7293 = vmatmul.msk.f32.gmra.mxu2 %vm1116_vm1, %v9328_v33  ;;  %v2697_v33 = vsel %vm12136_vm3, %v9301_v34, 0.0  ;;  %v7327_v34 = vld [vmem:[%s11914_s3 + $0x40] sm:$0xff]  ;;  %vm12141_vm3 = vcmp.ge.s32.totalorder %v12117_v6, 0 }
 0x305   :  { %7311 = vmatmul.msk.f32.gmra.mxu0 %vm1116_vm1, %v2696_v27  ;;  %2883 = vmatpush.msrb.mxu2 %v7327_v34 }
 0x307   :  { %3321 = vmatpush.msra.mxu2 %v9172_v22  ;;  %v2700_v22 = vsel %vm288_vm13, %v9342_v9, 0.0  ;;  %v12142_v9 = vrot.slane %v9412_v51, 1 }
 0x30a   :  { %7304 = vmatmul.msk.f32.gmra.mxu3 %vm1116_vm1, %v2615_v3  ;;  %7321 = vmatmul.msk.f32.gmra.mxu1 %vm1116_vm1, %v9365_v12  ;;  %v12147_v3 = vld [vmem:[#allocation12_spill] sm:$0xff] }
 0x30c   :  { %7294 = vmatmul.msk.f32.gmra.mxu2 %vm1116_vm1, %v9345_v43  ;;  %v2698_v43 = vsel %vm12137_vm11, %v9336_v48, 0.0  ;;  %v2699_v48 = vsel %vm12139_vm0, %v9339_v28, 0.0  ;;  %v2619_v28 = vsel %vm12140_vm8, %v9439_v11, 0.0  ;;  %vm12143_vm11 = vcmask 1046528  }
 0x30d   :  { %7312 = vmatmul.msk.f32.gmra.mxu0 %vm1116_vm1, %v2697_v33  ;;  %vm12145_vm15 = vmmov %vm12143_vm11  ;;  %vm12152_vm0 = vcmp.ge.s32.totalorder %v12082_v54, 0  ;;  %vm12155_vm8 = vcmp.ge.s32.totalorder %v12087_v25, 0 }
 0x30e   :  { %v3033_v63 = vsel %vm12145_vm15, %v12062_v16, %v12144_v45  ;;  %v2836_v45 = vsel %vm500_vm9, %v9371_v50, 0.0 }
 0x312   :  { %7305 = vmatmul.msk.f32.gmra.mxu3 %vm1116_vm1, %v2616_v21  ;;  %7322 = vmatmul.msk.f32.gmra.mxu1 %vm1116_vm1, %v9374_v2 }
 0x314   :  { %7295 = vmatmul.msk.f32.gmra.mxu2 %vm1116_vm1, %v9365_v12  ;;  %v2618_v12 = vsel %vm504_vm10, %v9405_v13, 0.0 }
 0x315   :  { %7313 = vmatmul.msk.f32.gmra.mxu0 %vm1116_vm1, %v2698_v43 }
 0x31a   :  { %7306 = vmatmul.msk.f32.gmra.mxu3 %vm1116_vm1, %v2617_v55  ;;  %7323 = vmatmul.msk.f32.gmra.mxu1 %vm1116_vm1, %v9386_v31 }
 0x31c   :  { %7296 = vmatmul.msk.f32.gmra.mxu2 %vm1116_vm1, %v9374_v2  ;;  %v2701_v2 = vsel %vm12141_vm3, %v9383_v44, 0.0  ;;  %v2702_v44 = vsel %vm290_vm2, %v9412_v51, 0.0  ;;  %vm12157_vm3 = vcmp.ge.s32.totalorder %v12092_v14, 0 }
 0x31d   :  { %7314 = vmatmul.msk.f32.gmra.mxu0 %vm1116_vm1, %v2699_v48 }
 0x322   :  { %7307 = vmatmul.msk.f32.gmra.mxu3 %vm1116_vm1, %v2618_v12  ;;  %7324 = vmatmul.msk.f32.gmra.mxu1 %vm1116_vm1, %v9402_v57 }
 0x324   :  { %7297 = vmatmul.msk.f32.gmra.mxu2 %vm1116_vm1, %v9386_v31  ;;  %v2780_v31 = vsel %vm12143_vm11, %v12142_v9, %v12062_v16  ;;  %v12149_v9 = vld [vmem:[#allocation10_spill] sm:$0xff]  ;;  %vm12158_vm11 = vcmp.lt.s32.totalorder %v12125_v32, 8 }
 0x325   :  { %7315 = vmatmul.msk.f32.gmra.mxu0 %vm1116_vm1, %v2700_v22  ;;  %vm12161_vm15 = vmmov %vm12158_vm11 }
 0x32a   :  { %7308 = vmatmul.msk.f32.gmra.mxu3 %vm1116_vm1, %v2619_v28  ;;  %7325 = vmatmul.msk.f32.gmra.mxu1 %vm1116_vm1, %v9444_v29 }
 0x32c   :  { %7298 = vmatmul.msk.f32.gmra.mxu2 %vm1116_vm1, %v9402_v57  ;;  %v2339_v57 = vpop.f32.mrf.mxu3 }
 0x32d   :  { %7316 = vmatmul.msk.f32.gmra.mxu0 %vm1116_vm1, %v2701_v2 }
 0x332   :  { %7326 = vmatmul.msk.f32.gmra.mxu1 %vm1116_vm1, %v2780_v31  ;;  %7337 = vmatmul.msk.f32.vlgmr.msra.gmra.mxu3 %vm1116_vm1, %v3033_v63  ;;  %v12150_v31 = vld [vmem:[#allocation9_spill] sm:$0xff]  ;;  %v12151_v63 = vld [vmem:[#allocation8_spill] sm:$0xff] }
 0x333   :  { %3680 = vmatpush.msra.mxu3 %v7327_v34  ;;  %v12148_v34 = vld [vmem:[#allocation7_spill] sm:$0xff] }
 0x334   :  { %7299 = vmatmul.msk.f32.gmra.mxu2 %vm1116_vm1, %v9444_v29  ;;  %v2834_v29 = vsel %vm498_vm4, %v9333_v8, 0.0  ;;  %v3192_v55 = vsel %vm499_vm6, %v12148_v34, 0.0  ;;  %v3022_v8 = vsel %vm284_vm7, %v9459_v42, 0.0 }
 0x335   :  { %7317 = vmatmul.msk.f32.gmra.mxu0 %vm1116_vm1, %v2702_v44 }
 0x337   :  { %v9770_v33 = vpop.f32.mrf.mxu1 }
 0x33a   :  { %7338 = vmatmul.msk.f32.gmra.mxu3 %vm1116_vm1, %v9498_v7  ;;  %7353 = vmatmul.msk.f32.vlgmr.msra.gmra.mxu1 %vm1116_vm1, %v3191_v47  ;;  %v9765_v53 = vpop.f32.mrf.mxu0 }
 0x33c   :  { %7328 = vmatmul.msk.f32.vlgmr.msrb.gmra.mxu2 %vm1116_vm1, %v2834_v29  ;;  %v12153_v29 = vld [vmem:[#allocation11_spill] sm:$0xff] }
 0x33d   :  { %v2342_v27 = vpop.f32.mrf.mxu3  ;;  %3142 = vmatmul.f32.vlgmr.msrb.gmra.mxu0 %v12067_v35  ;;  %3596 = vmatpush.msrb.mxu2 %v12147_v3  ;;  %v2835_v35 = vsel %vm499_vm6, %v9348_v0, 0.0  ;;  %v3193_v0 = vsel %vm500_vm9, %v12149_v9, 0.0  ;;  %v2837_v3 = vsel %vm501_vm12, %v9380_v10, 0.0  ;;  %v2838_v10 = vsel %vm502_vm14, %v9389_v58, 0.0 }
 0x33f   :  { %v2275_v21 = vpop.f32.mrf.mxu2  ;;  %v9792_v2 = vpop.f32.mrf.mxu1 }
 0x340   :  { %v9772_v43 = vadd.f32 %v2339_v57, %v2275_v21  ;;  %v3023_v57 = vsel %vm12152_vm0, %v12151_v63, 0.0  ;;  %v12154_v21 = vld [vmem:[#allocation21_spill] sm:$0xff]  ;;  %vm12167_vm0 = vcmp.ge.s32.totalorder %v12117_v6, 0 }
 0x342   :  { %7339 = vmatmul.msk.f32.gmra.mxu3 %vm1116_vm1, %v9509_v61  ;;  %7354 = vmatmul.msk.f32.gmra.mxu1 %vm1116_vm1, %v3192_v55  ;;  %v9787_v48 = vpop.f32.mrf.mxu0  ;;  %v3024_v55 = vsel %vm12155_vm8, %v12154_v21, 0.0  ;;  %vm12170_vm8 = vcmp.lt.s32.totalorder %v12133_v26, 8 }
 0x344   :  { %7329 = vmatmul.msk.f32.gmra.mxu2 %vm1116_vm1, %v2835_v35 }
 0x345   :  { %v2345_v12 = vpop.f32.mrf.mxu3  ;;  %7345 = vmatmul.msk.f32.gmra.mxu0 %vm1116_vm1, %v3022_v8 }
 0x347   :  { %v2278_v22 = vpop.f32.mrf.mxu2  ;;  %v9818_v50 = vpop.f32.mrf.mxu1 }
 0x348   :  { %v9790_v28 = vadd.f32 %v2342_v27, %v2278_v22  ;;  %v3194_v27 = vsel %vm501_vm12, %v12153_v29, 0.0 }
 0x34a   :  { %7340 = vmatmul.msk.f32.gmra.mxu3 %vm1116_vm1, %v12150_v31  ;;  %7355 = vmatmul.msk.f32.gmra.mxu1 %vm1116_vm1, %v3193_v0  ;;  %v9808_v41 = vpop.f32.mrf.mxu0  ;;  %v3195_v0 = vsel %vm502_vm14, %v9559_v37, 0.0  ;;  %v2463_v49 = vadd.f32 %v9787_v48, %v9790_v28  ;;  %v3633_v48 = vsel %vm499_vm6, %v12153_v29, 0.0 }
 0x34c   :  { %7330 = vmatmul.msk.f32.gmra.mxu2 %vm1116_vm1, %v2836_v45  ;;  %v12156_v45 = vld [vmem:[#allocation4_spill] sm:$0xff]  ;;  %v2546_v36 = vadd.f32 %v9792_v2, %v2463_v49 }
 0x34d   :  { %v2348_v44 = vpop.f32.mrf.mxu3  ;;  %7346 = vmatmul.msk.f32.gmra.mxu0 %vm1116_vm1, %v3023_v57  ;;  %v3025_v57 = vsel %vm12157_vm3, %v12156_v45, 0.0  ;;  %vm12171_vm3 = vmmov %vm12170_vm8 }
 0x34f   :  { %v2281_v52 = vpop.f32.mrf.mxu2 }
 0x350   :  { %v9810_v47 = vadd.f32 %v2345_v12, %v2281_v52 }
 0x352   :  { %7341 = vmatmul.msk.f32.gmra.mxu3 %vm1116_vm1, %v9556_v18  ;;  %7356 = vmatmul.msk.f32.gmra.mxu1 %vm1116_vm1, %v3194_v27  ;;  %v9830_v22 = vpop.f32.mrf.mxu0 }
 0x354   :  { %7331 = vmatmul.msk.f32.gmra.mxu2 %vm1116_vm1, %v2837_v3 }
 0x355   :  { %v2351_v35 = vpop.f32.mrf.mxu3  ;;  %7347 = vmatmul.msk.f32.gmra.mxu0 %vm1116_vm1, %v3024_v55  ;;  %v3196_v55 = vsel %vm12158_vm11, %v9566_v17, 0.0  ;;  %vm12175_vm11 = vcmp.ge.s32.totalorder %v12073_v23, 0  ;;  %v3274_v23 = vsel %vm284_vm7, %v12151_v63, 0.0 }
 0x357   :  { %v2284_v8 = vpop.f32.mrf.mxu2 }
 0x358   :  { %v9828_v12 = vadd.f32 %v2348_v44, %v2284_v8  ;;  %v9845_v44 = vpop.f32.mrf.mxu1  ;;  %v12159_v8 = vld [vmem:[#allocation16_spill] sm:$0xff] }
 0x35a   :  { %7342 = vmatmul.msk.f32.gmra.mxu3 %vm1116_vm1, %v9563_v20  ;;  %7357 = vmatmul.msk.f32.gmra.mxu1 %vm1116_vm1, %v3195_v0  ;;  %v9856_v58 = vpop.f32.mrf.mxu0  ;;  %v2839_v0 = vsel %vm12161_vm15, %v9405_v13, 0.0  ;;  %v2840_v13 = vsel %vm504_vm10, %v9439_v11, 0.0  ;;  %vm12177_vm15 = vmmov %vm12175_vm11 }
 0x35b   :  { %12160 = vst [vmem:[#allocation18_spill] sm:$0xff] %v9856_v58 }
 0x35c   :  { %7332 = vmatmul.msk.f32.gmra.mxu2 %vm1116_vm1, %v2838_v10  ;;  %v12162_v10 = vld [vmem:[#allocation13_spill] sm:$0xff] }
 0x35d   :  { %v2354_v52 = vpop.f32.mrf.mxu3  ;;  %7348 = vmatmul.msk.f32.gmra.mxu0 %vm1116_vm1, %v3025_v57 }
 0x35f   :  { %v2287_v27 = vpop.f32.mrf.mxu2 }
 0x360   :  { %v9848_v3 = vadd.f32 %v2351_v35, %v2287_v27  ;;  %v3026_v35 = vsel %vm288_vm13, %v12162_v10, 0.0  ;;  %v9866_v27 = vpop.f32.mrf.mxu1 }
 0x361   :  { %12163 = vst [vmem:[#allocation19_spill] sm:$0xff] %v9866_v27 }
 0x362   :  { %7343 = vmatmul.msk.f32.gmra.mxu3 %vm1116_vm1, %v12159_v8  ;;  %7358 = vmatmul.msk.f32.gmra.mxu1 %vm1116_vm1, %v3196_v55  ;;  %v12165_v55 = vld [vmem:[#allocation23_spill] sm:$0xff] }
 0x363   :  { %v3197_v16 = vsel %vm504_vm10, %v12165_v55, 0.0 }
 0x364   :  { %7333 = vmatmul.msk.f32.gmra.mxu2 %vm1116_vm1, %v2839_v0  ;;  %v12166_v0 = vld [vmem:[#allocation14_spill] sm:$0xff] }
 0x365   :  { %v2357_v57 = vpop.f32.mrf.mxu3  ;;  %7349 = vmatmul.msk.f32.gmra.mxu0 %vm1116_vm1, %v3026_v35 }
 0x367   :  { %v2290_v5 = vpop.f32.mrf.mxu2 }
 0x368   :  { %v9868_v60 = vadd.f32 %v2354_v52, %v2290_v5  ;;  %v3027_v5 = vsel %vm12167_vm0, %v12166_v0, 0.0  ;;  %v9883_v52 = vpop.f32.mrf.mxu0  ;;  %v9892_v11 = vpop.f32.mrf.mxu1  ;;  %vm12180_vm0 = vcmp.ge.s32.totalorder %v12082_v54, 0 }
 0x36a   :  { %12164 = vst [vmem:[#allocation20_spill] sm:$0xff] %v9868_v60  ;;  %7344 = vmatmul.msk.f32.gmra.mxu3 %vm1116_vm1, %v9599_v15  ;;  %7359 = vmatmul.msk.f32.gmra.mxu1 %vm1116_vm1, %v3197_v16  ;;  %v12169_v16 = vrot.slane %v9412_v51, 2 }
 0x36c   :  { %7334 = vmatmul.msk.f32.gmra.mxu2 %vm1116_vm1, %v2840_v13  ;;  %v2832_v58 = vsel %vm530_vm5, %v12169_v16, %v12065_v38  ;;  %v3198_v13 = vsel %vm12170_vm8, %v9602_v59, 0.0  ;;  %vm12182_vm8 = vcmp.ge.s32.totalorder %v12087_v25, 0 }
 0x36d   :  { %v2360_v35 = vpop.f32.mrf.mxu3  ;;  %7350 = vmatmul.msk.f32.gmra.mxu0 %vm1116_vm1, %v3027_v5 }
 0x36f   :  { %v2293_v60 = vpop.f32.mrf.mxu2 }
 0x370   :  { %v9886_v27 = vadd.f32 %v2357_v57, %v2293_v60  ;;  %v2841_v60 = vsel %vm12171_vm3, %v2832_v58, 0.0  ;;  %v12172_v57 = vld [vmem:[#allocation15_spill] sm:$0xff]  ;;  %v9909_v16 = vpop.f32.mrf.mxu0  ;;  %v9919_v58 = vpop.f32.mrf.mxu1  ;;  %vm12183_vm3 = vmmov %vm12182_vm8 }
 0x371   :  { %v3028_v51 = vsel %vm290_vm2, %v12172_v57, 0.0  ;;  %12173 = vst [vmem:[#allocation7_spill] sm:$0xff] %v9909_v16  ;;  %v3276_v54 = vsel %vm12183_vm3, %v12156_v45, 0.0 }
 0x372   :  { %12168 = vst [vmem:[#allocation12_spill] sm:$0xff] %v9886_v27  ;;  %7360 = vmatmul.msk.f32.gmra.mxu1 %vm1116_vm1, %v3198_v13  ;;  %7371 = vmatmul.msk.f32.vlgmr.msrb.gmra.mxu3 %vm1116_vm1, %v9498_v7  ;;  %v3495_v7 = vsel %vm12175_vm11, %v12151_v63, 0.0  ;;  %vm12184_vm11 = vcmp.ge.s32.totalorder %v12092_v14, 0 }
 0x373   :  { %12176 = vst [vmem:[#allocation9_spill] sm:$0xff] %v9919_v58  ;;  %v3499_v25 = vsel %vm12184_vm11, %v12166_v0, 0.0 }
 0x374   :  { %7335 = vmatmul.msk.f32.gmra.mxu2 %vm1116_vm1, %v2841_v60  ;;  %v3273_v60 = vsel %vm12177_vm15, %v9459_v42, 0.0  ;;  %v3414_v42 = vsel %vm499_vm6, %v12149_v9, 0.0  ;;  %vm12185_vm15 = vmmov %vm12184_vm11 }
 0x375   :  { %v9906_v5 = vpop.f32.mrf.mxu3  ;;  %7351 = vmatmul.msk.f32.gmra.mxu0 %vm1116_vm1, %v3028_v51 }
 0x377   :  { %v2296_v38 = vpop.f32.mrf.mxu2 }
 0x378   :  { %v9911_v13 = vadd.f32 %v2360_v35, %v2296_v38  ;;  %v3413_v38 = vsel %vm498_vm4, %v12148_v34, 0.0  ;;  %v9948_v34 = vpop.f32.mrf.mxu1 }
 0x379   :  { %12179 = vst [vmem:[#allocation11_spill] sm:$0xff] %v9948_v34 }
 0x37a   :  { %12174 = vst [vmem:[#allocation10_spill] sm:$0xff] %v9911_v13  ;;  %7372 = vmatmul.msk.f32.gmra.mxu3 %vm1116_vm1, %v9509_v61  ;;  %7389 = vmatmul.msk.f32.vlgmr.msrb.gmra.mxu1 %vm1116_vm1, %v3495_v7  ;;  %v9933_v13 = vpop.f32.mrf.mxu0  ;;  %v3496_v7 = vsel %vm284_vm7, %v12154_v21, 0.0  ;;  %vm12181_vm7 = vmmov %vm12180_vm0 }
 0x37b   :  { %12178 = vst [vmem:[#allocation8_spill] sm:$0xff] %v9933_v13  ;;  %v3275_v63 = vsel %vm12181_vm7, %v12154_v21, 0.0  ;;  %v3416_v21 = vsel %vm501_vm12, %v9559_v37, 0.0  ;;  %vm12190_vm7 = vcmp.ge.s32.totalorder %v12117_v6, 0 }
 0x37c   :  { %7362 = vmatmul.msk.f32.vlgmr.msra.gmra.mxu2 %vm1116_vm1, %v3273_v60 }
 0x37d   :  { %v9928_v35 = vpop.f32.mrf.mxu3  ;;  %7380 = vmatmul.msk.f32.vlgmr.msra.gmra.mxu0 %vm1116_vm1, %v3413_v38 }
 0x37f   :  { %v9931_v51 = vpop.f32.mrf.mxu2 }
 0x380   :  { %v9973_v34 = vpop.f32.mrf.mxu1 }
 0x382   :  { %7373 = vmatmul.msk.f32.gmra.mxu3 %vm1116_vm1, %v12150_v31  ;;  %7390 = vmatmul.msk.f32.gmra.mxu1 %vm1116_vm1, %v3496_v7  ;;  %v3497_v7 = vsel %vm12180_vm0, %v12156_v45, 0.0  ;;  %v9961_v19 = vpop.f32.mrf.mxu0  ;;  %v3277_v45 = vsel %vm12185_vm15, %v12162_v10, 0.0  ;;  %vm12187_vm0 = vcmp.lt.s32.totalorder %v12125_v32, 8 }
 0x384   :  { %7363 = vmatmul.msk.f32.gmra.mxu2 %vm1116_vm1, %v3274_v23  ;;  %v3415_v23 = vsel %vm500_vm9, %v12153_v29, 0.0 }
 0x385   :  { %v9950_v60 = vpop.f32.mrf.mxu3  ;;  %7381 = vmatmul.msk.f32.gmra.mxu0 %vm1116_vm1, %v3414_v42 }
 0x387   :  { %v9953_v38 = vpop.f32.mrf.mxu2 }
 0x388   :  { %v9997_v16 = vpop.f32.mrf.mxu1  ;;  %v2602_v28 = vadd.f32 %v9953_v38, %v2546_v36 }
 0x38a   :  { %7374 = vmatmul.msk.f32.gmra.mxu3 %vm1116_vm1, %v9556_v18  ;;  %7391 = vmatmul.msk.f32.gmra.mxu1 %vm1116_vm1, %v3497_v7  ;;  %v3498_v7 = vsel %vm12182_vm8, %v12162_v10, 0.0  ;;  %v3278_v10 = vsel %vm288_vm13, %v12166_v0, 0.0  ;;  %v2462_v0 = vadd.f32 %v9765_v53, %v9772_v43  ;;  %v3632_v53 = vsel %vm498_vm4, %v12149_v9, 0.0 }
 0x38b   :  { %v3502_v43 = vsel %vm290_vm2, %v9605_v39, 0.0  ;;  %vm12192_vm4 = vcmp.lt.s32.totalorder %v12133_v26, 8  ;;  %v2688_v29 = vadd.f32 %v9928_v35, %v2602_v28  ;;  %vm12217_vm8 = vcmask 31744  }
 0x38c   :  { %7364 = vmatmul.msk.f32.gmra.mxu2 %vm1116_vm1, %v3275_v63  ;;  %v9990_v63 = vpop.f32.mrf.mxu0  ;;  %v2545_v6 = vadd.f32 %v9770_v33, %v2462_v0  ;;  %v3420_v9 = vsel %vm12192_vm4, %v9630_v1, 0.0  ;;  %vm12209_vm6 = vmmov %vm12192_vm4 }
 0x38d   :  { %v9970_v42 = vpop.f32.mrf.mxu3  ;;  %7382 = vmatmul.msk.f32.gmra.mxu0 %vm1116_vm1, %v3415_v23  ;;  %v2771_v35 = vadd.f32 %v9990_v63, %v2688_v29  ;;  %vm12221_vm3 = vmmov %vm12217_vm8 }
 0x38e   :  { %vm12224_vm11 = vmmov %vm12221_vm3 }
 0x38f   :  { %v9975_v13 = vpop.f32.mrf.mxu2  ;;  %vm12225_vm15 = vmmov %vm12221_vm3 }
 0x390   :  { %v10025_v14 = vpop.f32.mrf.mxu1  ;;  %vm12229_vm4 = vmmov %vm12221_vm3 }
 0x392   :  { %7375 = vmatmul.msk.f32.gmra.mxu3 %vm1116_vm1, %v9563_v20  ;;  %7392 = vmatmul.msk.f32.gmra.mxu1 %vm1116_vm1, %v3498_v7  ;;  %v3417_v7 = vsel %vm502_vm14, %v9566_v17, 0.0 }
 0x394   :  { %7365 = vmatmul.msk.f32.gmra.mxu2 %vm1116_vm1, %v3276_v54 }
 0x395   :  { %v9992_v23 = vpop.f32.mrf.mxu3  ;;  %7383 = vmatmul.msk.f32.gmra.mxu0 %vm1116_vm1, %v3416_v21  ;;  %v10015_v21 = vpop.f32.mrf.mxu0 }
 0x397   :  { %v9995_v58 = vpop.f32.mrf.mxu2 }
 0x39a   :  { %7376 = vmatmul.msk.f32.gmra.mxu3 %vm1116_vm1, %v12159_v8  ;;  %7393 = vmatmul.msk.f32.gmra.mxu1 %vm1116_vm1, %v3499_v25  ;;  %v3500_v25 = vsel %vm288_vm13, %v12172_v57, 0.0  ;;  %vm12191_vm13 = vmmov %vm12190_vm7 }
 0x39b   :  { %v3279_v24 = vsel %vm12191_vm13, %v12172_v57, 0.0  ;;  %v2601_v57 = vadd.f32 %v9931_v51, %v2545_v6  ;;  %vm12228_vm13 = vmmov %vm12221_vm3 }
 0x39c   :  { %7366 = vmatmul.msk.f32.gmra.mxu2 %vm1116_vm1, %v3277_v45  ;;  %v3418_v45 = vsel %vm12187_vm0, %v12165_v55, 0.0 }
 0x39d   :  { %v10012_v54 = vpop.f32.mrf.mxu3  ;;  %7384 = vmatmul.msk.f32.gmra.mxu0 %vm1116_vm1, %v3417_v7  ;;  %v2687_v0 = vadd.f32 %v9906_v5, %v2601_v57  ;;  %v10102_v5 = vld [vmem:[%s11915_s4] sm:$0x7] }
 0x39e   :  { %12186 = vst [vmem:[#allocation21_spill] sm:$0xff] %v10012_v54 }
 0x39f   :  { %v10017_v27 = vpop.f32.mrf.mxu2 }
 0x3a2   :  { %7377 = vmatmul.msk.f32.gmra.mxu3 %vm1116_vm1, %v9599_v15  ;;  %7394 = vmatmul.msk.f32.gmra.mxu1 %vm1116_vm1, %v3500_v25  ;;  %v10039_v15 = vpop.f32.mrf.mxu0  ;;  %v12189_v25 = vld [vmem:[#allocation22_spill] sm:$0xff] }
 0x3a3   :  { %v3501_v8 = vsel %vm12190_vm7, %v12189_v25, 0.0  ;;  %v3280_v33 = vsel %vm290_vm2, %v12189_v25, 0.0  ;;  %v2770_v25 = vadd.f32 %v9961_v19, %v2687_v0  ;;  %v10115_v19 = vperm.slane %v10102_v5, 0  ;;  %vm12196_vm2 = vmmov %vm12187_vm0 }
 0x3a4   :  { %7367 = vmatmul.msk.f32.gmra.mxu2 %vm1116_vm1, %v3278_v10  ;;  %v3419_v10 = vsel %vm504_vm10, %v9602_v59, 0.0  ;;  %vm12227_vm7 = vmmov %vm12221_vm3 }
 0x3a5   :  { %v10034_v7 = vpop.f32.mrf.mxu3  ;;  %7385 = vmatmul.msk.f32.gmra.mxu0 %vm1116_vm1, %v3418_v45  ;;  %v10056_v45 = vpop.f32.mrf.mxu1  ;;  %v2824_v38 = vadd.f32 %v9973_v34, %v2770_v25  ;;  %v2465_v34 = vadd.f32 %v9830_v22, %v9828_v12  ;;  %v3635_v12 = vsel %vm501_vm12, %v9566_v17, 0.0 }
 0x3a6   :  { %12188 = vst [vmem:[#allocation4_spill] sm:$0xff] %v10034_v7 }
 0x3a7   :  { %v10037_v54 = vpop.f32.mrf.mxu2  ;;  %v2548_v0 = vadd.f32 %v9845_v44, %v2465_v34  ;;  %v3637_v34 = vsel %vm12196_vm2, %v9602_v59, 0.0  ;;  %vm12230_vm2 = vmmov %vm12221_vm3 }
 0x3a9   :  { %v2604_v22 = vadd.f32 %v9995_v58, %v2548_v0 }
 0x3aa   :  { %7378 = vmatmul.msk.f32.gmra.mxu3 %vm1116_vm1, %v9620_v30  ;;  %7395 = vmatmul.msk.f32.gmra.mxu1 %vm1116_vm1, %v3501_v8 }
 0x3ab   :  { %v2690_v28 = vadd.f32 %v9970_v42, %v2604_v22 }
 0x3ac   :  { %7368 = vmatmul.msk.f32.gmra.mxu2 %vm1116_vm1, %v3279_v24  ;;  %v10073_v24 = vpop.f32.mrf.mxu0 }
 0x3ad   :  { %v10058_v7 = vpop.f32.mrf.mxu3  ;;  %7386 = vmatmul.msk.f32.gmra.mxu0 %vm1116_vm1, %v3419_v10  ;;  %v10088_v10 = vpop.f32.mrf.mxu1  ;;  %v2773_v42 = vadd.f32 %v10039_v15, %v2690_v28 }
 0x3af   :  { %v10061_v8 = vpop.f32.mrf.mxu2 }
 0x3b2   :  { %7396 = vmatmul.msk.f32.gmra.mxu1 %vm1116_vm1, %v3502_v43  ;;  %7407 = vmatmul.msk.f32.vlgmr.msra.gmra.mxu3 %vm1116_vm1, %v3632_v53  ;;  %v2464_v53 = vadd.f32 %v9808_v41, %v9810_v47 }
 0x3b4   :  { %7369 = vmatmul.msk.f32.gmra.mxu2 %vm1116_vm1, %v3280_v33  ;;  %v10108_v2 = vpop.f32.mrf.mxu0  ;;  %v2547_v57 = vadd.f32 %v9818_v50, %v2464_v53  ;;  %v12194_v53 = vld [vmem:[#allocation19_spill] sm:$0xff] }
 0x3b5   :  { %v10084_v51 = vpop.f32.mrf.mxu3  ;;  %7387 = vmatmul.msk.f32.gmra.mxu0 %vm1116_vm1, %v3420_v9  ;;  %v10118_v49 = vpop.f32.mrf.mxu1 }
 0x3b6   :  { %v2603_v41 = vadd.f32 %v9975_v13, %v2547_v57 }
 0x3b7   :  { %v10090_v6 = vpop.f32.mrf.mxu2 }
 0x3b8   :  { %v2689_v62 = vadd.f32 %v9950_v60, %v2603_v41 }
 0x3ba   :  { %7408 = vmatmul.msk.f32.gmra.mxu3 %vm1116_vm1, %v3633_v48  ;;  %v2772_v60 = vadd.f32 %v10015_v21, %v2689_v62 }
 0x3bc   :  { %7398 = vmatmul.msk.f32.vlgmr.msrb.gmra.mxu2 %vm1116_vm1, %v9509_v61  ;;  %v3634_v61 = vsel %vm500_vm9, %v9559_v37, 0.0  ;;  %v2825_v37 = vadd.f32 %v9997_v16, %v2771_v35  ;;  %v10136_v13 = vpop.f32.mrf.mxu0  ;;  %v12193_v16 = vld [vmem:[#allocation18_spill] sm:$0xff]  ;;  %v2826_v21 = vadd.f32 %v10025_v14, %v2772_v60  ;;  %v12201_v60 = vld [vmem:[#allocation9_spill] sm:$0xff]  ;;  %vm12213_vm9 = vcmask 1043456  }
 0x3bd   :  { %v10110_v4 = vpop.f32.mrf.mxu3  ;;  %v10146_v36 = vpop.f32.mrf.mxu1  ;;  %v2466_v48 = vadd.f32 %v12193_v16, %v9848_v3  ;;  %vm12226_vm0 = vmmov %vm12213_vm9 }
 0x3bf   :  { %v2885_v43 = vpop.f32.mrf.mxu2  ;;  %v2549_v29 = vadd.f32 %v12194_v53, %v2466_v48 }
 0x3c0   :  { %v2909_v33 = vadd.f32 %v2885_v43, %v2824_v38  ;;  %v3636_v43 = vsel %vm502_vm14, %v12165_v55, 0.0 }
 0x3c1   :  { %v2605_v57 = vadd.f32 %v10017_v27, %v2549_v29  ;;  %v12204_v29 = vld [vmem:[#allocation17_spill] sm:$0xff] }
 0x3c2   :  { %v2918_v47 = vadd.f32 %v10115_v19, %v2909_v33  ;;  %7409 = vmatmul.msk.f32.gmra.mxu3 %vm1116_vm1, %v3634_v61  ;;  %v12195_v33 = vld [vmem:[#allocation20_spill] sm:$0xff] }
 0x3c3   :  { %v2467_v14 = vadd.f32 %v9883_v52, %v12195_v33  ;;  %v2691_v41 = vadd.f32 %v9992_v23, %v2605_v57  ;;  %v12197_v23 = vld [vmem:[#allocation12_spill] sm:$0xff] }
 0x3c4   :  { %2926 = vst.msk [vmem:[#allocation3] sm:$0xff] %vm1116_vm1, %v2918_v47  ;;  %7399 = vmatmul.msk.f32.gmra.mxu2 %vm1116_vm1, %v12150_v31  ;;  %v2934_v44 = vsel %vm1116_vm1, %v2918_v47, 0.0  ;;  %v10160_v38 = vpop.f32.mrf.mxu0  ;;  %v2827_v47 = vadd.f32 %v10056_v45, %v2773_v42  ;;  %v12198_v45 = vld [vmem:[#allocation7_spill] sm:$0xff] }
 0x3c5   :  { %v10132_v50 = vpop.f32.mrf.mxu3  ;;  %v10175_v46 = vpop.f32.mrf.mxu1  ;;  %v2550_v35 = vadd.f32 %v9892_v11, %v2467_v14  ;;  %v2468_v0 = vadd.f32 %v12198_v45, %v12197_v23  ;;  %v12208_v14 = vld [vmem:[#allocation11_spill] sm:$0xff] }
 0x3c7   :  { %v2888_v9 = vpop.f32.mrf.mxu2  ;;  %v2606_v62 = vadd.f32 %v10037_v54, %v2550_v35  ;;  %v12200_v54 = vld [vmem:[#allocation21_spill] sm:$0xff]  ;;  %v2551_v16 = vadd.f32 %v12201_v60, %v2468_v0 }
 0x3c8   :  { %v2910_v63 = vadd.f32 %v2888_v9, %v2825_v37  ;;  %v2774_v37 = vadd.f32 %v10073_v24, %v2691_v41 }
 0x3ca   :  { %v2919_v31 = vadd.f32 %v10115_v19, %v2910_v63  ;;  %7410 = vmatmul.msk.f32.gmra.mxu3 %vm1116_vm1, %v3635_v12  ;;  %v12199_v63 = vld [vmem:[#allocation16_spill] sm:$0xff]  ;;  %v2692_v12 = vadd.f32 %v12200_v54, %v2606_v62  ;;  %v2828_v22 = vadd.f32 %v10088_v10, %v2774_v37 }
 0x3cb   :  { %v12203_v10 = vld [vmem:[#allocation8_spill] sm:$0xff] }
 0x3cc   :  { %2927 = vst.msk [vmem:[#allocation3 + $0x8] sm:$0xff] %vm1116_vm1, %v2919_v31  ;;  %v2935_v40 = vsel %vm1116_vm1, %v2919_v31, 0.0  ;;  %7400 = vmatmul.msk.f32.gmra.mxu2 %vm1116_vm1, %v9556_v18  ;;  %v10189_v9 = vpop.f32.mrf.mxu0  ;;  %v2775_v28 = vadd.f32 %v10108_v2, %v2692_v12  ;;  %v12206_v2 = vld [vmem:[#allocation6_spill] sm:$0xff] }
 0x3cd   :  { %v2936_v17 = vadd.f32 %v2935_v40, %v2934_v44  ;;  %v10155_v58 = vpop.f32.mrf.mxu3  ;;  %v10201_v24 = vpop.f32.mrf.mxu1  ;;  %v3638_v44 = vsel %vm504_vm10, %v9630_v1, 0.0  ;;  %v2607_v40 = vadd.f32 %v10061_v8, %v2551_v16 }
 0x3ce   :  { %v2829_v57 = vadd.f32 %v10118_v49, %v2775_v28 }
 0x3cf   :  { %v2891_v25 = vpop.f32.mrf.mxu2 }
 0x3d0   :  { %v2911_v3 = vadd.f32 %v2891_v25, %v2826_v21  ;;  %v12202_v21 = vld [vmem:[#allocation10_spill] sm:$0xff] }
 0x3d1   :  { %v2469_v25 = vadd.f32 %v12203_v10, %v12202_v21 }
 0x3d2   :  { %v2920_v18 = vadd.f32 %v10115_v19, %v2911_v3  ;;  %7411 = vmatmul.msk.f32.gmra.mxu3 %vm1116_vm1, %v3636_v43  ;;  %v12205_v3 = vld [vmem:[#allocation4_spill] sm:$0xff] }
 0x3d3   :  { %v2693_v43 = vadd.f32 %v12205_v3, %v2607_v40 }
 0x3d4   :  { %2928 = vst.msk [vmem:[#allocation3 + $0x10] sm:$0xff] %vm1116_vm1, %v2920_v18  ;;  %v2937_v61 = vsel %vm1116_vm1, %v2920_v18, 0.0  ;;  %7401 = vmatmul.msk.f32.gmra.mxu2 %vm1116_vm1, %v9563_v20  ;;  %v10217_v56 = vpop.f32.mrf.mxu0  ;;  %v12207_v18 = vrot.slane %v9605_v39, 2 }
 0x3d5   :  { %v2938_v55 = vadd.f32 %v2937_v61, %v2936_v17  ;;  %v10177_v27 = vpop.f32.mrf.mxu3  ;;  %v2552_v61 = vadd.f32 %v12208_v14, %v2469_v25  ;;  %v10228_v41 = vpop.f32.mrf.mxu1  ;;  %v2776_v49 = vadd.f32 %v10136_v13, %v2693_v43 }
 0x3d6   :  { %v3630_v42 = vsel %vm530_vm5, %v12207_v18, %v12206_v2  ;;  %vm12212_vm5 = vcmask 1046528  }
 0x3d7   :  { %v2894_v15 = vpop.f32.mrf.mxu2 }
 0x3d8   :  { %v2912_v52 = vadd.f32 %v2894_v15, %v2827_v47  ;;  %v3639_v47 = vsel %vm12209_vm6, %v3630_v42, 0.0  ;;  %v2608_v15 = vadd.f32 %v10090_v6, %v2552_v61  ;;  %v2830_v6 = vadd.f32 %v10146_v36, %v2776_v49  ;;  %vm12231_vm6 = vmmov %vm12226_vm0 }
 0x3da   :  { %v2921_v20 = vadd.f32 %v10115_v19, %v2912_v52  ;;  %7412 = vmatmul.msk.f32.gmra.mxu3 %vm1116_vm1, %v3637_v34  ;;  %v2694_v26 = vadd.f32 %v10058_v7, %v2608_v15 }
 0x3dc   :  { %2929 = vst.msk [vmem:[#allocation3 + $0x18] sm:$0xff] %vm1116_vm1, %v2921_v20  ;;  %v2939_v11 = vsel %vm1116_vm1, %v2921_v20, 0.0  ;;  %7402 = vmatmul.msk.f32.gmra.mxu2 %vm1116_vm1, %v12199_v63  ;;  %v3149_v20 = vpop.f32.mrf.mxu0  ;;  %v2777_v13 = vadd.f32 %v10160_v38, %v2694_v26  ;;  %v12211_v63 = vrot.slane %v9605_v39, 1 }
 0x3dd   :  { %v2940_v32 = vadd.f32 %v2939_v11, %v2938_v55  ;;  %v10197_v59 = vpop.f32.mrf.mxu3  ;;  %v3247_v0 = vpop.f32.mrf.mxu1  ;;  %v12210_v11 = vld [vmem:[#allocation5_spill] sm:$0xff] }
 0x3de   :  { %v2831_v54 = vadd.f32 %v10175_v46, %v2777_v13 }
 0x3df   :  { %v2897_v31 = vpop.f32.mrf.mxu2 }
 0x3e0   :  { %v2913_v48 = vadd.f32 %v2897_v31, %v2828_v22 }
 0x3e2   :  { %v2922_v17 = vadd.f32 %v10115_v19, %v2913_v48  ;;  %7413 = vmatmul.msk.f32.gmra.mxu3 %vm1116_vm1, %v3638_v44 }
 0x3e4   :  { %2930 = vst.msk [vmem:[#allocation3 + $0x20] sm:$0xff] %vm1116_vm1, %v2922_v17  ;;  %v2941_v53 = vsel %vm1116_vm1, %v2922_v17, 0.0  ;;  %7403 = vmatmul.msk.f32.gmra.mxu2 %vm1116_vm1, %v12204_v29  ;;  %v3152_v31 = vpop.f32.mrf.mxu0 }
 0x3e5   :  { %v2942_v1 = vadd.f32 %v2941_v53, %v2940_v32  ;;  %v10219_v8 = vpop.f32.mrf.mxu3  ;;  %v3250_v60 = vpop.f32.mrf.mxu1 }
 0x3e7   :  { %v2900_v33 = vpop.f32.mrf.mxu2 }
 0x3e8   :  { %v2914_v55 = vadd.f32 %v2900_v33, %v2829_v57 }
 0x3ea   :  { %v2923_v35 = vadd.f32 %v10115_v19, %v2914_v55  ;;  %7414 = vmatmul.msk.f32.gmra.mxu3 %vm1116_vm1, %v3639_v47  ;;  %v3144_v55 = vadd.f32 %v10189_v9, %v10084_v51 }
 0x3ec   :  { %2931 = vst.msk [vmem:[#allocation3 + $0x28] sm:$0xff] %vm1116_vm1, %v2923_v35  ;;  %v2943_v52 = vsel %vm1116_vm1, %v2923_v35, 0.0  ;;  %7404 = vmatmul.msk.f32.gmra.mxu2 %vm1116_vm1, %v9620_v30  ;;  %v3578_v30 = vsel %vm12212_vm5, %v12211_v63, %v12210_v11  ;;  %v3155_v40 = vpop.f32.mrf.mxu0  ;;  %v3265_v49 = vadd.f32 %v10201_v24, %v3144_v55  ;;  %v3150_v11 = vadd.f32 %v3149_v20, %v10132_v50  ;;  %vm12232_vm5 = vmmov %vm12230_vm2 }
 0x3ed   :  { %v2944_v34 = vadd.f32 %v2943_v52, %v2942_v1  ;;  %v10240_v62 = vpop.f32.mrf.mxu3  ;;  %v10259_v28 = vpop.f32.mrf.mxu1 }
 0x3ef   :  { %v2903_v37 = vpop.f32.mrf.mxu2 }
 0x3f0   :  { %v2915_v23 = vadd.f32 %v2903_v37, %v2830_v6 }
 0x3f2   :  { %v2924_v45 = vadd.f32 %v10115_v19, %v2915_v23 }
 0x3f4   :  { %2932 = vst.msk [vmem:[#allocation3 + $0x30] sm:$0xff] %vm1116_vm1, %v2924_v45  ;;  %v2945_v32 = vsel %vm1116_vm1, %v2924_v45, 0.0  ;;  %7405 = vmatmul.msk.f32.gmra.mxu2 %vm1116_vm1, %v3578_v30  ;;  %v10261_v46 = vpop.f32.mrf.mxu0 }
 0x3f5   :  { %v2946_v7 = vadd.f32 %v2945_v32, %v2944_v34  ;;  %v3378_v36 = vpop.f32.mrf.mxu3  ;;  %v10263_v53 = vpop.f32.mrf.mxu1  ;;  %v3147_v34 = vadd.f32 %v10217_v56, %v10110_v4 }
 0x3f7   :  { %v2906_v12 = vpop.f32.mrf.mxu2  ;;  %v3266_v45 = vadd.f32 %v10228_v41, %v3147_v34 }
 0x3f8   :  { %v2916_v22 = vadd.f32 %v2906_v12, %v2831_v54  ;;  %v3267_v54 = vadd.f32 %v3247_v0, %v3150_v11 }
 0x3fa   :  { %v2925_v38 = vadd.f32 %v10115_v19, %v2916_v22 }
 0x3fc   :  { %2933 = vst.msk [vmem:[#allocation3 + $0x38] sm:$0xff] %vm1116_vm1, %v2925_v38  ;;  %v2947_v39 = vsel %vm1116_vm1, %v2925_v38, 0.0  ;;  %v10267_v1 = vpop.f32.mrf.mxu0  ;;  %v3153_v38 = vadd.f32 %v3152_v31, %v10155_v58 }
 0x3fd   :  { %v10257_v16 = vadd.f32 %v2947_v39, %v2946_v7  ;;  %v3381_v48 = vpop.f32.mrf.mxu3  ;;  %v10269_v43 = vpop.f32.mrf.mxu1 }
 0x3ff   :  { %v3323_v44 = vpop.f32.mrf.mxu2 }
 0x400   :  { %v3347_v52 = vadd.f32 %v3323_v44, %v3265_v49  ;;  %v3268_v44 = vadd.f32 %v3250_v60, %v3153_v38 }
 0x402   :  { %v3402_v37 = vadd.f32 %v3378_v36, %v3347_v52 }
 0x404   :  { %v10273_v18 = vpop.f32.mrf.mxu0 }
 0x405   :  { %v3384_v17 = vpop.f32.mrf.mxu3  ;;  %v10275_v42 = vpop.f32.mrf.mxu1 }
 0x407   :  { %v3326_v21 = vpop.f32.mrf.mxu2 }
 0x408   :  { %v3348_v51 = vadd.f32 %v3326_v21, %v3266_v45 }
 0x40a   :  { %v3403_v30 = vadd.f32 %v3381_v48, %v3348_v51 }
 0x40c   :  { %v3463_v61 = vpop.f32.mrf.mxu0 }
 0x40d   :  { %v3387_v10 = vpop.f32.mrf.mxu3  ;;  %v3545_v15 = vpop.f32.mrf.mxu1  ;;  %v3487_v9 = vadd.f32 %v3463_v61, %v3402_v37 }
 0x40f   :  { %v3329_v25 = vpop.f32.mrf.mxu2  ;;  %v3569_v32 = vadd.f32 %v3545_v15, %v3487_v9  ;;  %v3156_v15 = vadd.f32 %v3155_v40, %v10177_v27 }
 0x410   :  { %v3349_v4 = vadd.f32 %v3329_v25, %v3267_v54 }
 0x411   :  { %v3269_v34 = vadd.f32 %v10259_v28, %v3156_v15 }
 0x412   :  { %v3404_v39 = vadd.f32 %v3384_v17, %v3349_v4 }
 0x414   :  { %v3466_v26 = vpop.f32.mrf.mxu0 }
 0x415   :  { %v10265_v29 = vpop.f32.mrf.mxu3  ;;  %v3548_v13 = vpop.f32.mrf.mxu1  ;;  %v3488_v22 = vadd.f32 %v3466_v26, %v3403_v30 }
 0x417   :  { %v3332_v3 = vpop.f32.mrf.mxu2  ;;  %v3570_v50 = vadd.f32 %v3548_v13, %v3488_v22  ;;  %v3159_v13 = vadd.f32 %v10261_v46, %v10197_v59  ;;  %v3162_v59 = vadd.f32 %v10267_v1, %v10219_v8  ;;  %v3165_v8 = vadd.f32 %v10273_v18, %v10240_v62 }
 0x418   :  { %v3350_v61 = vadd.f32 %v3332_v3, %v3268_v44 }
 0x419   :  { %v3270_v28 = vadd.f32 %v10263_v53, %v3159_v13  ;;  %v3271_v53 = vadd.f32 %v10269_v43, %v3162_v59  ;;  %v3272_v43 = vadd.f32 %v10275_v42, %v3165_v8  ;;  %v3864_v59 = vld [vmem:[%s11916_s5] sm:$0xf] }
 0x41a   :  { %v3405_v49 = vadd.f32 %v3387_v10, %v3350_v61  ;;  %3977 = vrot.lane.b32.xlu2 %v3864_v59, %s7818_s9  ;;  %7415 = vmatpush.msk.msrb.mxu0 %vm12213_vm9, %v3864_v59  ;;  %v3760_v59 = vld [vmem:[#allocation3 + $0x30] sm:$0xff]  ;;  %vm12233_vm9 = vmmov %vm12230_vm2 }
 0x41c   :  { %v3469_v24 = vpop.f32.mrf.mxu0 }
 0x41d   :  { %v10271_v57 = vpop.f32.mrf.mxu3  ;;  %v3551_v36 = vpop.f32.mrf.mxu1  ;;  %v3489_v55 = vadd.f32 %v3469_v24, %v3404_v39 }
 0x41f   :  { %v3335_v2 = vpop.f32.mrf.mxu2  ;;  %v3571_v17 = vadd.f32 %v3551_v36, %v3489_v55 }
 0x420   :  { %v3351_v60 = vadd.f32 %v3335_v2, %v3269_v34 }
 0x422   :  { %v3406_v40 = vadd.f32 %v10265_v29, %v3351_v60  ;;  %v2949_v60 = vrot.slane %v10257_v16, 4 }
 0x424   :  { %v3472_v0 = vpop.f32.mrf.mxu0 }
 0x425   :  { %v10277_v33 = vpop.f32.mrf.mxu3  ;;  %v3554_v31 = vpop.f32.mrf.mxu1  ;;  %v3490_v45 = vadd.f32 %v3472_v0, %v3405_v49 }
 0x427   :  { %v10279_v14 = vpop.f32.mrf.mxu2  ;;  %v3572_v10 = vadd.f32 %v3554_v31, %v3490_v45 }
 0x428   :  { %v3352_v2 = vadd.f32 %v10279_v14, %v3270_v28 }
 0x42a   :  { %v3407_v29 = vadd.f32 %v10271_v57, %v3352_v2 }
 0x42c   :  { %v3475_v3 = vpop.f32.mrf.mxu0 }
 0x42d   :  { %v10283_v47 = vpop.f32.mrf.mxu3  ;;  %v3557_v51 = vpop.f32.mrf.mxu1  ;;  %v3491_v30 = vadd.f32 %v3475_v3, %v3406_v40 }
 0x42f   :  { %v10285_v35 = vpop.f32.mrf.mxu2 }
 0x430   :  { %v3353_v14 = vadd.f32 %v10285_v35, %v3271_v53 }
 0x432   :  { %v3408_v57 = vadd.f32 %v10277_v33, %v3353_v14 }
 0x434   :  { %v3478_v24 = vpop.f32.mrf.mxu0 }
 0x435   :  { %v3682_v6 = vpop.f32.mrf.mxu3  ;;  %v3560_v4 = vpop.f32.mrf.mxu1  ;;  %v3492_v22 = vadd.f32 %v3478_v24, %v3407_v29 }
 0x437   :  { %v10290_v23 = vpop.f32.mrf.mxu2  ;;  %v3574_v38 = vadd.f32 %v3560_v4, %v3492_v22 }
 0x438   :  { %v3354_v35 = vadd.f32 %v10290_v23, %v3272_v43 }
 0x43a   :  { %v3409_v18 = vadd.f32 %v10283_v47, %v3354_v35 }
 0x43c   :  { %v3481_v39 = vpop.f32.mrf.mxu0 }
 0x43d   :  { %v3685_v63 = vpop.f32.mrf.mxu3  ;;  %v3493_v44 = vadd.f32 %v3481_v39, %v3408_v57 }
 0x43f   :  { %v3598_v7 = vpop.f32.mrf.mxu2 }
 0x440   :  { %v3622_v12 = vadd.f32 %v3598_v7, %v3569_v32  ;;  %v3573_v7 = vadd.f32 %v3557_v51, %v3491_v30  ;;  %v2950_v51 = vadd.f32 %v2949_v60, %v10257_v16 }
 0x442   :  { %v3706_v56 = vadd.f32 %v3682_v6, %v3622_v12 }
 0x444   :  { %v10296_v41 = vadd.f32 %v3706_v56, %v10115_v19  ;;  %v3484_v15 = vpop.f32.mrf.mxu0 }
 0x445   :  { %v3688_v20 = vpop.f32.mrf.mxu3  ;;  %v3494_v49 = vadd.f32 %v3484_v15, %v3409_v18  ;;  %v10373_v15 = vld [vmem:[#allocation3 + $0x8] sm:$0xff] }
 0x446   :  { %3723 = vst.msk [vmem:[#allocation3 + $0x40] sm:$0xff] %vm1116_vm1, %v10296_v41  ;;  %v3731_v42 = vsel %vm1116_vm1, %v10296_v41, 0.0 }
 0x447   :  { %v3601_v48 = vpop.f32.mrf.mxu2 }
 0x448   :  { %v3623_v21 = vadd.f32 %v3601_v48, %v3570_v50 }
 0x44a   :  { %v3707_v25 = vadd.f32 %v3685_v63, %v3623_v21  ;;  %v3563_v21 = vpop.f32.mrf.mxu1 }
 0x44b   :  { %v3575_v33 = vadd.f32 %v3563_v21, %v3493_v44 }
 0x44c   :  { %v3715_v58 = vadd.f32 %v3707_v25, %v10115_v19 }
 0x44d   :  { %v3691_v6 = vpop.f32.mrf.mxu3  ;;  %v10348_v4 = vld [vmem:[#allocation3 + $0x40] sm:$0xff] }
 0x44e   :  { %3724 = vst.msk [vmem:[#allocation3 + $0x48] sm:$0xff] %vm1116_vm1, %v3715_v58  ;;  %v3732_v25 = vsel %vm1116_vm1, %v3715_v58, 0.0 }
 0x44f   :  { %v3604_v52 = vpop.f32.mrf.mxu2 }
 0x450   :  { %v3624_v26 = vadd.f32 %v3604_v52, %v3571_v17  ;;  %v3733_v17 = vadd.f32 %v3732_v25, %v3731_v42  ;;  %v10375_v42 = vld [vmem:[#allocation3 + $0x10] sm:$0xff] }
 0x452   :  { %v3708_v37 = vadd.f32 %v3688_v20, %v3624_v26  ;;  %v3566_v34 = vpop.f32.mrf.mxu1 }
 0x453   :  { %v3576_v58 = vadd.f32 %v3566_v34, %v3494_v49  ;;  %v10380_v49 = vld [vmem:[#allocation3 + $0x18] sm:$0xff] }
 0x454   :  { %v3716_v27 = vadd.f32 %v3708_v37, %v10115_v19 }
 0x455   :  { %v3694_v32 = vpop.f32.mrf.mxu3 }
 0x456   :  { %3725 = vst.msk [vmem:[#allocation3 + $0x50] sm:$0xff] %vm1116_vm1, %v3716_v27  ;;  %v3734_v23 = vsel %vm1116_vm1, %v3716_v27, 0.0 }
 0x457   :  { %v3607_v9 = vpop.f32.mrf.mxu2  ;;  %v3735_v26 = vadd.f32 %v3734_v23, %v3733_v17 }
 0x458   :  { %v3625_v11 = vadd.f32 %v3607_v9, %v3572_v10 }
 0x45a   :  { %v3709_v63 = vadd.f32 %v3691_v6, %v3625_v11 }
 0x45c   :  { %v3717_v46 = vadd.f32 %v3709_v63, %v10115_v19  ;;  %v2951_v63 = vrot.slane %v2950_v51, 2 }
 0x45d   :  { %v3697_v36 = vpop.f32.mrf.mxu3  ;;  %v3802_v22 = vld [vmem:[#allocation3 + $0x50] sm:$0xff] }
 0x45e   :  { %3726 = vst.msk [vmem:[#allocation3 + $0x58] sm:$0xff] %vm1116_vm1, %v3717_v46  ;;  %v3736_v52 = vsel %vm1116_vm1, %v3717_v46, 0.0  ;;  %v2952_v46 = vadd.f32 %v2951_v63, %v2950_v51  ;;  %v10398_v51 = vld [vmem:[#allocation3 + $0x28] sm:$0xff] }
 0x45f   :  { %v3610_v54 = vpop.f32.mrf.mxu2  ;;  %v3737_v37 = vadd.f32 %v3736_v52, %v3735_v26 }
 0x460   :  { %v3626_v12 = vadd.f32 %v3610_v54, %v3573_v7 }
 0x462   :  { %v3710_v56 = vadd.f32 %v3694_v32, %v3626_v12 }
 0x464   :  { %v3718_v1 = vadd.f32 %v3710_v56, %v10115_v19  ;;  %v10352_v56 = vld [vmem:[#allocation3 + $0x48] sm:$0xff] }
 0x465   :  { %v3700_v0 = vpop.f32.mrf.mxu3  ;;  %v10354_v8 = vld [vmem:[#allocation3 + $0x58] sm:$0xff] }
 0x466   :  { %3727 = vst.msk [vmem:[#allocation3 + $0x60] sm:$0xff] %vm1116_vm1, %v3718_v1  ;;  %v3738_v6 = vsel %vm1116_vm1, %v3718_v1, 0.0 }
 0x467   :  { %v3613_v50 = vpop.f32.mrf.mxu2  ;;  %v3739_v13 = vadd.f32 %v3738_v6, %v3737_v37  ;;  %v10393_v37 = vld [vmem:[#allocation3 + $0x20] sm:$0xff] }
 0x468   :  { %v3627_v20 = vadd.f32 %v3613_v50, %v3574_v38 }
 0x46a   :  { %v3711_v48 = vadd.f32 %v3697_v36, %v3627_v20 }
 0x46c   :  { %v3719_v62 = vadd.f32 %v3711_v48, %v10115_v19 }
 0x46d   :  { %v3703_v27 = vpop.f32.mrf.mxu3  ;;  %v3804_v1 = vld [vmem:[#allocation3 + $0x60] sm:$0xff] }
 0x46e   :  { %3728 = vst.msk [vmem:[#allocation3 + $0x68] sm:$0xff] %vm1116_vm1, %v3719_v62  ;;  %v3740_v45 = vsel %vm1116_vm1, %v3719_v62, 0.0 }
 0x46f   :  { %v3616_v61 = vpop.f32.mrf.mxu2  ;;  %v3741_v9 = vadd.f32 %v3740_v45, %v3739_v13 }
 0x470   :  { %v3628_v55 = vadd.f32 %v3616_v61, %v3575_v33 }
 0x472   :  { %v3712_v31 = vadd.f32 %v3700_v0, %v3628_v55  ;;  %v10371_v55 = vld [vmem:[#allocation3] sm:$0xff] }
 0x474   :  { %v3720_v47 = vadd.f32 %v3712_v31, %v10115_v19 }
 0x475   :  { %v10364_v48 = vld [vmem:[#allocation3 + $0x68] sm:$0xff] }
 0x476   :  { %3729 = vst.msk [vmem:[#allocation3 + $0x70] sm:$0xff] %vm1116_vm1, %v3720_v47  ;;  %v3742_v40 = vsel %vm1116_vm1, %v3720_v47, 0.0 }
 0x477   :  { %v3619_v41 = vpop.f32.mrf.mxu2  ;;  %v3743_v11 = vadd.f32 %v3742_v40, %v3741_v9 }
 0x478   :  { %v3629_v3 = vadd.f32 %v3619_v41, %v3576_v58 }
 0x47a   :  { %v3713_v10 = vadd.f32 %v3703_v27, %v3629_v3 }
 0x47c   :  { %v3721_v28 = vadd.f32 %v3713_v10, %v10115_v19  ;;  %v2953_v19 = vrot.slane %v2952_v46, 1 }
 0x47d   :  { %v3806_v44 = vld [vmem:[#allocation3 + $0x70] sm:$0xff] }
 0x47e   :  { %3730 = vst.msk [vmem:[#allocation3 + $0x78] sm:$0xff] %vm1116_vm1, %v3721_v28  ;;  %v3744_v2 = vsel %vm1116_vm1, %v3721_v28, 0.0  ;;  %v2954_v54 = vadd.f32 %v2953_v19, %v2952_v46 }
 0x47f   :  { %v3745_v30 = vadd.f32 %v3744_v2, %v3743_v11 }
 0x481   :  { %v3746_v32 = vrot.slane %v3745_v30, 4 }
 0x483   :  { %v3747_v24 = vadd.f32 %v3746_v32, %v3745_v30 }
 0x485   :  { %v3748_v16 = vrot.slane %v3747_v24, 2  ;;  %v10377_v23 = vld [vmem:[#allocation3 + $0x78] sm:$0xff] }
 0x487   :  { %v3749_v29 = vadd.f32 %v3748_v16, %v3747_v24 }
 0x489   :  { %v3750_v7 = vrot.slane %v3749_v29, 1 }
 0x48b   :  { %v3751_v53 = vadd.f32 %v3750_v7, %v3749_v29 }
 0x48d   :  { %v3752_v12 = vadd.f32 %v3751_v53, %v2954_v54  ;;  %v3761_v54 = vld [vmem:[#allocation3 + $0x38] sm:$0xff] }
 0x48f   :  { %v10350_v14 = vmul.f32 0.0078125, %v3752_v12 }
 0x491   :  { %v3808_v36 = vsub.f32 %v10348_v4, %v10350_v14  ;;  %v3809_v57 = vsub.f32 %v10352_v56, %v10350_v14  ;;  %v3810_v38 = vsub.f32 %v3802_v22, %v10350_v14  ;;  %v3811_v39 = vsub.f32 %v10354_v8, %v10350_v14 }
 0x492   :  { %v3812_v50 = vsub.f32 %v3804_v1, %v10350_v14  ;;  %v3813_v21 = vsub.f32 %v10364_v48, %v10350_v14  ;;  %v3814_v0 = vsub.f32 %v3806_v44, %v10350_v14  ;;  %v3762_v17 = vsub.f32 %v10371_v55, %v10350_v14 }
 0x493   :  { %v3816_v43 = vmul.f32 %v3808_v36, %v3808_v36  ;;  %v3817_v20 = vmul.f32 %v3809_v57, %v3809_v57  ;;  %v3818_v35 = vmul.f32 %v3810_v38, %v3810_v38  ;;  %v3819_v62 = vmul.f32 %v3811_v39, %v3811_v39 }
 0x494   :  { %v3820_v61 = vmul.f32 %v3812_v50, %v3812_v50  ;;  %v3763_v52 = vsub.f32 %v10373_v15, %v10350_v14  ;;  %v3764_v47 = vsub.f32 %v10375_v42, %v10350_v14  ;;  %v3815_v34 = vsub.f32 %v10377_v23, %v10350_v14 }
 0x495   :  { %v3824_v18 = vsel %vm1116_vm1, %v3816_v43, 0.0  ;;  %v3825_v33 = vsel %vm1116_vm1, %v3817_v20, 0.0  ;;  %v3827_v31 = vsel %vm1116_vm1, %v3818_v35, 0.0  ;;  %v3765_v6 = vsub.f32 %v10380_v49, %v10350_v14 }
 0x496   :  { %v3826_v25 = vadd.f32 %v3825_v33, %v3824_v18  ;;  %v3821_v58 = vmul.f32 %v3813_v21, %v3813_v21  ;;  %v3829_v60 = vsel %vm1116_vm1, %v3819_v62, 0.0  ;;  %v3770_v41 = vmul.f32 %v3762_v17, %v3762_v17 }
 0x497   :  { %v3771_v45 = vmul.f32 %v3763_v52, %v3763_v52  ;;  %v3766_v13 = vsub.f32 %v10393_v37, %v10350_v14  ;;  %v3772_v27 = vmul.f32 %v3764_v47, %v3764_v47  ;;  %v3822_v40 = vmul.f32 %v3814_v0, %v3814_v0 }
 0x498   :  { %v3828_v26 = vadd.f32 %v3827_v31, %v3826_v25  ;;  %v3831_v10 = vsel %vm1116_vm1, %v3820_v61, 0.0  ;;  %v3778_v9 = vsel %vm1116_vm1, %v3770_v41, 0.0  ;;  %v3767_v11 = vsub.f32 %v10398_v51, %v10350_v14 }
 0x499   :  { %v3773_v2 = vmul.f32 %v3765_v6, %v3765_v6  ;;  %v3779_v63 = vsel %vm1116_vm1, %v3771_v45, 0.0  ;;  %v3823_v30 = vmul.f32 %v3815_v34, %v3815_v34  ;;  %v3833_v32 = vsel %vm1116_vm1, %v3821_v58, 0.0 }
 0x49a   :  { %v3830_v3 = vadd.f32 %v3829_v60, %v3828_v26  ;;  %v3780_v46 = vadd.f32 %v3779_v63, %v3778_v9  ;;  %v3768_v16 = vsub.f32 %v3760_v59, %v10350_v14  ;;  %v3774_v19 = vmul.f32 %v3766_v13, %v3766_v13 }
 0x49b   :  { %v3781_v29 = vsel %vm1116_vm1, %v3772_v27, 0.0  ;;  %v3835_v7 = vsel %vm1116_vm1, %v3822_v40, 0.0  ;;  %v3769_v22 = vsub.f32 %v3761_v54, %v10350_v14  ;;  %v3775_v1 = vmul.f32 %v3767_v11, %v3767_v11 }
 0x49c   :  { %v3832_v28 = vadd.f32 %v3831_v10, %v3830_v3  ;;  %v3782_v53 = vadd.f32 %v3781_v29, %v3780_v46  ;;  %v3783_v36 = vsel %vm1116_vm1, %v3773_v2, 0.0  ;;  %v3837_v57 = vsel %vm1116_vm1, %v3823_v30, 0.0 }
 0x49d   :  { %v3776_v50 = vmul.f32 %v3768_v16, %v3768_v16  ;;  %v3785_v43 = vsel %vm1116_vm1, %v3774_v19, 0.0  ;;  %v3777_v35 = vmul.f32 %v3769_v22, %v3769_v22  ;;  %v3787_v44 = vsel %vm1116_vm1, %v3775_v1, 0.0 }
 0x49e   :  { %v3834_v24 = vadd.f32 %v3833_v32, %v3832_v28  ;;  %v3784_v38 = vadd.f32 %v3783_v36, %v3782_v53 }
 0x49f   :  { %v3789_v18 = vsel %vm1116_vm1, %v3776_v50, 0.0  ;;  %v3791_v61 = vsel %vm1116_vm1, %v3777_v35, 0.0 }
 0x4a0   :  { %v3836_v12 = vadd.f32 %v3835_v7, %v3834_v24  ;;  %v3786_v20 = vadd.f32 %v3785_v43, %v3784_v38 }
 0x4a2   :  { %v3838_v39 = vadd.f32 %v3837_v57, %v3836_v12  ;;  %v3788_v62 = vadd.f32 %v3787_v44, %v3786_v20 }
 0x4a4   :  { %v3839_v21 = vrot.slane %v3838_v39, 4  ;;  %v3790_v0 = vadd.f32 %v3789_v18, %v3788_v62  ;;  %v5488_v62 = vld [vmem:[#allocation3 + $0x60] sm:$0xff]  ;;  %v5490_v18 = vld [vmem:[#allocation3 + $0x70] sm:$0xff] }
 0x4a6   :  { %v3840_v33 = vadd.f32 %v3839_v21, %v3838_v39  ;;  %v3792_v31 = vadd.f32 %v3791_v61, %v3790_v0  ;;  %v5486_v21 = vld [vmem:[#allocation3 + $0x50] sm:$0xff] }
 0x4a8   :  { %v3841_v25 = vrot.slane %v3840_v33, 2  ;;  %v3793_v17 = vrot.slane %v3792_v31, 4 }
 0x4aa   :  { %v3842_v52 = vadd.f32 %v3841_v25, %v3840_v33  ;;  %v3794_v47 = vadd.f32 %v3793_v17, %v3792_v31 }
 0x4ac   :  { %v3795_v34 = vrot.slane %v3794_v47, 2  ;;  %v3843_v26 = vrot.slane %v3842_v52, 1 }
 0x4ae   :  { %v3796_v6 = vadd.f32 %v3795_v34, %v3794_v47  ;;  %v3844_v60 = vadd.f32 %v3843_v26, %v3842_v52  ;;  %v10485_v26 = vpop.permute.xlu2 %3977 }
 0x4af   :  { %7424 = vmatpush.msk.msra.mxu1 %vm12226_vm0, %v10485_v26  ;;  %vm12241_vm0 = vmmov %vm12230_vm2 }
 0x4b0   :  { %v3797_v58 = vrot.slane %v3796_v6, 1 }
 0x4b2   :  { %v3798_v41 = vadd.f32 %v3797_v58, %v3796_v6  ;;  %v10500_v6 = vld [vmem:[%s11917_s6] sm:$0xff] }
 0x4b3   :  { %7452 = vmatpush.msk.msra.mxu0 %vm12231_vm6, %v10500_v6  ;;  %vm12246_vm6 = vmmov %vm12241_vm0 }
 0x4b4   :  { %v3845_v45 = vadd.f32 %v3844_v60, %v3798_v41 }
 0x4b6   :  { %v3846_v3 = vmul.f32 0.0078125, %v3845_v45 }
 0x4b8   :  { %v3847_v13 = vadd.f32 1e-05, %v3846_v3 }
 0x4ba   :  { %7632 = vrsqrt.f32 %v3847_v13  ;;  %vm3854_vm12 = vweird.f32 %v3847_v13 }
 0x4c0   :  { %v7633_v27 = vpop.eup %7632 }
 0x4c1   :  { %v3849_v40 = vmul.f32 %v7633_v27, %v3847_v13  ;;  %vm3855_vm10 = vweird.f32 %v7633_v27 }
 0x4c2   :  { %vm3856_vm14 = vmor %vm3854_vm12, %vm3855_vm10 }
 0x4c3   :  { %v3850_v10 = vmul.f32 %v7633_v27, %v3849_v40  ;;  %vm12234_vm10 = vmmov %vm12230_vm2 }
 0x4c4   :  { %vm12235_vm12 = vmmov %vm12230_vm2 }
 0x4c5   :  { %v3851_v9 = vmul.f32 0.5, %v3850_v10 }
 0x4c7   :  { %v3852_v28 = vsub.f32 1.5, %v3851_v9 }
 0x4c9   :  { %v3853_v11 = vmul.f32 %v7633_v27, %v3852_v28 }
 0x4cb   :  { %v3857_v2 = vsel %vm3856_vm14, %v7633_v27, %v3853_v11  ;;  %vm12236_vm14 = vmmov %vm12230_vm2 }
 0x4cc   :  { %v3858_v63 = vmul.f32 %v3857_v2, %v10102_v5 }
 0x4ce   :  { %v3859_v30 = vmul.f32 %v3858_v63, %v10350_v14  ;;  %v3867_v32 = vperm.slane %v3858_v63, 1 }
 0x4d0   :  { %v3861_v46 = vrot.slane %v3859_v30, 7  ;;  %v3868_v24 = vmul.f32 %v3867_v32, %v10371_v55  ;;  %v3872_v16 = vmul.f32 %v3867_v32, %v10393_v37  ;;  %v3871_v19 = vmul.f32 %v3867_v32, %v10380_v49 }
 0x4d1   :  { %v3875_v29 = vmul.f32 %v3867_v32, %v3761_v54  ;;  %v3874_v53 = vmul.f32 %v3867_v32, %v3760_v59  ;;  %v3870_v12 = vmul.f32 %v3867_v32, %v10375_v42  ;;  %v3869_v1 = vmul.f32 %v3867_v32, %v10373_v15 }
 0x4d2   :  { %v3863_v7 = vsub.f32 %v10102_v5, %v3861_v46  ;;  %v3873_v38 = vmul.f32 %v3867_v32, %v10398_v51  ;;  %v5492_v54 = vmul.f32 %v3867_v32, %v10348_v4  ;;  %v5493_v20 = vmul.f32 %v3867_v32, %v10352_v56 }
 0x4d3   :  { %v5495_v35 = vmul.f32 %v3867_v32, %v10354_v8  ;;  %v5497_v44 = vmul.f32 %v3867_v32, %v10364_v48  ;;  %v5499_v33 = vmul.f32 %v3867_v32, %v10377_v23  ;;  %v5494_v0 = vmul.f32 %v5486_v21, %v3867_v32 }
 0x4d4   :  { %v3876_v22 = vperm.slane %v3863_v7, 2  ;;  %v5496_v61 = vmul.f32 %v5488_v62, %v3867_v32  ;;  %v5498_v25 = vmul.f32 %v5490_v18, %v3867_v32 }
 0x4d6   :  { %v3879_v36 = vadd.f32 %v3876_v22, %v3870_v12  ;;  %v3878_v57 = vadd.f32 %v3876_v22, %v3869_v1  ;;  %v3877_v14 = vadd.f32 %v3876_v22, %v3868_v24  ;;  %v3881_v39 = vadd.f32 %v3876_v22, %v3872_v16 }
 0x4d7   :  { %v3880_v55 = vadd.f32 %v3876_v22, %v3871_v19  ;;  %v3884_v50 = vadd.f32 %v3876_v22, %v3875_v29  ;;  %v3883_v37 = vadd.f32 %v3876_v22, %v3874_v53  ;;  %v3882_v59 = vadd.f32 %v3876_v22, %v3873_v38 }
 0x4d8   :  { %v10424_v43 = vmax.f32 %v3879_v36, 0.0  ;;  %v10426_v49 = vmax.f32 %v3878_v57, 0.0  ;;  %v10428_v5 = vmax.f32 %v3877_v14, 0.0  ;;  %v10440_v42 = vmax.f32 %v3881_v39, 0.0 }
 0x4d9   :  { %v10438_v15 = vmax.f32 %v3882_v59, 0.0  ;;  %v10442_v51 = vmax.f32 %v3880_v55, 0.0  ;;  %v10449_v31 = vadd.f32 %v5492_v54, %v3876_v22  ;;  %v10451_v17 = vadd.f32 %v5493_v20, %v3876_v22 }
 0x4da   :  { %12214 = vst [vmem:[#allocation13_spill] sm:$0xff] %v10424_v43  ;;  %3965 = vrot.lane.b32.xlu2 %v10424_v43, %s7818_s9  ;;  %3963 = vrot.lane.b32.xlu1 %v10426_v49, %s7818_s9  ;;  %v10453_v52 = vadd.f32 %v5495_v35, %v3876_v22  ;;  %v10455_v4 = vadd.f32 %v5497_v44, %v3876_v22  ;;  %v10473_v23 = vmax.f32 %v3884_v50, 0.0  ;;  %v10475_v34 = vmax.f32 %v3883_v37, 0.0 }
 0x4db   :  { %12215 = vst [vmem:[#allocation23_spill] sm:$0xff] %v10426_v49  ;;  %3961 = vrot.lane.b32.xlu0 %v10428_v5, %s7818_s9  ;;  %7416 = vmatmul.msk.f32.vlgmr.msrb.gmra.mxu0 %vm12217_vm8, %v10428_v5  ;;  %v10457_v56 = vadd.f32 %v5499_v33, %v3876_v22  ;;  %v10459_v8 = vadd.f32 %v5494_v0, %v3876_v22  ;;  %vm12237_vm8 = vmmov %vm12230_vm2  ;;  %v10530_v55 = vrot.slane %v10500_v6, 4 }
 0x4dc   :  { %12216 = vst [vmem:[#allocation14_spill] sm:$0xff] %v10428_v5  ;;  %v10461_v48 = vadd.f32 %v5496_v61, %v3876_v22  ;;  %v10463_v47 = vadd.f32 %v5498_v25, %v3876_v22 }
 0x4dd   :  { %12218 = vst [vmem:[#allocation15_spill] sm:$0xff] %v10438_v15 }
 0x4de   :  { %12219 = vst [vmem:[#allocation22_spill] sm:$0xff] %v10440_v42 }
 0x4df   :  { %12220 = vst [vmem:[#allocation18_spill] sm:$0xff] %v10442_v51 }
 0x4e0   :  { %12222 = vst [vmem:[#allocation19_spill] sm:$0xff] %v10473_v23 }
 0x4e1   :  { %12223 = vst [vmem:[#allocation20_spill] sm:$0xff] %v10475_v34 }
 0x4e2   :  { %3971 = vrot.lane.b32.xlu2 %v10438_v15, %s7818_s9  ;;  %3969 = vrot.lane.b32.xlu1 %v10440_v42, %s7818_s9 }
 0x4e3   :  { %3967 = vrot.lane.b32.xlu0 %v10442_v51, %s7818_s9  ;;  %7417 = vmatmul.msk.f32.gmra.mxu0 %vm12221_vm3, %v10426_v49  ;;  %vm12238_vm3 = vmmov %vm12230_vm2 }
 0x4ea   :  { %3975 = vrot.lane.b32.xlu1 %v10473_v23, %s7818_s9 }
 0x4eb   :  { %3973 = vrot.lane.b32.xlu0 %v10475_v34, %s7818_s9  ;;  %7418 = vmatmul.msk.f32.gmra.mxu0 %vm12224_vm11, %v10424_v43  ;;  %vm12239_vm11 = vmmov %vm12230_vm2 }
 0x4f3   :  { %7419 = vmatmul.msk.f32.gmra.mxu0 %vm12225_vm15, %v10442_v51  ;;  %vm12240_vm15 = vmmov %vm12230_vm2 }
 0x4fb   :  { %7420 = vmatmul.msk.f32.gmra.mxu0 %vm12227_vm7, %v10440_v42  ;;  %vm12242_vm7 = vmmov %vm12241_vm0 }
 0x503   :  { %7421 = vmatmul.msk.f32.gmra.mxu0 %vm12228_vm13, %v10438_v15  ;;  %vm12243_vm13 = vmmov %vm12241_vm0 }
 0x50b   :  { %7422 = vmatmul.msk.f32.gmra.mxu0 %vm12229_vm4, %v10475_v34  ;;  %vm12244_vm4 = vmmov %vm12241_vm0 }
 0x513   :  { %7423 = vmatmul.msk.f32.gmra.mxu0 %vm12230_vm2, %v10473_v23  ;;  %vm12245_vm2 = vmmov %vm12241_vm0 }
 0x534   :  { %v3966_v41 = vpop.permute.xlu2 %3965 }
 0x53c   :  { %v3972_v13 = vpop.permute.xlu2 %3971 }
 0x54c   :  { %v3964_v60 = vpop.permute.xlu1 %3963 }
 0x54d   :  { %v3962_v58 = vpop.permute.xlu0 %3961 }
 0x54e   :  { %7425 = vmatmul.msk.f32.vlgmr.msra.gmra.mxu1 %vm12232_vm5, %v3962_v58  ;;  %7453 = vmatmul.msk.f32.vlgmr.msra.gmra.mxu0 %vm12233_vm9, %v3962_v58  ;;  %vm12247_vm5 = vmmov %vm12241_vm0  ;;  %vm12248_vm9 = vcmask 1043456  }
 0x554   :  { %v3970_v3 = vpop.permute.xlu1 %3969 }
 0x555   :  { %v3968_v45 = vpop.permute.xlu0 %3967 }
 0x556   :  { %7426 = vmatmul.msk.f32.gmra.mxu1 %vm12234_vm10, %v3964_v60  ;;  %7454 = vmatmul.msk.f32.gmra.mxu0 %vm12235_vm12, %v3964_v60  ;;  %vm4102_vm10 = vcmask 523264   ;;  %vm4127_vm12 = vcmask 27648  }
 0x55c   :  { %v3976_v40 = vpop.permute.xlu1 %3975 }
 0x55d   :  { %v3974_v27 = vpop.permute.xlu0 %3973 }
 0x55e   :  { %7427 = vmatmul.msk.f32.gmra.mxu1 %vm12236_vm14, %v3966_v41  ;;  %7455 = vmatmul.msk.f32.gmra.mxu0 %vm12237_vm8, %v3966_v41 }
 0x566   :  { %7428 = vmatmul.msk.f32.gmra.mxu1 %vm12238_vm3, %v3968_v45  ;;  %7456 = vmatmul.msk.f32.gmra.mxu0 %vm12239_vm11, %v3968_v45 }
 0x56e   :  { %7429 = vmatmul.msk.f32.gmra.mxu1 %vm12240_vm15, %v3970_v3  ;;  %7457 = vmatmul.msk.f32.gmra.mxu0 %vm12241_vm0, %v3970_v3  ;;  %vm12249_vm15 = vmmov %vm12241_vm0 }
 0x576   :  { %7430 = vmatmul.msk.f32.gmra.mxu1 %vm12242_vm7, %v3972_v13  ;;  %7458 = vmatmul.msk.f32.gmra.mxu0 %vm12243_vm13, %v3972_v13  ;;  %vm12250_vm7 = vmmov %vm12241_vm0 }
 0x577   :  { %vm12251_vm13 = vmmov %vm12241_vm0 }
 0x57e   :  { %7431 = vmatmul.msk.f32.gmra.mxu1 %vm12244_vm4, %v3974_v27  ;;  %7459 = vmatmul.msk.f32.gmra.mxu0 %vm12245_vm2, %v3974_v27  ;;  %vm12252_vm4 = vmmov %vm12241_vm0 }
 0x57f   :  { %vm12253_vm2 = vmmov %vm12241_vm0 }
 0x586   :  { %7432 = vmatmul.msk.f32.gmra.mxu1 %vm12246_vm6, %v3976_v40  ;;  %7460 = vmatmul.msk.f32.gmra.mxu0 %vm12247_vm5, %v3976_v40  ;;  %vm12254_vm6 = vmmov %vm12241_vm0 }
 0x587   :  { %vm12255_vm5 = vmmov %vm12241_vm0 }
 0x5cb   :  { %v4014_v10 = vpop.f32.mrf.mxu1 }
 0x5d3   :  { %v4017_v9 = vpop.f32.mrf.mxu1 }
 0x5d4   :  { %v7605_v19 = vpack.i.bf16 %v4014_v10, %v4017_v9 }
 0x5db   :  { %v10520_v28 = vpop.f32.mrf.mxu1 }
 0x5e3   :  { %v4023_v11 = vpop.f32.mrf.mxu1 }
 0x5e4   :  { %v7600_v2 = vpack.i.bf16 %v10520_v28, %v4023_v11 }
 0x5e6   :  { %7601 = vrot.lane.b32.xlu1 %v7600_v2, %s7818_s9 }
 0x5eb   :  { %v4026_v63 = vpop.f32.mrf.mxu1 }
 0x5f3   :  { %v4029_v30 = vpop.f32.mrf.mxu1 }
 0x5f4   :  { %v7595_v32 = vpack.i.bf16 %v4026_v63, %v4029_v30 }
 0x5f6   :  { %7596 = vrot.lane.b32.xlu0 %v7595_v32, %s7818_s9 }
 0x5fb   :  { %v4032_v46 = vpop.f32.mrf.mxu1 }
 0x603   :  { %v4035_v24 = vpop.f32.mrf.mxu1 }
 0x604   :  { %v7590_v16 = vpack.i.bf16 %v4032_v46, %v4035_v24 }
 0x606   :  { %7591 = vrot.lane.b32.xlu2 %v7590_v16, %s7818_s9 }
 0x60e   :  { %7606 = vrot.lane.b32.xlu2 %v7605_v19, %s7818_s9 }
 0x616   :  { %4152 = vrot.lane.b32.xlu2 %v4014_v10, %s7820_s2 }
 0x618   :  { %4038 = vxpose.xlu0.b32.start [1/8] (short) (narrow) %v4014_v10, 8 }
 0x620   :  { %4039 = vxpose.xlu0.b32.cont [2/8] (short) (narrow) %v4017_v9, 8 }
 0x628   :  { %4040 = vxpose.xlu0.b32.cont [3/8] (short) (narrow) %v10520_v28, 8 }
 0x630   :  { %4041 = vxpose.xlu0.b32.cont [4/8] (short) (narrow) %v4023_v11, 8 }
 0x638   :  { %4042 = vxpose.xlu0.b32.cont [5/8] (short) (narrow) %v4026_v63, 8 }
 0x640   :  { %4043 = vxpose.xlu0.b32.cont [6/8] (short) (narrow) %v4029_v30, 8 }
 0x648   :  { %4044 = vxpose.xlu0.b32.cont [7/8] (short) (narrow) %v4032_v46, 8 }
 0x650   :  { %4045 = vxpose.xlu0.b32.end [8/8] (short) (narrow) %v4035_v24, 8 }
 0x658   :  { %v7602_v1 = vpop.permute.xlu1 %7601 }
 0x659   :  { %v7603_v57 = vunpack.i.l.bf16 %v7602_v1  ;;  %v7604_v38 = vunpack.i.h.bf16 %v7602_v1 }
 0x660   :  { %v7592_v29 = vpop.permute.xlu2 %7591 }
 0x661   :  { %v7593_v7 = vunpack.i.l.bf16 %v7592_v29  ;;  %v7594_v53 = vunpack.i.h.bf16 %v7592_v29 }
 0x663   :  { %4114 = vmatpush.msra.mxu2 %v7593_v7  ;;  %v10559_v7 = vpop.f32.mrf.mxu0 }
 0x665   :  { %4115 = vmatpush.msra.mxu2 %v7594_v53 }
 0x668   :  { %v7597_v12 = vpop.permute.xlu0 %7596  ;;  %v7607_v14 = vpop.permute.xlu2 %7606 }
 0x669   :  { %v7598_v22 = vunpack.i.l.bf16 %v7597_v12  ;;  %v7599_v36 = vunpack.i.h.bf16 %v7597_v12  ;;  %v7608_v39 = vunpack.i.l.bf16 %v7607_v14  ;;  %v7609_v50 = vunpack.i.h.bf16 %v7607_v14 }
 0x66b   :  { %4116 = vmatpush.msra.mxu2 %v7598_v22  ;;  %v10563_v22 = vpop.f32.mrf.mxu0 }
 0x66d   :  { %4117 = vmatpush.msra.mxu2 %v7599_v36 }
 0x66f   :  { %4118 = vmatpush.msra.mxu2 %v7603_v57 }
 0x670   :  { %v4153_v33 = vpop.permute.xlu2 %4152 }
 0x671   :  { %4119 = vmatpush.msra.mxu2 %v7604_v38 }
 0x673   :  { %4120 = vmatpush.msra.mxu2 %v7608_v39  ;;  %v10566_v36 = vpop.f32.mrf.mxu0 }
 0x675   :  { %4121 = vmatpush.msra.mxu2 %v7609_v50 }
 0x677   :  { %7443 = vmatpush.msk.msrb.mxu2 %vm12248_vm9, %v10530_v55  ;;  %vm12256_vm9 = vmmov %vm12241_vm0 }
 0x67b   :  { %v10568_v57 = vpop.f32.mrf.mxu0 }
 0x683   :  { %v10570_v14 = vpop.f32.mrf.mxu0 }
 0x68b   :  { %v10572_v38 = vpop.f32.mrf.mxu0 }
 0x693   :  { %v10574_v39 = vpop.f32.mrf.mxu0 }
 0x69b   :  { %v10576_v50 = vpop.f32.mrf.mxu0 }
 0x6bc   :  { %v4054_v37 = vpop.trf.xlu0 }
 0x6bd   :  { %7433 = vmatmul.msk.f32.vlgmr.msra.gmra.mxu2 %vm4102_vm10, %v4054_v37  ;;  %v4316_v37 = vpop.f32.mrf.mxu0 }
 0x740   :  { %v4123_v59 = vpop.f32.mrf.mxu2 }
 0x741   :  { %v4126_v54 = vmul.f32 0.00390625, %v4123_v59  ;;  %v4319_v59 = vpop.f32.mrf.mxu0 }
 0x743   :  { %v4128_v20 = vsel %vm4127_vm12, %v4126_v54, -inf }
 0x744   :  { %4129 = vmax.xlane.f32.xlu1 %v4128_v20 }
 0x749   :  { %v4322_v20 = vpop.f32.mrf.mxu0 }
 0x75d   :  { %4154 = vrot.lane.b32.xlu1 %v4017_v9, %s7820_s2 }
 0x765   :  { %4158 = vrot.lane.b32.xlu1 %v4023_v11, %s7820_s2 }
 0x76d   :  { %4162 = vrot.lane.b32.xlu1 %v4029_v30, %s7820_s2 }
 0x775   :  { %4166 = vrot.lane.b32.xlu1 %v4035_v24, %s7820_s2 }
 0x7b7   :  { %v4130_v35 = vpop.xlane.xlu1 %4129 }
 0x7b8   :  { %v4131_v44 = vsub.f32 %v4126_v54, %v4130_v35 }
 0x7ba   :  { %v4132_v21 = vmul.f32 1.442695, %v4131_v44  ;;  %v4325_v44 = vpop.f32.mrf.mxu0 }
 0x7bc   :  { %7634 = vpow2.f32 %v4132_v21 }
 0x7c2   :  { %v7635_v62 = vpop.eup %7634 }
 0x7c3   :  { %v4134_v18 = vsel %vm4127_vm12, %v7635_v62, 0.0 }
 0x7c4   :  { %4135 = vadd.xlane.f32.xlu2 %v4134_v18  ;;  %v4328_v18 = vpop.f32.mrf.mxu0 }
 0x7cf   :  { %v4155_v9 = vpop.permute.xlu1 %4154 }
 0x7d7   :  { %v4159_v11 = vpop.permute.xlu1 %4158 }
 0x7dc   :  { %4156 = vrot.lane.b32.xlu2 %v10520_v28, %s7820_s2 }
 0x7e4   :  { %4160 = vrot.lane.b32.xlu2 %v4026_v63, %s7820_s2  ;;  %v4163_v63 = vpop.permute.xlu1 %4162 }
 0x7ec   :  { %4164 = vrot.lane.b32.xlu2 %v4032_v46, %s7820_s2  ;;  %v4167_v32 = vpop.permute.xlu1 %4166 }
 0x837   :  { %v4136_v0 = vpop.xlane.xlu2 %4135 }
 0x838   :  { %7636 = vrcp.f32 %v4136_v0  ;;  %v4148_v60 = vand.u32 2147483648, %v4136_v0  ;;  %v4146_v45 = vand.u32 2147483647, %v4136_v0  ;;  %vm4142_vm8 = vweird.f32 %v4136_v0 }
 0x83a   :  { %v4149_v13 = vor.u32 1.1754944e-38, %v4148_v60  ;;  %vm4147_vm11 = vcmp.eq.f32.partialorder %v4146_v45, 8.507059e+37 }
 0x83e   :  { %v7637_v61 = vpop.eup %7636 }
 0x83f   :  { %v4138_v25 = vmul.f32 %v7637_v61, %v4136_v0  ;;  %vm4143_vm14 = vweird.f32 %v7637_v61  ;;  %v4157_v28 = vpop.permute.xlu2 %4156 }
 0x840   :  { %vm4144_vm3 = vmor %vm4142_vm8, %vm4143_vm14 }
 0x841   :  { %v4139_v58 = vsub.f32 1.0, %v4138_v25  ;;  %vm12257_vm14 = vmmov %vm12241_vm0  ;;  %v4331_v25 = vpop.f32.mrf.mxu0 }
 0x842   :  { %vm12258_vm8 = vmmov %vm12241_vm0 }
 0x843   :  { %v4140_v41 = vmul.f32 %v7637_v61, %v4139_v58 }
 0x845   :  { %v4141_v3 = vadd.f32 %v7637_v61, %v4140_v41 }
 0x847   :  { %v4145_v27 = vsel %vm4144_vm3, %v7637_v61, %v4141_v3  ;;  %v4161_v2 = vpop.permute.xlu2 %4160  ;;  %vm12259_vm3 = vmmov %vm12241_vm0 }
 0x848   :  { %v4150_v40 = vsel %vm4147_vm11, %v4149_v13, %v4145_v27  ;;  %vm12260_vm11 = vmmov %vm12241_vm0 }
 0x849   :  { %v4151_v10 = vmul.f32 %v7635_v62, %v4150_v40  ;;  %v4334_v45 = vpop.f32.mrf.mxu0 }
 0x84b   :  { %7434 = vmatpush.xpose.msk.msrb.mxu3 %vm12249_vm15, %v4151_v10  ;;  %vm12261_vm15 = vmmov %vm12241_vm0 }
 0x84e   :  { %7435 = vmatmul.msk.f32.vlgmr.msrb.gmra.mxu3 %vm12241_vm0, %v4153_v33 }
 0x84f   :  { %v4165_v30 = vpop.permute.xlu2 %4164 }
 0x856   :  { %7436 = vmatmul.msk.f32.gmra.mxu3 %vm12250_vm7, %v4155_v9  ;;  %vm12262_vm7 = vmmov %vm12241_vm0 }
 0x85e   :  { %7437 = vmatmul.msk.f32.gmra.mxu3 %vm12251_vm13, %v4157_v28  ;;  %vm12263_vm13 = vmmov %vm12241_vm0  ;;  %v4337_v28 = vpop.f32.mrf.mxu0 }
 0x866   :  { %7438 = vmatmul.msk.f32.gmra.mxu3 %vm12252_vm4, %v4159_v11  ;;  %vm12264_vm4 = vmmov %vm12241_vm0 }
 0x86e   :  { %7439 = vmatmul.msk.f32.gmra.mxu3 %vm12253_vm2, %v4161_v2  ;;  %vm12265_vm2 = vmmov %vm12241_vm0 }
 0x876   :  { %7440 = vmatmul.msk.f32.gmra.mxu3 %vm12254_vm6, %v4163_v63  ;;  %vm12266_vm6 = vmmov %vm12241_vm0 }
 0x87e   :  { %7441 = vmatmul.msk.f32.gmra.mxu3 %vm12255_vm5, %v4165_v30  ;;  %vm12267_vm5 = vmmov %vm12241_vm0 }
 0x886   :  { %7442 = vmatmul.msk.f32.gmra.mxu3 %vm12256_vm9, %v4167_v32  ;;  %vm12268_vm9 = vmmov %vm12241_vm0 }
 0x8d1   :  { %v4204_v46 = vpop.f32.mrf.mxu3 }
 0x8d2   :  { %7444 = vmatmul.msk.f32.vlgmr.msrb.gmra.mxu2 %vm12257_vm14, %v4204_v46  ;;  %vm12269_vm14 = vmmov %vm12241_vm0 }
 0x8d9   :  { %v4207_v24 = vpop.f32.mrf.mxu3 }
 0x8da   :  { %7445 = vmatmul.msk.f32.gmra.mxu2 %vm12258_vm8, %v4207_v24  ;;  %vm12270_vm8 = vmmov %vm12241_vm0  ;;  %v10589_v24 = vmax.f32 %v10449_v31, 0.0  ;;  %v10605_v31 = vmax.f32 %v10455_v4, 0.0 }
 0x8e1   :  { %v4210_v16 = vpop.f32.mrf.mxu3 }
 0x8e2   :  { %7446 = vmatmul.msk.f32.gmra.mxu2 %vm12259_vm3, %v4210_v16  ;;  %vm12271_vm3 = vmmov %vm12241_vm0 }
 0x8e9   :  { %v4213_v19 = vpop.f32.mrf.mxu3 }
 0x8ea   :  { %7447 = vmatmul.msk.f32.gmra.mxu2 %vm12260_vm11, %v4213_v19 }
 0x8f1   :  { %v4216_v29 = vpop.f32.mrf.mxu3 }
 0x8f2   :  { %7448 = vmatmul.msk.f32.gmra.mxu2 %vm12261_vm15, %v4216_v29  ;;  %v10595_v29 = vmax.f32 %v10451_v17, 0.0  ;;  %v7821_v17 = vmov 4.0   ;;  %vm12272_vm15 = vmmov %vm12241_vm0 }
 0x8f3   :  { %7638 = vrcp.f32 %v7821_v17 }
 0x8f9   :  { %v4219_v53 = vpop.f32.mrf.mxu3 }
 0x8fa   :  { %7449 = vmatmul.msk.f32.gmra.mxu2 %vm12241_vm0, %v4219_v53  ;;  %v10600_v53 = vmax.f32 %v10453_v52, 0.0 }
 0x901   :  { %v4222_v12 = vpop.f32.mrf.mxu3 }
 0x902   :  { %7450 = vmatmul.msk.f32.gmra.mxu2 %vm12262_vm7, %v4222_v12  ;;  %v10610_v12 = vmax.f32 %v10457_v56, 0.0  ;;  %vm12273_vm7 = vmmov %vm12241_vm0 }
 0x909   :  { %v4225_v1 = vpop.f32.mrf.mxu3 }
 0x90a   :  { %7451 = vmatmul.msk.f32.gmra.mxu2 %vm12263_vm13, %v4225_v1  ;;  %v7639_v1 = vpop.eup %7638  ;;  %vm12274_vm13 = vmmov %vm12241_vm0 }
 0x90b   :  { %v4365_v52 = vmul.f32 4.0, %v7639_v1  ;;  %vm4369_vm11 = vweird.f32 %v7639_v1 }
 0x955   :  { %v4273_v54 = vpop.f32.mrf.mxu2 }
 0x956   :  { %v4317_v16 = vadd.f32 %v4316_v37, %v4273_v54  ;;  %v4366_v37 = vsub.f32 1.0, %v4365_v52 }
 0x958   :  { %v4340_v19 = vsel %vm12271_vm3, %v4317_v16, 0.0 }
 0x95d   :  { %v4276_v35 = vpop.f32.mrf.mxu2 }
 0x95e   :  { %v4320_v9 = vadd.f32 %v4319_v59, %v4276_v35  ;;  %v4367_v59 = vmul.f32 %v7639_v1, %v4366_v37 }
 0x960   :  { %v4343_v30 = vsel %vm12269_vm14, %v4320_v9, 0.0  ;;  %v4368_v54 = vadd.f32 %v7639_v1, %v4367_v59 }
 0x965   :  { %v4279_v21 = vpop.f32.mrf.mxu2 }
 0x966   :  { %v4323_v32 = vadd.f32 %v4322_v20, %v4279_v21  ;;  %v10614_v20 = vsel %vm4369_vm11, %v7639_v1, %v4368_v54 }
 0x968   :  { %v4346_v46 = vsel %vm12270_vm8, %v4323_v32, 0.0 }
 0x96d   :  { %v4282_v62 = vpop.f32.mrf.mxu2 }
 0x96e   :  { %v4326_v3 = vadd.f32 %v4325_v44, %v4282_v62 }
 0x970   :  { %v4349_v10 = vsel %vm12267_vm5, %v4326_v3, 0.0  ;;  %vm12278_vm5 = vmmov %vm12241_vm0 }
 0x975   :  { %v4285_v33 = vpop.f32.mrf.mxu2 }
 0x976   :  { %v4329_v0 = vadd.f32 %v4328_v18, %v4285_v33 }
 0x978   :  { %v4352_v61 = vsel %vm12264_vm4, %v4329_v0, 0.0  ;;  %vm12275_vm4 = vmmov %vm12241_vm0 }
 0x979   :  { %4353 = vadd.xlane.f32.xlu2 %v4352_v61 }
 0x97d   :  { %v4288_v58 = vpop.f32.mrf.mxu2 }
 0x97e   :  { %v4332_v60 = vadd.f32 %v4331_v25, %v4288_v58 }
 0x980   :  { %v4355_v41 = vsel %vm12265_vm2, %v4332_v60, 0.0  ;;  %vm12276_vm2 = vmmov %vm12241_vm0 }
 0x981   :  { %4356 = vadd.xlane.f32.xlu1 %v4355_v41 }
 0x985   :  { %v4291_v13 = vpop.f32.mrf.mxu2 }
 0x986   :  { %v4335_v27 = vadd.f32 %v4334_v45, %v4291_v13 }
 0x988   :  { %v4358_v40 = vsel %vm12266_vm6, %v4335_v27, 0.0  ;;  %vm12277_vm6 = vmmov %vm12241_vm0 }
 0x989   :  { %4359 = vadd.xlane.f32.xlu0 %v4358_v40  ;;  %4350 = vadd.xlane.f32.xlu1 %v4349_v10 }
 0x98d   :  { %v4294_v11 = vpop.f32.mrf.mxu2 }
 0x98e   :  { %v10582_v2 = vadd.f32 %v4337_v28, %v4294_v11 }
 0x990   :  { %v4361_v63 = vsel %vm12268_vm9, %v10582_v2, 0.0 }
 0x991   :  { %4362 = vadd.xlane.f32.xlu2 %v4361_v63  ;;  %4344 = vadd.xlane.f32.xlu1 %v4343_v30 }
 0x999   :  { %4347 = vadd.xlane.f32.xlu2 %v4346_v46 }
 0x99d   :  { %5581 = vrot.lane.b32.xlu0 %v10589_v24, %s7818_s9 }
 0x9a1   :  { %4341 = vadd.xlane.f32.xlu2 %v4340_v19 }
 0x9a5   :  { %5583 = vrot.lane.b32.xlu0 %v10595_v29, %s7818_s9 }
 0x9ad   :  { %5587 = vrot.lane.b32.xlu0 %v10600_v53, %s7818_s9 }
 0x9b5   :  { %5591 = vrot.lane.b32.xlu0 %v10605_v31, %s7818_s9 }
 0x9bd   :  { %5595 = vrot.lane.b32.xlu0 %v10610_v12, %s7818_s9 }
 0x9ec   :  { %v4354_v4 = vpop.xlane.xlu2 %4353 }
 0x9ed   :  { %v4375_v35 = vmul.f32 %v10614_v20, %v4354_v4 }
 0x9ef   :  { %v10617_v44 = vsub.f32 %v4329_v0, %v4375_v35 }
 0x9f1   :  { %v4391_v56 = vmul.f32 %v10617_v44, %v10617_v44 }
 0x9f3   :  { %v4407_v21 = vsel %vm12272_vm15, %v4391_v56, 0.0 }
 0x9f4   :  { %v4357_v62 = vpop.xlane.xlu1 %4356  ;;  %4408 = vadd.xlane.f32.xlu2 %v4407_v21 }
 0x9f5   :  { %v4376_v58 = vmul.f32 %v10614_v20, %v4357_v62 }
 0x9f7   :  { %v10633_v40 = vsub.f32 %v4332_v60, %v4376_v58 }
 0x9fc   :  { %v4360_v18 = vpop.xlane.xlu0 %4359  ;;  %v4351_v33 = vpop.xlane.xlu1 %4350 }
 0x9fd   :  { %v4377_v61 = vmul.f32 %v10614_v20, %v4360_v18  ;;  %v4374_v25 = vmul.f32 %v10614_v20, %v4351_v33 }
 0x9ff   :  { %v10625_v41 = vsub.f32 %v4335_v27, %v4377_v61  ;;  %v10627_v45 = vsub.f32 %v4326_v3, %v4374_v25  ;;  %v4392_v3 = vmul.f32 %v10633_v40, %v10633_v40 }
 0xa01   :  { %v4390_v0 = vmul.f32 %v10627_v45, %v10627_v45  ;;  %v4393_v13 = vmul.f32 %v10625_v41, %v10625_v41  ;;  %v4410_v46 = vsel %vm12274_vm13, %v4392_v3, 0.0 }
 0xa03   :  { %v4404_v10 = vsel %vm12241_vm0, %v4390_v0, 0.0  ;;  %v4413_v28 = vsel %vm12273_vm7, %v4393_v13, 0.0 }
 0xa04   :  { %v4363_v11 = vpop.xlane.xlu2 %4362  ;;  %4405 = vadd.xlane.f32.xlu1 %v4404_v10  ;;  %v4345_v63 = vpop.xlane.xlu1 %4344  ;;  %4414 = vadd.xlane.f32.xlu2 %v4413_v28 }
 0xa05   :  { %v4372_v27 = vmul.f32 %v10614_v20, %v4345_v63  ;;  %v4378_v17 = vmul.f32 %v10614_v20, %v4363_v11 }
 0xa07   :  { %v10640_v30 = vsub.f32 %v4320_v9, %v4372_v27  ;;  %v10652_v59 = vsub.f32 %v10582_v2, %v4378_v17 }
 0xa09   :  { %v4388_v52 = vmul.f32 %v10640_v30, %v10640_v30  ;;  %v4394_v56 = vmul.f32 %v10652_v59, %v10652_v59 }
 0xa0b   :  { %v4398_v9 = vsel %vm12275_vm4, %v4388_v52, 0.0  ;;  %v4416_v2 = vsel %vm12277_vm6, %v4394_v56, 0.0 }
 0xa0c   :  { %v4348_v19 = vpop.xlane.xlu2 %4347  ;;  %4411 = vadd.xlane.f32.xlu1 %v4410_v46 }
 0xa0d   :  { %v4373_v60 = vmul.f32 %v10614_v20, %v4348_v19 }
 0xa0f   :  { %v10645_v1 = vsub.f32 %v4323_v32, %v4373_v60 }
 0xa11   :  { %v4389_v37 = vmul.f32 %v10645_v1, %v10645_v1 }
 0xa13   :  { %v4401_v54 = vsel %vm12276_vm2, %v4389_v37, 0.0 }
 0xa14   :  { %4399 = vadd.xlane.f32.xlu1 %v4398_v9  ;;  %4402 = vadd.xlane.f32.xlu2 %v4401_v54  ;;  %v4342_v4 = vpop.xlane.xlu2 %4341 }
 0xa15   :  { %v4371_v35 = vmul.f32 %v10614_v20, %v4342_v4 }
 0xa17   :  { %v10657_v32 = vsub.f32 %v4317_v16, %v4371_v35 }
 0xa19   :  { %v4387_v21 = vmul.f32 %v10657_v32, %v10657_v32 }
 0xa1b   :  { %v4395_v62 = vsel %vm12278_vm5, %v4387_v21, 0.0 }
 0xa1c   :  { %4417 = vadd.xlane.f32.xlu1 %v4416_v2  ;;  %4396 = vadd.xlane.f32.xlu2 %v4395_v62 }
 0xa56   :  { %4541 = vxpose.xlu1.b32.start [1/8] (short) (narrow) %v10559_v7, 8 }
 0xa5e   :  { %4542 = vxpose.xlu1.b32.cont [2/8] (short) (narrow) %v10563_v22, 8 }
 0xa66   :  { %4543 = vxpose.xlu1.b32.cont [3/8] (short) (narrow) %v10566_v36, 8 }
 0xa67   :  { %v4409_v16 = vpop.xlane.xlu2 %4408 }
 0xa68   :  { %v4423_v25 = vmul.f32 %v4409_v16, %v10614_v20 }
 0xa6e   :  { %4544 = vxpose.xlu1.b32.cont [4/8] (short) (narrow) %v10568_v57, 8  ;;  %v10679_v57 = vadd.f32 1e-05, %v4423_v25 }
 0xa70   :  { %vm4481_vm7 = vweird.f32 %v10679_v57 }
 0xa76   :  { %4545 = vxpose.xlu1.b32.cont [5/8] (short) (narrow) %v10570_v14, 8 }
 0xa77   :  { %v4406_v18 = vpop.xlane.xlu1 %4405  ;;  %v4415_v33 = vpop.xlane.xlu2 %4414 }
 0xa78   :  { %v4425_v61 = vmul.f32 %v4415_v33, %v10614_v20  ;;  %v4422_v36 = vmul.f32 %v4406_v18, %v10614_v20 }
 0xa7a   :  { %v10673_v58 = vadd.f32 1e-05, %v4425_v61  ;;  %v10682_v14 = vadd.f32 1e-05, %v4422_v36 }
 0xa7c   :  { %7640 = vrsqrt.f32 %v10673_v58  ;;  %vm4501_vm14 = vweird.f32 %v10673_v58  ;;  %vm4471_vm5 = vweird.f32 %v10682_v14 }
 0xa7e   :  { %4546 = vxpose.xlu1.b32.cont [6/8] (short) (narrow) %v10572_v38, 8 }
 0xa7f   :  { %v4412_v7 = vpop.xlane.xlu1 %4411 }
 0xa80   :  { %v4424_v22 = vmul.f32 %v4412_v7, %v10614_v20 }
 0xa82   :  { %v10677_v0 = vadd.f32 1e-05, %v4424_v22  ;;  %v10689_v11 = vpop.eup %7640 }
 0xa83   :  { %vm4502_vm9 = vweird.f32 %v10689_v11 }
 0xa84   :  { %7642 = vrsqrt.f32 %v10677_v0  ;;  %vm10740_vm8 = vmor %vm4501_vm14, %vm4502_vm9  ;;  %vm4491_vm15 = vweird.f32 %v10677_v0 }
 0xa85   :  { %7644 = vrsqrt.f32 %v10679_v57 }
 0xa86   :  { %4547 = vxpose.xlu1.b32.cont [7/8] (short) (narrow) %v10574_v39, 8  ;;  %7646 = vrsqrt.f32 %v10682_v14  ;;  %v4496_v39 = vmul.f32 %v10689_v11, %v10673_v58 }
 0xa87   :  { %v4400_v38 = vpop.xlane.xlu1 %4399  ;;  %v4403_v13 = vpop.xlane.xlu2 %4402 }
 0xa88   :  { %v4420_v10 = vmul.f32 %v4400_v38, %v10614_v20  ;;  %v4421_v28 = vmul.f32 %v4403_v13, %v10614_v20  ;;  %v4497_v9 = vmul.f32 %v10689_v11, %v4496_v39 }
 0xa8a   :  { %v10692_v63 = vadd.f32 1e-05, %v4420_v10  ;;  %v10694_v27 = vadd.f32 1e-05, %v4421_v28  ;;  %v10696_v3 = vpop.eup %7642  ;;  %v4498_v18 = vmul.f32 0.5, %v4497_v9 }
 0xa8b   :  { %v10700_v46 = vpop.eup %7644  ;;  %v4486_v60 = vmul.f32 %v10696_v3, %v10677_v0  ;;  %vm4492_vm3 = vweird.f32 %v10696_v3 }
 0xa8c   :  { %7648 = vrsqrt.f32 %v10694_v27  ;;  %v10705_v19 = vpop.eup %7646  ;;  %v4476_v37 = vmul.f32 %v10700_v46, %v10679_v57  ;;  %v4499_v36 = vsub.f32 1.5, %v4498_v18  ;;  %vm4482_vm11 = vweird.f32 %v10700_v46  ;;  %vm10757_vm4 = vmor %vm4491_vm15, %vm4492_vm3 }
 0xa8d   :  { %7650 = vrsqrt.f32 %v10692_v63  ;;  %v4466_v35 = vmul.f32 %v10705_v19, %v10682_v14  ;;  %v4487_v2 = vmul.f32 %v10696_v3, %v4486_v60  ;;  %vm4472_vm13 = vweird.f32 %v10705_v19  ;;  %vm10761_vm2 = vmor %vm4481_vm7, %vm4482_vm11 }
 0xa8e   :  { %4548 = vxpose.xlu1.b32.end [8/8] (short) (narrow) %v10576_v50, 8  ;;  %v4477_v16 = vmul.f32 %v10700_v46, %v4476_v37  ;;  %v4500_v37 = vmul.f32 %v10689_v11, %v4499_v36  ;;  %vm4461_vm11 = vweird.f32 %v10694_v27 }
 0xa8f   :  { %v4418_v17 = vpop.xlane.xlu1 %4417  ;;  %v4397_v52 = vpop.xlane.xlu2 %4396  ;;  %v4467_v61 = vmul.f32 %v10705_v19, %v4466_v35  ;;  %v4488_v25 = vmul.f32 0.5, %v4487_v2 }
 0xa90   :  { %v4426_v54 = vmul.f32 %v4418_v17, %v10614_v20  ;;  %v4419_v4 = vmul.f32 %v4397_v52, %v10614_v20  ;;  %v4478_v22 = vmul.f32 0.5, %v4477_v16  ;;  %v4504_v58 = vsel %vm10740_vm8, %v10689_v11, %v4500_v37  ;;  %vm10780_vm8 = vmor %vm4471_vm5, %vm4472_vm13 }
 0xa91   :  { %v4468_v10 = vmul.f32 0.5, %v4467_v61  ;;  %v4489_v39 = vsub.f32 1.5, %v4488_v25 }
 0xa92   :  { %v4434_v50 = vadd.f32 1e-05, %v4426_v54  ;;  %v10716_v56 = vadd.f32 1e-05, %v4419_v4  ;;  %v10718_v21 = vpop.eup %7648  ;;  %v4479_v52 = vsub.f32 1.5, %v4478_v22 }
 0xa93   :  { %v10721_v62 = vpop.eup %7650  ;;  %v4456_v33 = vmul.f32 %v10718_v21, %v10694_v27  ;;  %v4469_v35 = vsub.f32 1.5, %v4468_v10  ;;  %v4490_v18 = vmul.f32 %v10696_v3, %v4489_v39  ;;  %vm4462_vm14 = vweird.f32 %v10718_v21 }
 0xa94   :  { %7652 = vrsqrt.f32 %v4434_v50  ;;  %v4446_v7 = vmul.f32 %v10721_v62, %v10692_v63  ;;  %v4480_v25 = vmul.f32 %v10700_v46, %v4479_v52  ;;  %vm4511_vm6 = vweird.f32 %v4434_v50  ;;  %vm10794_vm15 = vmor %vm4461_vm11, %vm4462_vm14 }
 0xa95   :  { %7654 = vrsqrt.f32 %v10716_v56  ;;  %v4457_v38 = vmul.f32 %v10718_v21, %v4456_v33  ;;  %v4494_v0 = vsel %vm10757_vm4, %v10696_v3, %v4490_v18  ;;  %v4521_v52 = vmul.f32 %v4504_v58, %v10625_v41 }
 0xa96   :  { %v4447_v60 = vmul.f32 %v10721_v62, %v4446_v7  ;;  %v4520_v14 = vmul.f32 %v4494_v0, %v10633_v40  ;;  %vm4452_vm3 = vweird.f32 %v10721_v62  ;;  %vm4441_vm4 = vweird.f32 %v10716_v56 }
 0xa97   :  { %v4458_v54 = vmul.f32 0.5, %v4457_v38  ;;  %v4470_v38 = vmul.f32 %v10705_v19, %v4469_v35  ;;  %vm12291_vm11 = vcmask 31744  }
 0xa98   :  { %v4448_v33 = vmul.f32 0.5, %v4447_v60  ;;  %v3866_v60 = vld [vmem:[%s11918_s7] sm:$0x3f] }
 0xa99   :  { %v4459_v7 = vsub.f32 1.5, %v4458_v54  ;;  %v4474_v41 = vsel %vm10780_vm8, %v10705_v19, %v4470_v38  ;;  %v10799_v35 = vperm.slane %v3866_v60, 3 }
 0xa9a   :  { %v7653_v13 = vpop.eup %7652  ;;  %v4449_v39 = vsub.f32 1.5, %v4448_v33  ;;  %v4518_v33 = vmul.f32 %v4474_v41, %v10627_v45 }
 0xa9b   :  { %v10731_v28 = vpop.eup %7654  ;;  %v4506_v17 = vmul.f32 %v7653_v13, %v4434_v50  ;;  %vm4512_vm0 = vweird.f32 %v7653_v13  ;;  %v4460_v37 = vmul.f32 %v10718_v21, %v4459_v7  ;;  %v10860_v50 = vmax.f32 %v10461_v48, 0.0 }
 0xa9c   :  { %v4436_v9 = vmul.f32 %v10731_v28, %v10716_v56  ;;  %vm4513_vm9 = vmor %vm4511_vm6, %vm4512_vm0  ;;  %vm4451_vm0 = vweird.f32 %v10692_v63  ;;  %vm4442_vm7 = vweird.f32 %v10731_v28  ;;  %vm12289_vm6 = vcmask 1043456  }
 0xa9d   :  { %v4507_v4 = vmul.f32 %v7653_v13, %v4506_v17  ;;  %v4484_v17 = vsel %vm10761_vm2, %v10700_v46, %v4480_v25  ;;  %v10785_v46 = vperm.slane %v3866_v60, 2  ;;  %v4464_v19 = vsel %vm10794_vm15, %v10718_v21, %v4460_v37  ;;  %vm4453_vm13 = vmor %vm4451_vm0, %vm4452_vm3 }
 0xa9e   :  { %v4437_v2 = vmul.f32 %v10731_v28, %v4436_v9  ;;  %vm4443_vm2 = vmor %vm4441_vm4, %vm4442_vm7 }
 0xa9f   :  { %v4508_v61 = vmul.f32 0.5, %v4507_v4  ;;  %v4450_v4 = vmul.f32 %v10721_v62, %v4449_v39  ;;  %v4530_v40 = vmul.f32 %v10785_v46, %v4521_v52  ;;  %v4529_v18 = vmul.f32 %v10785_v46, %v4520_v14  ;;  %vm12290_vm5 = vmmov %vm12289_vm6 }
 0xaa0   :  { %v4438_v36 = vmul.f32 0.5, %v4437_v2  ;;  %v4519_v2 = vmul.f32 %v4484_v17, %v10617_v44  ;;  %vm12292_vm15 = vmmov %vm12290_vm5 }
 0xaa1   :  { %v4509_v22 = vsub.f32 1.5, %v4508_v61  ;;  %v4454_v44 = vsel %vm4453_vm13, %v10721_v62, %v4450_v4  ;;  %v10818_v63 = vadd.f32 %v10799_v35, %v4530_v40  ;;  %v4517_v61 = vmul.f32 %v4464_v19, %v10645_v1  ;;  %vm12293_vm0 = vmmov %vm12291_vm11 }
 0xaa2   :  { %v4439_v9 = vsub.f32 1.5, %v4438_v36  ;;  %v4528_v21 = vmul.f32 %v10785_v46, %v4519_v2  ;;  %v10825_v45 = vadd.f32 %v10799_v35, %v4529_v18  ;;  %v4527_v62 = vmul.f32 %v10785_v46, %v4518_v33  ;;  %vm12294_vm7 = vmmov %vm12290_vm5 }
 0xaa3   :  { %v4510_v57 = vmul.f32 %v7653_v13, %v4509_v22  ;;  %v4516_v56 = vmul.f32 %v4454_v44, %v10640_v30  ;;  %v4526_v7 = vmul.f32 %v10785_v46, %v4517_v61  ;;  %vm12295_vm13 = vmmov %vm12293_vm0 }
 0xaa4   :  { %v4440_v27 = vmul.f32 %v10731_v28, %v4439_v9  ;;  %v10831_v58 = vadd.f32 %v10799_v35, %v4528_v21  ;;  %v10855_v9 = vmax.f32 %v10459_v8, 0.0  ;;  %vm12296_vm4 = vmmov %vm12293_vm0 }
 0xaa5   :  { %v4514_v3 = vsel %vm4513_vm9, %v7653_v13, %v4510_v57  ;;  %v4525_v22 = vmul.f32 %v10785_v46, %v4516_v56  ;;  %v10842_v30 = vadd.f32 %v10799_v35, %v4526_v7 }
 0xaa6   :  { %v4522_v54 = vmul.f32 %v4514_v3, %v10652_v59  ;;  %v4444_v25 = vsel %vm4443_vm2, %v10731_v28, %v4440_v27  ;;  %v10837_v28 = vadd.f32 %v10799_v35, %v4527_v62  ;;  %v7814_v3 = vld [vmem:[%s11916_s5] sm:$0xf]  ;;  %vm12297_vm2 = vmmov %vm12290_vm5 }
 0xaa7   :  { %v4515_v1 = vmul.f32 %v4444_v25, %v10657_v32  ;;  %v4534_v38 = vadd.f32 %v10799_v35, %v4525_v22 }
 0xaa8   :  { %v4531_v59 = vmul.f32 %v10785_v46, %v4522_v54  ;;  %v10865_v54 = vmax.f32 %v10463_v47, 0.0 }
 0xaa9   :  { %v4524_v36 = vmul.f32 %v10785_v46, %v4515_v1 }
 0xaaa   :  { %v10810_v16 = vadd.f32 %v10799_v35, %v4531_v59 }
 0xaab   :  { %v4533_v32 = vadd.f32 %v10799_v35, %v4524_v36 }
 0xaac   :  { %4584 = vmatpush.msrb.mxu1 %v10810_v16 }
 0xaae   :  { %4585 = vmatpush.msrb.mxu1 %v10818_v63 }
 0xab0   :  { %4586 = vmatpush.msrb.mxu1 %v10825_v45 }
 0xab2   :  { %4587 = vmatpush.msrb.mxu1 %v10831_v58 }
 0xab4   :  { %4588 = vmatpush.msrb.mxu1 %v10837_v28 }
 0xab6   :  { %4589 = vmatpush.msrb.mxu1 %v10842_v30 }
 0xab8   :  { %4590 = vmatpush.msrb.mxu1 %v4534_v38 }
 0xaba   :  { %4591 = vmatpush.msrb.mxu1 %v4533_v32 }
 0xafa   :  { %v4557_v10 = vpop.trf.xlu1 }
 0xafb   :  { %7461 = vmatmul.msk.f32.vlgmr.msrb.gmra.mxu1 %vm4102_vm10, %v4557_v10 }
 0xb78   :  { %v4593_v11 = vpop.f32.mrf.mxu1 }
 0xb79   :  { %v4596_v0 = vmul.f32 0.00390625, %v4593_v11 }
 0xb7b   :  { %v4597_v39 = vsel %vm4127_vm12, %v4596_v0, -inf }
 0xb7c   :  { %4598 = vmax.xlane.f32.xlu2 %v4597_v39 }
 0xbef   :  { %v4599_v57 = vpop.xlane.xlu2 %4598 }
 0xbf0   :  { %v4600_v60 = vsub.f32 %v4596_v0, %v4599_v57 }
 0xbf2   :  { %v4601_v17 = vmul.f32 1.442695, %v4600_v60 }
 0xbf4   :  { %7656 = vpow2.f32 %v4601_v17 }
 0xbfa   :  { %v7657_v52 = vpop.eup %7656 }
 0xbfb   :  { %v4603_v37 = vsel %vm4127_vm12, %v7657_v52, 0.0 }
 0xbfc   :  { %4604 = vadd.xlane.f32.xlu2 %v4603_v37 }
 0xc14   :  { %4857 = vrot.lane.b32.xlu2 %v7814_v3, %s7822_s23 }
 0xc1c   :  { %5585 = vrot.lane.b32.xlu2 %v10855_v9, %s7818_s9 }
 0xc24   :  { %5589 = vrot.lane.b32.xlu2 %v10860_v50, %s7818_s9 }
 0xc2c   :  { %5593 = vrot.lane.b32.xlu2 %v10865_v54, %s7818_s9 }
 0xc34   :  { %5120 = vrot.lane.b32.xlu2 %v10530_v55, %s7818_s9 }
 0xc6f   :  { %v4605_v8 = vpop.xlane.xlu2 %4604 }
 0xc70   :  { %7658 = vrcp.f32 %v4605_v8  ;;  %v4617_v47 = vand.u32 2147483648, %v4605_v8  ;;  %v4615_v59 = vand.u32 2147483647, %v4605_v8  ;;  %vm4611_vm14 = vweird.f32 %v4605_v8 }
 0xc72   :  { %v4618_v2 = vor.u32 1.1754944e-38, %v4617_v47  ;;  %vm4616_vm3 = vcmp.eq.f32.partialorder %v4615_v59, 8.507059e+37 }
 0xc76   :  { %v7659_v14 = vpop.eup %7658 }
 0xc77   :  { %v4607_v41 = vmul.f32 %v7659_v14, %v4605_v8  ;;  %v10871_v4 = vpop.permute.xlu2 %4857  ;;  %vm4612_vm9 = vweird.f32 %v7659_v14 }
 0xc78   :  { %7471 = vmatpush.msk.msra.mxu1 %vm12289_vm6, %v10871_v4  ;;  %vm4613_vm8 = vmor %vm4611_vm14, %vm4612_vm9 }
 0xc79   :  { %v4608_v48 = vsub.f32 1.0, %v4607_v41  ;;  %vm12298_vm6 = vmmov %vm12293_vm0 }
 0xc7a   :  { %7507 = vmatpush.msk.msrb.mxu1 %vm12290_vm5, %v10485_v26  ;;  %vm12299_vm5 = vmmov %vm12293_vm0 }
 0xc7b   :  { %v4609_v13 = vmul.f32 %v7659_v14, %v4608_v48  ;;  %vm12300_vm9 = vmmov %vm12293_vm0 }
 0xc7c   :  { %vm12301_vm14 = vmmov %vm12293_vm0 }
 0xc7d   :  { %v4610_v40 = vadd.f32 %v7659_v14, %v4609_v13 }
 0xc7f   :  { %v4614_v19 = vsel %vm4613_vm8, %v7659_v14, %v4610_v40  ;;  %v10877_v27 = vpop.permute.xlu2 %5585  ;;  %vm12302_vm8 = vmmov %vm12293_vm0 }
 0xc80   :  { %v4619_v18 = vsel %vm4616_vm3, %v4618_v2, %v4614_v19  ;;  %vm12303_vm3 = vmmov %vm12293_vm0 }
 0xc81   :  { %v4620_v33 = vmul.f32 %v7657_v52, %v4619_v18 }
 0xc83   :  { %7462 = vmatpush.xpose.msk.msra.mxu3 %vm12291_vm11, %v4620_v33  ;;  %vm12304_vm11 = vmmov %vm12293_vm0 }
 0xc86   :  { %7463 = vmatmul.msk.f32.vlgmr.msra.gmra.mxu3 %vm12293_vm0, %v4533_v32 }
 0xc87   :  { %7498 = vmatpush.msk.msrb.mxu3 %vm12292_vm15, %v7814_v3  ;;  %v10882_v26 = vpop.permute.xlu2 %5589  ;;  %vm12305_vm15 = vmmov %vm12293_vm0 }
 0xc89   :  { %7535 = vmatpush.msk.msra.mxu3 %vm12294_vm7, %v10500_v6  ;;  %vm12306_vm7 = vmmov %vm12293_vm0  ;;  %v10935_v6 = vpop.permute.xlu0 %5581 }
 0xc8e   :  { %7464 = vmatmul.msk.f32.gmra.mxu3 %vm12295_vm13, %v4534_v38  ;;  %vm12307_vm13 = vmmov %vm12293_vm0 }
 0xc8f   :  { %v10887_v44 = vpop.permute.xlu2 %5593 }
 0xc91   :  { %v10939_v25 = vpop.permute.xlu0 %5583 }
 0xc96   :  { %7465 = vmatmul.msk.f32.gmra.mxu3 %vm12296_vm4, %v10842_v30  ;;  %vm12308_vm4 = vmmov %vm12293_vm0 }
 0xc97   :  { %v10891_v21 = vpop.permute.xlu2 %5120 }
 0xc98   :  { %7480 = vmatpush.msk.msra.mxu2 %vm12297_vm2, %v10891_v21  ;;  %vm12309_vm2 = vmmov %vm12293_vm0 }
 0xc99   :  { %7481 = vmatmul.msk.f32.vlgmr.msra.gmra.mxu2 %vm12298_vm6, %v4533_v32  ;;  %vm12310_vm6 = vmmov %vm12293_vm0 }
 0xc9e   :  { %7466 = vmatmul.msk.f32.gmra.mxu3 %vm12299_vm5, %v10837_v28  ;;  %vm12311_vm5 = vmmov %vm12293_vm0 }
 0xca1   :  { %7482 = vmatmul.msk.f32.gmra.mxu2 %vm12300_vm9, %v4534_v38  ;;  %vm12312_vm9 = vmmov %vm12293_vm0  ;;  %v10945_v38 = vpop.permute.xlu0 %5587 }
 0xca6   :  { %7467 = vmatmul.msk.f32.gmra.mxu3 %vm12301_vm14, %v10831_v58  ;;  %vm12313_vm14 = vmmov %vm12293_vm0 }
 0xca9   :  { %7483 = vmatmul.msk.f32.gmra.mxu2 %vm12302_vm8, %v10842_v30  ;;  %vm12314_vm8 = vmmov %vm12293_vm0 }
 0xcae   :  { %7468 = vmatmul.msk.f32.gmra.mxu3 %vm12303_vm3, %v10825_v45  ;;  %vm12315_vm3 = vmmov %vm12293_vm0 }
 0xcb1   :  { %7484 = vmatmul.msk.f32.gmra.mxu2 %vm12304_vm11, %v10837_v28  ;;  %vm12316_vm11 = vmmov %vm12293_vm0 }
 0xcb6   :  { %7469 = vmatmul.msk.f32.gmra.mxu3 %vm12305_vm15, %v10818_v63  ;;  %vm12317_vm15 = vmmov %vm12293_vm0 }
 0xcb9   :  { %7485 = vmatmul.msk.f32.gmra.mxu2 %vm12293_vm0, %v10831_v58 }
 0xcbe   :  { %7470 = vmatmul.msk.f32.gmra.mxu3 %vm12306_vm7, %v10810_v16  ;;  %vm12318_vm7 = vmmov %vm12293_vm0 }
 0xcc1   :  { %7486 = vmatmul.msk.f32.gmra.mxu2 %vm12307_vm13, %v10825_v45  ;;  %vm12319_vm13 = vmmov %vm12293_vm0 }
 0xcc6   :  { %7499 = vmatmul.msk.f32.vlgmr.msrb.gmra.mxu3 %vm12308_vm4, %v10589_v24  ;;  %vm12320_vm4 = vmmov %vm12293_vm0 }
 0xcc9   :  { %7487 = vmatmul.msk.f32.gmra.mxu2 %vm12309_vm2, %v10818_v63 }
 0xcce   :  { %7500 = vmatmul.msk.f32.gmra.mxu3 %vm12310_vm6, %v10595_v29 }
 0xcd1   :  { %7488 = vmatmul.msk.f32.gmra.mxu2 %vm12311_vm5, %v10810_v16 }
 0xcd6   :  { %7501 = vmatmul.msk.f32.gmra.mxu3 %vm12312_vm9, %v10855_v9 }
 0xcde   :  { %7502 = vmatmul.msk.f32.gmra.mxu3 %vm12313_vm14, %v10600_v53  ;;  %vm12321_vm14 = vmmov %vm12293_vm0 }
 0xce6   :  { %7503 = vmatmul.msk.f32.gmra.mxu3 %vm12314_vm8, %v10860_v50 }
 0xcee   :  { %7504 = vmatmul.msk.f32.gmra.mxu3 %vm12315_vm3, %v10605_v31  ;;  %vm12322_vm3 = vmmov %vm12293_vm0 }
 0xcf6   :  { %7505 = vmatmul.msk.f32.gmra.mxu3 %vm12316_vm11, %v10865_v54 }
 0xcfe   :  { %7506 = vmatmul.msk.f32.gmra.mxu3 %vm12317_vm15, %v10610_v12 }
 0xd06   :  { %7536 = vmatmul.msk.f32.vlgmr.msra.gmra.mxu3 %vm12293_vm0, %v10935_v6 }
 0xd09   :  { %v4665_v16 = vpop.f32.mrf.mxu3 }
 0xd0a   :  { %v4689_v63 = vsub.f32 0.0, %v4665_v16 }
 0xd0c   :  { %v4697_v61 = vmul.f32 1.442695, %v4689_v63 }
 0xd0e   :  { %7660 = vpow2.f32 %v4697_v61  ;;  %7537 = vmatmul.msk.f32.gmra.mxu3 %vm12318_vm7, %v10939_v25 }
 0xd11   :  { %v4668_v45 = vpop.f32.mrf.mxu3 }
 0xd12   :  { %v4690_v62 = vsub.f32 0.0, %v4668_v45 }
 0xd14   :  { %v7661_v56 = vpop.eup %7660  ;;  %v4699_v58 = vmul.f32 1.442695, %v4690_v62 }
 0xd15   :  { %v4713_v7 = vadd.f32 1.0, %v7661_v56 }
 0xd16   :  { %7662 = vpow2.f32 %v4699_v58  ;;  %7538 = vmatmul.msk.f32.gmra.mxu3 %vm12319_vm13, %v10877_v27  ;;  %v10954_v58 = vpop.permute.xlu0 %5591 }
 0xd17   :  { %7664 = vrcp.f32 %v4713_v7  ;;  %v4732_v0 = vand.u32 2147483648, %v4713_v7  ;;  %v4730_v60 = vand.u32 2147483647, %v4713_v7  ;;  %vm4726_vm6 = vweird.f32 %v4713_v7 }
 0xd19   :  { %v4671_v1 = vpop.f32.mrf.mxu3  ;;  %v4733_v14 = vor.u32 1.1754944e-38, %v4732_v0  ;;  %vm4731_vm9 = vcmp.eq.f32.partialorder %v4730_v60, 8.507059e+37 }
 0xd1a   :  { %v4691_v28 = vsub.f32 0.0, %v4671_v1 }
 0xd1c   :  { %v7663_v22 = vpop.eup %7662  ;;  %v4701_v30 = vmul.f32 1.442695, %v4691_v28 }
 0xd1d   :  { %v7665_v36 = vpop.eup %7664  ;;  %v4714_v32 = vadd.f32 1.0, %v7663_v22 }
 0xd1e   :  { %v4722_v10 = vmul.f32 %v7665_v36, %v4713_v7  ;;  %7666 = vpow2.f32 %v4701_v30  ;;  %7539 = vmatmul.msk.f32.gmra.mxu3 %vm12320_vm4, %v10945_v38  ;;  %vm4727_vm2 = vweird.f32 %v7665_v36  ;;  %vm12323_vm4 = vmmov %vm12293_vm0 }
 0xd1f   :  { %7668 = vrcp.f32 %v4714_v32  ;;  %vm4728_vm5 = vmor %vm4726_vm6, %vm4727_vm2  ;;  %v4747_v19 = vand.u32 2147483648, %v4714_v32  ;;  %v4745_v63 = vand.u32 2147483647, %v4714_v32  ;;  %vm4741_vm11 = vweird.f32 %v4714_v32 }
 0xd20   :  { %v4723_v11 = vsub.f32 1.0, %v4722_v10 }
 0xd21   :  { %v4674_v39 = vpop.f32.mrf.mxu3  ;;  %v4748_v1 = vor.u32 1.1754944e-38, %v4747_v19  ;;  %vm4746_vm7 = vcmp.eq.f32.partialorder %v4745_v63, 8.507059e+37 }
 0xd22   :  { %v4724_v57 = vmul.f32 %v7665_v36, %v4723_v11  ;;  %v4692_v17 = vsub.f32 0.0, %v4674_v39 }
 0xd24   :  { %v7667_v52 = vpop.eup %7666  ;;  %v4725_v37 = vadd.f32 %v7665_v36, %v4724_v57  ;;  %v4703_v3 = vmul.f32 1.442695, %v4692_v17 }
 0xd25   :  { %v7669_v8 = vpop.eup %7668  ;;  %v4715_v41 = vadd.f32 1.0, %v7667_v52 }
 0xd26   :  { %v4729_v48 = vsel %vm4728_vm5, %v7665_v36, %v4725_v37  ;;  %v4737_v47 = vmul.f32 %v7669_v8, %v4714_v32  ;;  %7670 = vpow2.f32 %v4703_v3  ;;  %7540 = vmatmul.msk.f32.gmra.mxu3 %vm12321_vm14, %v10882_v26  ;;  %vm4742_vm8 = vweird.f32 %v7669_v8  ;;  %vm12324_vm5 = vmmov %vm12293_vm0 }
 0xd27   :  { %v4734_v13 = vsel %vm4731_vm9, %v4733_v14, %v4729_v48  ;;  %7672 = vrcp.f32 %v4715_v41  ;;  %vm4743_vm15 = vmor %vm4741_vm11, %vm4742_vm8  ;;  %v4762_v32 = vand.u32 2147483648, %v4715_v41  ;;  %v4760_v60 = vand.u32 2147483647, %v4715_v41 }
 0xd28   :  { %v4738_v59 = vsub.f32 1.0, %v4737_v47  ;;  %v4841_v40 = vmul.f32 %v4734_v13, %v10428_v5  ;;  %vm4756_vm2 = vweird.f32 %v4715_v41  ;;  %vm12325_vm8 = vmmov %vm12293_vm0 }
 0xd29   :  { %v4677_v2 = vpop.f32.mrf.mxu3  ;;  %v4763_v14 = vor.u32 1.1754944e-38, %v4762_v32  ;;  %vm4761_vm9 = vcmp.eq.f32.partialorder %v4760_v60, 8.507059e+37 }
 0xd2a   :  { %v4693_v18 = vsub.f32 0.0, %v4677_v2  ;;  %v4849_v33 = vadd.f32 %v4841_v40, %v10428_v5  ;;  %v4739_v16 = vmul.f32 %v7669_v8, %v4738_v59 }
 0xd2c   :  { %v7671_v61 = vpop.eup %7670  ;;  %v4705_v45 = vmul.f32 1.442695, %v4693_v18  ;;  %7472 = vmatmul.msk.f32.vlgmr.msra.gmra.mxu1 %vm12322_vm3, %v4849_v33  ;;  %v4740_v62 = vadd.f32 %v7669_v8, %v4739_v16 }
 0xd2d   :  { %v7673_v56 = vpop.eup %7672  ;;  %v4716_v7 = vadd.f32 1.0, %v7671_v61 }
 0xd2e   :  { %v4752_v28 = vmul.f32 %v7673_v56, %v4715_v41  ;;  %7674 = vpow2.f32 %v4705_v45  ;;  %7541 = vmatmul.msk.f32.gmra.mxu3 %vm12293_vm0, %v10954_v58  ;;  %v4744_v22 = vsel %vm4743_vm15, %v7669_v8, %v4740_v62  ;;  %vm4757_vm13 = vweird.f32 %v7673_v56  ;;  %vm12326_vm15 = vmmov %vm12293_vm0 }
 0xd2f   :  { %7676 = vrcp.f32 %v4716_v7  ;;  %v4749_v30 = vsel %vm4746_vm7, %v4748_v1, %v4744_v22  ;;  %vm4758_vm6 = vmor %vm4756_vm2, %vm4757_vm13  ;;  %v4777_v19 = vand.u32 2147483648, %v4716_v7  ;;  %v4775_v16 = vand.u32 2147483647, %v4716_v7 }
 0xd30   :  { %v4753_v36 = vsub.f32 1.0, %v4752_v28  ;;  %v4842_v10 = vmul.f32 %v4749_v30, %v10426_v49  ;;  %vm4771_vm3 = vweird.f32 %v4716_v7  ;;  %vm12327_vm13 = vmmov %vm12323_vm4 }
 0xd31   :  { %v4680_v11 = vpop.f32.mrf.mxu3  ;;  %v4778_v28 = vor.u32 1.1754944e-38, %v4777_v19  ;;  %vm4776_vm0 = vcmp.eq.f32.partialorder %v4775_v16, 8.507059e+37 }
 0xd32   :  { %v4694_v0 = vsub.f32 0.0, %v4680_v11  ;;  %v4850_v39 = vadd.f32 %v4842_v10, %v10426_v49  ;;  %v4754_v57 = vmul.f32 %v7673_v56, %v4753_v36 }
 0xd34   :  { %v7675_v17 = vpop.eup %7674  ;;  %v4707_v52 = vmul.f32 1.442695, %v4694_v0  ;;  %7473 = vmatmul.msk.f32.gmra.mxu1 %vm12323_vm4, %v4850_v39  ;;  %v4755_v37 = vadd.f32 %v7673_v56, %v4754_v57 }
 0xd35   :  { %v7677_v3 = vpop.eup %7676  ;;  %v4717_v8 = vadd.f32 1.0, %v7675_v17 }
 0xd36   :  { %v4767_v48 = vmul.f32 %v7677_v3, %v4716_v7  ;;  %7678 = vpow2.f32 %v4707_v52  ;;  %7542 = vmatmul.msk.f32.gmra.mxu3 %vm12324_vm5, %v10887_v44  ;;  %v4759_v47 = vsel %vm4758_vm6, %v7673_v56, %v4755_v37  ;;  %vm4772_vm14 = vweird.f32 %v7677_v3  ;;  %v10966_v56 = vpop.permute.xlu0 %5595 }
 0xd37   :  { %7680 = vrcp.f32 %v4717_v8  ;;  %v4764_v13 = vsel %vm4761_vm9, %v4763_v14, %v4759_v47  ;;  %vm4773_vm11 = vmor %vm4771_vm3, %vm4772_vm14  ;;  %v4790_v7 = vand.u32 2147483647, %v4717_v8  ;;  %v4792_v0 = vand.u32 2147483648, %v4717_v8 }
 0xd38   :  { %v4768_v59 = vsub.f32 1.0, %v4767_v48  ;;  %v4843_v40 = vmul.f32 %v4764_v13, %v10424_v43  ;;  %vm4786_vm4 = vweird.f32 %v4717_v8  ;;  %vm12328_vm9 = vmmov %vm12325_vm8 }
 0xd39   :  { %v4683_v2 = vpop.f32.mrf.mxu3  ;;  %v4793_v48 = vor.u32 1.1754944e-38, %v4792_v0  ;;  %vm4791_vm6 = vcmp.eq.f32.partialorder %v4790_v7, 8.507059e+37 }
 0xd3a   :  { %v4695_v41 = vsub.f32 0.0, %v4683_v2  ;;  %v4851_v18 = vadd.f32 %v4843_v40, %v10424_v43  ;;  %v4769_v33 = vmul.f32 %v7677_v3, %v4768_v59 }
 0xd3c   :  { %v7679_v63 = vpop.eup %7678  ;;  %v4709_v61 = vmul.f32 1.442695, %v4695_v41  ;;  %7474 = vmatmul.msk.f32.gmra.mxu1 %vm12325_vm8, %v4851_v18  ;;  %v4770_v45 = vadd.f32 %v7677_v3, %v4769_v33 }
 0xd3d   :  { %v7681_v62 = vpop.eup %7680  ;;  %v4718_v1 = vadd.f32 1.0, %v7679_v63 }
 0xd3e   :  { %v4782_v22 = vmul.f32 %v7681_v62, %v4717_v8  ;;  %7682 = vpow2.f32 %v4709_v61  ;;  %7543 = vmatmul.msk.f32.gmra.mxu3 %vm12326_vm15, %v10966_v56  ;;  %v4774_v30 = vsel %vm4773_vm11, %v7677_v3, %v4770_v45  ;;  %vm4787_vm7 = vweird.f32 %v7681_v62  ;;  %vm12329_vm15 = vmmov %vm12328_vm9 }
 0xd3f   :  { %7684 = vrcp.f32 %v4718_v1  ;;  %v4779_v36 = vsel %vm4776_vm0, %v4778_v28, %v4774_v30  ;;  %vm4788_vm2 = vmor %vm4786_vm4, %vm4787_vm7  ;;  %v4807_v19 = vand.u32 2147483648, %v4718_v1  ;;  %v4805_v33 = vand.u32 2147483647, %v4718_v1 }
 0xd40   :  { %v4783_v10 = vsub.f32 1.0, %v4782_v22  ;;  %v4844_v11 = vmul.f32 %v4779_v36, %v10442_v51  ;;  %vm4801_vm14 = vweird.f32 %v4718_v1 }
 0xd41   :  { %v4686_v32 = vpop.f32.mrf.mxu3  ;;  %v4808_v45 = vor.u32 1.1754944e-38, %v4807_v19  ;;  %vm4806_vm3 = vcmp.eq.f32.partialorder %v4805_v33, 8.507059e+37 }
 0xd42   :  { %v4696_v39 = vsub.f32 0.0, %v4686_v32  ;;  %v4852_v57 = vadd.f32 %v4844_v11, %v10442_v51  ;;  %v4784_v60 = vmul.f32 %v7681_v62, %v4783_v10 }
 0xd44   :  { %v7683_v17 = vpop.eup %7682  ;;  %v4711_v52 = vmul.f32 1.442695, %v4696_v39  ;;  %7475 = vmatmul.msk.f32.gmra.mxu1 %vm12327_vm13, %v4852_v57  ;;  %v4785_v37 = vadd.f32 %v7681_v62, %v4784_v60 }
 0xd45   :  { %v7685_v3 = vpop.eup %7684  ;;  %v4719_v14 = vadd.f32 1.0, %v7683_v17 }
 0xd46   :  { %v4797_v47 = vmul.f32 %v7685_v3, %v4718_v1  ;;  %7686 = vpow2.f32 %v4711_v52  ;;  %v4789_v13 = vsel %vm4788_vm2, %v7681_v62, %v4785_v37  ;;  %vm4802_vm5 = vweird.f32 %v7685_v3  ;;  %vm12330_vm2 = vmmov %vm12328_vm9 }
 0xd47   :  { %7688 = vrcp.f32 %v4719_v14  ;;  %v4794_v59 = vsel %vm4791_vm6, %v4793_v48, %v4789_v13  ;;  %vm4803_vm8 = vmor %vm4801_vm14, %vm4802_vm5  ;;  %v4822_v10 = vand.u32 2147483648, %v4719_v14  ;;  %v4820_v7 = vand.u32 2147483647, %v4719_v14 }
 0xd48   :  { %v4798_v40 = vsub.f32 1.0, %v4797_v47  ;;  %v4845_v2 = vmul.f32 %v4794_v59, %v10440_v42  ;;  %vm4816_vm0 = vweird.f32 %v4719_v14  ;;  %vm12331_vm14 = vmmov %vm12330_vm2 }
 0xd49   :  { %v4823_v39 = vor.u32 1.1754944e-38, %v4822_v10  ;;  %vm4821_vm13 = vcmp.eq.f32.partialorder %v4820_v7, 8.507059e+37 }
 0xd4a   :  { %v4853_v41 = vadd.f32 %v4845_v2, %v10440_v42  ;;  %v4799_v18 = vmul.f32 %v7685_v3, %v4798_v40 }
 0xd4c   :  { %v7687_v8 = vpop.eup %7686  ;;  %7476 = vmatmul.msk.f32.gmra.mxu1 %vm12328_vm9, %v4853_v41  ;;  %v4800_v16 = vadd.f32 %v7685_v3, %v4799_v18 }
 0xd4d   :  { %v7689_v63 = vpop.eup %7688  ;;  %v4720_v61 = vadd.f32 1.0, %v7687_v8 }
 0xd4e   :  { %v4812_v62 = vmul.f32 %v7689_v63, %v4719_v14  ;;  %v4804_v28 = vsel %vm4803_vm8, %v7685_v3, %v4800_v16  ;;  %vm4817_vm11 = vweird.f32 %v7689_v63  ;;  %vm12332_vm8 = vmmov %vm12330_vm2 }
 0xd4f   :  { %7690 = vrcp.f32 %v4720_v61  ;;  %v4809_v22 = vsel %vm4806_vm3, %v4808_v45, %v4804_v28  ;;  %vm4818_vm7 = vmor %vm4816_vm0, %vm4817_vm11  ;;  %v4837_v3 = vand.u32 2147483648, %v4720_v61  ;;  %v4835_v13 = vand.u32 2147483647, %v4720_v61 }
 0xd50   :  { %v4813_v30 = vsub.f32 1.0, %v4812_v62  ;;  %v4846_v36 = vmul.f32 %v4809_v22, %v10438_v15  ;;  %vm4831_vm6 = vweird.f32 %v4720_v61  ;;  %vm12333_vm3 = vmmov %vm12330_vm2 }
 0xd51   :  { %v4838_v14 = vor.u32 1.1754944e-38, %v4837_v3  ;;  %vm4836_vm9 = vcmp.eq.f32.partialorder %v4835_v13, 8.507059e+37  ;;  %vm12334_vm11 = vmmov %vm12330_vm2 }
 0xd52   :  { %v4854_v11 = vadd.f32 %v4846_v36, %v10438_v15  ;;  %v4814_v32 = vmul.f32 %v7689_v63, %v4813_v30  ;;  %vm12336_vm0 = vmmov %vm12330_vm2 }
 0xd54   :  { %7477 = vmatmul.msk.f32.gmra.mxu1 %vm12329_vm15, %v4854_v11  ;;  %v4815_v1 = vadd.f32 %v7689_v63, %v4814_v32  ;;  %vm12335_vm15 = vmmov %vm12330_vm2 }
 0xd55   :  { %v7691_v0 = vpop.eup %7690 }
 0xd56   :  { %v4827_v57 = vmul.f32 %v7691_v0, %v4720_v61  ;;  %v4819_v60 = vsel %vm4818_vm7, %v7689_v63, %v4815_v1  ;;  %vm4832_vm4 = vweird.f32 %v7691_v0  ;;  %vm12337_vm7 = vmmov %vm12336_vm0 }
 0xd57   :  { %v4824_v17 = vsel %vm4821_vm13, %v4823_v39, %v4819_v60  ;;  %vm4833_vm5 = vmor %vm4831_vm6, %vm4832_vm4 }
 0xd58   :  { %v4828_v52 = vsub.f32 1.0, %v4827_v57  ;;  %v4847_v37 = vmul.f32 %v4824_v17, %v10475_v34  ;;  %vm12338_vm13 = vmmov %vm12336_vm0 }
 0xd59   :  { %vm12339_vm4 = vmmov %vm12336_vm0 }
 0xd5a   :  { %v4855_v48 = vadd.f32 %v4847_v37, %v10475_v34  ;;  %v4829_v47 = vmul.f32 %v7691_v0, %v4828_v52  ;;  %vm12341_vm6 = vmmov %vm12336_vm0 }
 0xd5c   :  { %7478 = vmatmul.msk.f32.gmra.mxu1 %vm12330_vm2, %v4855_v48  ;;  %v4830_v59 = vadd.f32 %v7691_v0, %v4829_v47  ;;  %vm12340_vm2 = vmmov %vm12336_vm0 }
 0xd5e   :  { %v4834_v40 = vsel %vm4833_vm5, %v7691_v0, %v4830_v59  ;;  %vm12342_vm5 = vmmov %vm12336_vm0 }
 0xd5f   :  { %v4839_v2 = vsel %vm4836_vm9, %v4838_v14, %v4834_v40  ;;  %vm12343_vm9 = vmmov %vm12336_vm0 }
 0xd60   :  { %v4848_v19 = vmul.f32 %v4839_v2, %v10473_v23 }
 0xd62   :  { %v4856_v41 = vadd.f32 %v4848_v19, %v10473_v23 }
 0xd64   :  { %7479 = vmatmul.msk.f32.gmra.mxu1 %vm12331_vm14, %v4856_v41  ;;  %vm12344_vm14 = vmmov %vm12336_vm0 }
 0xd6c   :  { %7508 = vmatmul.msk.f32.vlgmr.msrb.gmra.mxu1 %vm12332_vm8, %v10935_v6  ;;  %vm12345_vm8 = vmmov %vm12336_vm0 }
 0xd74   :  { %7509 = vmatmul.msk.f32.gmra.mxu1 %vm12333_vm3, %v10939_v25  ;;  %vm12346_vm3 = vmmov %vm12336_vm0 }
 0xd7c   :  { %7510 = vmatmul.msk.f32.gmra.mxu1 %vm12334_vm11, %v10877_v27  ;;  %vm12347_vm11 = vmmov %vm12336_vm0 }
 0xd84   :  { %7511 = vmatmul.msk.f32.gmra.mxu1 %vm12335_vm15, %v10945_v38  ;;  %vm12348_vm15 = vmmov %vm12336_vm0 }
 0xd8c   :  { %7512 = vmatmul.msk.f32.gmra.mxu1 %vm12336_vm0, %v10882_v26 }
 0xd94   :  { %7513 = vmatmul.msk.f32.gmra.mxu1 %vm12337_vm7, %v10954_v58  ;;  %vm12349_vm7 = vmmov %vm12336_vm0 }
 0xd9c   :  { %7514 = vmatmul.msk.f32.gmra.mxu1 %vm12338_vm13, %v10887_v44  ;;  %vm12350_vm13 = vmmov %vm12336_vm0 }
 0xda4   :  { %7515 = vmatmul.msk.f32.gmra.mxu1 %vm12339_vm4, %v10966_v56  ;;  %vm12351_vm4 = vmmov %vm12336_vm0 }
 0xda9   :  { %v11001_v6 = vpop.f32.mrf.mxu1 }
 0xdaa   :  { %v4926_v32 = vsel %vm12342_vm5, %v11001_v6, 0.0 }
 0xdb1   :  { %v11003_v25 = vpop.f32.mrf.mxu1 }
 0xdb2   :  { %v4929_v7 = vsel %vm12343_vm9, %v11003_v25, 0.0 }
 0xdb9   :  { %v11005_v27 = vpop.f32.mrf.mxu1 }
 0xdba   :  { %v4932_v1 = vsel %vm12344_vm14, %v11005_v27, 0.0 }
 0xdc1   :  { %v11007_v18 = vpop.f32.mrf.mxu1 }
 0xdc2   :  { %v4935_v26 = vsel %vm12340_vm2, %v11007_v18, 0.0  ;;  %vm12352_vm2 = vmmov %vm12336_vm0 }
 0xdc3   :  { %4936 = vadd.xlane.f32.xlu1 %v4935_v26 }
 0xdc9   :  { %v11011_v38 = vpop.f32.mrf.mxu1 }
 0xdca   :  { %v4938_v44 = vsel %vm12341_vm6, %v11011_v38, 0.0 }
 0xdcb   :  { %4939 = vadd.xlane.f32.xlu1 %v4938_v44 }
 0xdd1   :  { %v11015_v58 = vpop.f32.mrf.mxu1 }
 0xdd9   :  { %v11017_v56 = vpop.f32.mrf.mxu1 }
 0xde1   :  { %v11019_v33 = vpop.f32.mrf.mxu1 }
 0xde9   :  { %v5630_v8 = vpop.f32.mrf.mxu1 }
 0xdf1   :  { %v5633_v16 = vpop.f32.mrf.mxu1 }
 0xdf2   :  { %v7620_v36 = vpack.i.bf16 %v5630_v8, %v5633_v16 }
 0xdf9   :  { %v11021_v63 = vpop.f32.mrf.mxu1 }
 0xe01   :  { %v5639_v61 = vpop.f32.mrf.mxu1 }
 0xe02   :  { %v7610_v45 = vpack.i.bf16 %v11021_v63, %v5639_v61  ;;  %5772 = vrot.lane.b32.xlu1 %v5639_v61, %s7820_s2 }
 0xe04   :  { %7611 = vrot.lane.b32.xlu0 %v7610_v45, %s7818_s9 }
 0xe09   :  { %v11026_v62 = vpop.f32.mrf.mxu1 }
 0xe11   :  { %v11028_v28 = vpop.f32.mrf.mxu1 }
 0xe12   :  { %v7615_v22 = vpack.i.bf16 %v11026_v62, %v11028_v28 }
 0xe14   :  { %7616 = vrot.lane.b32.xlu2 %v7615_v22, %s7818_s9 }
 0xe19   :  { %v11033_v30 = vpop.f32.mrf.mxu1 }
 0xe1c   :  { %7621 = vrot.lane.b32.xlu2 %v7620_v36, %s7818_s9 }
 0xe21   :  { %v5651_v10 = vpop.f32.mrf.mxu1 }
 0xe22   :  { %v7625_v11 = vpack.i.bf16 %v11033_v30, %v5651_v10 }
 0xe24   :  { %7626 = vrot.lane.b32.xlu0 %v7625_v11, %s7818_s9 }
 0xe45   :  { %4927 = vadd.xlane.f32.xlu2 %v4926_v32 }
 0xe46   :  { %5654 = vxpose.xlu0.b32.start [1/8] (short) (narrow) %v5630_v8, 8 }
 0xe4d   :  { %4930 = vadd.xlane.f32.xlu2 %v4929_v7 }
 0xe4e   :  { %5655 = vxpose.xlu0.b32.cont [2/8] (short) (narrow) %v5633_v16, 8 }
 0xe56   :  { %5656 = vxpose.xlu0.b32.cont [3/8] (short) (narrow) %v11021_v63, 8 }
 0xe5e   :  { %5657 = vxpose.xlu0.b32.cont [4/8] (short) (narrow) %v5639_v61, 8 }
 0xe65   :  { %5766 = vrot.lane.b32.xlu2 %v5630_v8, %s7820_s2  ;;  %v11058_v8 = vpop.f32.mrf.mxu2 }
 0xe66   :  { %5658 = vxpose.xlu0.b32.cont [5/8] (short) (narrow) %v11026_v62, 8 }
 0xe6d   :  { %v11060_v61 = vpop.f32.mrf.mxu2 }
 0xe6e   :  { %5659 = vxpose.xlu0.b32.cont [6/8] (short) (narrow) %v11028_v28, 8  ;;  %v7617_v39 = vpop.permute.xlu2 %7616 }
 0xe6f   :  { %v7618_v52 = vunpack.i.l.bf16 %v7617_v39  ;;  %v7619_v37 = vunpack.i.h.bf16 %v7617_v39  ;;  %v4944_v39 = vsel %vm12347_vm11, %v11017_v56, 0.0 }
 0xe76   :  { %5660 = vxpose.xlu0.b32.cont [7/8] (short) (narrow) %v11033_v30, 8  ;;  %v7612_v0 = vpop.permute.xlu0 %7611  ;;  %v7622_v48 = vpop.permute.xlu2 %7621 }
 0xe77   :  { %v7613_v3 = vunpack.i.l.bf16 %v7612_v0  ;;  %v7614_v47 = vunpack.i.h.bf16 %v7612_v0  ;;  %v7623_v13 = vunpack.i.l.bf16 %v7622_v48  ;;  %v7624_v59 = vunpack.i.h.bf16 %v7622_v48 }
 0xe78   :  { %v4941_v0 = vsel %vm12346_vm3, %v11015_v58, 0.0 }
 0xe7e   :  { %5661 = vxpose.xlu0.b32.end [8/8] (short) (narrow) %v5651_v10, 8 }
 0xe8e   :  { %4933 = vadd.xlane.f32.xlu2 %v4932_v1 }
 0xe96   :  { %v7627_v57 = vpop.permute.xlu0 %7626 }
 0xe97   :  { %v7628_v60 = vunpack.i.l.bf16 %v7627_v57  ;;  %v7629_v17 = vunpack.i.h.bf16 %v7627_v57 }
 0xe99   :  { %5729 = vmatpush.msrb.mxu2 %v7628_v60 }
 0xe9b   :  { %5730 = vmatpush.msrb.mxu2 %v7629_v17 }
 0xe9d   :  { %5731 = vmatpush.msrb.mxu2 %v7618_v52 }
 0xe9f   :  { %5732 = vmatpush.msrb.mxu2 %v7619_v37 }
 0xea1   :  { %5733 = vmatpush.msrb.mxu2 %v7613_v3  ;;  %v4937_v3 = vpop.xlane.xlu1 %4936 }
 0xea3   :  { %5734 = vmatpush.msrb.mxu2 %v7614_v47 }
 0xea5   :  { %5735 = vmatpush.msrb.mxu2 %v7623_v13 }
 0xea7   :  { %5736 = vmatpush.msrb.mxu2 %v7624_v59 }
 0xea9   :  { %v4940_v59 = vpop.xlane.xlu1 %4939 }
 0xeb8   :  { %v4928_v40 = vpop.xlane.xlu2 %4927 }
 0xec0   :  { %v4931_v2 = vpop.xlane.xlu2 %4930 }
 0xec1   :  { %v4951_v19 = vmul.f32 %v4931_v2, %v10614_v20 }
 0xec3   :  { %v11053_v41 = vsub.f32 %v11003_v25, %v4951_v19  ;;  %v11067_v25 = vpop.f32.mrf.mxu2 }
 0xec5   :  { %v4967_v26 = vmul.f32 %v11053_v41, %v11053_v41 }
 0xec7   :  { %v4977_v44 = vsel %vm12345_vm8, %v4967_v26, 0.0  ;;  %vm12353_vm8 = vcmask 1043456  }
 0xec8   :  { %v11088_v57 = vpop.permute.xlu2 %5766  ;;  %vm12354_vm3 = vmmov %vm12353_vm8 }
 0xec9   :  { %vm12355_vm11 = vmmov %vm12354_vm3 }
 0xecb   :  { %v11069_v45 = vpop.f32.mrf.mxu2 }
 0xed3   :  { %v11071_v22 = vpop.f32.mrf.mxu2 }
 0xedb   :  { %v11073_v36 = vpop.f32.mrf.mxu2 }
 0xee3   :  { %v11075_v11 = vpop.f32.mrf.mxu2 }
 0xeea   :  { %v5670_v14 = vpop.trf.xlu0 }
 0xeeb   :  { %7516 = vmatmul.msk.f32.vlgmr.msrb.gmra.mxu2 %vm4102_vm10, %v5670_v14  ;;  %v11077_v32 = vpop.f32.mrf.mxu2 }
 0xeec   :  { %5768 = vrot.lane.b32.xlu0 %v5633_v16, %s7820_s2  ;;  %v7815_v16 = vld [vmem:[%s11917_s6] sm:$0xff] }
 0xf01   :  { %v4934_v60 = vpop.xlane.xlu2 %4933 }
 0xf16   :  { %4978 = vadd.xlane.f32.xlu0 %v4977_v44 }
 0xf2a   :  { %5780 = vrot.lane.b32.xlu0 %v5651_v10, %s7820_s2 }
 0xf32   :  { %5165 = vrot.lane.b32.xlu0 %v7815_v16, %s7818_s9 }
 0xf6e   :  { %v5738_v7 = vpop.f32.mrf.mxu2 }
 0xf6f   :  { %v5741_v10 = vmul.f32 0.00390625, %v5738_v7 }
 0xf71   :  { %v5742_v1 = vsel %vm4127_vm12, %v5741_v10, -inf }
 0xf72   :  { %5743 = vmax.xlane.f32.xlu2 %v5742_v1 }
 0xf8a   :  { %5770 = vrot.lane.b32.xlu2 %v11021_v63, %s7820_s2  ;;  %v4952_v63 = vmul.f32 %v4934_v60, %v10614_v20 }
 0xf8c   :  { %v11093_v13 = vsub.f32 %v11005_v27, %v4952_v63  ;;  %v5769_v63 = vpop.permute.xlu0 %5768 }
 0xf8e   :  { %v4968_v14 = vmul.f32 %v11093_v13, %v11093_v13 }
 0xf90   :  { %v4980_v19 = vsel %vm12348_vm15, %v4968_v14, 0.0  ;;  %vm12356_vm15 = vmmov %vm12336_vm0 }
 0xfb3   :  { %4942 = vadd.xlane.f32.xlu2 %v4941_v0 }
 0xfbb   :  { %4945 = vadd.xlane.f32.xlu2 %v4944_v39 }
 0xfd3   :  { %5776 = vrot.lane.b32.xlu2 %v11028_v28, %s7820_s2  ;;  %v4954_v28 = vmul.f32 %v4940_v59, %v10614_v20 }
 0xfd5   :  { %v11099_v2 = vsub.f32 %v11011_v38, %v4954_v28 }
 0xfd7   :  { %v4970_v26 = vmul.f32 %v11099_v2, %v11099_v2 }
 0xfd9   :  { %v4986_v44 = vsel %vm12336_vm0, %v4970_v26, 0.0  ;;  %vm12357_vm0 = vmmov %vm12354_vm3 }
 0xfe5   :  { %v5744_v17 = vpop.xlane.xlu2 %5743 }
 0xfe6   :  { %v5745_v52 = vsub.f32 %v5741_v10, %v5744_v17  ;;  %v4950_v10 = vmul.f32 %v4928_v40, %v10614_v20 }
 0xfe8   :  { %v5746_v37 = vmul.f32 1.442695, %v5745_v52  ;;  %v11115_v0 = vsub.f32 %v11001_v6, %v4950_v10  ;;  %v4953_v10 = vmul.f32 %v4937_v3, %v10614_v20 }
 0xfea   :  { %7692 = vpow2.f32 %v5746_v37  ;;  %v4966_v17 = vmul.f32 %v11115_v0, %v11115_v0  ;;  %v4947_v37 = vsel %vm12352_vm2, %v11019_v33, 0.0 }
 0xfec   :  { %v4974_v52 = vsel %vm12350_vm13, %v4966_v17, 0.0  ;;  %v11140_v17 = vsub.f32 %v11007_v18, %v4953_v10  ;;  %vm12359_vm13 = vmmov %vm12352_vm2 }
 0xfed   :  { %v5771_v27 = vpop.permute.xlu2 %5770 }
 0xfee   :  { %v4969_v3 = vmul.f32 %v11140_v17, %v11140_v17 }
 0xff0   :  { %v7693_v48 = vpop.eup %7692 }
 0xff1   :  { %v5748_v47 = vsel %vm4127_vm12, %v7693_v48, 0.0 }
 0xff2   :  { %5749 = vadd.xlane.f32.xlu1 %v5748_v47  ;;  %v5773_v47 = vpop.permute.xlu1 %5772 }
 0xffc   :  { %4981 = vadd.xlane.f32.xlu2 %v4980_v19 }
0x1004   :  { %4987 = vadd.xlane.f32.xlu2 %v4986_v44 }
0x100b   :  { %5774 = vrot.lane.b32.xlu1 %v11026_v62, %s7820_s2 }
0x1026   :  { %v4943_v16 = vpop.xlane.xlu2 %4942 }
0x1027   :  { %v4955_v7 = vmul.f32 %v4943_v16, %v10614_v20 }
0x1029   :  { %v11110_v38 = vsub.f32 %v11015_v58, %v4955_v7 }
0x102b   :  { %v4971_v1 = vmul.f32 %v11110_v38, %v11110_v38 }
0x102d   :  { %v4989_v39 = vsel %vm12349_vm7, %v4971_v1, 0.0  ;;  %vm12358_vm7 = vmmov %vm12352_vm2 }
0x102e   :  { %4990 = vadd.xlane.f32.xlu0 %v4989_v39  ;;  %v4946_v60 = vpop.xlane.xlu2 %4945 }
0x102f   :  { %v4956_v62 = vmul.f32 %v4946_v60, %v10614_v20 }
0x1031   :  { %v11122_v40 = vsub.f32 %v11017_v56, %v4956_v62  ;;  %v4979_v56 = vpop.xlane.xlu0 %4978 }
0x1032   :  { %v4999_v18 = vmul.f32 %v4979_v56, %v10614_v20 }
0x1033   :  { %v4972_v58 = vmul.f32 %v11122_v40, %v11122_v40 }
0x1035   :  { %4975 = vadd.xlane.f32.xlu1 %v4974_v52  ;;  %v4992_v6 = vsel %vm12351_vm4, %v4972_v58, 0.0  ;;  %v4983_v52 = vsel %vm12359_vm13, %v4969_v3, 0.0  ;;  %vm12360_vm4 = vmmov %vm12352_vm2 }
0x1036   :  { %4993 = vadd.xlane.f32.xlu2 %v4992_v6 }
0x1039   :  { %v11132_v14 = vpop.permute.xlu0 %5780 }
0x103d   :  { %4948 = vadd.xlane.f32.xlu1 %v4947_v37 }
0x1041   :  { %v5166_v39 = vpop.permute.xlu0 %5165 }
0x1042   :  { %7489 = vmatpush.msk.msrb.mxu0 %vm12353_vm8, %v5166_v39  ;;  %7572 = vmatpush.msk.msrb.mxu3 %vm12354_vm3, %v5166_v39 }
0x1044   :  { %7526 = vmatpush.msk.msra.mxu0 %vm12355_vm11, %v10530_v55  ;;  %v5777_v55 = vpop.permute.xlu2 %5776 }
0x1056   :  { %5778 = vrot.lane.b32.xlu1 %v11033_v30, %s7820_s2 }
0x1065   :  { %v5750_v59 = vpop.xlane.xlu1 %5749 }
0x1066   :  { %7694 = vrcp.f32 %v5750_v59  ;;  %v5762_v44 = vand.u32 2147483648, %v5750_v59  ;;  %v5760_v7 = vand.u32 2147483647, %v5750_v59  ;;  %vm5756_vm5 = vweird.f32 %v5750_v59 }
0x1068   :  { %v5763_v30 = vor.u32 1.1754944e-38, %v5762_v44  ;;  %vm5761_vm14 = vcmp.eq.f32.partialorder %v5760_v7, 8.507059e+37 }
0x106c   :  { %v7695_v28 = vpop.eup %7694 }
0x106d   :  { %v5752_v19 = vmul.f32 %v7695_v28, %v5750_v59  ;;  %vm5757_vm6 = vweird.f32 %v7695_v28 }
0x106e   :  { %vm5758_vm9 = vmor %vm5756_vm5, %vm5757_vm6 }
0x106f   :  { %v5753_v26 = vsub.f32 1.0, %v5752_v19  ;;  %vm12361_vm6 = vmmov %vm12352_vm2  ;;  %v4982_v6 = vpop.xlane.xlu2 %4981 }
0x1070   :  { %vm12362_vm5 = vmmov %vm12352_vm2 }
0x1071   :  { %v5754_v16 = vmul.f32 %v7695_v28, %v5753_v26 }
0x1073   :  { %v5755_v1 = vadd.f32 %v7695_v28, %v5754_v16 }
0x1075   :  { %v5759_v60 = vsel %vm5758_vm9, %v7695_v28, %v5755_v1  ;;  %vm12363_vm9 = vmmov %vm12352_vm2 }
0x1076   :  { %v5764_v62 = vsel %vm5761_vm14, %v5763_v30, %v5759_v60  ;;  %vm12364_vm14 = vmmov %vm12352_vm2 }
0x1077   :  { %v5765_v58 = vmul.f32 %v7693_v48, %v5764_v62 }
0x1079   :  { %7517 = vmatpush.xpose.msk.msra.mxu2 %vm12356_vm15, %v5765_v58 }
0x107c   :  { %7518 = vmatmul.msk.f32.vlgmr.msra.gmra.mxu2 %vm12358_vm7, %v11088_v57  ;;  %v5000_v57 = vmul.f32 %v4982_v6, %v10614_v20 }
0x107d   :  { %7554 = vmatpush.msk.msrb.mxu2 %vm12357_vm0, %v10871_v4  ;;  %v5775_v48 = vpop.permute.xlu1 %5774  ;;  %v5007_v4 = vadd.f32 1e-05, %v4999_v18 }
0x107e   :  { %v5008_v37 = vadd.f32 1e-05, %v5000_v57  ;;  %v7816_v57 = vld [vmem:[%s11918_s7] sm:$0x3f] }
0x107f   :  { %7696 = vrsqrt.f32 %v5007_v4  ;;  %vm5030_vm0 = vweird.f32 %v5007_v4 }
0x1080   :  { %4984 = vadd.xlane.f32.xlu1 %v4983_v52  ;;  %7698 = vrsqrt.f32 %v5008_v37 }
0x1084   :  { %7519 = vmatmul.msk.f32.gmra.mxu2 %vm12360_vm4, %v5769_v63  ;;  %vm12365_vm4 = vmmov %vm12352_vm2 }
0x1085   :  { %v7697_v63 = vpop.eup %7696 }
0x1086   :  { %v5025_v28 = vmul.f32 %v7697_v63, %v5007_v4  ;;  %v7699_v26 = vpop.eup %7698  ;;  %vm5031_vm3 = vweird.f32 %v7697_v63 }
0x1087   :  { %v5035_v1 = vmul.f32 %v7699_v26, %v5008_v37  ;;  %vm5032_vm7 = vmor %vm5030_vm0, %vm5031_vm3  ;;  %vm5041_vm13 = vweird.f32 %v7699_v26 }
0x1088   :  { %v5026_v56 = vmul.f32 %v7697_v63, %v5025_v28  ;;  %vm12370_vm3 = vmmov %vm12365_vm4 }
0x1089   :  { %v5036_v3 = vmul.f32 %v7699_v26, %v5035_v1 }
0x108a   :  { %v5027_v10 = vmul.f32 0.5, %v5026_v56 }
0x108c   :  { %7520 = vmatmul.msk.f32.gmra.mxu2 %vm12352_vm2, %v5771_v27  ;;  %v5028_v58 = vsub.f32 1.5, %v5027_v10  ;;  %vm5040_vm2 = vweird.f32 %v5008_v37  ;;  %v4988_v37 = vpop.xlane.xlu2 %4987 }
0x108e   :  { %v5029_v18 = vmul.f32 %v7697_v63, %v5028_v58 }
0x1090   :  { %v5033_v28 = vsel %vm5032_vm7, %v7697_v63, %v5029_v18 }
0x1094   :  { %7521 = vmatmul.msk.f32.gmra.mxu2 %vm12361_vm6, %v5773_v47  ;;  %vm12366_vm6 = vcmask 1043456  }
0x109c   :  { %7522 = vmatmul.msk.f32.gmra.mxu2 %vm12362_vm5, %v5775_v48  ;;  %v5037_v48 = vmul.f32 0.5, %v5036_v3  ;;  %vm5042_vm5 = vmor %vm5040_vm2, %vm5041_vm13 }
0x109e   :  { %v5038_v56 = vsub.f32 1.5, %v5037_v48 }
0x10a4   :  { %7523 = vmatmul.msk.f32.gmra.mxu2 %vm12363_vm9, %v5777_v55  ;;  %vm12367_vm9 = vmmov %vm12365_vm4 }
0x10a8   :  { %v4976_v59 = vpop.xlane.xlu1 %4975 }
0x10a9   :  { %v4998_v27 = vmul.f32 %v4976_v59, %v10614_v20  ;;  %v11168_v59 = vperm.slane %v7816_v57, 0  ;;  %v4994_v3 = vpop.xlane.xlu2 %4993 }
0x10ab   :  { %v5006_v47 = vadd.f32 1e-05, %v4998_v27 }
0x10ad   :  { %7700 = vrsqrt.f32 %v5006_v47  ;;  %vm5020_vm11 = vweird.f32 %v5006_v47 }
0x10b0   :  { %v4949_v19 = vpop.xlane.xlu1 %4948 }
0x10b1   :  { %v4957_v44 = vmul.f32 %v4949_v19, %v10614_v20  ;;  %v11171_v19 = vperm.slane %v7816_v57, 1 }
0x10b3   :  { %v7701_v16 = vpop.eup %7700  ;;  %v11160_v7 = vsub.f32 %v11019_v33, %v4957_v44 }
0x10b4   :  { %v5015_v30 = vmul.f32 %v7701_v16, %v5006_v47  ;;  %vm5021_vm8 = vweird.f32 %v7701_v16  ;;  %v5095_v47 = vmul.f32 %v5033_v28, %v11053_v41 }
0x10b5   :  { %v4973_v39 = vmul.f32 %v11160_v7, %v11160_v7  ;;  %vm5022_vm15 = vmor %vm5020_vm11, %vm5021_vm8 }
0x10b6   :  { %v5016_v60 = vmul.f32 %v7701_v16, %v5015_v30  ;;  %vm12369_vm8 = vmmov %vm12365_vm4 }
0x10b7   :  { %v4995_v62 = vsel %vm12364_vm14, %v4973_v39, 0.0  ;;  %vm12368_vm14 = vmmov %vm12365_vm4 }
0x10b8   :  { %v5017_v52 = vmul.f32 0.5, %v5016_v60  ;;  %4996 = vadd.xlane.f32.xlu2 %v4995_v62  ;;  %v4991_v60 = vpop.xlane.xlu0 %4990 }
0x10ba   :  { %v5018_v55 = vsub.f32 1.5, %v5017_v52 }
0x10bc   :  { %v5019_v33 = vmul.f32 %v7701_v16, %v5018_v55 }
0x10be   :  { %v5023_v6 = vsel %vm5022_vm15, %v7701_v16, %v5019_v33  ;;  %v5039_v16 = vmul.f32 %v7699_v26, %v5038_v56 }
0x10bf   :  { %v5094_v27 = vmul.f32 %v5023_v6, %v11115_v0  ;;  %v5104_v0 = vmul.f32 %v11168_v59, %v5095_v47 }
0x10c0   :  { %v5043_v63 = vsel %vm5042_vm5, %v7699_v26, %v5039_v16  ;;  %v5002_v26 = vmul.f32 %v4988_v37, %v10614_v20 }
0x10c1   :  { %v5103_v44 = vmul.f32 %v11168_v59, %v5094_v27  ;;  %v5096_v1 = vmul.f32 %v5043_v63, %v11093_v13  ;;  %v5113_v41 = vadd.f32 %v11171_v19, %v5104_v0  ;;  %v5003_v13 = vmul.f32 %v4991_v60, %v10614_v20 }
0x10c2   :  { %v5010_v39 = vadd.f32 1e-05, %v5002_v26 }
0x10c3   :  { %v5112_v4 = vadd.f32 %v11171_v19, %v5103_v44  ;;  %v5105_v30 = vmul.f32 %v11168_v59, %v5096_v1  ;;  %v5011_v62 = vadd.f32 1e-05, %v5003_v13 }
0x10c4   :  { %7702 = vrsqrt.f32 %v5010_v39  ;;  %vm5060_vm13 = vweird.f32 %v5010_v39 }
0x10c5   :  { %7490 = vmatmul.msk.f32.vlgmr.msrb.gmra.mxu0 %vm12365_vm4, %v5112_v4  ;;  %7704 = vrsqrt.f32 %v5011_v62  ;;  %vm5070_vm5 = vweird.f32 %v5011_v62 }
0x10c6   :  { %7563 = vmatpush.msk.msrb.mxu0 %vm12366_vm6, %v10891_v21  ;;  %v5114_v21 = vadd.f32 %v11171_v19, %v5105_v30  ;;  %vm12371_vm6 = vmmov %vm12370_vm3 }
0x10c8   :  { %v5779_v10 = vpop.permute.xlu1 %5778 }
0x10c9   :  { %7524 = vmatmul.msk.f32.gmra.mxu2 %vm12367_vm9, %v5779_v10 }
0x10ca   :  { %v7703_v58 = vpop.eup %7702 }
0x10cb   :  { %v5055_v18 = vmul.f32 %v7703_v58, %v5010_v39  ;;  %v7705_v57 = vpop.eup %7704  ;;  %vm5061_vm15 = vweird.f32 %v7703_v58 }
0x10cc   :  { %v5065_v56 = vmul.f32 %v7705_v57, %v5011_v62  ;;  %vm5062_vm4 = vmor %vm5060_vm13, %vm5061_vm15  ;;  %vm5071_vm2 = vweird.f32 %v7705_v57 }
0x10cd   :  { %7491 = vmatmul.msk.f32.gmra.mxu0 %vm12368_vm14, %v5113_v41  ;;  %v5056_v33 = vmul.f32 %v7703_v58, %v5055_v18  ;;  %vm5072_vm9 = vmor %vm5070_vm5, %vm5071_vm2 }
0x10ce   :  { %v5066_v16 = vmul.f32 %v7705_v57, %v5065_v56  ;;  %vm12373_vm15 = vmmov %vm12371_vm6 }
0x10cf   :  { %v5057_v28 = vmul.f32 0.5, %v5056_v33 }
0x10d0   :  { %v5067_v41 = vmul.f32 0.5, %v5066_v16 }
0x10d1   :  { %7525 = vmatmul.msk.f32.gmra.mxu2 %vm12369_vm8, %v11132_v14  ;;  %v5004_v14 = vmul.f32 %v4994_v3, %v10614_v20  ;;  %v5058_v4 = vsub.f32 1.5, %v5057_v28  ;;  %vm12372_vm8 = vmmov %vm12370_vm3 }
0x10d2   :  { %v5068_v13 = vsub.f32 1.5, %v5067_v41 }
0x10d3   :  { %v5012_v6 = vadd.f32 1e-05, %v5004_v14  ;;  %v5059_v1 = vmul.f32 %v7703_v58, %v5058_v4 }
0x10d4   :  { %v5069_v14 = vmul.f32 %v7705_v57, %v5068_v13 }
0x10d5   :  { %7492 = vmatmul.msk.f32.gmra.mxu0 %vm12370_vm3, %v5114_v21  ;;  %v5063_v60 = vsel %vm5062_vm4, %v7703_v58, %v5059_v1  ;;  %vm5080_vm3 = vweird.f32 %v5012_v6 }
0x10f3   :  { %v4985_v52 = vpop.xlane.xlu1 %4984 }
0x10f4   :  { %v5001_v55 = vmul.f32 %v4985_v52, %v10614_v20 }
0x10f6   :  { %v5009_v48 = vadd.f32 1e-05, %v5001_v55  ;;  %v5098_v55 = vmul.f32 %v5063_v60, %v11099_v2 }
0x10f8   :  { %7706 = vrsqrt.f32 %v5009_v48  ;;  %vm5050_vm0 = vweird.f32 %v5009_v48  ;;  %v5107_v39 = vmul.f32 %v11168_v59, %v5098_v55 }
0x10f9   :  { %7708 = vrsqrt.f32 %v5012_v6 }
0x10fe   :  { %v7707_v27 = vpop.eup %7706 }
0x10ff   :  { %v5045_v44 = vmul.f32 %v7707_v27, %v5009_v48  ;;  %v7709_v63 = vpop.eup %7708  ;;  %vm5051_vm11 = vweird.f32 %v7707_v27  ;;  %v5073_v48 = vsel %vm5072_vm9, %v7705_v57, %v5069_v14 }
0x1100   :  { %v5075_v30 = vmul.f32 %v7709_v63, %v5012_v6  ;;  %vm5052_vm7 = vmor %vm5050_vm0, %vm5051_vm11  ;;  %v5099_v58 = vmul.f32 %v5073_v48, %v11110_v38  ;;  %vm5081_vm14 = vweird.f32 %v7709_v63 }
0x1101   :  { %v5046_v47 = vmul.f32 %v7707_v27, %v5045_v44  ;;  %vm5082_vm11 = vmor %vm5080_vm3, %vm5081_vm14 }
0x1102   :  { %v5076_v3 = vmul.f32 %v7709_v63, %v5075_v30  ;;  %v5108_v2 = vmul.f32 %v11168_v59, %v5099_v58  ;;  %vm12374_vm0 = vmmov %vm12371_vm6 }
0x1103   :  { %v5047_v0 = vmul.f32 0.5, %v5046_v47  ;;  %vm12375_vm2 = vmmov %vm12374_vm0 }
0x1104   :  { %v5077_v33 = vmul.f32 0.5, %v5076_v3  ;;  %v5117_v44 = vadd.f32 %v11171_v19, %v5108_v2  ;;  %vm12377_vm5 = vmmov %vm12374_vm0 }
0x1105   :  { %v5048_v10 = vsub.f32 1.5, %v5047_v0  ;;  %vm12378_vm9 = vmmov %vm12374_vm0 }
0x1106   :  { %vm12379_vm14 = vmmov %vm12374_vm0 }
0x1107   :  { %v5049_v21 = vmul.f32 %v7707_v27, %v5048_v10  ;;  %vm12381_vm3 = vmmov %vm12374_vm0 }
0x1109   :  { %v5053_v37 = vsel %vm5052_vm7, %v7707_v27, %v5049_v21  ;;  %v5116_v27 = vadd.f32 %v11171_v19, %v5107_v39  ;;  %v5818_v21 = vpop.f32.mrf.mxu2 }
0x110a   :  { %v5097_v26 = vmul.f32 %v5053_v37, %v11140_v17  ;;  %v5078_v17 = vsub.f32 1.5, %v5077_v33 }
0x110c   :  { %v5106_v52 = vmul.f32 %v11168_v59, %v5097_v26  ;;  %v5079_v28 = vmul.f32 %v7709_v63, %v5078_v17 }
0x110e   :  { %v5115_v18 = vadd.f32 %v11171_v19, %v5106_v52  ;;  %v5083_v56 = vsel %vm5082_vm11, %v7709_v63, %v5079_v28  ;;  %vm12382_vm11 = vmmov %vm12374_vm0 }
0x110f   :  { %v5100_v62 = vmul.f32 %v5083_v56, %v11122_v40 }
0x1110   :  { %7493 = vmatmul.msk.f32.gmra.mxu0 %vm12371_vm6, %v5115_v18  ;;  %vm12376_vm6 = vmmov %vm12374_vm0 }
0x1111   :  { %v5109_v57 = vmul.f32 %v11168_v59, %v5100_v62  ;;  %v5821_v60 = vpop.f32.mrf.mxu2 }
0x1113   :  { %v5118_v38 = vadd.f32 %v11171_v19, %v5109_v57 }
0x1118   :  { %7494 = vmatmul.msk.f32.gmra.mxu0 %vm12372_vm8, %v5116_v27  ;;  %vm12380_vm8 = vmmov %vm12374_vm0 }
0x1119   :  { %v5824_v13 = vpop.f32.mrf.mxu2 }
0x1120   :  { %7495 = vmatmul.msk.f32.gmra.mxu0 %vm12373_vm15, %v5117_v44  ;;  %vm12383_vm15 = vmmov %vm12374_vm0 }
0x1121   :  { %v5827_v3 = vpop.f32.mrf.mxu2 }
0x1128   :  { %7496 = vmatmul.msk.f32.gmra.mxu0 %vm12374_vm0, %v5118_v38 }
0x1129   :  { %v5830_v52 = vpop.f32.mrf.mxu2 }
0x112b   :  { %v4997_v47 = vpop.xlane.xlu2 %4996 }
0x112c   :  { %v5005_v4 = vmul.f32 %v4997_v47, %v10614_v20 }
0x112e   :  { %v5013_v6 = vadd.f32 1e-05, %v5005_v4 }
0x1130   :  { %7710 = vrsqrt.f32 %v5013_v6  ;;  %vm5090_vm13 = vweird.f32 %v5013_v6 }
0x1131   :  { %v5833_v55 = vpop.f32.mrf.mxu2 }
0x1136   :  { %v7711_v16 = vpop.eup %7710 }
0x1137   :  { %v5085_v0 = vmul.f32 %v7711_v16, %v5013_v6  ;;  %vm5091_vm7 = vweird.f32 %v7711_v16 }
0x1138   :  { %vm5092_vm4 = vmor %vm5090_vm13, %vm5091_vm7 }
0x1139   :  { %v5086_v63 = vmul.f32 %v7711_v16, %v5085_v0  ;;  %vm12384_vm7 = vmmov %vm12374_vm0 }
0x113a   :  { %vm12385_vm13 = vmmov %vm12374_vm0 }
0x113b   :  { %v5087_v10 = vmul.f32 0.5, %v5086_v63 }
0x113d   :  { %v5088_v40 = vsub.f32 1.5, %v5087_v10 }
0x113f   :  { %v5089_v1 = vmul.f32 %v7711_v16, %v5088_v40 }
0x1141   :  { %v5093_v41 = vsel %vm5092_vm4, %v7711_v16, %v5089_v1  ;;  %vm12386_vm4 = vmmov %vm12374_vm0 }
0x1142   :  { %v5101_v30 = vmul.f32 %v5093_v41, %v11160_v7  ;;  %v11218_v7 = vpop.f32.mrf.mxu3  ;;  %v11227_v39 = vpop.f32.mrf.mxu0 }
0x1144   :  { %v5110_v37 = vmul.f32 %v11168_v59, %v5101_v30 }
0x1146   :  { %v5119_v26 = vadd.f32 %v11171_v19, %v5110_v37 }
0x1148   :  { %7497 = vmatmul.msk.f32.gmra.mxu0 %vm12375_vm2, %v5119_v26  ;;  %vm12387_vm2 = vmmov %vm12374_vm0 }
0x114a   :  { %v11222_v18 = vpop.f32.mrf.mxu3  ;;  %v11232_v58 = vpop.f32.mrf.mxu0 }
0x114c   :  { %v5836_v14 = vpop.f32.mrf.mxu2 }
0x1150   :  { %7527 = vmatmul.msk.f32.vlgmr.msra.gmra.mxu0 %vm12376_vm6, %v5818_v21  ;;  %vm12388_vm6 = vmmov %vm12374_vm0 }
0x1152   :  { %v11225_v33 = vpop.f32.mrf.mxu3  ;;  %v11236_v28 = vpop.f32.mrf.mxu0 }
0x1154   :  { %v5839_v48 = vpop.f32.mrf.mxu2 }
0x1158   :  { %7528 = vmatmul.msk.f32.gmra.mxu0 %vm12377_vm5, %v5821_v60  ;;  %vm12389_vm5 = vmmov %vm12374_vm0 }
0x115a   :  { %v11230_v17 = vpop.f32.mrf.mxu3 }
0x1160   :  { %7529 = vmatmul.msk.f32.gmra.mxu0 %vm12378_vm9, %v5824_v13  ;;  %vm12390_vm9 = vmmov %vm12374_vm0 }
0x1162   :  { %v11234_v27 = vpop.f32.mrf.mxu3 }
0x1168   :  { %7530 = vmatmul.msk.f32.gmra.mxu0 %vm12379_vm14, %v5827_v3  ;;  %vm12391_vm14 = vmmov %vm12374_vm0 }
0x116a   :  { %v11240_v56 = vpop.f32.mrf.mxu3 }
0x1170   :  { %7531 = vmatmul.msk.f32.gmra.mxu0 %vm12380_vm8, %v5830_v52  ;;  %vm12392_vm8 = vmmov %vm12374_vm0 }
0x1172   :  { %v11244_v44 = vpop.f32.mrf.mxu3 }
0x1178   :  { %7532 = vmatmul.msk.f32.gmra.mxu0 %vm12381_vm3, %v5833_v55  ;;  %vm12393_vm3 = vmmov %vm12374_vm0 }
0x117a   :  { %v11248_v38 = vpop.f32.mrf.mxu3 }
0x1180   :  { %7533 = vmatmul.msk.f32.gmra.mxu0 %vm12382_vm11, %v5836_v14  ;;  %vm12394_vm11 = vmmov %vm12374_vm0 }
0x1182   :  { %v5924_v4 = vpop.f32.mrf.mxu3 }
0x1188   :  { %7534 = vmatmul.msk.f32.gmra.mxu0 %vm12383_vm15, %v5839_v48  ;;  %vm12395_vm15 = vmmov %vm12374_vm0 }
0x118a   :  { %v5927_v16 = vpop.f32.mrf.mxu3 }
0x118d   :  { %v11238_v2 = vpop.f32.mrf.mxu0 }
0x1192   :  { %v5930_v10 = vpop.f32.mrf.mxu3 }
0x1195   :  { %v11242_v62 = vpop.f32.mrf.mxu0 }
0x119a   :  { %v5933_v41 = vpop.f32.mrf.mxu3 }
0x119d   :  { %v11246_v57 = vpop.f32.mrf.mxu0 }
0x11a2   :  { %v5936_v37 = vpop.f32.mrf.mxu3 }
0x11a5   :  { %v11250_v47 = vpop.f32.mrf.mxu0 }
0x11aa   :  { %v5939_v3 = vpop.f32.mrf.mxu3 }
0x11b2   :  { %v5942_v48 = vpop.f32.mrf.mxu3 }
0x11ba   :  { %v5945_v23 = vpop.f32.mrf.mxu3 }
0x11c5   :  { %v11252_v6 = vpop.f32.mrf.mxu0 }
0x11cd   :  { %v5883_v0 = vpop.f32.mrf.mxu0 }
0x11ce   :  { %v11254_v63 = vadd.f32 %v5924_v4, %v5883_v0 }
0x11d5   :  { %v5886_v40 = vpop.f32.mrf.mxu0 }
0x11d6   :  { %v11256_v1 = vadd.f32 %v5927_v16, %v5886_v40 }
0x11dd   :  { %v5889_v30 = vpop.f32.mrf.mxu0 }
0x11de   :  { %v5931_v40 = vadd.f32 %v5930_v10, %v5889_v30  ;;  %v5951_v10 = vsel %vm12390_vm9, %v11256_v1, 0.0 }
0x11e5   :  { %v5892_v21 = vpop.f32.mrf.mxu0 }
0x11ed   :  { %v5895_v26 = vpop.f32.mrf.mxu0 }
0x11ee   :  { %v5937_v60 = vadd.f32 %v5936_v37, %v5895_v26  ;;  %v5954_v37 = vsel %vm12386_vm4, %v5931_v40, 0.0 }
0x11f0   :  { %v5960_v13 = vsel %vm12374_vm0, %v5937_v60, 0.0 }
0x11f1   :  { %5961 = vadd.xlane.f32.xlu2 %v5960_v13  ;;  %v5934_v13 = vadd.f32 %v5933_v41, %v5892_v21 }
0x11f5   :  { %v5898_v52 = vpop.f32.mrf.mxu0 }
0x11f6   :  { %v5940_v55 = vadd.f32 %v5939_v3, %v5898_v52  ;;  %v5948_v3 = vsel %vm12388_vm6, %v11254_v63, 0.0  ;;  %v5957_v52 = vsel %vm12389_vm5, %v5934_v13, 0.0 }
0x11f8   :  { %v5963_v14 = vsel %vm12384_vm7, %v5940_v55, 0.0  ;;  %vm12396_vm7 = vmmov %vm12374_vm0 }
0x11f9   :  { %5964 = vadd.xlane.f32.xlu1 %v5963_v14 }
0x11fd   :  { %v5901_v4 = vpop.f32.mrf.mxu0 }
0x11fe   :  { %v5943_v0 = vadd.f32 %v5942_v48, %v5901_v4 }
0x1200   :  { %v5966_v16 = vsel %vm12385_vm13, %v5943_v0, 0.0  ;;  %vm12397_vm13 = vmmov %vm12374_vm0 }
0x1201   :  { %5967 = vadd.xlane.f32.xlu2 %v5966_v16 }
0x1205   :  { %v5904_v34 = vpop.f32.mrf.mxu0 }
0x1206   :  { %v5946_v15 = vadd.f32 %v5945_v23, %v5904_v34 }
0x1208   :  { %v5969_v26 = vsel %vm12387_vm2, %v5946_v15, 0.0 }
0x1209   :  { %5955 = vadd.xlane.f32.xlu2 %v5954_v37  ;;  %5970 = vadd.xlane.f32.xlu1 %v5969_v26 }
0x1211   :  { %5949 = vadd.xlane.f32.xlu2 %v5948_v3  ;;  %5958 = vadd.xlane.f32.xlu1 %v5957_v52 }
0x1219   :  { %5952 = vadd.xlane.f32.xlu1 %v5951_v10 }
0x1264   :  { %v5962_v30 = vpop.xlane.xlu2 %5961 }
0x126c   :  { %v5965_v23 = vpop.xlane.xlu1 %5964 }
0x126d   :  { %v5977_v34 = vmul.f32 %v5965_v23, %v10614_v20  ;;  %v5976_v23 = vmul.f32 %v5962_v30, %v10614_v20 }
0x126f   :  { %v11269_v14 = vsub.f32 %v5940_v55, %v5977_v34 }
0x1271   :  { %v5993_v41 = vmul.f32 %v11269_v14, %v11269_v14 }
0x1273   :  { %v6011_v21 = vsel %vm12391_vm14, %v5993_v41, 0.0 }
0x1274   :  { %6012 = vadd.xlane.f32.xlu2 %v6011_v21  ;;  %v5968_v48 = vpop.xlane.xlu2 %5967 }
0x1275   :  { %v5978_v4 = vmul.f32 %v5968_v48, %v10614_v20  ;;  %v11291_v48 = vsub.f32 %v5937_v60, %v5976_v23 }
0x1277   :  { %v11275_v16 = vsub.f32 %v5943_v0, %v5978_v4 }
0x1279   :  { %v5994_v37 = vmul.f32 %v11275_v16, %v11275_v16 }
0x127b   :  { %v6014_v26 = vsel %vm12392_vm8, %v5994_v37, 0.0 }
0x127c   :  { %v5956_v3 = vpop.xlane.xlu2 %5955  ;;  %6015 = vadd.xlane.f32.xlu1 %v6014_v26  ;;  %v5971_v55 = vpop.xlane.xlu1 %5970 }
0x127d   :  { %v5974_v52 = vmul.f32 %v5956_v3, %v10614_v20  ;;  %v5979_v10 = vmul.f32 %v5971_v55, %v10614_v20  ;;  %v5992_v55 = vmul.f32 %v11291_v48, %v11291_v48 }
0x127f   :  { %v11283_v34 = vsub.f32 %v5931_v40, %v5974_v52  ;;  %v11285_v41 = vsub.f32 %v5946_v15, %v5979_v10  ;;  %v6008_v10 = vsel %vm12395_vm15, %v5992_v55, 0.0 }
0x1281   :  { %v5990_v0 = vmul.f32 %v11283_v34, %v11283_v34  ;;  %v5995_v21 = vmul.f32 %v11285_v41, %v11285_v41 }
0x1283   :  { %v6002_v4 = vsel %vm12393_vm3, %v5990_v0, 0.0  ;;  %v6017_v37 = vsel %vm12394_vm11, %v5995_v21, 0.0 }
0x1284   :  { %6003 = vadd.xlane.f32.xlu2 %v6002_v4  ;;  %v5950_v26 = vpop.xlane.xlu2 %5949  ;;  %6018 = vadd.xlane.f32.xlu0 %v6017_v37  ;;  %v5959_v30 = vpop.xlane.xlu1 %5958 }
0x1285   :  { %v5975_v40 = vmul.f32 %v5959_v30, %v10614_v20  ;;  %v5972_v15 = vmul.f32 %v5950_v26, %v10614_v20 }
0x1287   :  { %v11297_v3 = vsub.f32 %v5934_v13, %v5975_v40  ;;  %v11304_v52 = vsub.f32 %v11254_v63, %v5972_v15 }
0x1289   :  { %v5991_v60 = vmul.f32 %v11297_v3, %v11297_v3  ;;  %v5988_v4 = vmul.f32 %v11304_v52, %v11304_v52 }
0x128b   :  { %v6005_v23 = vsel %vm12374_vm0, %v5991_v60, 0.0  ;;  %v5996_v63 = vsel %vm12396_vm7, %v5988_v4, 0.0 }
0x128c   :  { %6009 = vadd.xlane.f32.xlu0 %v6008_v10  ;;  %6006 = vadd.xlane.f32.xlu1 %v6005_v23  ;;  %v5953_v0 = vpop.xlane.xlu1 %5952 }
0x128d   :  { %v5973_v21 = vmul.f32 %v5953_v0, %v10614_v20 }
0x128f   :  { %v11310_v13 = vsub.f32 %v11256_v1, %v5973_v21 }
0x1291   :  { %v5989_v37 = vmul.f32 %v11310_v13, %v11310_v13 }
0x1293   :  { %v5999_v26 = vsel %vm12397_vm13, %v5989_v37, 0.0 }
0x1294   :  { %5997 = vadd.xlane.f32.xlu1 %v5996_v63  ;;  %6000 = vadd.xlane.f32.xlu0 %v5999_v26 }
0x12ad   :  { %6140 = vxpose.xlu2.b32.start [1/8] (short) (narrow) %v11218_v7, 8 }
0x12b5   :  { %6141 = vxpose.xlu2.b32.cont [2/8] (short) (narrow) %v11222_v18, 8 }
0x12bd   :  { %6142 = vxpose.xlu2.b32.cont [3/8] (short) (narrow) %v11225_v33, 8 }
0x12c5   :  { %6143 = vxpose.xlu2.b32.cont [4/8] (short) (narrow) %v11230_v17, 8 }
0x12cd   :  { %6144 = vxpose.xlu2.b32.cont [5/8] (short) (narrow) %v11234_v27, 8 }
0x12d5   :  { %6145 = vxpose.xlu2.b32.cont [6/8] (short) (narrow) %v11240_v56, 8 }
0x12dd   :  { %6146 = vxpose.xlu2.b32.cont [7/8] (short) (narrow) %v11244_v44, 8 }
0x12e5   :  { %6147 = vxpose.xlu2.b32.end [8/8] (short) (narrow) %v11248_v38, 8 }
0x12e7   :  { %v6013_v1 = vpop.xlane.xlu2 %6012 }
0x12e8   :  { %v6025_v30 = vmul.f32 %v6013_v1, %v10614_v20 }
0x12ea   :  { %v6033_v40 = vadd.f32 1e-05, %v6025_v30 }
0x12ec   :  { %7712 = vrsqrt.f32 %v6033_v40  ;;  %vm6092_vm5 = vweird.f32 %v6033_v40 }
0x12ef   :  { %v6016_v7 = vpop.xlane.xlu1 %6015 }
0x12f0   :  { %v6026_v18 = vmul.f32 %v6016_v7, %v10614_v20 }
0x12f2   :  { %v6034_v15 = vadd.f32 1e-05, %v6026_v18  ;;  %v11328_v33 = vpop.eup %7712 }
0x12f3   :  { %v6087_v17 = vmul.f32 %v11328_v33, %v6033_v40  ;;  %vm6093_vm2 = vweird.f32 %v11328_v33 }
0x12f4   :  { %7714 = vrsqrt.f32 %v6034_v15  ;;  %vm6102_vm6 = vweird.f32 %v6034_v15  ;;  %vm11358_vm8 = vmor %vm6092_vm5, %vm6093_vm2 }
0x12f5   :  { %v6088_v23 = vmul.f32 %v11328_v33, %v6087_v17 }
0x12f7   :  { %v6004_v27 = vpop.xlane.xlu2 %6003  ;;  %v6019_v56 = vpop.xlane.xlu0 %6018  ;;  %v6089_v4 = vmul.f32 0.5, %v6088_v23 }
0x12f8   :  { %v6022_v44 = vmul.f32 %v6004_v27, %v10614_v20  ;;  %v6027_v38 = vmul.f32 %v6019_v56, %v10614_v20 }
0x12fa   :  { %v7715_v55 = vpop.eup %7714  ;;  %v11333_v60 = vadd.f32 1e-05, %v6022_v44  ;;  %v6035_v10 = vadd.f32 1e-05, %v6027_v38  ;;  %v6090_v44 = vsub.f32 1.5, %v6089_v4 }
0x12fb   :  { %v6097_v0 = vmul.f32 %v7715_v55, %v6034_v15  ;;  %vm6103_vm4 = vweird.f32 %v7715_v55 }
0x12fc   :  { %7716 = vrsqrt.f32 %v11333_v60  ;;  %vm11354_vm9 = vmor %vm6102_vm6, %vm6103_vm4  ;;  %vm6112_vm3 = vweird.f32 %v6035_v10  ;;  %vm6062_vm0 = vweird.f32 %v11333_v60 }
0x12fd   :  { %v6098_v21 = vmul.f32 %v7715_v55, %v6097_v0  ;;  %7718 = vrsqrt.f32 %v6035_v10 }
0x12ff   :  { %v6099_v37 = vmul.f32 0.5, %v6098_v21  ;;  %v6010_v63 = vpop.xlane.xlu0 %6009  ;;  %v6007_v26 = vpop.xlane.xlu1 %6006 }
0x1300   :  { %v6024_v1 = vmul.f32 %v6010_v63, %v10614_v20  ;;  %v6023_v30 = vmul.f32 %v6007_v26, %v10614_v20 }
0x1301   :  { %v6100_v18 = vsub.f32 1.5, %v6099_v37  ;;  %v6091_v37 = vmul.f32 %v11328_v33, %v6090_v44 }
0x1302   :  { %v11339_v7 = vpop.eup %7716  ;;  %v11341_v27 = vadd.f32 1e-05, %v6024_v1  ;;  %v11343_v56 = vadd.f32 1e-05, %v6023_v30 }
0x1303   :  { %v7719_v17 = vpop.eup %7718  ;;  %v6057_v38 = vmul.f32 %v11339_v7, %v11333_v60  ;;  %v6101_v21 = vmul.f32 %v7715_v55, %v6100_v18  ;;  %v6095_v40 = vsel %vm11358_vm8, %v11328_v33, %v6091_v37  ;;  %vm6063_vm15 = vweird.f32 %v11339_v7 }
0x1304   :  { %v6107_v23 = vmul.f32 %v7719_v17, %v6035_v10  ;;  %7720 = vrsqrt.f32 %v11341_v27  ;;  %vm6113_vm14 = vweird.f32 %v7719_v17  ;;  %v6121_v33 = vmul.f32 %v6095_v40, %v11269_v14  ;;  %vm11384_vm13 = vmor %vm6062_vm0, %vm6063_vm15 }
0x1305   :  { %v6058_v0 = vmul.f32 %v11339_v7, %v6057_v38  ;;  %7722 = vrsqrt.f32 %v11343_v56  ;;  %vm6114_vm11 = vmor %vm6112_vm3, %vm6113_vm14  ;;  %vm6082_vm4 = vweird.f32 %v11341_v27  ;;  %vm6072_vm5 = vweird.f32 %v11343_v56 }
0x1306   :  { %v6108_v63 = vmul.f32 %v7719_v17, %v6107_v23  ;;  %v6105_v23 = vsel %vm11354_vm9, %v7715_v55, %v6101_v21 }
0x1307   :  { %v6059_v26 = vmul.f32 0.5, %v6058_v0  ;;  %v6001_v1 = vpop.xlane.xlu0 %6000  ;;  %v5998_v4 = vpop.xlane.xlu1 %5997 }
0x1308   :  { %v6109_v30 = vmul.f32 0.5, %v6108_v63  ;;  %v6021_v42 = vmul.f32 %v6001_v1, %v10614_v20  ;;  %v6020_v51 = vmul.f32 %v5998_v4, %v10614_v20 }
0x1309   :  { %v6060_v4 = vsub.f32 1.5, %v6059_v26 }
0x130a   :  { %v7721_v18 = vpop.eup %7720  ;;  %v6110_v15 = vsub.f32 1.5, %v6109_v30  ;;  %v11364_v0 = vadd.f32 1e-05, %v6021_v42  ;;  %v11366_v63 = vadd.f32 1e-05, %v6020_v51  ;;  %v6122_v51 = vmul.f32 %v6105_v23, %v11275_v16 }
0x130b   :  { %v7723_v1 = vpop.eup %7722  ;;  %v6077_v43 = vmul.f32 %v7721_v18, %v11341_v27  ;;  %v6061_v37 = vmul.f32 %v11339_v7, %v6060_v4  ;;  %vm6083_vm7 = vweird.f32 %v7721_v18 }
0x130c   :  { %v6111_v49 = vmul.f32 %v7719_v17, %v6110_v15  ;;  %v6067_v5 = vmul.f32 %v7723_v1, %v11343_v56  ;;  %7724 = vrsqrt.f32 %v11364_v0  ;;  %v6130_v16 = vmul.f32 %v6122_v51, %v10785_v46  ;;  %vm6084_vm6 = vmor %vm6082_vm4, %vm6083_vm7 }
0x130d   :  { %v6078_v42 = vmul.f32 %v7721_v18, %v6077_v43  ;;  %7726 = vrsqrt.f32 %v11366_v63  ;;  %vm6073_vm2 = vweird.f32 %v7723_v1  ;;  %v6065_v60 = vsel %vm11384_vm13, %v11339_v7, %v6061_v37 }
0x130e   :  { %v6115_v55 = vsel %vm6114_vm11, %v7719_v17, %v6111_v49  ;;  %v6068_v21 = vmul.f32 %v7723_v1, %v6067_v5  ;;  %vm6074_vm9 = vmor %vm6072_vm5, %vm6073_vm2  ;;  %v11401_v51 = vadd.f32 %v6130_v16, %v10799_v35  ;;  %vm6052_vm3 = vweird.f32 %v11364_v0 }
0x130f   :  { %v6123_v10 = vmul.f32 %v6115_v55, %v11285_v41  ;;  %v6079_v26 = vmul.f32 0.5, %v6078_v42  ;;  %v6129_v41 = vmul.f32 %v6121_v33, %v10785_v46  ;;  %v6118_v33 = vmul.f32 %v6065_v60, %v11283_v34 }
0x1310   :  { %v6069_v30 = vmul.f32 0.5, %v6068_v21  ;;  %vm6042_vm15 = vweird.f32 %v11366_v63  ;;  %vm12404_vm7 = vcmask 31744  }
0x1311   :  { %v6080_v38 = vsub.f32 1.5, %v6079_v26  ;;  %v6131_v43 = vmul.f32 %v6123_v10, %v10785_v46  ;;  %v11407_v56 = vadd.f32 %v6129_v41, %v10799_v35  ;;  %vm12405_vm13 = vmmov %vm12404_vm7 }
0x1312   :  { %v7725_v49 = vpop.eup %7724  ;;  %v6070_v14 = vsub.f32 1.5, %v6069_v30  ;;  %vm12406_vm4 = vmmov %vm12404_vm7 }
0x1313   :  { %v7727_v17 = vpop.eup %7726  ;;  %v6081_v44 = vmul.f32 %v7721_v18, %v6080_v38  ;;  %v6047_v23 = vmul.f32 %v7725_v49, %v11364_v0  ;;  %v11395_v15 = vadd.f32 %v6131_v43, %v10799_v35  ;;  %vm6053_vm14 = vweird.f32 %v7725_v49  ;;  %vm12407_vm2 = vmmov %vm12406_vm4 }
0x1314   :  { %v6071_v40 = vmul.f32 %v7723_v1, %v6070_v14  ;;  %v6037_v27 = vmul.f32 %v7727_v17, %v11366_v63  ;;  %vm6043_vm8 = vweird.f32 %v7727_v17  ;;  %v6126_v38 = vmul.f32 %v6118_v33, %v10785_v46  ;;  %vm6054_vm11 = vmor %vm6052_vm3, %vm6053_vm14 }
0x1315   :  { %v6085_v4 = vsel %vm6084_vm6, %v7721_v18, %v6081_v44  ;;  %v6048_v42 = vmul.f32 %v7725_v49, %v6047_v23  ;;  %6183 = vmatpush.msra.mxu1 %v11395_v15  ;;  %vm6044_vm0 = vmor %vm6042_vm15, %vm6043_vm8 }
0x1316   :  { %v6075_v7 = vsel %vm6074_vm9, %v7723_v1, %v6071_v40  ;;  %v6038_v55 = vmul.f32 %v7727_v17, %v6037_v27  ;;  %v6120_v21 = vmul.f32 %v6085_v4, %v11291_v48  ;;  %v6134_v41 = vadd.f32 %v6126_v38, %v10799_v35  ;;  %vm12408_vm6 = vmmov %vm12407_vm2 }
0x1317   :  { %v6049_v37 = vmul.f32 0.5, %v6048_v42  ;;  %6184 = vmatpush.msra.mxu1 %v11401_v51  ;;  %v6119_v18 = vmul.f32 %v6075_v7, %v11297_v3  ;;  %vm12409_vm5 = vmmov %vm12407_vm2 }
0x1318   :  { %v6039_v10 = vmul.f32 0.5, %v6038_v55  ;;  %v6128_v26 = vmul.f32 %v6120_v21, %v10785_v46  ;;  %vm12410_vm9 = vmmov %vm12407_vm2 }
0x1319   :  { %v6050_v30 = vsub.f32 1.5, %v6049_v37  ;;  %6185 = vmatpush.msra.mxu1 %v11407_v56  ;;  %v6127_v1 = vmul.f32 %v6119_v18, %v10785_v46  ;;  %vm12411_vm14 = vmmov %vm12407_vm2 }
0x131a   :  { %v6040_v48 = vsub.f32 1.5, %v6039_v10  ;;  %v11414_v34 = vadd.f32 %v6128_v26, %v10799_v35 }
0x131b   :  { %v6051_v43 = vmul.f32 %v7725_v49, %v6050_v30  ;;  %v6135_v16 = vadd.f32 %v6127_v1, %v10799_v35 }
0x131c   :  { %v6041_v3 = vmul.f32 %v7727_v17, %v6040_v48  ;;  %6186 = vmatpush.msra.mxu1 %v11414_v34 }
0x131d   :  { %v6055_v5 = vsel %vm6054_vm11, %v7725_v49, %v6051_v43 }
0x131e   :  { %v6045_v14 = vsel %vm6044_vm0, %v7727_v17, %v6041_v3  ;;  %6187 = vmatpush.msra.mxu1 %v6135_v16  ;;  %v6117_v60 = vmul.f32 %v6055_v5, %v11310_v13  ;;  %vm12412_vm0 = vmmov %vm12407_vm2 }
0x131f   :  { %v6116_v44 = vmul.f32 %v6045_v14, %v11304_v52 }
0x1320   :  { %6188 = vmatpush.msra.mxu1 %v6134_v41  ;;  %v6125_v0 = vmul.f32 %v6117_v60, %v10785_v46 }
0x1321   :  { %v6124_v23 = vmul.f32 %v6116_v44, %v10785_v46 }
0x1322   :  { %v6133_v63 = vadd.f32 %v6125_v0, %v10799_v35 }
0x1323   :  { %v6132_v40 = vadd.f32 %v6124_v23, %v10799_v35 }
0x1324   :  { %6189 = vmatpush.msra.mxu1 %v6133_v63 }
0x1325   :  { %7564 = vmatmul.msk.f32.vlgmr.msrb.gmra.mxu0 %vm12404_vm7, %v6132_v40  ;;  %vm12414_vm7 = vmmov %vm12412_vm0 }
0x1326   :  { %6190 = vmatpush.msra.mxu1 %v6132_v40 }
0x132d   :  { %7565 = vmatmul.msk.f32.gmra.mxu0 %vm12405_vm13, %v6133_v63  ;;  %vm12415_vm13 = vmmov %vm12412_vm0 }
0x1335   :  { %7566 = vmatmul.msk.f32.gmra.mxu0 %vm12406_vm4, %v6134_v41  ;;  %vm12416_vm4 = vmmov %vm12412_vm0 }
0x133d   :  { %7567 = vmatmul.msk.f32.gmra.mxu0 %vm12407_vm2, %v6135_v16  ;;  %vm12417_vm2 = vmmov %vm12412_vm0 }
0x1345   :  { %7568 = vmatmul.msk.f32.gmra.mxu0 %vm12408_vm6, %v11414_v34  ;;  %vm12418_vm6 = vmmov %vm12412_vm0 }
0x1346   :  { %v6156_v52 = vpop.trf.xlu2 }
0x1347   :  { %7544 = vmatmul.msk.f32.vlgmr.msra.gmra.mxu1 %vm4102_vm10, %v6156_v52 }
0x134d   :  { %7569 = vmatmul.msk.f32.gmra.mxu0 %vm12409_vm5, %v11407_v56  ;;  %vm12419_vm5 = vmmov %vm12412_vm0 }
0x1355   :  { %7570 = vmatmul.msk.f32.gmra.mxu0 %vm12410_vm9, %v11401_v51  ;;  %vm12420_vm9 = vmmov %vm12412_vm0 }
0x135d   :  { %7571 = vmatmul.msk.f32.gmra.mxu0 %vm12411_vm14, %v11395_v15 }
0x13c4   :  { %v6192_v46 = vpop.f32.mrf.mxu1 }
0x13c5   :  { %v6195_v35 = vmul.f32 0.00390625, %v6192_v46 }
0x13c7   :  { %v6196_v13 = vsel %vm4127_vm12, %v6195_v35, -inf }
0x13c8   :  { %6197 = vmax.xlane.f32.xlu0 %v6196_v13 }
0x143b   :  { %v6198_v49 = vpop.xlane.xlu0 %6197 }
0x143c   :  { %v6199_v17 = vsub.f32 %v6195_v35, %v6198_v49 }
0x143e   :  { %v6200_v27 = vmul.f32 1.442695, %v6199_v17 }
0x1440   :  { %7728 = vpow2.f32 %v6200_v27 }
0x1446   :  { %v7729_v4 = vpop.eup %7728 }
0x1447   :  { %v6202_v42 = vsel %vm4127_vm12, %v7729_v4, 0.0  ;;  %vm12413_vm12 = vmmov %vm12412_vm0 }
0x1448   :  { %6203 = vadd.xlane.f32.xlu1 %v6202_v42 }
0x14bb   :  { %v6204_v7 = vpop.xlane.xlu1 %6203 }
0x14bc   :  { %7730 = vrcp.f32 %v6204_v7  ;;  %v6216_v37 = vand.u32 2147483648, %v6204_v7  ;;  %v6214_v10 = vand.u32 2147483647, %v6204_v7  ;;  %vm6210_vm3 = vweird.f32 %v6204_v7 }
0x14be   :  { %v6217_v30 = vor.u32 1.1754944e-38, %v6216_v37  ;;  %vm6215_vm15 = vcmp.eq.f32.partialorder %v6214_v10, 8.507059e+37 }
0x14c2   :  { %v7731_v55 = vpop.eup %7730 }
0x14c3   :  { %v6206_v21 = vmul.f32 %v7731_v55, %v6204_v7  ;;  %vm6211_vm8 = vweird.f32 %v7731_v55 }
0x14c4   :  { %vm6212_vm11 = vmor %vm6210_vm3, %vm6211_vm8 }
0x14c5   :  { %v6207_v33 = vsub.f32 1.0, %v6206_v21 }
0x14c7   :  { %v6208_v18 = vmul.f32 %v7731_v55, %v6207_v33 }
0x14c9   :  { %v6209_v26 = vadd.f32 %v7731_v55, %v6208_v18 }
0x14cb   :  { %v6213_v1 = vsel %vm6212_vm11, %v7731_v55, %v6209_v26 }
0x14cc   :  { %v6218_v48 = vsel %vm6215_vm15, %v6217_v30, %v6213_v1 }
0x14cd   :  { %v6219_v38 = vmul.f32 %v7729_v4, %v6218_v48 }
0x14cf   :  { %7545 = vmatpush.xpose.msk.msrb.mxu1 %vm12412_vm0, %v6219_v38 }
0x14d2   :  { %7546 = vmatmul.msk.f32.vlgmr.msrb.gmra.mxu1 %vm12413_vm12, %v6132_v40  ;;  %vm12421_vm12 = vmmov %vm12417_vm2 }
0x14da   :  { %7547 = vmatmul.msk.f32.gmra.mxu1 %vm12414_vm7, %v6133_v63 }
0x14e2   :  { %7548 = vmatmul.msk.f32.gmra.mxu1 %vm12415_vm13, %v6134_v41 }
0x14ea   :  { %7549 = vmatmul.msk.f32.gmra.mxu1 %vm12416_vm4, %v6135_v16 }
0x14f2   :  { %7550 = vmatmul.msk.f32.gmra.mxu1 %vm12417_vm2, %v11414_v34 }
0x14fa   :  { %7551 = vmatmul.msk.f32.gmra.mxu1 %vm12418_vm6, %v11407_v56  ;;  %vm12422_vm6 = vmmov %vm12419_vm5 }
0x1502   :  { %7552 = vmatmul.msk.f32.gmra.mxu1 %vm12419_vm5, %v11401_v51 }
0x150a   :  { %7553 = vmatmul.msk.f32.gmra.mxu1 %vm12420_vm9, %v11395_v15 }
0x154f   :  { %v6264_v43 = vpop.f32.mrf.mxu1 }
0x1550   :  { %v6288_v3 = vsub.f32 0.0, %v6264_v43 }
0x1552   :  { %v6296_v5 = vmul.f32 1.442695, %v6288_v3 }
0x1554   :  { %7732 = vpow2.f32 %v6296_v5 }
0x1557   :  { %v6267_v14 = vpop.f32.mrf.mxu1 }
0x1558   :  { %v6289_v41 = vsub.f32 0.0, %v6267_v14 }
0x155a   :  { %v7733_v60 = vpop.eup %7732  ;;  %v6298_v16 = vmul.f32 1.442695, %v6289_v41 }
0x155b   :  { %v6312_v44 = vadd.f32 1.0, %v7733_v60 }
0x155c   :  { %7734 = vpow2.f32 %v6298_v16 }
0x155d   :  { %7736 = vrcp.f32 %v6312_v44  ;;  %v6331_v52 = vand.u32 2147483648, %v6312_v44  ;;  %v6329_v13 = vand.u32 2147483647, %v6312_v44  ;;  %vm6325_vm8 = vweird.f32 %v6312_v44 }
0x155f   :  { %v6270_v34 = vpop.f32.mrf.mxu1  ;;  %v6332_v7 = vor.u32 1.1754944e-38, %v6331_v52  ;;  %vm6330_vm11 = vcmp.eq.f32.partialorder %v6329_v13, 8.507059e+37 }
0x1560   :  { %v6290_v0 = vsub.f32 0.0, %v6270_v34 }
0x1562   :  { %v7735_v56 = vpop.eup %7734  ;;  %v6300_v23 = vmul.f32 1.442695, %v6290_v0 }
0x1563   :  { %v7737_v63 = vpop.eup %7736  ;;  %v6313_v51 = vadd.f32 1.0, %v7735_v56 }
0x1564   :  { %v6321_v40 = vmul.f32 %v7737_v63, %v6312_v44  ;;  %7738 = vpow2.f32 %v6300_v23  ;;  %vm6326_vm14 = vweird.f32 %v7737_v63 }
0x1565   :  { %7740 = vrcp.f32 %v6313_v51  ;;  %vm6327_vm3 = vmor %vm6325_vm8, %vm6326_vm14  ;;  %v6344_v30 = vand.u32 2147483647, %v6313_v51  ;;  %v6346_v1 = vand.u32 2147483648, %v6313_v51  ;;  %vm6340_vm0 = vweird.f32 %v6313_v51 }
0x1566   :  { %v6322_v15 = vsub.f32 1.0, %v6321_v40 }
0x1567   :  { %v6273_v46 = vpop.f32.mrf.mxu1  ;;  %v6347_v16 = vor.u32 1.1754944e-38, %v6346_v1  ;;  %vm6345_vm13 = vcmp.eq.f32.partialorder %v6344_v30, 8.507059e+37 }
0x1568   :  { %v6323_v35 = vmul.f32 %v7737_v63, %v6322_v15  ;;  %v6291_v49 = vsub.f32 0.0, %v6273_v46 }
0x156a   :  { %v7739_v17 = vpop.eup %7738  ;;  %v6324_v27 = vadd.f32 %v7737_v63, %v6323_v35  ;;  %v6302_v4 = vmul.f32 1.442695, %v6291_v49 }
0x156b   :  { %v7741_v42 = vpop.eup %7740  ;;  %v6314_v55 = vadd.f32 1.0, %v7739_v17 }
0x156c   :  { %v6328_v21 = vsel %vm6327_vm3, %v7737_v63, %v6324_v27  ;;  %v6336_v33 = vmul.f32 %v7741_v42, %v6313_v51  ;;  %7742 = vpow2.f32 %v6302_v4  ;;  %vm6341_vm15 = vweird.f32 %v7741_v42  ;;  %vm12423_vm3 = vmmov %vm12422_vm6 }
0x156d   :  { %v6333_v37 = vsel %vm6330_vm11, %v6332_v7, %v6328_v21  ;;  %7744 = vrcp.f32 %v6314_v55  ;;  %vm6342_vm7 = vmor %vm6340_vm0, %vm6341_vm15  ;;  %v6359_v40 = vand.u32 2147483647, %v6314_v55  ;;  %v6361_v51 = vand.u32 2147483648, %v6314_v55 }
0x156e   :  { %v6337_v18 = vsub.f32 1.0, %v6336_v33  ;;  %v6440_v10 = vmul.f32 %v6333_v37, %v10589_v24  ;;  %vm6355_vm2 = vweird.f32 %v6314_v55 }
0x156f   :  { %v6276_v26 = vpop.f32.mrf.mxu1  ;;  %v6362_v4 = vor.u32 1.1754944e-38, %v6361_v51  ;;  %vm6360_vm9 = vcmp.eq.f32.partialorder %v6359_v40, 8.507059e+37 }
0x1570   :  { %v6338_v48 = vmul.f32 %v7741_v42, %v6337_v18  ;;  %v6292_v38 = vsub.f32 0.0, %v6276_v26  ;;  %v6448_v43 = vadd.f32 %v6440_v10, %v10589_v24 }
0x1572   :  { %v7743_v3 = vpop.eup %7742  ;;  %v6304_v5 = vmul.f32 1.442695, %v6292_v38  ;;  %7555 = vmatmul.msk.f32.vlgmr.msrb.gmra.mxu2 %vm12421_vm12, %v6448_v43  ;;  %v6339_v14 = vadd.f32 %v7741_v42, %v6338_v48 }
0x1573   :  { %v7745_v41 = vpop.eup %7744  ;;  %v6315_v60 = vadd.f32 1.0, %v7743_v3 }
0x1574   :  { %v6351_v44 = vmul.f32 %v7745_v41, %v6314_v55  ;;  %7746 = vpow2.f32 %v6304_v5  ;;  %v6343_v34 = vsel %vm6342_vm7, %v7741_v42, %v6339_v14  ;;  %vm6356_vm4 = vweird.f32 %v7745_v41  ;;  %vm12424_vm7 = vmmov %vm12423_vm3 }
0x1575   :  { %7748 = vrcp.f32 %v6315_v60  ;;  %v6348_v0 = vsel %vm6345_vm13, %v6347_v16, %v6343_v34  ;;  %vm6357_vm5 = vmor %vm6355_vm2, %vm6356_vm4  ;;  %v6374_v10 = vand.u32 2147483647, %v6315_v60  ;;  %v6376_v55 = vand.u32 2147483648, %v6315_v60 }
0x1576   :  { %v6352_v56 = vsub.f32 1.0, %v6351_v44  ;;  %v6441_v23 = vmul.f32 %v6348_v0, %v10595_v29  ;;  %vm6370_vm8 = vweird.f32 %v6315_v60 }
0x1577   :  { %v6279_v63 = vpop.f32.mrf.mxu1  ;;  %v6377_v14 = vor.u32 1.1754944e-38, %v6376_v55  ;;  %vm6375_vm15 = vcmp.eq.f32.partialorder %v6374_v10, 8.507059e+37 }
0x1578   :  { %v6353_v15 = vmul.f32 %v7745_v41, %v6352_v56  ;;  %v6293_v52 = vsub.f32 0.0, %v6279_v63  ;;  %v6449_v46 = vadd.f32 %v6441_v23, %v10595_v29 }
0x157a   :  { %v7747_v35 = vpop.eup %7746  ;;  %v6306_v13 = vmul.f32 1.442695, %v6293_v52  ;;  %7556 = vmatmul.msk.f32.gmra.mxu2 %vm12422_vm6, %v6449_v46  ;;  %v6354_v49 = vadd.f32 %v7745_v41, %v6353_v15 }
0x157b   :  { %v7749_v17 = vpop.eup %7748  ;;  %v6316_v27 = vadd.f32 1.0, %v7747_v35 }
0x157c   :  { %v6366_v42 = vmul.f32 %v7749_v17, %v6315_v60  ;;  %7750 = vpow2.f32 %v6306_v13  ;;  %v6358_v7 = vsel %vm6357_vm5, %v7745_v41, %v6354_v49  ;;  %vm6371_vm14 = vweird.f32 %v7749_v17  ;;  %vm12425_vm5 = vmmov %vm12423_vm3 }
0x157d   :  { %7752 = vrcp.f32 %v6316_v27  ;;  %v6363_v21 = vsel %vm6360_vm9, %v6362_v4, %v6358_v7  ;;  %vm6372_vm11 = vmor %vm6370_vm8, %vm6371_vm14  ;;  %v6389_v23 = vand.u32 2147483647, %v6316_v27  ;;  %v6391_v60 = vand.u32 2147483648, %v6316_v27 }
0x157e   :  { %v6367_v33 = vsub.f32 1.0, %v6366_v42  ;;  %v6442_v37 = vmul.f32 %v6363_v21, %v10855_v9  ;;  %vm6385_vm12 = vweird.f32 %v6316_v27 }
0x157f   :  { %v6282_v18 = vpop.f32.mrf.mxu1  ;;  %v6392_v49 = vor.u32 1.1754944e-38, %v6391_v60  ;;  %vm6390_vm4 = vcmp.eq.f32.partialorder %v6389_v23, 8.507059e+37 }
0x1580   :  { %v6368_v26 = vmul.f32 %v7749_v17, %v6367_v33  ;;  %v6294_v30 = vsub.f32 0.0, %v6282_v18  ;;  %v6450_v1 = vadd.f32 %v6442_v37, %v10855_v9 }
0x1582   :  { %v7751_v48 = vpop.eup %7750  ;;  %v6308_v38 = vmul.f32 1.442695, %v6294_v30  ;;  %7557 = vmatmul.msk.f32.gmra.mxu2 %vm12423_vm3, %v6450_v1  ;;  %v6369_v43 = vadd.f32 %v7749_v17, %v6368_v26 }
0x1583   :  { %v7753_v3 = vpop.eup %7752  ;;  %v6317_v5 = vadd.f32 1.0, %v7751_v48 }
0x1584   :  { %v6381_v41 = vmul.f32 %v7753_v3, %v6316_v27  ;;  %7754 = vpow2.f32 %v6308_v38  ;;  %v6373_v16 = vsel %vm6372_vm11, %v7749_v17, %v6369_v43  ;;  %vm6386_vm0 = vweird.f32 %v7753_v3  ;;  %vm12426_vm11 = vmmov %vm12425_vm5 }
0x1585   :  { %7756 = vrcp.f32 %v6317_v5  ;;  %v6378_v44 = vsel %vm6375_vm15, %v6377_v14, %v6373_v16  ;;  %vm6387_vm13 = vmor %vm6385_vm12, %vm6386_vm0  ;;  %v6406_v33 = vand.u32 2147483648, %v6317_v5  ;;  %v6404_v18 = vand.u32 2147483647, %v6317_v5 }
0x1586   :  { %v6382_v34 = vsub.f32 1.0, %v6381_v41  ;;  %v6443_v0 = vmul.f32 %v6378_v44, %v10600_v53  ;;  %vm6400_vm6 = vweird.f32 %v6317_v5 }
0x1587   :  { %v6285_v56 = vpop.f32.mrf.mxu1  ;;  %v6407_v1 = vor.u32 1.1754944e-38, %v6406_v33  ;;  %vm6405_vm14 = vcmp.eq.f32.partialorder %v6404_v18, 8.507059e+37 }
0x1588   :  { %v6383_v63 = vmul.f32 %v7753_v3, %v6382_v34  ;;  %v6295_v40 = vsub.f32 0.0, %v6285_v56  ;;  %v6451_v51 = vadd.f32 %v6443_v0, %v10600_v53 }
0x158a   :  { %v7755_v15 = vpop.eup %7754  ;;  %v6310_v52 = vmul.f32 1.442695, %v6295_v40  ;;  %7558 = vmatmul.msk.f32.gmra.mxu2 %vm12424_vm7, %v6451_v51  ;;  %v6384_v46 = vadd.f32 %v7753_v3, %v6383_v63 }
0x158b   :  { %v7757_v35 = vpop.eup %7756  ;;  %v6318_v13 = vadd.f32 1.0, %v7755_v15 }
0x158c   :  { %v6396_v17 = vmul.f32 %v7757_v35, %v6317_v5  ;;  %7758 = vpow2.f32 %v6310_v52  ;;  %v6388_v4 = vsel %vm6387_vm13, %v7753_v3, %v6384_v46  ;;  %vm6401_vm2 = vweird.f32 %v7757_v35  ;;  %vm12427_vm13 = vmmov %vm12425_vm5 }
0x158d   :  { %7760 = vrcp.f32 %v6318_v13  ;;  %v6393_v42 = vsel %vm6390_vm4, %v6392_v49, %v6388_v4  ;;  %vm6402_vm9 = vmor %vm6400_vm6, %vm6401_vm2  ;;  %v6421_v41 = vand.u32 2147483648, %v6318_v13  ;;  %v6419_v5 = vand.u32 2147483647, %v6318_v13 }
0x158e   :  { %v6397_v7 = vsub.f32 1.0, %v6396_v17  ;;  %v6444_v21 = vmul.f32 %v6393_v42, %v10860_v50  ;;  %vm6415_vm3 = vweird.f32 %v6318_v13  ;;  %vm12428_vm6 = vmmov %vm12425_vm5 }
0x158f   :  { %v6422_v56 = vor.u32 1.1754944e-38, %v6421_v41  ;;  %vm6420_vm0 = vcmp.eq.f32.partialorder %v6419_v5, 8.507059e+37 }
0x1590   :  { %v6398_v37 = vmul.f32 %v7757_v35, %v6397_v7  ;;  %v6452_v27 = vadd.f32 %v6444_v21, %v10860_v50 }
0x1592   :  { %v7759_v10 = vpop.eup %7758  ;;  %7559 = vmatmul.msk.f32.gmra.mxu2 %vm12425_vm5, %v6452_v27  ;;  %v6399_v55 = vadd.f32 %v7757_v35, %v6398_v37 }
0x1593   :  { %v7761_v26 = vpop.eup %7760  ;;  %v6319_v30 = vadd.f32 1.0, %v7759_v10 }
0x1594   :  { %v6411_v48 = vmul.f32 %v7761_v26, %v6318_v13  ;;  %v6403_v38 = vsel %vm6402_vm9, %v7757_v35, %v6399_v55  ;;  %vm6416_vm8 = vweird.f32 %v7761_v26  ;;  %vm12429_vm9 = vmmov %vm12425_vm5 }
0x1595   :  { %7762 = vrcp.f32 %v6319_v30  ;;  %v6408_v43 = vsel %vm6405_vm14, %v6407_v1, %v6403_v38  ;;  %vm6417_vm15 = vmor %vm6415_vm3, %vm6416_vm8  ;;  %v6436_v15 = vand.u32 2147483648, %v6319_v30  ;;  %v6434_v35 = vand.u32 2147483647, %v6319_v30 }
0x1596   :  { %v6412_v3 = vsub.f32 1.0, %v6411_v48  ;;  %v6445_v14 = vmul.f32 %v6408_v43, %v10605_v31  ;;  %vm6430_vm7 = vweird.f32 %v6319_v30  ;;  %vm12430_vm14 = vmmov %vm12425_vm5 }
0x1597   :  { %v6437_v49 = vor.u32 1.1754944e-38, %v6436_v15  ;;  %vm6435_vm2 = vcmp.eq.f32.partialorder %v6434_v35, 8.507059e+37  ;;  %vm12431_vm8 = vmmov %vm12425_vm5 }
0x1598   :  { %v6413_v16 = vmul.f32 %v7761_v26, %v6412_v3  ;;  %v6453_v44 = vadd.f32 %v6445_v14, %v10605_v31  ;;  %vm12432_vm3 = vmmov %vm12425_vm5 }
0x159a   :  { %7560 = vmatmul.msk.f32.gmra.mxu2 %vm12426_vm11, %v6453_v44  ;;  %v6414_v34 = vadd.f32 %v7761_v26, %v6413_v16  ;;  %vm12433_vm11 = vmmov %vm12432_vm3 }
0x159b   :  { %v7763_v0 = vpop.eup %7762 }
0x159c   :  { %v6426_v23 = vmul.f32 %v7763_v0, %v6319_v30  ;;  %v6418_v60 = vsel %vm6417_vm15, %v7761_v26, %v6414_v34  ;;  %vm6431_vm12 = vweird.f32 %v7763_v0  ;;  %vm12434_vm15 = vmmov %vm12432_vm3 }
0x159d   :  { %v6423_v63 = vsel %vm6420_vm0, %v6422_v56, %v6418_v60  ;;  %vm6432_vm4 = vmor %vm6430_vm7, %vm6431_vm12 }
0x159e   :  { %v6427_v40 = vsub.f32 1.0, %v6426_v23  ;;  %v6446_v51 = vmul.f32 %v6423_v63, %v10865_v54  ;;  %vm12435_vm0 = vmmov %vm12432_vm3 }
0x159f   :  { %vm12436_vm12 = vmmov %vm12435_vm0 }
0x15a0   :  { %v6428_v52 = vmul.f32 %v7763_v0, %v6427_v40  ;;  %v6454_v46 = vadd.f32 %v6446_v51, %v10865_v54  ;;  %vm12437_vm7 = vmmov %vm12435_vm0 }
0x15a2   :  { %7561 = vmatmul.msk.f32.gmra.mxu2 %vm12427_vm13, %v6454_v46  ;;  %v6429_v13 = vadd.f32 %v7763_v0, %v6428_v52  ;;  %vm12438_vm13 = vmmov %vm12435_vm0 }
0x15a4   :  { %v6433_v17 = vsel %vm6432_vm4, %v7763_v0, %v6429_v13  ;;  %vm12439_vm4 = vmmov %vm12435_vm0 }
0x15a5   :  { %v6438_v4 = vsel %vm6435_vm2, %v6437_v49, %v6433_v17  ;;  %vm12440_vm2 = vmmov %vm12435_vm0 }
0x15a6   :  { %v6447_v42 = vmul.f32 %v6438_v4, %v10610_v12 }
0x15a8   :  { %v6455_v7 = vadd.f32 %v6447_v42, %v10610_v12 }
0x15aa   :  { %7562 = vmatmul.msk.f32.gmra.mxu2 %vm12428_vm6, %v6455_v7  ;;  %vm12441_vm6 = vmmov %vm12435_vm0 }
0x15f5   :  { %v6497_v21 = vpop.f32.mrf.mxu2 }
0x15f6   :  { %v6521_v33 = vsel %vm12425_vm5, %v6497_v21, 0.0  ;;  %vm12442_vm5 = vmmov %vm12435_vm0 }
0x15f7   :  { %6522 = vadd.xlane.f32.xlu0 %v6521_v33 }
0x15fd   :  { %v6500_v37 = vpop.f32.mrf.mxu2 }
0x15fe   :  { %v6524_v27 = vsel %vm12429_vm9, %v6500_v37, 0.0  ;;  %vm12443_vm9 = vmmov %vm12435_vm0 }
0x15ff   :  { %6525 = vadd.xlane.f32.xlu1 %v6524_v27 }
0x1605   :  { %v6503_v18 = vpop.f32.mrf.mxu2 }
0x1606   :  { %v6527_v10 = vsel %vm12430_vm14, %v6503_v18, 0.0 }
0x1607   :  { %6528 = vadd.xlane.f32.xlu0 %v6527_v10 }
0x160d   :  { %v6506_v55 = vpop.f32.mrf.mxu2 }
0x160e   :  { %v6530_v26 = vsel %vm12431_vm8, %v6506_v55, 0.0 }
0x160f   :  { %6531 = vadd.xlane.f32.xlu1 %v6530_v26 }
0x1615   :  { %v6509_v30 = vpop.f32.mrf.mxu2 }
0x1616   :  { %v6533_v1 = vsel %vm12432_vm3, %v6509_v30, 0.0 }
0x1617   :  { %6534 = vadd.xlane.f32.xlu0 %v6533_v1 }
0x161d   :  { %v6512_v48 = vpop.f32.mrf.mxu2 }
0x161e   :  { %v6536_v38 = vsel %vm12433_vm11, %v6512_v48, 0.0 }
0x161f   :  { %6537 = vadd.xlane.f32.xlu1 %v6536_v38 }
0x1625   :  { %v6515_v43 = vpop.f32.mrf.mxu2 }
0x1626   :  { %v6539_v3 = vsel %vm12434_vm15, %v6515_v43, 0.0 }
0x1627   :  { %6540 = vadd.xlane.f32.xlu1 %v6539_v3 }
0x162d   :  { %v6518_v14 = vpop.f32.mrf.mxu2 }
0x162e   :  { %v6542_v41 = vsel %vm12435_vm0, %v6518_v14, 0.0 }
0x162f   :  { %6543 = vadd.xlane.f32.xlu1 %v6542_v41 }
0x166a   :  { %v6523_v16 = vpop.xlane.xlu0 %6522 }
0x166b   :  { %v6545_v44 = vmul.f32 %v6523_v16, %v10614_v20 }
0x166d   :  { %v11489_v5 = vsub.f32 %v6497_v21, %v6545_v44 }
0x166f   :  { %v6561_v34 = vmul.f32 %v11489_v5, %v11489_v5 }
0x1671   :  { %v6569_v0 = vsel %vm12436_vm12, %v6561_v34, 0.0  ;;  %v11533_v34 = vadd.f32 %v11227_v39, %v11058_v8  ;;  %v11550_v39 = vadd.f32 %v11236_v28, %v11067_v25  ;;  %vm12444_vm12 = vmmov %vm12440_vm2 }
0x1672   :  { %v6526_v56 = vpop.xlane.xlu1 %6525  ;;  %6570 = vadd.xlane.f32.xlu0 %v6569_v0 }
0x1673   :  { %v6546_v23 = vmul.f32 %v6526_v56, %v10614_v20 }
0x1675   :  { %v11495_v60 = vsub.f32 %v6500_v37, %v6546_v23 }
0x1677   :  { %v6562_v63 = vmul.f32 %v11495_v60, %v11495_v60 }
0x1679   :  { %v6572_v40 = vsel %vm12437_vm7, %v6562_v63, 0.0  ;;  %v11544_v63 = vadd.f32 %v11232_v58, %v11060_v61 }
0x167a   :  { %v6529_v51 = vpop.xlane.xlu0 %6528  ;;  %6573 = vadd.xlane.f32.xlu0 %v6572_v40  ;;  %v11556_v40 = vadd.f32 %v11238_v2, %v11069_v45 }
0x167b   :  { %v6547_v15 = vmul.f32 %v6529_v51, %v10614_v20  ;;  %v5237_v8 = vsel %vm1116_vm1, %v11544_v63, 0.0 }
0x167c   :  { %v5243_v61 = vsel %vm1116_vm1, %v11556_v40, 0.0 }
0x167d   :  { %v11501_v52 = vsub.f32 %v6503_v18, %v6547_v15 }
0x167f   :  { %v6563_v46 = vmul.f32 %v11501_v52, %v11501_v52 }
0x1681   :  { %v6575_v35 = vsel %vm12438_vm13, %v6563_v46, 0.0 }
0x1682   :  { %v6532_v13 = vpop.xlane.xlu1 %6531  ;;  %6576 = vadd.xlane.f32.xlu0 %v6575_v35 }
0x1683   :  { %v6548_v49 = vmul.f32 %v6532_v13, %v10614_v20 }
0x1685   :  { %v11507_v17 = vsub.f32 %v6506_v55, %v6548_v49 }
0x1687   :  { %v6564_v4 = vmul.f32 %v11507_v17, %v11507_v17 }
0x1689   :  { %v6578_v42 = vsel %vm12439_vm4, %v6564_v4, 0.0 }
0x168a   :  { %v6535_v7 = vpop.xlane.xlu0 %6534  ;;  %6579 = vadd.xlane.f32.xlu1 %v6578_v42 }
0x168b   :  { %v6549_v21 = vmul.f32 %v6535_v7, %v10614_v20 }
0x168d   :  { %v11513_v33 = vsub.f32 %v6509_v30, %v6549_v21 }
0x168f   :  { %v6565_v37 = vmul.f32 %v11513_v33, %v11513_v33 }
0x1691   :  { %v6581_v27 = vsel %vm12440_vm2, %v6565_v37, 0.0 }
0x1692   :  { %6582 = vadd.xlane.f32.xlu0 %v6581_v27  ;;  %v6538_v18 = vpop.xlane.xlu1 %6537 }
0x1693   :  { %v6550_v10 = vmul.f32 %v6538_v18, %v10614_v20 }
0x1695   :  { %v11519_v55 = vsub.f32 %v6512_v48, %v6550_v10 }
0x1697   :  { %v6566_v26 = vmul.f32 %v11519_v55, %v11519_v55 }
0x1699   :  { %v6584_v1 = vsel %vm12441_vm6, %v6566_v26, 0.0 }
0x169a   :  { %v6541_v38 = vpop.xlane.xlu1 %6540  ;;  %6585 = vadd.xlane.f32.xlu1 %v6584_v1 }
0x169b   :  { %v6551_v30 = vmul.f32 %v6541_v38, %v10614_v20 }
0x169d   :  { %v11525_v3 = vsub.f32 %v6515_v43, %v6551_v30  ;;  %v5234_v43 = vsel %vm1116_vm1, %v11533_v34, 0.0 }
0x169f   :  { %v6567_v41 = vmul.f32 %v11525_v3, %v11525_v3 }
0x16a1   :  { %v6587_v16 = vsel %vm12442_vm5, %v6567_v41, 0.0 }
0x16a2   :  { %6588 = vadd.xlane.f32.xlu0 %v6587_v16  ;;  %v6544_v44 = vpop.xlane.xlu1 %6543 }
0x16a3   :  { %v6552_v48 = vmul.f32 %v6544_v44, %v10614_v20 }
0x16a5   :  { %v11535_v0 = vsub.f32 %v6518_v14, %v6552_v48  ;;  %v5240_v14 = vsel %vm1116_vm1, %v11550_v39, 0.0 }
0x16a7   :  { %v6568_v56 = vmul.f32 %v11535_v0, %v11535_v0 }
0x16a9   :  { %v6590_v23 = vsel %vm12443_vm9, %v6568_v56, 0.0 }
0x16aa   :  { %5235 = vadd.xlane.f32.xlu0 %v5234_v43  ;;  %6591 = vadd.xlane.f32.xlu1 %v6590_v23 }
0x16b2   :  { %5238 = vadd.xlane.f32.xlu0 %v5237_v8 }
0x16ba   :  { %5241 = vadd.xlane.f32.xlu0 %v5240_v14 }
0x16c2   :  { %5244 = vadd.xlane.f32.xlu0 %v5243_v61 }
0x16e5   :  { %v6571_v58 = vpop.xlane.xlu0 %6570 }
0x16e6   :  { %v6593_v51 = vmul.f32 %v6571_v58, %v10614_v20 }
0x16e8   :  { %v6601_v15 = vadd.f32 1e-05, %v6593_v51 }
0x16ea   :  { %7764 = vrsqrt.f32 %v6601_v15  ;;  %vm6615_vm8 = vweird.f32 %v6601_v15 }
0x16ed   :  { %v6574_v46 = vpop.xlane.xlu0 %6573 }
0x16ee   :  { %v6594_v25 = vmul.f32 %v6574_v46, %v10614_v20 }
0x16f0   :  { %v7765_v28 = vpop.eup %7764  ;;  %v6602_v35 = vadd.f32 1e-05, %v6594_v25 }
0x16f1   :  { %v6610_v13 = vmul.f32 %v7765_v28, %v6601_v15  ;;  %vm6616_vm14 = vweird.f32 %v7765_v28 }
0x16f2   :  { %7766 = vrsqrt.f32 %v6602_v35  ;;  %vm6617_vm3 = vmor %vm6615_vm8, %vm6616_vm14  ;;  %vm6625_vm15 = vweird.f32 %v6602_v35 }
0x16f3   :  { %v6611_v49 = vmul.f32 %v7765_v28, %v6610_v13  ;;  %vm12445_vm14 = vmmov %vm12440_vm2 }
0x16f5   :  { %v6612_v4 = vmul.f32 0.5, %v6611_v49  ;;  %v6577_v45 = vpop.xlane.xlu0 %6576 }
0x16f6   :  { %v6595_v2 = vmul.f32 %v6577_v45, %v10614_v20 }
0x16f7   :  { %v6613_v42 = vsub.f32 1.5, %v6612_v4 }
0x16f8   :  { %v7767_v7 = vpop.eup %7766  ;;  %v6603_v21 = vadd.f32 1e-05, %v6595_v2 }
0x16f9   :  { %v6614_v37 = vmul.f32 %v7765_v28, %v6613_v42  ;;  %v6620_v27 = vmul.f32 %v7767_v7, %v6602_v35  ;;  %vm6626_vm11 = vweird.f32 %v7767_v7 }
0x16fa   :  { %7768 = vrsqrt.f32 %v6603_v21  ;;  %vm6627_vm0 = vmor %vm6625_vm15, %vm6626_vm11  ;;  %vm6635_vm13 = vweird.f32 %v6603_v21 }
0x16fb   :  { %v6618_v18 = vsel %vm6617_vm3, %v7765_v28, %v6614_v37  ;;  %v6621_v10 = vmul.f32 %v7767_v7, %v6620_v27  ;;  %vm12446_vm15 = vmmov %vm12440_vm2 }
0x16fc   :  { %v6689_v26 = vmul.f32 %v6618_v18, %v11489_v5 }
0x16fd   :  { %v6622_v1 = vmul.f32 0.5, %v6621_v10  ;;  %v6580_v38 = vpop.xlane.xlu1 %6579 }
0x16fe   :  { %v6697_v30 = vmul.f32 %v6689_v26, %v11168_v59  ;;  %v6596_v41 = vmul.f32 %v6580_v38, %v10614_v20 }
0x16ff   :  { %v6623_v16 = vsub.f32 1.5, %v6622_v1 }
0x1700   :  { %v7769_v44 = vpop.eup %7768  ;;  %v6705_v48 = vadd.f32 %v6697_v30, %v11171_v19  ;;  %v6604_v56 = vadd.f32 1e-05, %v6596_v41 }
0x1701   :  { %v6624_v43 = vmul.f32 %v7767_v7, %v6623_v16  ;;  %v6630_v23 = vmul.f32 %v7769_v44, %v6603_v21  ;;  %vm6636_vm7 = vweird.f32 %v7769_v44 }
0x1702   :  { %7770 = vrsqrt.f32 %v6604_v56  ;;  %7573 = vmatmul.msk.f32.vlgmr.msrb.gmra.mxu3 %vm12444_vm12, %v6705_v48  ;;  %vm6637_vm4 = vmor %vm6635_vm13, %vm6636_vm7  ;;  %vm6645_vm5 = vweird.f32 %v6604_v56 }
0x1703   :  { %v6628_v5 = vsel %vm6627_vm0, %v7767_v7, %v6624_v43  ;;  %v6631_v8 = vmul.f32 %v7769_v44, %v6630_v23  ;;  %vm12447_vm13 = vmmov %vm12440_vm2 }
0x1704   :  { %v6690_v14 = vmul.f32 %v6628_v5, %v11495_v60 }
0x1705   :  { %v6632_v61 = vmul.f32 0.5, %v6631_v8  ;;  %v6583_v58 = vpop.xlane.xlu0 %6582 }
0x1706   :  { %v6597_v51 = vmul.f32 %v6583_v58, %v10614_v20  ;;  %v6698_v15 = vmul.f32 %v6690_v14, %v11168_v59 }
0x1707   :  { %v6633_v46 = vsub.f32 1.5, %v6632_v61 }
0x1708   :  { %v7771_v25 = vpop.eup %7770  ;;  %v6605_v28 = vadd.f32 1e-05, %v6597_v51  ;;  %v6706_v35 = vadd.f32 %v6698_v15, %v11171_v19 }
0x1709   :  { %v6634_v13 = vmul.f32 %v7769_v44, %v6633_v46  ;;  %v6640_v49 = vmul.f32 %v7771_v25, %v6604_v56  ;;  %vm6646_vm6 = vweird.f32 %v7771_v25 }
0x170a   :  { %7772 = vrsqrt.f32 %v6605_v28  ;;  %7574 = vmatmul.msk.f32.gmra.mxu3 %vm12440_vm2, %v6706_v35  ;;  %vm6647_vm9 = vmor %vm6645_vm5, %vm6646_vm6  ;;  %vm6655_vm3 = vweird.f32 %v6605_v28 }
0x170b   :  { %v6638_v60 = vsel %vm6637_vm4, %v7769_v44, %v6634_v13  ;;  %v6641_v4 = vmul.f32 %v7771_v25, %v6640_v49  ;;  %vm12448_vm5 = vmmov %vm12447_vm13 }
0x170c   :  { %v6691_v45 = vmul.f32 %v6638_v60, %v11501_v52 }
0x170d   :  { %v6642_v2 = vmul.f32 0.5, %v6641_v4  ;;  %v6586_v42 = vpop.xlane.xlu1 %6585 }
0x170e   :  { %v6598_v7 = vmul.f32 %v6586_v42, %v10614_v20  ;;  %v6699_v37 = vmul.f32 %v6691_v45, %v11168_v59 }
0x170f   :  { %v6643_v27 = vsub.f32 1.5, %v6642_v2 }
0x1710   :  { %v7773_v18 = vpop.eup %7772  ;;  %v6606_v10 = vadd.f32 1e-05, %v6598_v7  ;;  %v6707_v21 = vadd.f32 %v6699_v37, %v11171_v19 }
0x1711   :  { %v6644_v26 = vmul.f32 %v7771_v25, %v6643_v27  ;;  %v6650_v1 = vmul.f32 %v7773_v18, %v6605_v28  ;;  %vm6656_vm8 = vweird.f32 %v7773_v18 }
0x1712   :  { %7774 = vrsqrt.f32 %v6606_v10  ;;  %7575 = vmatmul.msk.f32.gmra.mxu3 %vm12445_vm14, %v6707_v21  ;;  %vm6657_vm11 = vmor %vm6655_vm3, %vm6656_vm8  ;;  %vm6665_vm12 = vweird.f32 %v6606_v10 }
0x1713   :  { %v6648_v52 = vsel %vm6647_vm9, %v7771_v25, %v6644_v26  ;;  %v6651_v38 = vmul.f32 %v7773_v18, %v6650_v1  ;;  %vm12449_vm3 = vmmov %vm12448_vm5 }
0x1714   :  { %v6692_v30 = vmul.f32 %v6648_v52, %v11507_v17 }
0x1715   :  { %v6652_v41 = vmul.f32 0.5, %v6651_v38  ;;  %v6589_v16 = vpop.xlane.xlu0 %6588 }
0x1716   :  { %v6599_v44 = vmul.f32 %v6589_v16, %v10614_v20  ;;  %v6700_v48 = vmul.f32 %v6692_v30, %v11168_v59 }
0x1717   :  { %v6653_v43 = vsub.f32 1.5, %v6652_v41 }
0x1718   :  { %v7775_v23 = vpop.eup %7774  ;;  %v6607_v5 = vadd.f32 1e-05, %v6599_v44  ;;  %v6708_v56 = vadd.f32 %v6700_v48, %v11171_v19 }
0x1719   :  { %v6654_v8 = vmul.f32 %v7773_v18, %v6653_v43  ;;  %v6660_v14 = vmul.f32 %v7775_v23, %v6606_v10  ;;  %vm6666_vm0 = vweird.f32 %v7775_v23 }
0x171a   :  { %7776 = vrsqrt.f32 %v6607_v5  ;;  %7576 = vmatmul.msk.f32.gmra.mxu3 %vm12446_vm15, %v6708_v56  ;;  %vm6667_vm7 = vmor %vm6665_vm12, %vm6666_vm0  ;;  %vm6675_vm2 = vweird.f32 %v6607_v5 }
0x171b   :  { %v6658_v17 = vsel %vm6657_vm11, %v7773_v18, %v6654_v8  ;;  %v6661_v61 = vmul.f32 %v7775_v23, %v6660_v14  ;;  %vm12450_vm11 = vmmov %vm12449_vm3 }
0x171c   :  { %v6693_v58 = vmul.f32 %v6658_v17, %v11513_v33 }
0x171d   :  { %v6662_v51 = vmul.f32 0.5, %v6661_v61  ;;  %v6592_v15 = vpop.xlane.xlu1 %6591 }
0x171e   :  { %v6600_v46 = vmul.f32 %v6592_v15, %v10614_v20  ;;  %v6701_v25 = vmul.f32 %v6693_v58, %v11168_v59 }
0x171f   :  { %v6663_v35 = vsub.f32 1.5, %v6662_v51  ;;  %v7823_v51 = vmov 8.0  }
0x1720   :  { %v7777_v13 = vpop.eup %7776  ;;  %v6608_v49 = vadd.f32 1e-05, %v6600_v46  ;;  %v6709_v28 = vadd.f32 %v6701_v25, %v11171_v19  ;;  %v11614_v46 = vadd.f32 %v11242_v62, %v11071_v22 }
0x1721   :  { %v6664_v60 = vmul.f32 %v7775_v23, %v6663_v35  ;;  %v6670_v4 = vmul.f32 %v7777_v13, %v6607_v5  ;;  %vm6676_vm4 = vweird.f32 %v7777_v13 }
0x1722   :  { %7778 = vrsqrt.f32 %v6608_v49  ;;  %7577 = vmatmul.msk.f32.gmra.mxu3 %vm12447_vm13, %v6709_v28  ;;  %vm6677_vm6 = vmor %vm6675_vm2, %vm6676_vm4  ;;  %vm6685_vm14 = vweird.f32 %v6608_v49  ;;  %v5246_v28 = vsel %vm1116_vm1, %v11614_v46, 0.0 }
0x1723   :  { %v6668_v33 = vsel %vm6667_vm7, %v7775_v23, %v6664_v60  ;;  %v6671_v45 = vmul.f32 %v7777_v13, %v6670_v4  ;;  %7780 = vrcp.f32 %v7823_v51 }
0x1724   :  { %v6694_v2 = vmul.f32 %v6668_v33, %v11519_v55  ;;  %v11624_v33 = vadd.f32 %v11246_v57, %v11073_v36 }
0x1725   :  { %v6672_v20 = vmul.f32 0.5, %v6671_v45 }
0x1726   :  { %v6702_v42 = vmul.f32 %v6694_v2, %v11168_v59  ;;  %v5249_v2 = vsel %vm1116_vm1, %v11624_v33, 0.0 }
0x1727   :  { %v6673_v7 = vsub.f32 1.5, %v6672_v20 }
0x1728   :  { %v7779_v37 = vpop.eup %7778  ;;  %v6710_v27 = vadd.f32 %v6702_v42, %v11171_v19 }
0x1729   :  { %v6674_v18 = vmul.f32 %v7777_v13, %v6673_v7  ;;  %v6680_v10 = vmul.f32 %v7779_v37, %v6608_v49  ;;  %vm6686_vm9 = vweird.f32 %v7779_v37  ;;  %v7781_v35 = vpop.eup %7780 }
0x172a   :  { %7578 = vmatmul.msk.f32.gmra.mxu3 %vm12448_vm5, %v6710_v27  ;;  %vm6687_vm8 = vmor %vm6685_vm14, %vm6686_vm9  ;;  %v5259_v4 = vmul.f32 8.0, %v7781_v35  ;;  %v11634_v27 = vadd.f32 %v11250_v47, %v11075_v11  ;;  %vm5263_vm15 = vweird.f32 %v7781_v35  ;;  %v11646_v11 = vadd.f32 %v11252_v6, %v11077_v32 }
0x172b   :  { %v6678_v21 = vsel %vm6677_vm6, %v7777_v13, %v6674_v18  ;;  %v6681_v26 = vmul.f32 %v7779_v37, %v6680_v10 }
0x172c   :  { %v6695_v1 = vmul.f32 %v6678_v21, %v11525_v3  ;;  %v6730_v3 = vpop.f32.mrf.mxu0  ;;  %v5260_v22 = vsub.f32 1.0, %v5259_v4  ;;  %v5252_v10 = vsel %vm1116_vm1, %v11634_v27, 0.0 }
0x172d   :  { %v6682_v52 = vmul.f32 0.5, %v6681_v26 }
0x172e   :  { %v6703_v55 = vmul.f32 %v6695_v1, %v11168_v59  ;;  %v5261_v7 = vmul.f32 %v7781_v35, %v5260_v22 }
0x172f   :  { %v6683_v38 = vsub.f32 1.5, %v6682_v52 }
0x1730   :  { %v6711_v30 = vadd.f32 %v6703_v55, %v11171_v19  ;;  %v5262_v36 = vadd.f32 %v7781_v35, %v5261_v7 }
0x1731   :  { %v6684_v41 = vmul.f32 %v7779_v37, %v6683_v38 }
0x1732   :  { %7579 = vmatmul.msk.f32.gmra.mxu3 %vm12449_vm3, %v6711_v30  ;;  %v11642_v26 = vsel %vm5263_vm15, %v7781_v35, %v5262_v36 }
0x1733   :  { %v6688_v16 = vsel %vm6687_vm8, %v7779_v37, %v6684_v41  ;;  %v5236_v37 = vpop.xlane.xlu0 %5235 }
0x1734   :  { %v6696_v44 = vmul.f32 %v6688_v16, %v11535_v0  ;;  %v6733_v23 = vpop.f32.mrf.mxu0  ;;  %v5265_v47 = vmul.f32 %v11642_v26, %v5236_v37  ;;  %v5255_v16 = vsel %vm1116_vm1, %v11646_v11, 0.0 }
0x1736   :  { %v6704_v48 = vmul.f32 %v6696_v44, %v11168_v59  ;;  %v11652_v30 = vsub.f32 %v11533_v34, %v5265_v47 }
0x1738   :  { %v6712_v43 = vadd.f32 %v6704_v48, %v11171_v19  ;;  %v5281_v6 = vmul.f32 %v11652_v30, %v11652_v30 }
0x173a   :  { %7580 = vmatmul.msk.f32.gmra.mxu3 %vm12450_vm11, %v6712_v43 }
0x173b   :  { %v5239_v52 = vpop.xlane.xlu0 %5238 }
0x173c   :  { %v6736_v14 = vpop.f32.mrf.mxu0  ;;  %v5266_v32 = vmul.f32 %v11642_v26, %v5239_v52 }
0x173e   :  { %v11664_v34 = vsub.f32 %v11544_v63, %v5266_v32 }
0x1744   :  { %v6739_v19 = vpop.f32.mrf.mxu0 }
0x174c   :  { %v6742_v49 = vpop.f32.mrf.mxu0 }
0x1754   :  { %v6745_v42 = vpop.f32.mrf.mxu0 }
0x175c   :  { %v6748_v1 = vpop.f32.mrf.mxu0 }
0x1764   :  { %v6751_v44 = vpop.f32.mrf.mxu0 }
0x1785   :  { %v6795_v5 = vpop.f32.mrf.mxu3 }
0x1786   :  { %v11600_v56 = vadd.f32 %v6795_v5, %v6730_v3  ;;  %v5242_v3 = vpop.xlane.xlu0 %5241  ;;  %v5289_v5 = vsel %vm1116_vm1, %v5281_v6, 0.0 }
0x1788   :  { %v6819_v8 = vsel %vm1116_vm1, %v11600_v56, 0.0 }
0x1789   :  { %6820 = vadd.xlane.f32.xlu1 %v6819_v8  ;;  %v5267_v8 = vmul.f32 %v11642_v26, %v5242_v3 }
0x178d   :  { %v6798_v17 = vpop.f32.mrf.mxu3 }
0x178e   :  { %v11604_v61 = vadd.f32 %v6798_v17, %v6733_v23  ;;  %v11673_v17 = vsub.f32 %v11550_v39, %v5267_v8 }
0x1790   :  { %v6822_v59 = vsel %vm1116_vm1, %v11604_v61, 0.0 }
0x1791   :  { %6823 = vadd.xlane.f32.xlu1 %v6822_v59 }
0x1795   :  { %v6801_v0 = vpop.f32.mrf.mxu3 }
0x1796   :  { %v11608_v58 = vadd.f32 %v6801_v0, %v6736_v14  ;;  %v5282_v14 = vmul.f32 %v11664_v34, %v11664_v34  ;;  %v5283_v0 = vmul.f32 %v11673_v17, %v11673_v17 }
0x1798   :  { %v6825_v15 = vsel %vm1116_vm1, %v11608_v58, 0.0  ;;  %v5292_v59 = vsel %vm1116_vm1, %v5282_v14, 0.0 }
0x1799   :  { %6826 = vadd.xlane.f32.xlu1 %v6825_v15  ;;  %v5295_v15 = vsel %vm1116_vm1, %v5283_v0, 0.0 }
0x179d   :  { %v6804_v25 = vpop.f32.mrf.mxu3 }
0x179e   :  { %v11616_v13 = vadd.f32 %v6804_v25, %v6739_v19  ;;  %v5245_v19 = vpop.xlane.xlu0 %5244 }
0x179f   :  { %v5268_v63 = vmul.f32 %v11642_v26, %v5245_v19 }
0x17a0   :  { %v6828_v60 = vsel %vm1116_vm1, %v11616_v13, 0.0 }
0x17a1   :  { %5247 = vadd.xlane.f32.xlu1 %v5246_v28  ;;  %6829 = vadd.xlane.f32.xlu2 %v6828_v60  ;;  %v11680_v51 = vsub.f32 %v11556_v40, %v5268_v63 }
0x17a3   :  { %v5284_v25 = vmul.f32 %v11680_v51, %v11680_v51 }
0x17a5   :  { %v6807_v62 = vpop.f32.mrf.mxu3  ;;  %v5298_v39 = vsel %vm1116_vm1, %v5284_v25, 0.0 }
0x17a6   :  { %v11626_v45 = vadd.f32 %v6807_v62, %v6742_v49 }
0x17a8   :  { %v6831_v20 = vsel %vm1116_vm1, %v11626_v45, 0.0 }
0x17a9   :  { %5250 = vadd.xlane.f32.xlu1 %v5249_v2  ;;  %6832 = vadd.xlane.f32.xlu0 %v6831_v20 }
0x17ad   :  { %v6810_v57 = vpop.f32.mrf.mxu3 }
0x17ae   :  { %v11636_v18 = vadd.f32 %v6810_v57, %v6745_v42 }
0x17b0   :  { %v6834_v21 = vsel %vm1116_vm1, %v11636_v18, 0.0 }
0x17b1   :  { %5253 = vadd.xlane.f32.xlu1 %v5252_v10  ;;  %6835 = vadd.xlane.f32.xlu0 %v6834_v21 }
0x17b5   :  { %v6813_v55 = vpop.f32.mrf.mxu3 }
0x17b6   :  { %v11649_v38 = vadd.f32 %v6813_v55, %v6748_v1 }
0x17b8   :  { %v6837_v41 = vsel %vm1116_vm1, %v11649_v38, 0.0 }
0x17b9   :  { %6838 = vadd.xlane.f32.xlu0 %v6837_v41  ;;  %5256 = vadd.xlane.f32.xlu1 %v5255_v16 }
0x17bd   :  { %v6816_v48 = vpop.f32.mrf.mxu3 }
0x17be   :  { %v11661_v43 = vadd.f32 %v6816_v48, %v6751_v44 }
0x17c0   :  { %v6840_v23 = vsel %vm1116_vm1, %v11661_v43, 0.0 }
0x17c1   :  { %6841 = vadd.xlane.f32.xlu0 %v6840_v23  ;;  %5290 = vadd.xlane.f32.xlu1 %v5289_v5 }
0x17c9   :  { %5293 = vadd.xlane.f32.xlu1 %v5292_v59 }
0x17d1   :  { %5296 = vadd.xlane.f32.xlu1 %v5295_v15 }
0x17d9   :  { %5299 = vadd.xlane.f32.xlu1 %v5298_v39 }
0x17fc   :  { %v6821_v35 = vpop.xlane.xlu1 %6820 }
0x17fd   :  { %v6843_v49 = vmul.f32 %v6821_v35, %v11642_v26 }
0x17ff   :  { %v11688_v28 = vsub.f32 %v11600_v56, %v6843_v49 }
0x1801   :  { %v6859_v60 = vmul.f32 %v11688_v28, %v11688_v28 }
0x1803   :  { %v6867_v40 = vsel %vm1116_vm1, %v6859_v60, 0.0 }
0x1804   :  { %6868 = vadd.xlane.f32.xlu0 %v6867_v40  ;;  %v6824_v4 = vpop.xlane.xlu1 %6823 }
0x1805   :  { %v6844_v22 = vmul.f32 %v6824_v4, %v11642_v26 }
0x1807   :  { %v11695_v62 = vsub.f32 %v11604_v61, %v6844_v22 }
0x1809   :  { %v6860_v2 = vmul.f32 %v11695_v62, %v11695_v62 }
0x180b   :  { %v6870_v20 = vsel %vm1116_vm1, %v6860_v2, 0.0 }
0x180c   :  { %6871 = vadd.xlane.f32.xlu0 %v6870_v20  ;;  %v6827_v56 = vpop.xlane.xlu1 %6826 }
0x180d   :  { %v6845_v42 = vmul.f32 %v6827_v56, %v11642_v26 }
0x180f   :  { %v11702_v7 = vsub.f32 %v11608_v58, %v6845_v42 }
0x1811   :  { %v6861_v37 = vmul.f32 %v11702_v7, %v11702_v7 }
0x1813   :  { %v6873_v36 = vsel %vm1116_vm1, %v6861_v37, 0.0 }
0x1814   :  { %v6830_v57 = vpop.xlane.xlu2 %6829  ;;  %6874 = vadd.xlane.f32.xlu0 %v6873_v36  ;;  %v5248_v61 = vpop.xlane.xlu1 %5247 }
0x1815   :  { %v6846_v10 = vmul.f32 %v6830_v57, %v11642_v26  ;;  %v5269_v21 = vmul.f32 %v11642_v26, %v5248_v61 }
0x1817   :  { %v11710_v1 = vsub.f32 %v11616_v13, %v6846_v10  ;;  %v11713_v47 = vsub.f32 %v11614_v46, %v5269_v21 }
0x1819   :  { %v6862_v58 = vmul.f32 %v11710_v1, %v11710_v1  ;;  %v5285_v52 = vmul.f32 %v11713_v47, %v11713_v47 }
0x181b   :  { %v6876_v55 = vsel %vm1116_vm1, %v6862_v58, 0.0  ;;  %v5301_v41 = vsel %vm1116_vm1, %v5285_v52, 0.0 }
0x181c   :  { %v6833_v16 = vpop.xlane.xlu0 %6832  ;;  %6877 = vadd.xlane.f32.xlu0 %v6876_v55  ;;  %v5251_v32 = vpop.xlane.xlu1 %5250  ;;  %5302 = vadd.xlane.f32.xlu1 %v5301_v41 }
0x181d   :  { %v6847_v13 = vmul.f32 %v6833_v16, %v11642_v26  ;;  %v5270_v6 = vmul.f32 %v11642_v26, %v5251_v32 }
0x181f   :  { %v11724_v46 = vsub.f32 %v11626_v45, %v6847_v13  ;;  %v11727_v44 = vsub.f32 %v11624_v33, %v5270_v6 }
0x1821   :  { %v6863_v48 = vmul.f32 %v11724_v46, %v11724_v46  ;;  %v5286_v3 = vmul.f32 %v11727_v44, %v11727_v44 }
0x1823   :  { %v6879_v23 = vsel %vm1116_vm1, %v6863_v48, 0.0  ;;  %v5304_v5 = vsel %vm1116_vm1, %v5286_v3, 0.0 }
0x1824   :  { %v6836_v8 = vpop.xlane.xlu0 %6835  ;;  %6880 = vadd.xlane.f32.xlu0 %v6879_v23  ;;  %v5254_v14 = vpop.xlane.xlu1 %5253  ;;  %5305 = vadd.xlane.f32.xlu1 %v5304_v5 }
0x1825   :  { %v6848_v45 = vmul.f32 %v6836_v8, %v11642_v26  ;;  %v5271_v59 = vmul.f32 %v11642_v26, %v5254_v14 }
0x1827   :  { %v11738_v33 = vsub.f32 %v11636_v18, %v6848_v45  ;;  %v11741_v19 = vsub.f32 %v11634_v27, %v5271_v59 }
0x1829   :  { %v6864_v63 = vmul.f32 %v11738_v33, %v11738_v33  ;;  %v5287_v0 = vmul.f32 %v11741_v19, %v11741_v19 }
0x182b   :  { %v6882_v15 = vsel %vm1116_vm1, %v6864_v63, 0.0  ;;  %v5307_v25 = vsel %vm1116_vm1, %v5287_v0, 0.0 }
0x182c   :  { %v6839_v39 = vpop.xlane.xlu0 %6838  ;;  %6883 = vadd.xlane.f32.xlu0 %v6882_v15  ;;  %5308 = vadd.xlane.f32.xlu1 %v5307_v25  ;;  %v5257_v35 = vpop.xlane.xlu1 %5256 }
0x182d   :  { %v6849_v18 = vmul.f32 %v6839_v39, %v11642_v26  ;;  %v5272_v49 = vmul.f32 %v11642_v26, %v5257_v35  ;;  %v7817_v35 = vld [vmem:[%s11918_s7] sm:$0x3f] }
0x182f   :  { %v11752_v27 = vsub.f32 %v11649_v38, %v6849_v18  ;;  %v11755_v60 = vsub.f32 %v11646_v11, %v5272_v49  ;;  %v11777_v18 = vperm.slane %v7817_v35, 4 }
0x1831   :  { %v6865_v40 = vmul.f32 %v11752_v27, %v11752_v27  ;;  %v5288_v4 = vmul.f32 %v11755_v60, %v11755_v60 }
0x1833   :  { %v6885_v22 = vsel %vm1116_vm1, %v6865_v40, 0.0  ;;  %v5310_v2 = vsel %vm1116_vm1, %v5288_v4, 0.0 }
0x1834   :  { %v6842_v20 = vpop.xlane.xlu0 %6841  ;;  %6886 = vadd.xlane.f32.xlu0 %v6885_v22  ;;  %5311 = vadd.xlane.f32.xlu1 %v5310_v2  ;;  %v5291_v56 = vpop.xlane.xlu1 %5290 }
0x1835   :  { %v6850_v38 = vmul.f32 %v6842_v20, %v11642_v26  ;;  %v5313_v42 = vmul.f32 %v5291_v56, %v11642_v26  ;;  %v11781_v20 = vperm.slane %v7817_v35, 5 }
0x1837   :  { %v11766_v11 = vsub.f32 %v11661_v43, %v6850_v38  ;;  %v5321_v37 = vadd.f32 1e-05, %v5313_v42 }
0x1839   :  { %v6866_v36 = vmul.f32 %v11766_v11, %v11766_v11  ;;  %7782 = vrsqrt.f32 %v5321_v37  ;;  %vm5335_vm0 = vweird.f32 %v5321_v37 }
0x183b   :  { %v6888_v57 = vsel %vm1116_vm1, %v6866_v36, 0.0 }
0x183c   :  { %6889 = vadd.xlane.f32.xlu0 %v6888_v57  ;;  %v5294_v61 = vpop.xlane.xlu1 %5293 }
0x183d   :  { %v5314_v10 = vmul.f32 %v5294_v61, %v11642_v26 }
0x183f   :  { %v5322_v21 = vadd.f32 1e-05, %v5314_v10  ;;  %v7783_v58 = vpop.eup %7782 }
0x1840   :  { %v5330_v55 = vmul.f32 %v7783_v58, %v5321_v37  ;;  %vm5336_vm1 = vweird.f32 %v7783_v58 }
0x1841   :  { %7784 = vrsqrt.f32 %v5322_v21  ;;  %vm5337_vm12 = vmor %vm5335_vm0, %vm5336_vm1  ;;  %vm5345_vm13 = vweird.f32 %v5322_v21 }
0x1842   :  { %v5331_v16 = vmul.f32 %v7783_v58, %v5330_v55  ;;  %v12451_v55 = vld [vmem:[#allocation14_spill] sm:$0xff] }
0x1844   :  { %v5297_v52 = vpop.xlane.xlu1 %5296  ;;  %v5332_v6 = vmul.f32 0.5, %v5331_v16 }
0x1845   :  { %v5315_v41 = vmul.f32 %v5297_v52, %v11642_v26 }
0x1846   :  { %v5333_v5 = vsub.f32 1.5, %v5332_v6 }
0x1847   :  { %v5323_v43 = vadd.f32 1e-05, %v5315_v41  ;;  %v7785_v32 = vpop.eup %7784 }
0x1848   :  { %v5340_v48 = vmul.f32 %v7785_v32, %v5322_v21  ;;  %v5334_v45 = vmul.f32 %v7783_v58, %v5333_v5  ;;  %vm5346_vm7 = vweird.f32 %v7785_v32 }
0x1849   :  { %7786 = vrsqrt.f32 %v5323_v43  ;;  %vm5347_vm4 = vmor %vm5345_vm13, %vm5346_vm7  ;;  %vm5355_vm6 = vweird.f32 %v5323_v43 }
0x184a   :  { %v5341_v8 = vmul.f32 %v7785_v32, %v5340_v48  ;;  %v5338_v0 = vsel %vm5337_vm12, %v7783_v58, %v5334_v45  ;;  %v12452_v48 = vld [vmem:[#allocation23_spill] sm:$0xff] }
0x184b   :  { %v5409_v49 = vmul.f32 %v5338_v0, %v11652_v30 }
0x184c   :  { %v5300_v13 = vpop.xlane.xlu1 %5299  ;;  %v5342_v59 = vmul.f32 0.5, %v5341_v8 }
0x184d   :  { %v5316_v3 = vmul.f32 %v5300_v13, %v11642_v26  ;;  %v5418_v2 = vmul.f32 %v11777_v18, %v5409_v49 }
0x184e   :  { %v5343_v15 = vsub.f32 1.5, %v5342_v59 }
0x184f   :  { %v5324_v23 = vadd.f32 1e-05, %v5316_v3  ;;  %v7787_v14 = vpop.eup %7786  ;;  %v5427_v36 = vadd.f32 %v11781_v20, %v5418_v2 }
0x1850   :  { %v5350_v63 = vmul.f32 %v7787_v14, %v5323_v43  ;;  %v5344_v40 = vmul.f32 %v7785_v32, %v5343_v15  ;;  %vm5356_vm2 = vweird.f32 %v7787_v14 }
0x1851   :  { %7788 = vrsqrt.f32 %v5324_v23  ;;  %vm5357_vm5 = vmor %vm5355_vm6, %vm5356_vm2  ;;  %v5435_v10 = vmax.f32 %v5427_v36, 0.0  ;;  %vm5365_vm14 = vweird.f32 %v5324_v23 }
0x1852   :  { %v5351_v25 = vmul.f32 %v7787_v14, %v5350_v63  ;;  %v5348_v56 = vsel %vm5347_vm4, %v7785_v32, %v5344_v40  ;;  %v12454_v40 = vld [vmem:[#allocation18_spill] sm:$0xff] }
0x1853   :  { %v5410_v37 = vmul.f32 %v5348_v56, %v11664_v34  ;;  %v5443_v41 = vadd.f32 %v5435_v10, %v12451_v55 }
0x1854   :  { %v5352_v4 = vmul.f32 0.5, %v5351_v25 }
0x1855   :  { %v5419_v61 = vmul.f32 %v11777_v18, %v5410_v37 }
0x1856   :  { %v5353_v38 = vsub.f32 1.5, %v5352_v4 }
0x1857   :  { %v7789_v39 = vpop.eup %7788  ;;  %v5428_v16 = vadd.f32 %v11781_v20, %v5419_v61 }
0x1858   :  { %v5360_v22 = vmul.f32 %v7789_v39, %v5324_v23  ;;  %v5354_v57 = vmul.f32 %v7787_v14, %v5353_v38  ;;  %vm5366_vm9 = vweird.f32 %v7789_v39  ;;  %v12453_v23 = vld [vmem:[#allocation13_spill] sm:$0xff] }
0x1859   :  { %vm5367_vm8 = vmor %vm5365_vm14, %vm5366_vm9  ;;  %v5436_v43 = vmax.f32 %v5428_v16, 0.0 }
0x185a   :  { %v5361_v42 = vmul.f32 %v7789_v39, %v5360_v22  ;;  %v5358_v21 = vsel %vm5357_vm5, %v7787_v14, %v5354_v57 }
0x185b   :  { %v5411_v52 = vmul.f32 %v5358_v21, %v11673_v17  ;;  %v5444_v3 = vadd.f32 %v5436_v43, %v12452_v48 }
0x185c   :  { %v5362_v30 = vmul.f32 0.5, %v5361_v42 }
0x185d   :  { %v5420_v34 = vmul.f32 %v11777_v18, %v5411_v52 }
0x185e   :  { %v5363_v58 = vsub.f32 1.5, %v5362_v30 }
0x185f   :  { %v5429_v5 = vadd.f32 %v11781_v20, %v5420_v34 }
0x1860   :  { %v5364_v32 = vmul.f32 %v7789_v39, %v5363_v58 }
0x1861   :  { %v5437_v45 = vmax.f32 %v5429_v5, 0.0 }
0x1862   :  { %v5368_v13 = vsel %vm5367_vm8, %v7789_v39, %v5364_v32 }
0x1863   :  { %v5412_v6 = vmul.f32 %v5368_v13, %v11680_v51  ;;  %v5445_v63 = vadd.f32 %v5437_v45, %v12453_v23 }
0x1865   :  { %v5421_v8 = vmul.f32 %v11777_v18, %v5412_v6 }
0x1867   :  { %v5430_v0 = vadd.f32 %v11781_v20, %v5421_v8 }
0x1869   :  { %v5438_v25 = vmax.f32 %v5430_v0, 0.0 }
0x186b   :  { %v5446_v4 = vadd.f32 %v5438_v25, %v12454_v40 }
0x186e   :  { %5451 = vxpose.xlu1.b32.start [1/8] (short) (narrow) %v5443_v41, 8 }
0x1876   :  { %5452 = vxpose.xlu1.b32.cont [2/8] (short) (narrow) %v5444_v3, 8 }
0x1877   :  { %v6869_v17 = vpop.xlane.xlu0 %6868 }
0x1878   :  { %v6891_v14 = vmul.f32 %v6869_v17, %v11642_v26 }
0x187a   :  { %v6899_v59 = vadd.f32 1e-05, %v6891_v14 }
0x187c   :  { %7790 = vrsqrt.f32 %v6899_v59  ;;  %vm6913_vm11 = vweird.f32 %v6899_v59 }
0x187e   :  { %5453 = vxpose.xlu1.b32.cont [3/8] (short) (narrow) %v5445_v63, 8 }
0x187f   :  { %v6872_v15 = vpop.xlane.xlu0 %6871 }
0x1880   :  { %v6892_v51 = vmul.f32 %v6872_v15, %v11642_v26 }
0x1882   :  { %v7791_v39 = vpop.eup %7790  ;;  %v6900_v35 = vadd.f32 1e-05, %v6892_v51 }
0x1883   :  { %v6908_v49 = vmul.f32 %v7791_v39, %v6899_v59  ;;  %vm6914_vm3 = vweird.f32 %v7791_v39 }
0x1884   :  { %7792 = vrsqrt.f32 %v6900_v35  ;;  %vm6915_vm15 = vmor %vm6913_vm11, %vm6914_vm3  ;;  %vm6923_vm0 = vweird.f32 %v6900_v35 }
0x1885   :  { %v6909_v22 = vmul.f32 %v7791_v39, %v6908_v49 }
0x1886   :  { %5454 = vxpose.xlu1.b32.cont [4/8] (short) (narrow) %v5446_v4, 8 }
0x1887   :  { %v6910_v2 = vmul.f32 0.5, %v6909_v22  ;;  %v6875_v56 = vpop.xlane.xlu0 %6874 }
0x1888   :  { %v6893_v38 = vmul.f32 %v6875_v56, %v11642_v26 }
0x1889   :  { %v6911_v42 = vsub.f32 1.5, %v6910_v2 }
0x188a   :  { %v7793_v37 = vpop.eup %7792  ;;  %v6901_v36 = vadd.f32 1e-05, %v6893_v38 }
0x188b   :  { %v6912_v57 = vmul.f32 %v7791_v39, %v6911_v42  ;;  %v6918_v30 = vmul.f32 %v7793_v37, %v6900_v35  ;;  %vm6924_vm1 = vweird.f32 %v7793_v37 }
0x188c   :  { %7794 = vrsqrt.f32 %v6901_v36  ;;  %vm6925_vm12 = vmor %vm6923_vm0, %vm6924_vm1  ;;  %vm6933_vm13 = vweird.f32 %v6901_v36 }
0x188d   :  { %v6916_v61 = vsel %vm6915_vm15, %v7791_v39, %v6912_v57  ;;  %v6919_v10 = vmul.f32 %v7793_v37, %v6918_v30 }
0x188e   :  { %v6987_v21 = vmul.f32 %v6916_v61, %v11688_v28 }
0x188f   :  { %v6920_v58 = vmul.f32 0.5, %v6919_v10  ;;  %v6878_v52 = vpop.xlane.xlu0 %6877  ;;  %v5303_v55 = vpop.xlane.xlu1 %5302 }
0x1890   :  { %v6995_v41 = vmul.f32 %v6987_v21, %v11777_v18  ;;  %v6894_v16 = vmul.f32 %v6878_v52, %v11642_v26  ;;  %v5317_v32 = vmul.f32 %v5303_v55, %v11642_v26 }
0x1891   :  { %v6921_v34 = vsub.f32 1.5, %v6920_v58 }
0x1892   :  { %v7795_v43 = vpop.eup %7794  ;;  %v6902_v13 = vadd.f32 1e-05, %v6894_v16  ;;  %v11804_v6 = vadd.f32 1e-05, %v5317_v32  ;;  %v7003_v48 = vadd.f32 %v6995_v41, %v11781_v20 }
0x1893   :  { %v6922_v3 = vmul.f32 %v7793_v37, %v6921_v34  ;;  %v6928_v28 = vmul.f32 %v7795_v43, %v6901_v36  ;;  %vm6934_vm7 = vweird.f32 %v7795_v43 }
0x1894   :  { %7796 = vrsqrt.f32 %v6902_v13  ;;  %v7011_v5 = vmax.f32 %v7003_v48, 0.0  ;;  %vm6935_vm4 = vmor %vm6933_vm13, %vm6934_vm7  ;;  %vm6943_vm5 = vweird.f32 %v6902_v13  ;;  %vm5375_vm14 = vweird.f32 %v11804_v6 }
0x1895   :  { %v6926_v17 = vsel %vm6925_vm12, %v7793_v37, %v6922_v3  ;;  %v6929_v8 = vmul.f32 %v7795_v43, %v6928_v28  ;;  %7798 = vrsqrt.f32 %v11804_v6 }
0x1896   :  { %v6988_v14 = vmul.f32 %v6926_v17, %v11695_v62  ;;  %v7019_v45 = vadd.f32 %v7011_v5, %v10589_v24 }
0x1897   :  { %v6930_v59 = vmul.f32 0.5, %v6929_v8  ;;  %v6881_v23 = vpop.xlane.xlu0 %6880  ;;  %v5306_v63 = vpop.xlane.xlu1 %5305 }
0x1898   :  { %v6996_v0 = vmul.f32 %v6988_v14, %v11777_v18  ;;  %v6895_v15 = vmul.f32 %v6881_v23, %v11642_v26  ;;  %v5318_v51 = vmul.f32 %v5306_v63, %v11642_v26  ;;  %7027 = vxpose.xlu0.b32.start [1/8] (short) (narrow) %v7019_v45, 8 }
0x1899   :  { %v6931_v25 = vsub.f32 1.5, %v6930_v59 }
0x189a   :  { %v7797_v39 = vpop.eup %7796  ;;  %v11813_v35 = vadd.f32 1e-05, %v6895_v15  ;;  %v11815_v49 = vadd.f32 1e-05, %v5318_v51  ;;  %v7004_v62 = vadd.f32 %v6996_v0, %v11781_v20 }
0x189b   :  { %v7799_v24 = vpop.eup %7798  ;;  %v6932_v40 = vmul.f32 %v7795_v43, %v6931_v25  ;;  %v6938_v4 = vmul.f32 %v7797_v39, %v6902_v13  ;;  %vm6944_vm2 = vweird.f32 %v7797_v39 }
0x189c   :  { %v5370_v22 = vmul.f32 %v7799_v24, %v11804_v6  ;;  %7800 = vrsqrt.f32 %v11813_v35  ;;  %v7012_v37 = vmax.f32 %v7004_v62, 0.0  ;;  %vm5376_vm6 = vweird.f32 %v7799_v24  ;;  %vm6945_vm9 = vmor %vm6943_vm5, %vm6944_vm2 }
0x189d   :  { %v6936_v2 = vsel %vm6935_vm4, %v7795_v43, %v6932_v40  ;;  %v6939_v56 = vmul.f32 %v7797_v39, %v6938_v4  ;;  %7802 = vrsqrt.f32 %v11815_v49  ;;  %vm5377_vm8 = vmor %vm5375_vm14, %vm5376_vm6  ;;  %vm6953_vm3 = vweird.f32 %v11813_v35 }
0x189e   :  { %v6989_v38 = vmul.f32 %v6936_v2, %v11702_v7  ;;  %v5371_v42 = vmul.f32 %v7799_v24, %v5370_v22  ;;  %v7020_v55 = vadd.f32 %v7012_v37, %v10595_v29  ;;  %vm5385_vm0 = vweird.f32 %v11815_v49 }
0x189f   :  { %v6940_v57 = vmul.f32 0.5, %v6939_v56  ;;  %v6884_v30 = vpop.xlane.xlu0 %6883  ;;  %v5309_v61 = vpop.xlane.xlu1 %5308 }
0x18a0   :  { %v6997_v10 = vmul.f32 %v6989_v38, %v11777_v18  ;;  %v5372_v36 = vmul.f32 0.5, %v5371_v42  ;;  %v6896_v21 = vmul.f32 %v6884_v30, %v11642_v26  ;;  %v5319_v58 = vmul.f32 %v5309_v61, %v11642_v26  ;;  %7028 = vxpose.xlu0.b32.cont [2/8] (short) (narrow) %v7020_v55, 8 }
0x18a1   :  { %v6941_v52 = vsub.f32 1.5, %v6940_v57 }
0x18a2   :  { %v7801_v41 = vpop.eup %7800  ;;  %v5373_v16 = vsub.f32 1.5, %v5372_v36  ;;  %v11826_v7 = vadd.f32 1e-05, %v6896_v21  ;;  %v11828_v32 = vadd.f32 1e-05, %v5319_v58  ;;  %v7005_v3 = vadd.f32 %v6997_v10, %v11781_v20 }
0x18a3   :  { %v7803_v34 = vpop.eup %7802  ;;  %v6942_v43 = vmul.f32 %v7797_v39, %v6941_v52  ;;  %v6948_v48 = vmul.f32 %v7801_v41, %v11813_v35  ;;  %vm6954_vm11 = vweird.f32 %v7801_v41 }
0x18a4   :  { %v5374_v28 = vmul.f32 %v7799_v24, %v5373_v16  ;;  %v5380_v29 = vmul.f32 %v7803_v34, %v11815_v49  ;;  %7804 = vrsqrt.f32 %v11826_v7  ;;  %v7013_v63 = vmax.f32 %v7005_v3, 0.0  ;;  %vm6955_vm1 = vmor %vm6953_vm3, %vm6954_vm11 }
0x18a5   :  { %v6946_v5 = vsel %vm6945_vm9, %v7797_v39, %v6942_v43  ;;  %v6949_v17 = vmul.f32 %v7801_v41, %v6948_v48  ;;  %7806 = vrsqrt.f32 %v11828_v32  ;;  %vm5386_vm15 = vweird.f32 %v7803_v34 }
0x18a6   :  { %v6990_v13 = vmul.f32 %v6946_v5, %v11710_v1  ;;  %v5378_v8 = vsel %vm5377_vm8, %v7799_v24, %v5374_v28  ;;  %v5381_v14 = vmul.f32 %v7803_v34, %v5380_v29  ;;  %v7021_v62 = vadd.f32 %v7013_v63, %v10855_v9  ;;  %vm5387_vm12 = vmor %vm5385_vm0, %vm5386_vm15 }
0x18a7   :  { %v5413_v45 = vmul.f32 %v5378_v8, %v11713_v47  ;;  %v6950_v59 = vmul.f32 0.5, %v6949_v17  ;;  %v6887_v6 = vpop.xlane.xlu0 %6886  ;;  %v5312_v23 = vpop.xlane.xlu1 %5311  ;;  %vm6963_vm4 = vweird.f32 %v11826_v7  ;;  %vm5395_vm6 = vweird.f32 %v11828_v32 }
0x18a8   :  { %v6998_v0 = vmul.f32 %v6990_v13, %v11777_v18  ;;  %v5382_v15 = vmul.f32 0.5, %v5381_v14  ;;  %v6897_v51 = vmul.f32 %v6887_v6, %v11642_v26  ;;  %v5320_v25 = vmul.f32 %v5312_v23, %v11642_v26  ;;  %7029 = vxpose.xlu0.b32.cont [3/8] (short) (narrow) %v7021_v62, 8 }
0x18a9   :  { %v5422_v39 = vmul.f32 %v11777_v18, %v5413_v45  ;;  %v6951_v1 = vsub.f32 1.5, %v6950_v59 }
0x18aa   :  { %v7805_v47 = vpop.eup %7804  ;;  %v5383_v24 = vsub.f32 1.5, %v5382_v15  ;;  %v11845_v40 = vadd.f32 1e-05, %v6897_v51  ;;  %v11847_v4 = vadd.f32 1e-05, %v5320_v25  ;;  %v7006_v38 = vadd.f32 %v6998_v0, %v11781_v20 }
0x18ab   :  { %v7807_v22 = vpop.eup %7806  ;;  %v6952_v2 = vmul.f32 %v7801_v41, %v6951_v1  ;;  %v6958_v56 = vmul.f32 %v7805_v47, %v11826_v7  ;;  %v5431_v42 = vadd.f32 %v11781_v20, %v5422_v39  ;;  %vm6964_vm7 = vweird.f32 %v7805_v47  ;;  %v12456_v1 = vld [vmem:[#allocation15_spill] sm:$0xff] }
0x18ac   :  { %v5384_v9 = vmul.f32 %v7803_v34, %v5383_v24  ;;  %v5390_v37 = vmul.f32 %v7807_v22, %v11828_v32  ;;  %7808 = vrsqrt.f32 %v11845_v40  ;;  %v7014_v52 = vmax.f32 %v7006_v38, 0.0  ;;  %vm6965_vm2 = vmor %vm6963_vm4, %vm6964_vm7 }
0x18ad   :  { %v6956_v57 = vsel %vm6955_vm1, %v7801_v41, %v6952_v2  ;;  %v6959_v30 = vmul.f32 %v7805_v47, %v6958_v56  ;;  %7810 = vrsqrt.f32 %v11847_v4  ;;  %v5439_v49 = vmax.f32 %v5431_v42, 0.0 }
0x18ae   :  { %v6991_v61 = vmul.f32 %v6956_v57, %v11724_v46  ;;  %v5388_v10 = vsel %vm5387_vm12, %v7803_v34, %v5384_v9  ;;  %v5391_v36 = vmul.f32 %v7807_v22, %v5390_v37  ;;  %v7022_v3 = vadd.f32 %v7014_v52, %v10600_v53  ;;  %v12455_v46 = vld [vmem:[#allocation22_spill] sm:$0xff] }
0x18af   :  { %v5414_v35 = vmul.f32 %v5388_v10, %v11727_v44  ;;  %v6960_v21 = vmul.f32 0.5, %v6959_v30  ;;  %v6890_v58 = vpop.xlane.xlu0 %6889  ;;  %v5447_v34 = vadd.f32 %v5439_v49, %v12455_v46  ;;  %vm5396_vm13 = vweird.f32 %v7807_v22 }
0x18b0   :  { %v6999_v55 = vmul.f32 %v6991_v61, %v11777_v18  ;;  %v5392_v16 = vmul.f32 0.5, %v5391_v36  ;;  %v6898_v41 = vmul.f32 %v6890_v58, %v11642_v26  ;;  %7030 = vxpose.xlu0.b32.cont [4/8] (short) (narrow) %v7022_v3, 8  ;;  %vm5397_vm5 = vmor %vm5395_vm6, %vm5396_vm13  ;;  %vm6973_vm8 = vweird.f32 %v11845_v40 }
0x18b1   :  { %v5423_v43 = vmul.f32 %v11777_v18, %v5414_v35  ;;  %v6961_v48 = vsub.f32 1.5, %v6960_v21  ;;  %5455 = vxpose.xlu1.b32.cont [5/8] (short) (narrow) %v5447_v34, 8  ;;  %vm5405_vm11 = vweird.f32 %v11847_v4  ;;  %v12457_v35 = vld [vmem:[#allocation20_spill] sm:$0xff] }
0x18b2   :  { %v7809_v28 = vpop.eup %7808  ;;  %v5393_v29 = vsub.f32 1.5, %v5392_v16  ;;  %v11866_v44 = vadd.f32 1e-05, %v6898_v41  ;;  %v7007_v5 = vadd.f32 %v6999_v55, %v11781_v20 }
0x18b3   :  { %v7811_v17 = vpop.eup %7810  ;;  %v6962_v13 = vmul.f32 %v7805_v47, %v6961_v48  ;;  %v6968_v26 = vmul.f32 %v7809_v28, %v11845_v40  ;;  %v5432_v8 = vadd.f32 %v11781_v20, %v5423_v43  ;;  %vm6974_vm9 = vweird.f32 %v7809_v28  ;;  %v12458_v48 = vld [vmem:[#allocation19_spill] sm:$0xff] }
0x18b4   :  { %v5394_v53 = vmul.f32 %v7807_v22, %v5393_v29  ;;  %v5400_v14 = vmul.f32 %v7811_v17, %v11847_v4  ;;  %7812 = vrsqrt.f32 %v11866_v44  ;;  %v7015_v7 = vmax.f32 %v7007_v5, 0.0  ;;  %vm6975_vm3 = vmor %vm6973_vm8, %vm6974_vm9 }
0x18b5   :  { %v6966_v45 = vsel %vm6965_vm2, %v7805_v47, %v6962_v13  ;;  %v6969_v59 = vmul.f32 %v7809_v28, %v6968_v26  ;;  %v5440_v0 = vmax.f32 %v5432_v8, 0.0  ;;  %vm5406_vm14 = vweird.f32 %v7811_v17 }
0x18b6   :  { %v6992_v6 = vmul.f32 %v6966_v45, %v11738_v33  ;;  %v5398_v23 = vsel %vm5397_vm5, %v7807_v22, %v5394_v53  ;;  %v5401_v63 = vmul.f32 %v7811_v17, %v5400_v14  ;;  %v7023_v25 = vadd.f32 %v7015_v7, %v10860_v50  ;;  %vm5407_vm15 = vmor %vm5405_vm11, %vm5406_vm14 }
0x18b7   :  { %v5415_v15 = vmul.f32 %v5398_v23, %v11741_v19  ;;  %v6970_v51 = vmul.f32 0.5, %v6969_v59  ;;  %v5448_v62 = vadd.f32 %v5440_v0, %v12456_v1  ;;  %vm6983_vm0 = vweird.f32 %v11866_v44 }
0x18b8   :  { %v7000_v32 = vmul.f32 %v6992_v6, %v11777_v18  ;;  %v5402_v39 = vmul.f32 0.5, %v5401_v63  ;;  %7031 = vxpose.xlu0.b32.cont [5/8] (short) (narrow) %v7023_v25, 8 }
0x18b9   :  { %v5424_v47 = vmul.f32 %v11777_v18, %v5415_v15  ;;  %v6971_v24 = vsub.f32 1.5, %v6970_v51  ;;  %5456 = vxpose.xlu1.b32.cont [6/8] (short) (narrow) %v5448_v62, 8 }
0x18ba   :  { %v7813_v2 = vpop.eup %7812  ;;  %v5403_v56 = vsub.f32 1.5, %v5402_v39  ;;  %v7008_v33 = vadd.f32 %v7000_v32, %v11781_v20 }
0x18bb   :  { %v6972_v22 = vmul.f32 %v7809_v28, %v6971_v24  ;;  %v6978_v19 = vmul.f32 %v7813_v2, %v11866_v44  ;;  %v5433_v50 = vadd.f32 %v11781_v20, %v5424_v47  ;;  %vm6984_vm1 = vweird.f32 %v7813_v2 }
0x18bc   :  { %v5404_v38 = vmul.f32 %v7811_v17, %v5403_v56  ;;  %v7016_v42 = vmax.f32 %v7008_v33, 0.0  ;;  %vm6985_vm12 = vmor %vm6983_vm0, %vm6984_vm1 }
0x18bd   :  { %v6976_v9 = vsel %vm6975_vm3, %v7809_v28, %v6972_v22  ;;  %v6979_v37 = vmul.f32 %v7813_v2, %v6978_v19  ;;  %v5441_v57 = vmax.f32 %v5433_v50, 0.0 }
0x18be   :  { %v6993_v30 = vmul.f32 %v6976_v9, %v11752_v27  ;;  %v5408_v61 = vsel %vm5407_vm15, %v7811_v17, %v5404_v38  ;;  %v7024_v36 = vadd.f32 %v7016_v42, %v10605_v31 }
0x18bf   :  { %v5416_v40 = vmul.f32 %v5408_v61, %v11755_v60  ;;  %v6980_v10 = vmul.f32 0.5, %v6979_v37  ;;  %v5449_v21 = vadd.f32 %v5441_v57, %v12457_v35 }
0x18c0   :  { %v7001_v58 = vmul.f32 %v6993_v30, %v11777_v18  ;;  %7032 = vxpose.xlu0.b32.cont [6/8] (short) (narrow) %v7024_v36, 8 }
0x18c1   :  { %v5425_v52 = vmul.f32 %v11777_v18, %v5416_v40  ;;  %v6981_v4 = vsub.f32 1.5, %v6980_v10  ;;  %5457 = vxpose.xlu1.b32.cont [7/8] (short) (narrow) %v5449_v21, 8 }
0x18c2   :  { %v7009_v49 = vadd.f32 %v7001_v58, %v11781_v20 }
0x18c3   :  { %v6982_v55 = vmul.f32 %v7813_v2, %v6981_v4  ;;  %v5434_v27 = vadd.f32 %v11781_v20, %v5425_v52 }
0x18c4   :  { %v7017_v60 = vmax.f32 %v7009_v49, 0.0 }
0x18c5   :  { %v6986_v31 = vsel %vm6985_vm12, %v7813_v2, %v6982_v55  ;;  %v5442_v16 = vmax.f32 %v5434_v27, 0.0 }
0x18c6   :  { %v6994_v41 = vmul.f32 %v6986_v31, %v11766_v11  ;;  %v7025_v43 = vadd.f32 %v7017_v60, %v10865_v54 }
0x18c7   :  { %v5450_v3 = vadd.f32 %v5442_v16, %v12458_v48 }
0x18c8   :  { %v7002_v46 = vmul.f32 %v6994_v41, %v11777_v18  ;;  %7033 = vxpose.xlu0.b32.cont [7/8] (short) (narrow) %v7025_v43, 8 }
0x18c9   :  { %5458 = vxpose.xlu1.b32.end [8/8] (short) (narrow) %v5450_v3, 8 }
0x18ca   :  { %v7010_v34 = vadd.f32 %v7002_v46, %v11781_v20 }
0x18cc   :  { %v7018_v28 = vmax.f32 %v7010_v34, 0.0 }
0x18ce   :  { %v7026_v29 = vadd.f32 %v7018_v28, %v10610_v12 }
0x18d0   :  { %7034 = vxpose.xlu0.b32.end [8/8] (short) (narrow) %v7026_v29, 8 }
0x1935   :  { %v5467_v44 = vpop.trf.xlu1 }
0x1936   :  { %5483 = vst.msk [vmem:[%s11919_s8] sm:$0xff] %vm4102_vm10, %v5467_v44 }
0x193c   :  { %v7043_v11 = vpop.trf.xlu0 }
0x193d   :  { %7581 = vst.msk [vmem:[%s11919_s8 + $0x8] sm:$0xff] %vm4102_vm10, %v7043_v11 }

</bundles_post_ra>
